<compile_context>
chip_gen: v7x
topology: tpu7x:2x2x1
jax: 0.10.0
libtpu: 0.0.40
codegen_flags: <defaults>
</compile_context>

<pallas_src>
import numpy as np

import jax
import jax.numpy as jnp
from jax import lax
from jax.experimental import pallas as pl
from jax.experimental.pallas import tpu as pltpu

EPS = 1e-5
LANE = 128
VMEM_LIMIT = 32 * 1024 * 1024


def _rup(v, m):
    return (v + m - 1) // m * m


# ----------------------------------------------------------------------------
# Kernels
# ----------------------------------------------------------------------------
def _make_stage1_kernel(W2, M, HEAD):
    """conv1 (3x3 as 9 shifted matmuls) + bias + ReLU, writes activation in the
    padded-flat layout and accumulates per-channel BN statistics."""

    def kernel(x_ref, w_ref, b_ref, mask_ref, out_ref, stat_ref):
        @pl.when(pl.program_id(0) == 0)
        def _init():
            stat_ref[...] = jnp.zeros_like(stat_ref)

        cout = out_ref.shape[-1]
        rtot = out_ref.shape[1]
        acc = jnp.zeros((M, cout), jnp.float32)
        for tap in range(9):
            off = (tap // 3) * W2 + (tap % 3)
            acc = acc + jnp.dot(x_ref[0, off:off + M, :], w_ref[tap],
                                preferred_element_type=jnp.float32)
        a = jnp.maximum(acc + b_ref[...], 0.0) * mask_ref[HEAD:HEAD + M, :]
        ab = a.astype(jnp.bfloat16)                 # stored precision
        af = ab.astype(jnp.float32)
        stat_ref[0:1, :] = stat_ref[0:1, :] + jnp.sum(af, axis=0, keepdims=True)
        stat_ref[1:2, :] = stat_ref[1:2, :] + jnp.sum(af * af, axis=0, keepdims=True)
        out_ref[0, 0:HEAD, :] = jnp.zeros((HEAD, cout), out_ref.dtype)
        out_ref[0, HEAD:HEAD + M, :] = ab
        out_ref[0, HEAD + M:rtot, :] = jnp.zeros((rtot - HEAD - M, cout), out_ref.dtype)

    return kernel


def _make_stage2_kernel(W2, M, HEAD, inv_count):
    """Fused: BN1 affine (+ time-MLP folded into the shift, + border mask)
    -> conv2 (3x3) + bias + ReLU -> activation + BN2 statistics."""

    def kernel(a_ref, stat_in_ref, g_ref, be_ref, t_ref, wt_ref, bt_ref,
               w_ref, b_ref, mask_ref, out_ref, stat_ref):
        @pl.when(pl.program_id(0) == 0)
        def _init():
            stat_ref[...] = jnp.zeros_like(stat_ref)

        cout = out_ref.shape[-1]
        rtot = out_ref.shape[1]

        mean = stat_in_ref[0:1, :] * inv_count
        var = stat_in_ref[1:2, :] * inv_count - mean * mean
        scale = g_ref[...] * lax.rsqrt(var + EPS)
        te = jnp.dot(t_ref[0], wt_ref[...], preferred_element_type=jnp.float32)
        te = jnp.maximum(te + bt_ref[...], 0.0)
        shift = be_ref[...] - mean * scale + te     # per-sample shift (time folded in)

        h = (a_ref[0].astype(jnp.float32) * scale + shift) * mask_ref[...]
        hb = h.astype(jnp.bfloat16)

        acc = jnp.zeros((M, cout), jnp.float32)
        for tap in range(9):
            off = (tap // 3) * W2 + (tap % 3)
            acc = acc + jnp.dot(hb[off:off + M, :], w_ref[tap],
                                preferred_element_type=jnp.float32)
        a = jnp.maximum(acc + b_ref[...], 0.0) * mask_ref[HEAD:HEAD + M, :]
        ab = a.astype(jnp.bfloat16)
        af = ab.astype(jnp.float32)
        stat_ref[0:1, :] = stat_ref[0:1, :] + jnp.sum(af, axis=0, keepdims=True)
        stat_ref[1:2, :] = stat_ref[1:2, :] + jnp.sum(af * af, axis=0, keepdims=True)
        out_ref[0, 0:HEAD, :] = jnp.zeros((HEAD, cout), out_ref.dtype)
        out_ref[0, HEAD:HEAD + M, :] = ab
        out_ref[0, HEAD + M:rtot, :] = jnp.zeros((rtot - HEAD - M, cout), out_ref.dtype)

    return kernel


def _make_stage3_kernel(Wo1, M3, inv_count):
    """Fused: BN2 affine (+ border mask) -> 4x4 stride-2 conv + bias.
    The strided conv is 4 phase-subsampled 2x2 convs (16 shifted matmuls)."""

    def kernel(a_ref, stat_in_ref, g_ref, be_ref, w_ref, b_ref, mask_ref, out_ref):
        mean = stat_in_ref[0:1, :] * inv_count
        var = stat_in_ref[1:2, :] * inv_count - mean * mean
        scale = g_ref[...] * lax.rsqrt(var + EPS)
        shift = be_ref[...] - mean * scale

        cout = out_ref.shape[-1]
        hs = []
        for p in range(4):
            hp = (a_ref[0, p].astype(jnp.float32) * scale + shift) * mask_ref[p]
            hs.append(hp.astype(jnp.bfloat16))

        acc = jnp.zeros((M3, cout), jnp.float32)
        for tap in range(16):
            ky, kx = tap // 4, tap % 4
            p = (ky % 2) * 2 + (kx % 2)
            off = (ky // 2) * Wo1 + (kx // 2)
            acc = acc + jnp.dot(hs[p][off:off + M3, :], w_ref[tap],
                                preferred_element_type=jnp.float32)
        out_ref[0] = acc + b_ref[...]

    return kernel


# ----------------------------------------------------------------------------
# Forward wrapper
# ----------------------------------------------------------------------------
@jax.jit
def block_forward(x_nchw, t, params):
    f32, bf16 = jnp.float32, jnp.bfloat16
    n, cin, h, w = x_nchw.shape
    cout = params["b1"].shape[-1]
    tdim = params["wt"].shape[0]
    ho, wo = h // 2, w // 2

    cinp, coutp, tdp = _rup(cin, LANE), _rup(cout, LANE), _rup(tdim, LANE)
    W2 = w + 2
    R = (h + 3) * W2          # padded-flat rows per image (1 margin row)
    M = h * W2                # rows computed per image (wide layout)
    HEAD = W2 + 1             # flat offset of pixel (0,0) inside padded buffer
    Wo1 = wo + 1
    R3 = (ho + 2) * Wo1       # per-phase rows (1 margin row)
    M3 = ho * Wo1
    inv_cnt = 1.0 / float(n * h * w)

    # ---- trace-time constant masks (valid-interior indicators) ----
    m2d = np.zeros((h + 3, W2), np.float32)
    m2d[1:h + 1, 1:w + 1] = 1.0
    mask12 = jnp.asarray(m2d.reshape(R, 1))
    ph = []
    for py in (0, 1):
        for px in (0, 1):
            mp = m2d[py:h + 2:2, px:w + 2:2]                       # (ho+1, Wo1)
            mp = np.pad(mp, ((0, (ho + 2) - mp.shape[0]), (0, 0)))
            ph.append(mp.reshape(R3, 1))
    mask3 = jnp.asarray(np.stack(ph, axis=0))                      # (4, R3, 1)

    # ---- operand packing: NHWC, 128-lane padded channels, bf16 matmul operands
    x = jnp.transpose(x_nchw, (0, 2, 3, 1)).astype(f32)
    xp = jnp.pad(x, ((0, 0), (1, 1), (1, 1), (0, cinp - cin)))
    xp = xp.reshape(n, (h + 2) * W2, cinp)
    xp = jnp.pad(xp, ((0, 0), (0, R - (h + 2) * W2), (0, 0))).astype(bf16)

    def pad_w3(wk, ci):
        wk = jnp.pad(wk, ((0, 0), (0, 0), (0, ci - wk.shape[2]),
                          (0, coutp - wk.shape[3])))
        return wk.reshape(9, ci, coutp).astype(bf16)

    w1 = pad_w3(params["w1"], cinp)
    w2 = pad_w3(params["w2"], coutp)
    wtr = jnp.pad(params["wtr"], ((0, 0), (0, 0), (0, coutp - cout),
                                  (0, coutp - cout))
                  ).reshape(16, coutp, coutp).astype(bf16)

    def pad_c(v):
        return jnp.pad(v.astype(f32), ((0, 0), (0, coutp - cout)))

    b1, g1, be1, b2, g2, be2, bt, btr = (
        pad_c(params[k]) for k in ("b1", "g1", "be1", "b2", "g2", "be2", "bt", "btr"))
    wt = jnp.pad(params["wt"].astype(f32),
                 ((0, tdp - tdim), (0, coutp - cout))).astype(bf16)
    tq = jnp.pad(t.astype(f32), ((0, 0), (0, tdp - tdim))
                 ).reshape(n, 1, tdp).astype(bf16)

    def full(shape):
        return pl.BlockSpec(shape, lambda i, _s=len(shape): (0,) * _s)

    def per_img(shape):
        return pl.BlockSpec(shape, lambda i, _s=len(shape): (i,) + (0,) * (_s - 1))

    # ---- stage 1: conv1 + ReLU + BN1 stats --------------------------------
    a1, stat1 = pl.pallas_call(
        _make_stage1_kernel(W2, M, HEAD),
        grid=(n,),
        in_specs=[per_img((1, R, cinp)), full((9, cinp, coutp)),
                  full((1, coutp)), full((R, 1))],
        out_specs=(per_img((1, R, coutp)), full((8, coutp))),
        out_shape=(jax.ShapeDtypeStruct((n, R, coutp), bf16),
                   jax.ShapeDtypeStruct((8, coutp), jnp.float32)),
        compiler_params=pltpu.CompilerParams(
            dimension_semantics=("arbitrary",), vmem_limit_bytes=VMEM_LIMIT),
        cost_estimate=pl.CostEstimate(
            flops=2 * n * M * 9 * cinp * coutp, transcendentals=0,
            bytes_accessed=xp.size * 2 + n * R * coutp * 2 + w1.size * 2),
    )(xp, w1, b1, mask12)

    # ---- stage 2: bn1 affine (+time) -> conv2 + ReLU + BN2 stats ----------
    a2, stat2 = pl.pallas_call(
        _make_stage2_kernel(W2, M, HEAD, inv_cnt),
        grid=(n,),
        in_specs=[per_img((1, R, coutp)), full((8, coutp)), full((1, coutp)),
                  full((1, coutp)), per_img((1, 1, tdp)), full((tdp, coutp)),
                  full((1, coutp)), full((9, coutp, coutp)), full((1, coutp)),
                  full((R, 1))],
        out_specs=(per_img((1, R, coutp)), full((8, coutp))),
        out_shape=(jax.ShapeDtypeStruct((n, R, coutp), bf16),
                   jax.ShapeDtypeStruct((8, coutp), jnp.float32)),
        compiler_params=pltpu.CompilerParams(
            dimension_semantics=("arbitrary",), vmem_limit_bytes=VMEM_LIMIT),
        cost_estimate=pl.CostEstimate(
            flops=2 * n * M * 9 * coutp * coutp, transcendentals=n * coutp,
            bytes_accessed=2 * n * R * coutp * 2 + w2.size * 2),
    )(a1, stat1, g1, be1, tq, wt, bt, w2, b2, mask12)

    # ---- phase split (stride-2 decomposition, pure layout, no expansion) --
    a2_3d = a2.reshape(n, h + 3, W2, coutp)
    subs = []
    for py in (0, 1):
        for px in (0, 1):
            s = a2_3d[:, py:h + 2:2, px:w + 2:2, :].reshape(n, (ho + 1) * Wo1, coutp)
            subs.append(jnp.pad(s, ((0, 0), (0, R3 - (ho + 1) * Wo1), (0, 0))))
    a2p = jnp.stack(subs, axis=1)                                  # (n, 4, R3, Cp)

    # ---- stage 3: bn2 affine -> 4x4 stride-2 transform conv ---------------
    out_flat = pl.pallas_call(
        _make_stage3_kernel(Wo1, M3, inv_cnt),
        grid=(n,),
        in_specs=[per_img((1, 4, R3, coutp)), full((8, coutp)), full((1, coutp)),
                  full((1, coutp)), full((16, coutp, coutp)), full((1, coutp)),
                  full((4, R3, 1))],
        out_specs=per_img((1, M3, coutp)),
        out_shape=jax.ShapeDtypeStruct((n, M3, coutp), jnp.float32),
        compiler_params=pltpu.CompilerParams(
            dimension_semantics=("parallel",), vmem_limit_bytes=VMEM_LIMIT),
        cost_estimate=pl.CostEstimate(
            flops=2 * n * M3 * 16 * coutp * coutp, transcendentals=n * coutp,
            bytes_accessed=n * 4 * R3 * coutp * 2 + n * M3 * coutp * 4 + wtr.size * 2),
    )(a2p, stat2, g2, be2, wtr, btr, mask3)

    out = out_flat.reshape(n, ho, Wo1, coutp)[:, :, :wo, :cout]
    return jnp.transpose(out, (0, 3, 1, 2))                        # -> NCHW


# ----------------------------------------------------------------------------
# Pure-JAX reference (PyTorch Block, train-mode BN).  cast_bf16=True emulates
# the kernel's bf16 matmul-operand / stored-activation rounding points.
# ----------------------------------------------------------------------------
def reference_forward(x_nchw, t, params, cast_bf16=False):
    f32 = jnp.float32
    rb = (lambda a: a.astype(jnp.bfloat16).astype(f32)) if cast_bf16 else (lambda a: a)
    dn = ("NHWC", "HWIO", "NHWC")
    x = jnp.transpose(x_nchw, (0, 2, 3, 1)).astype(f32)

    def bn(hh, g, b):
        m = jnp.mean(hh, axis=(0, 1, 2), keepdims=True)
        v = jnp.mean((hh - m) ** 2, axis=(0, 1, 2), keepdims=True)
        return (hh - m) * lax.rsqrt(v + EPS) * g.reshape(1, 1, 1, -1) + b.reshape(1, 1, 1, -1)

    hh = lax.conv_general_dilated(rb(x), rb(params["w1"]), (1, 1), ((1, 1), (1, 1)),
                                  dimension_numbers=dn)
    hh = rb(jnp.maximum(hh + params["b1"].reshape(1, 1, 1, -1), 0.0))
    hh = bn(hh, params["g1"], params["be1"])
    te = jnp.maximum(rb(t) @ rb(params["wt"]) + params["bt"], 0.0)
    hh = hh + te[:, None, None, :]
    hh = lax.conv_general_dilated(rb(hh), rb(params["w2"]), (1, 1), ((1, 1), (1, 1)),
                                  dimension_numbers=dn)
    hh = rb(jnp.maximum(hh + params["b2"].reshape(1, 1, 1, -1), 0.0))
    hh = bn(hh, params["g2"], params["be2"])
    out = lax.conv_general_dilated(rb(hh), rb(params["wtr"]), (2, 2), ((1, 1), (1, 1)),
                                   dimension_numbers=dn)
    return jnp.transpose(out + params["btr"].reshape(1, 1, 1, -1), (0, 3, 1, 2))


# ----------------------------------------------------------------------------
if __name__ == "__main__":
    N, CIN, COUT, H, W, TDIM = 2, 4, 8, 16, 16, 32

    key = jax.random.PRNGKey(0)
    ks = jax.random.split(key, 14)
    f32 = jnp.float32
    params = dict(
        # conv weights in HWIO (PyTorch OIHW -> transpose(2, 3, 1, 0))
        w1=jax.random.normal(ks[0], (3, 3, CIN, COUT), f32) * 0.2,
        b1=jax.random.normal(ks[1], (1, COUT), f32) * 0.1,
        g1=1.0 + 0.1 * jax.random.normal(ks[2], (1, COUT), f32),
        be1=0.1 * jax.random.normal(ks[3], (1, COUT), f32),
        wt=jax.random.normal(ks[4], (TDIM, COUT), f32) * 0.2,
        bt=0.1 * jax.random.normal(ks[5], (1, COUT), f32),
        w2=jax.random.normal(ks[6], (3, 3, COUT, COUT), f32) * 0.2,
        b2=0.1 * jax.random.normal(ks[7], (1, COUT), f32),
        g2=1.0 + 0.1 * jax.random.normal(ks[8], (1, COUT), f32),
        be2=0.1 * jax.random.normal(ks[9], (1, COUT), f32),
        wtr=jax.random.normal(ks[10], (4, 4, COUT, COUT), f32) * 0.2,
        btr=0.1 * jax.random.normal(ks[11], (1, COUT), f32),
    )

    x = jax.random.normal(ks[12], (N, CIN, H, W), f32)   # NCHW like PyTorch
    t = jax.random.normal(ks[13], (N, TDIM), f32)

    out = jax.block_until_ready(block_forward(x, t, params))
    ref_bf = np.asarray(reference_forward(x, t, params, cast_bf16=True))
    ref_f32 = np.asarray(reference_forward(x, t, params, cast_bf16=False))
    out_np = np.asarray(out)

    assert out.shape == (N, COUT, H // 2, W // 2), out.shape
    # Tight check vs a reference that matches the kernel's bf16 rounding points.
    err_bf = float(np.max(np.abs(out_np - ref_bf)))
    assert np.allclose(out_np, ref_bf, rtol=5e-3, atol=5e-3), err_bf
    # Loose sanity check vs the pure-f32 PyTorch-equivalent reference.
    err_f32 = float(np.max(np.abs(out_np - ref_f32)))
    assert err_f32 < 0.3, err_f32
    print("KERNEL_OK")
</pallas_src>

<mosaic_0001>
module attributes {stable_mosaic.version = 11 : i64} {
  func.func @kernel(%arg0: i32, %arg1: memref<1x342x128xbf16, #tpu.memory_space<vmem>>, %arg2: memref<9x128x128xbf16, #tpu.memory_space<vmem>>, %arg3: memref<1x128xf32, #tpu.memory_space<vmem>>, %arg4: memref<342x1xf32, #tpu.memory_space<vmem>>, %arg5: memref<1x342x128xbf16, #tpu.memory_space<vmem>>, %arg6: memref<8x128xf32, #tpu.memory_space<vmem>>) attributes {dimension_semantics = [#tpu.dimension_semantics<arbitrary>], iteration_bounds = array<i64: 2>, scalar_prefetch = 0 : i64, scratch_operands = 0 : i64, tpu.core_type = #tpu.core_type<tc>, window_params = [{transform_indices = @transform_0, window_bounds = array<i64: 1, 342, 128>}, {pipeline_mode = #tpu.pipeline_mode<synchronous>, transform_indices = @transform_1, window_bounds = array<i64: 9, 128, 128>}, {pipeline_mode = #tpu.pipeline_mode<synchronous>, transform_indices = @transform_2, window_bounds = array<i64: 1, 128>}, {pipeline_mode = #tpu.pipeline_mode<synchronous>, transform_indices = @transform_3, window_bounds = array<i64: 342, 1>}, {transform_indices = @transform_4, window_bounds = array<i64: 1, 342, 128>}, {pipeline_mode = #tpu.pipeline_mode<synchronous>, transform_indices = @transform_5, window_bounds = array<i64: 8, 128>}]} {
    %c0_i32 = arith.constant 0 : i32
    %0 = arith.cmpi eq, %arg0, %c0_i32 : i32
    %1 = arith.extui %0 : i1 to i32
    %c0_i32_0 = arith.constant 0 : i32
    %2 = arith.cmpi ne, %1, %c0_i32_0 : i32
    scf.if %2 {
      %cst_74 = arith.constant 0.000000e+00 : f32
      %90 = vector.broadcast %cst_74 : f32 to vector<8x128xf32>
      %c0_75 = arith.constant 0 : index
      %c0_76 = arith.constant 0 : index
      %91 = vector.load %arg6[%c0_75, %c0_76] : memref<8x128xf32, #tpu.memory_space<vmem>>, vector<8x128xf32>
      tpu.vector_store %arg6[%c0_75, %c0_76], %90 {strides = array<i32>} : memref<8x128xf32, #tpu.memory_space<vmem>>, vector<8x128xf32>,
    } else {
    }
    %cst = arith.constant 0.000000e+00 : f32
    %3 = vector.broadcast %cst : f32 to vector<288x128xf32>
    %c0 = arith.constant 0 : index
    %c0_1 = arith.constant 0 : index
    %c0_2 = arith.constant 0 : index
    %4 = vector.load %arg1[%c0, %c0_1, %c0_2] : memref<1x342x128xbf16, #tpu.memory_space<vmem>>, vector<1x288x128xbf16>
    %5 = vector.shape_cast %4 : vector<1x288x128xbf16> to vector<288x128xbf16>
    %c0_3 = arith.constant 0 : index
    %c0_4 = arith.constant 0 : index
    %c0_5 = arith.constant 0 : index
    %6 = vector.load %arg2[%c0_3, %c0_4, %c0_5] : memref<9x128x128xbf16, #tpu.memory_space<vmem>>, vector<1x128x128xbf16>
    %7 = vector.shape_cast %6 : vector<1x128x128xbf16> to vector<128x128xbf16>
    %cst_6 = arith.constant dense<0.000000e+00> : vector<288x128xf32>
    %8 = tpu.matmul %5, %7, %cst_6 {dimension_numbers = #tpu.dot_dimension_numbers<[1], [0], [0], [1], [0, 0, 1, 1], [], []>} : vector<288x128xbf16>, vector<128x128xbf16>, vector<288x128xf32> -> vector<288x128xf32>
    %9 = arith.addf %3, %8 : vector<288x128xf32>
    %c0_7 = arith.constant 0 : index
    %c1 = arith.constant 1 : index
    %c0_8 = arith.constant 0 : index
    %10 = vector.load %arg1[%c0_7, %c1, %c0_8] : memref<1x342x128xbf16, #tpu.memory_space<vmem>>, vector<1x288x128xbf16>
    %11 = vector.shape_cast %10 : vector<1x288x128xbf16> to vector<288x128xbf16>
    %c1_9 = arith.constant 1 : index
    %c0_10 = arith.constant 0 : index
    %c0_11 = arith.constant 0 : index
    %12 = vector.load %arg2[%c1_9, %c0_10, %c0_11] : memref<9x128x128xbf16, #tpu.memory_space<vmem>>, vector<1x128x128xbf16>
    %13 = vector.shape_cast %12 : vector<1x128x128xbf16> to vector<128x128xbf16>
    %cst_12 = arith.constant dense<0.000000e+00> : vector<288x128xf32>
    %14 = tpu.matmul %11, %13, %cst_12 {dimension_numbers = #tpu.dot_dimension_numbers<[1], [0], [0], [1], [0, 0, 1, 1], [], []>} : vector<288x128xbf16>, vector<128x128xbf16>, vector<288x128xf32> -> vector<288x128xf32>
    %15 = arith.addf %9, %14 : vector<288x128xf32>
    %c0_13 = arith.constant 0 : index
    %c2 = arith.constant 2 : index
    %c0_14 = arith.constant 0 : index
    %16 = vector.load %arg1[%c0_13, %c2, %c0_14] : memref<1x342x128xbf16, #tpu.memory_space<vmem>>, vector<1x288x128xbf16>
    %17 = vector.shape_cast %16 : vector<1x288x128xbf16> to vector<288x128xbf16>
    %c2_15 = arith.constant 2 : index
    %c0_16 = arith.constant 0 : index
    %c0_17 = arith.constant 0 : index
    %18 = vector.load %arg2[%c2_15, %c0_16, %c0_17] : memref<9x128x128xbf16, #tpu.memory_space<vmem>>, vector<1x128x128xbf16>
    %19 = vector.shape_cast %18 : vector<1x128x128xbf16> to vector<128x128xbf16>
    %cst_18 = arith.constant dense<0.000000e+00> : vector<288x128xf32>
    %20 = tpu.matmul %17, %19, %cst_18 {dimension_numbers = #tpu.dot_dimension_numbers<[1], [0], [0], [1], [0, 0, 1, 1], [], []>} : vector<288x128xbf16>, vector<128x128xbf16>, vector<288x128xf32> -> vector<288x128xf32>
    %21 = arith.addf %15, %20 : vector<288x128xf32>
    %c0_19 = arith.constant 0 : index
    %c18 = arith.constant 18 : index
    %c0_20 = arith.constant 0 : index
    %22 = vector.load %arg1[%c0_19, %c18, %c0_20] : memref<1x342x128xbf16, #tpu.memory_space<vmem>>, vector<1x288x128xbf16>
    %23 = vector.shape_cast %22 : vector<1x288x128xbf16> to vector<288x128xbf16>
    %c3 = arith.constant 3 : index
    %c0_21 = arith.constant 0 : index
    %c0_22 = arith.constant 0 : index
    %24 = vector.load %arg2[%c3, %c0_21, %c0_22] : memref<9x128x128xbf16, #tpu.memory_space<vmem>>, vector<1x128x128xbf16>
    %25 = vector.shape_cast %24 : vector<1x128x128xbf16> to vector<128x128xbf16>
    %cst_23 = arith.constant dense<0.000000e+00> : vector<288x128xf32>
    %26 = tpu.matmul %23, %25, %cst_23 {dimension_numbers = #tpu.dot_dimension_numbers<[1], [0], [0], [1], [0, 0, 1, 1], [], []>} : vector<288x128xbf16>, vector<128x128xbf16>, vector<288x128xf32> -> vector<288x128xf32>
    %27 = arith.addf %21, %26 : vector<288x128xf32>
    %c0_24 = arith.constant 0 : index
    %c19 = arith.constant 19 : index
    %c0_25 = arith.constant 0 : index
    %28 = vector.load %arg1[%c0_24, %c19, %c0_25] : memref<1x342x128xbf16, #tpu.memory_space<vmem>>, vector<1x288x128xbf16>
    %29 = vector.shape_cast %28 : vector<1x288x128xbf16> to vector<288x128xbf16>
    %c4 = arith.constant 4 : index
    %c0_26 = arith.constant 0 : index
    %c0_27 = arith.constant 0 : index
    %30 = vector.load %arg2[%c4, %c0_26, %c0_27] : memref<9x128x128xbf16, #tpu.memory_space<vmem>>, vector<1x128x128xbf16>
    %31 = vector.shape_cast %30 : vector<1x128x128xbf16> to vector<128x128xbf16>
    %cst_28 = arith.constant dense<0.000000e+00> : vector<288x128xf32>
    %32 = tpu.matmul %29, %31, %cst_28 {dimension_numbers = #tpu.dot_dimension_numbers<[1], [0], [0], [1], [0, 0, 1, 1], [], []>} : vector<288x128xbf16>, vector<128x128xbf16>, vector<288x128xf32> -> vector<288x128xf32>
    %33 = arith.addf %27, %32 : vector<288x128xf32>
    %c0_29 = arith.constant 0 : index
    %c20 = arith.constant 20 : index
    %c0_30 = arith.constant 0 : index
    %34 = vector.load %arg1[%c0_29, %c20, %c0_30] : memref<1x342x128xbf16, #tpu.memory_space<vmem>>, vector<1x288x128xbf16>
    %35 = vector.shape_cast %34 : vector<1x288x128xbf16> to vector<288x128xbf16>
    %c5 = arith.constant 5 : index
    %c0_31 = arith.constant 0 : index
    %c0_32 = arith.constant 0 : index
    %36 = vector.load %arg2[%c5, %c0_31, %c0_32] : memref<9x128x128xbf16, #tpu.memory_space<vmem>>, vector<1x128x128xbf16>
    %37 = vector.shape_cast %36 : vector<1x128x128xbf16> to vector<128x128xbf16>
    %cst_33 = arith.constant dense<0.000000e+00> : vector<288x128xf32>
    %38 = tpu.matmul %35, %37, %cst_33 {dimension_numbers = #tpu.dot_dimension_numbers<[1], [0], [0], [1], [0, 0, 1, 1], [], []>} : vector<288x128xbf16>, vector<128x128xbf16>, vector<288x128xf32> -> vector<288x128xf32>
    %39 = arith.addf %33, %38 : vector<288x128xf32>
    %c0_34 = arith.constant 0 : index
    %c36 = arith.constant 36 : index
    %c0_35 = arith.constant 0 : index
    %40 = vector.load %arg1[%c0_34, %c36, %c0_35] : memref<1x342x128xbf16, #tpu.memory_space<vmem>>, vector<1x288x128xbf16>
    %41 = vector.shape_cast %40 : vector<1x288x128xbf16> to vector<288x128xbf16>
    %c6 = arith.constant 6 : index
    %c0_36 = arith.constant 0 : index
    %c0_37 = arith.constant 0 : index
    %42 = vector.load %arg2[%c6, %c0_36, %c0_37] : memref<9x128x128xbf16, #tpu.memory_space<vmem>>, vector<1x128x128xbf16>
    %43 = vector.shape_cast %42 : vector<1x128x128xbf16> to vector<128x128xbf16>
    %cst_38 = arith.constant dense<0.000000e+00> : vector<288x128xf32>
    %44 = tpu.matmul %41, %43, %cst_38 {dimension_numbers = #tpu.dot_dimension_numbers<[1], [0], [0], [1], [0, 0, 1, 1], [], []>} : vector<288x128xbf16>, vector<128x128xbf16>, vector<288x128xf32> -> vector<288x128xf32>
    %45 = arith.addf %39, %44 : vector<288x128xf32>
    %c0_39 = arith.constant 0 : index
    %c37 = arith.constant 37 : index
    %c0_40 = arith.constant 0 : index
    %46 = vector.load %arg1[%c0_39, %c37, %c0_40] : memref<1x342x128xbf16, #tpu.memory_space<vmem>>, vector<1x288x128xbf16>
    %47 = vector.shape_cast %46 : vector<1x288x128xbf16> to vector<288x128xbf16>
    %c7 = arith.constant 7 : index
    %c0_41 = arith.constant 0 : index
    %c0_42 = arith.constant 0 : index
    %48 = vector.load %arg2[%c7, %c0_41, %c0_42] : memref<9x128x128xbf16, #tpu.memory_space<vmem>>, vector<1x128x128xbf16>
    %49 = vector.shape_cast %48 : vector<1x128x128xbf16> to vector<128x128xbf16>
    %cst_43 = arith.constant dense<0.000000e+00> : vector<288x128xf32>
    %50 = tpu.matmul %47, %49, %cst_43 {dimension_numbers = #tpu.dot_dimension_numbers<[1], [0], [0], [1], [0, 0, 1, 1], [], []>} : vector<288x128xbf16>, vector<128x128xbf16>, vector<288x128xf32> -> vector<288x128xf32>
    %51 = arith.addf %45, %50 : vector<288x128xf32>
    %c0_44 = arith.constant 0 : index
    %c38 = arith.constant 38 : index
    %c0_45 = arith.constant 0 : index
    %52 = vector.load %arg1[%c0_44, %c38, %c0_45] : memref<1x342x128xbf16, #tpu.memory_space<vmem>>, vector<1x288x128xbf16>
    %53 = vector.shape_cast %52 : vector<1x288x128xbf16> to vector<288x128xbf16>
    %c8 = arith.constant 8 : index
    %c0_46 = arith.constant 0 : index
    %c0_47 = arith.constant 0 : index
    %54 = vector.load %arg2[%c8, %c0_46, %c0_47] : memref<9x128x128xbf16, #tpu.memory_space<vmem>>, vector<1x128x128xbf16>
    %55 = vector.shape_cast %54 : vector<1x128x128xbf16> to vector<128x128xbf16>
    %cst_48 = arith.constant dense<0.000000e+00> : vector<288x128xf32>
    %56 = tpu.matmul %53, %55, %cst_48 {dimension_numbers = #tpu.dot_dimension_numbers<[1], [0], [0], [1], [0, 0, 1, 1], [], []>} : vector<288x128xbf16>, vector<128x128xbf16>, vector<288x128xf32> -> vector<288x128xf32>
    %57 = arith.addf %51, %56 : vector<288x128xf32>
    %c0_49 = arith.constant 0 : index
    %c0_50 = arith.constant 0 : index
    %58 = vector.load %arg3[%c0_49, %c0_50] : memref<1x128xf32, #tpu.memory_space<vmem>>, vector<1x128xf32>
    %59 = vector.broadcast %58 : vector<1x128xf32> to vector<288x128xf32>
    %60 = arith.addf %57, %59 : vector<288x128xf32>
    %cst_51 = arith.constant 0.000000e+00 : f32
    %61 = vector.broadcast %cst_51 : f32 to vector<288x128xf32>
    %62 = arith.maximumf %60, %61 : vector<288x128xf32>
    %c19_52 = arith.constant 19 : index
    %c0_53 = arith.constant 0 : index
    %63 = vector.load %arg4[%c19_52, %c0_53] : memref<342x1xf32, #tpu.memory_space<vmem>>, vector<288x1xf32>
    %64 = vector.broadcast %63 : vector<288x1xf32> to vector<288x128xf32>
    %65 = arith.mulf %62, %64 : vector<288x128xf32>
    %66 = arith.truncf %65 : vector<288x128xf32> to vector<288x128xbf16>
    %67 = arith.extf %66 : vector<288x128xbf16> to vector<288x128xf32>
    %c0_54 = arith.constant 0 : index
    %c0_55 = arith.constant 0 : index
    %68 = vector.load %arg6[%c0_54, %c0_55] : memref<8x128xf32, #tpu.memory_space<vmem>>, vector<1x128xf32>
    %cst_56 = arith.constant dense<0.000000e+00> : vector<128xf32>
    %69 = vector.multi_reduction <add>, %67, %cst_56 [0] : vector<288x128xf32> to vector<128xf32>
    %70 = vector.shape_cast %69 : vector<128xf32> to vector<1x128xf32>
    %71 = arith.addf %68, %70 : vector<1x128xf32>
    %c0_57 = arith.constant 0 : index
    %c0_58 = arith.constant 0 : index
    %72 = vector.load %arg6[%c0_57, %c0_58] : memref<8x128xf32, #tpu.memory_space<vmem>>, vector<1x128xf32>
    tpu.vector_store %arg6[%c0_57, %c0_58], %71 {strides = array<i32>} : memref<8x128xf32, #tpu.memory_space<vmem>>, vector<1x128xf32>,
    %c1_59 = arith.constant 1 : index
    %c0_60 = arith.constant 0 : index
    %73 = vector.load %arg6[%c1_59, %c0_60] : memref<8x128xf32, #tpu.memory_space<vmem>>, vector<1x128xf32>
    %74 = arith.mulf %67, %67 : vector<288x128xf32>
    %cst_61 = arith.constant dense<0.000000e+00> : vector<128xf32>
    %75 = vector.multi_reduction <add>, %74, %cst_61 [0] : vector<288x128xf32> to vector<128xf32>
    %76 = vector.shape_cast %75 : vector<128xf32> to vector<1x128xf32>
    %77 = arith.addf %73, %76 : vector<1x128xf32>
    %c1_62 = arith.constant 1 : index
    %c0_63 = arith.constant 0 : index
    %78 = vector.load %arg6[%c1_62, %c0_63] : memref<8x128xf32, #tpu.memory_space<vmem>>, vector<1x128xf32>
    tpu.vector_store %arg6[%c1_62, %c0_63], %77 {strides = array<i32>} : memref<8x128xf32, #tpu.memory_space<vmem>>, vector<1x128xf32>,
    %cst_64 = arith.constant 0.000000e+00 : bf16
    %79 = vector.broadcast %cst_64 : bf16 to vector<19x128xbf16>
    %c0_65 = arith.constant 0 : index
    %c0_66 = arith.constant 0 : index
    %c0_67 = arith.constant 0 : index
    %80 = vector.load %arg5[%c0_65, %c0_66, %c0_67] : memref<1x342x128xbf16, #tpu.memory_space<vmem>>, vector<1x19x128xbf16>
    %81 = vector.shape_cast %80 : vector<1x19x128xbf16> to vector<19x128xbf16>
    %82 = vector.shape_cast %79 : vector<19x128xbf16> to vector<1x19x128xbf16>
    tpu.vector_store %arg5[%c0_65, %c0_66, %c0_67], %82 {strides = array<i32>} : memref<1x342x128xbf16, #tpu.memory_space<vmem>>, vector<1x19x128xbf16>,
    %c0_68 = arith.constant 0 : index
    %c19_69 = arith.constant 19 : index
    %c0_70 = arith.constant 0 : index
    %83 = vector.load %arg5[%c0_68, %c19_69, %c0_70] : memref<1x342x128xbf16, #tpu.memory_space<vmem>>, vector<1x288x128xbf16>
    %84 = vector.shape_cast %83 : vector<1x288x128xbf16> to vector<288x128xbf16>
    %85 = vector.shape_cast %66 : vector<288x128xbf16> to vector<1x288x128xbf16>
    tpu.vector_store %arg5[%c0_68, %c19_69, %c0_70], %85 {strides = array<i32>} : memref<1x342x128xbf16, #tpu.memory_space<vmem>>, vector<1x288x128xbf16>,
    %cst_71 = arith.constant 0.000000e+00 : bf16
    %86 = vector.broadcast %cst_71 : bf16 to vector<35x128xbf16>
    %c0_72 = arith.constant 0 : index
    %c307 = arith.constant 307 : index
    %c0_73 = arith.constant 0 : index
    %87 = vector.load %arg5[%c0_72, %c307, %c0_73] : memref<1x342x128xbf16, #tpu.memory_space<vmem>>, vector<1x35x128xbf16>
    %88 = vector.shape_cast %87 : vector<1x35x128xbf16> to vector<35x128xbf16>
    %89 = vector.shape_cast %86 : vector<35x128xbf16> to vector<1x35x128xbf16>
    tpu.vector_store %arg5[%c0_72, %c307, %c0_73], %89 {strides = array<i32>} : memref<1x342x128xbf16, #tpu.memory_space<vmem>>, vector<1x35x128xbf16>,
    return
  }
  func.func @transform_0(%arg0: i32) -> (i32, i32, i32) {
    %c0_i32 = arith.constant 0 : i32
    %c0_i32_0 = arith.constant 0 : i32
    %c0_i32_1 = arith.constant 0 : i32
    return %arg0, %c0_i32, %c0_i32_0 : i32, i32, i32
  }
  func.func @transform_1(%arg0: i32) -> (i32, i32, i32) {
    %c0_i32 = arith.constant 0 : i32
    %c0_i32_0 = arith.constant 0 : i32
    %c0_i32_1 = arith.constant 0 : i32
    %c0_i32_2 = arith.constant 0 : i32
    return %c0_i32, %c0_i32_0, %c0_i32_1 : i32, i32, i32
  }
  func.func @transform_2(%arg0: i32) -> (i32, i32) {
    %c0_i32 = arith.constant 0 : i32
    %c0_i32_0 = arith.constant 0 : i32
    %c0_i32_1 = arith.constant 0 : i32
    return %c0_i32, %c0_i32_0 : i32, i32
  }
  func.func @transform_3(%arg0: i32) -> (i32, i32) {
    %c0_i32 = arith.constant 0 : i32
    %c0_i32_0 = arith.constant 0 : i32
    %c0_i32_1 = arith.constant 0 : i32
    return %c0_i32, %c0_i32_0 : i32, i32
  }
  func.func @transform_4(%arg0: i32) -> (i32, i32, i32) {
    %c0_i32 = arith.constant 0 : i32
    %c0_i32_0 = arith.constant 0 : i32
    %c0_i32_1 = arith.constant 0 : i32
    return %arg0, %c0_i32, %c0_i32_0 : i32, i32, i32
  }
  func.func @transform_5(%arg0: i32) -> (i32, i32) {
    %c0_i32 = arith.constant 0 : i32
    %c0_i32_0 = arith.constant 0 : i32
    %c0_i32_1 = arith.constant 0 : i32
    return %c0_i32, %c0_i32_0 : i32, i32
  }
}

module attributes {stable_mosaic.version = 11 : i64} {
  func.func @kernel(%arg0: i32, %arg1: memref<1x342x128xbf16, #tpu.memory_space<vmem>>, %arg2: memref<8x128xf32, #tpu.memory_space<vmem>>, %arg3: memref<1x128xf32, #tpu.memory_space<vmem>>, %arg4: memref<1x128xf32, #tpu.memory_space<vmem>>, %arg5: memref<1x1x128xbf16, #tpu.memory_space<vmem>>, %arg6: memref<128x128xbf16, #tpu.memory_space<vmem>>, %arg7: memref<1x128xf32, #tpu.memory_space<vmem>>, %arg8: memref<9x128x128xbf16, #tpu.memory_space<vmem>>, %arg9: memref<1x128xf32, #tpu.memory_space<vmem>>, %arg10: memref<342x1xf32, #tpu.memory_space<vmem>>, %arg11: memref<1x342x128xbf16, #tpu.memory_space<vmem>>, %arg12: memref<8x128xf32, #tpu.memory_space<vmem>>) attributes {dimension_semantics = [#tpu.dimension_semantics<arbitrary>], iteration_bounds = array<i64: 2>, scalar_prefetch = 0 : i64, scratch_operands = 0 : i64, tpu.core_type = #tpu.core_type<tc>, window_params = [{transform_indices = @transform_0, window_bounds = array<i64: 1, 342, 128>}, {pipeline_mode = #tpu.pipeline_mode<synchronous>, transform_indices = @transform_1, window_bounds = array<i64: 8, 128>}, {pipeline_mode = #tpu.pipeline_mode<synchronous>, transform_indices = @transform_2, window_bounds = array<i64: 1, 128>}, {pipeline_mode = #tpu.pipeline_mode<synchronous>, transform_indices = @transform_3, window_bounds = array<i64: 1, 128>}, {transform_indices = @transform_4, window_bounds = array<i64: 1, 1, 128>}, {pipeline_mode = #tpu.pipeline_mode<synchronous>, transform_indices = @transform_5, window_bounds = array<i64: 128, 128>}, {pipeline_mode = #tpu.pipeline_mode<synchronous>, transform_indices = @transform_6, window_bounds = array<i64: 1, 128>}, {pipeline_mode = #tpu.pipeline_mode<synchronous>, transform_indices = @transform_7, window_bounds = array<i64: 9, 128, 128>}, {pipeline_mode = #tpu.pipeline_mode<synchronous>, transform_indices = @transform_8, window_bounds = array<i64: 1, 128>}, {pipeline_mode = #tpu.pipeline_mode<synchronous>, transform_indices = @transform_9, window_bounds = array<i64: 342, 1>}, {transform_indices = @transform_10, window_bounds = array<i64: 1, 342, 128>}, {pipeline_mode = #tpu.pipeline_mode<synchronous>, transform_indices = @transform_11, window_bounds = array<i64: 8, 128>}]} {
    %c0_i32 = arith.constant 0 : i32
    %0 = arith.cmpi eq, %arg0, %c0_i32 : i32
    %1 = arith.extui %0 : i1 to i32
    %c0_i32_0 = arith.constant 0 : i32
    %2 = arith.cmpi ne, %1, %c0_i32_0 : i32
    scf.if %2 {
      %cst_77 = arith.constant 0.000000e+00 : f32
      %117 = vector.broadcast %cst_77 : f32 to vector<8x128xf32>
      %c0_78 = arith.constant 0 : index
      %c0_79 = arith.constant 0 : index
      %118 = vector.load %arg12[%c0_78, %c0_79] : memref<8x128xf32, #tpu.memory_space<vmem>>, vector<8x128xf32>
      tpu.vector_store %arg12[%c0_78, %c0_79], %117 {strides = array<i32>} : memref<8x128xf32, #tpu.memory_space<vmem>>, vector<8x128xf32>,
    } else {
    }
    %c0 = arith.constant 0 : index
    %c0_1 = arith.constant 0 : index
    %3 = vector.load %arg2[%c0, %c0_1] : memref<8x128xf32, #tpu.memory_space<vmem>>, vector<1x128xf32>
    %cst = arith.constant 0.001953125 : f32
    %4 = vector.broadcast %cst : f32 to vector<1x128xf32>
    %5 = arith.mulf %3, %4 : vector<1x128xf32>
    %c1 = arith.constant 1 : index
    %c0_2 = arith.constant 0 : index
    %6 = vector.load %arg2[%c1, %c0_2] : memref<8x128xf32, #tpu.memory_space<vmem>>, vector<1x128xf32>
    %cst_3 = arith.constant 0.001953125 : f32
    %7 = vector.broadcast %cst_3 : f32 to vector<1x128xf32>
    %8 = arith.mulf %6, %7 : vector<1x128xf32>
    %9 = arith.mulf %5, %5 : vector<1x128xf32>
    %10 = arith.subf %8, %9 : vector<1x128xf32>
    %c0_4 = arith.constant 0 : index
    %c0_5 = arith.constant 0 : index
    %11 = vector.load %arg3[%c0_4, %c0_5] : memref<1x128xf32, #tpu.memory_space<vmem>>, vector<1x128xf32>
    %cst_6 = arith.constant 9.99999974E-6 : f32
    %12 = vector.broadcast %cst_6 : f32 to vector<1x128xf32>
    %13 = arith.addf %10, %12 : vector<1x128xf32>
    %14 = math.rsqrt %13 : vector<1x128xf32>
    %15 = arith.mulf %11, %14 : vector<1x128xf32>
    %c0_7 = arith.constant 0 : index
    %c0_8 = arith.constant 0 : index
    %c0_9 = arith.constant 0 : index
    %16 = vector.load %arg5[%c0_7, %c0_8, %c0_9] : memref<1x1x128xbf16, #tpu.memory_space<vmem>>, vector<1x1x128xbf16>
    %17 = vector.shape_cast %16 : vector<1x1x128xbf16> to vector<1x128xbf16>
    %c0_10 = arith.constant 0 : index
    %c0_11 = arith.constant 0 : index
    %18 = vector.load %arg6[%c0_10, %c0_11] : memref<128x128xbf16, #tpu.memory_space<vmem>>, vector<128x128xbf16>
    %cst_12 = arith.constant dense<0.000000e+00> : vector<1x128xf32>
    %19 = tpu.matmul %17, %18, %cst_12 {dimension_numbers = #tpu.dot_dimension_numbers<[1], [0], [0], [1], [0, 0, 1, 1], [], []>} : vector<1x128xbf16>, vector<128x128xbf16>, vector<1x128xf32> -> vector<1x128xf32>
    %c0_13 = arith.constant 0 : index
    %c0_14 = arith.constant 0 : index
    %20 = vector.load %arg7[%c0_13, %c0_14] : memref<1x128xf32, #tpu.memory_space<vmem>>, vector<1x128xf32>
    %21 = arith.addf %19, %20 : vector<1x128xf32>
    %cst_15 = arith.constant 0.000000e+00 : f32
    %22 = vector.broadcast %cst_15 : f32 to vector<1x128xf32>
    %23 = arith.maximumf %21, %22 : vector<1x128xf32>
    %c0_16 = arith.constant 0 : index
    %c0_17 = arith.constant 0 : index
    %24 = vector.load %arg4[%c0_16, %c0_17] : memref<1x128xf32, #tpu.memory_space<vmem>>, vector<1x128xf32>
    %25 = arith.mulf %5, %15 : vector<1x128xf32>
    %26 = arith.subf %24, %25 : vector<1x128xf32>
    %27 = arith.addf %26, %23 : vector<1x128xf32>
    %c0_18 = arith.constant 0 : index
    %c0_19 = arith.constant 0 : index
    %c0_20 = arith.constant 0 : index
    %28 = vector.load %arg1[%c0_18, %c0_19, %c0_20] : memref<1x342x128xbf16, #tpu.memory_space<vmem>>, vector<1x342x128xbf16>
    %29 = vector.shape_cast %28 : vector<1x342x128xbf16> to vector<342x128xbf16>
    %30 = arith.extf %29 : vector<342x128xbf16> to vector<342x128xf32>
    %31 = vector.broadcast %15 : vector<1x128xf32> to vector<342x128xf32>
    %32 = arith.mulf %30, %31 : vector<342x128xf32>
    %33 = vector.broadcast %27 : vector<1x128xf32> to vector<342x128xf32>
    %34 = arith.addf %32, %33 : vector<342x128xf32>
    %c0_21 = arith.constant 0 : index
    %c0_22 = arith.constant 0 : index
    %35 = vector.load %arg10[%c0_21, %c0_22] : memref<342x1xf32, #tpu.memory_space<vmem>>, vector<342x1xf32>
    %36 = vector.broadcast %35 : vector<342x1xf32> to vector<342x128xf32>
    %37 = arith.mulf %34, %36 : vector<342x128xf32>
    %38 = arith.truncf %37 : vector<342x128xf32> to vector<342x128xbf16>
    %cst_23 = arith.constant 0.000000e+00 : f32
    %39 = vector.broadcast %cst_23 : f32 to vector<288x128xf32>
    %40 = vector.extract_strided_slice %38 {offsets = [0, 0], sizes = [288, 128], strides = [1, 1]} : vector<342x128xbf16> to vector<288x128xbf16>
    %c0_24 = arith.constant 0 : index
    %c0_25 = arith.constant 0 : index
    %c0_26 = arith.constant 0 : index
    %41 = vector.load %arg8[%c0_24, %c0_25, %c0_26] : memref<9x128x128xbf16, #tpu.memory_space<vmem>>, vector<1x128x128xbf16>
    %42 = vector.shape_cast %41 : vector<1x128x128xbf16> to vector<128x128xbf16>
    %cst_27 = arith.constant dense<0.000000e+00> : vector<288x128xf32>
    %43 = tpu.matmul %40, %42, %cst_27 {dimension_numbers = #tpu.dot_dimension_numbers<[1], [0], [0], [1], [0, 0, 1, 1], [], []>} : vector<288x128xbf16>, vector<128x128xbf16>, vector<288x128xf32> -> vector<288x128xf32>
    %44 = arith.addf %39, %43 : vector<288x128xf32>
    %45 = vector.extract_strided_slice %38 {offsets = [1, 0], sizes = [288, 128], strides = [1, 1]} : vector<342x128xbf16> to vector<288x128xbf16>
    %c1_28 = arith.constant 1 : index
    %c0_29 = arith.constant 0 : index
    %c0_30 = arith.constant 0 : index
    %46 = vector.load %arg8[%c1_28, %c0_29, %c0_30] : memref<9x128x128xbf16, #tpu.memory_space<vmem>>, vector<1x128x128xbf16>
    %47 = vector.shape_cast %46 : vector<1x128x128xbf16> to vector<128x128xbf16>
    %cst_31 = arith.constant dense<0.000000e+00> : vector<288x128xf32>
    %48 = tpu.matmul %45, %47, %cst_31 {dimension_numbers = #tpu.dot_dimension_numbers<[1], [0], [0], [1], [0, 0, 1, 1], [], []>} : vector<288x128xbf16>, vector<128x128xbf16>, vector<288x128xf32> -> vector<288x128xf32>
    %49 = arith.addf %44, %48 : vector<288x128xf32>
    %50 = vector.extract_strided_slice %38 {offsets = [2, 0], sizes = [288, 128], strides = [1, 1]} : vector<342x128xbf16> to vector<288x128xbf16>
    %c2 = arith.constant 2 : index
    %c0_32 = arith.constant 0 : index
    %c0_33 = arith.constant 0 : index
    %51 = vector.load %arg8[%c2, %c0_32, %c0_33] : memref<9x128x128xbf16, #tpu.memory_space<vmem>>, vector<1x128x128xbf16>
    %52 = vector.shape_cast %51 : vector<1x128x128xbf16> to vector<128x128xbf16>
    %cst_34 = arith.constant dense<0.000000e+00> : vector<288x128xf32>
    %53 = tpu.matmul %50, %52, %cst_34 {dimension_numbers = #tpu.dot_dimension_numbers<[1], [0], [0], [1], [0, 0, 1, 1], [], []>} : vector<288x128xbf16>, vector<128x128xbf16>, vector<288x128xf32> -> vector<288x128xf32>
    %54 = arith.addf %49, %53 : vector<288x128xf32>
    %55 = vector.extract_strided_slice %38 {offsets = [18, 0], sizes = [288, 128], strides = [1, 1]} : vector<342x128xbf16> to vector<288x128xbf16>
    %c3 = arith.constant 3 : index
    %c0_35 = arith.constant 0 : index
    %c0_36 = arith.constant 0 : index
    %56 = vector.load %arg8[%c3, %c0_35, %c0_36] : memref<9x128x128xbf16, #tpu.memory_space<vmem>>, vector<1x128x128xbf16>
    %57 = vector.shape_cast %56 : vector<1x128x128xbf16> to vector<128x128xbf16>
    %cst_37 = arith.constant dense<0.000000e+00> : vector<288x128xf32>
    %58 = tpu.matmul %55, %57, %cst_37 {dimension_numbers = #tpu.dot_dimension_numbers<[1], [0], [0], [1], [0, 0, 1, 1], [], []>} : vector<288x128xbf16>, vector<128x128xbf16>, vector<288x128xf32> -> vector<288x128xf32>
    %59 = arith.addf %54, %58 : vector<288x128xf32>
    %60 = vector.extract_strided_slice %38 {offsets = [19, 0], sizes = [288, 128], strides = [1, 1]} : vector<342x128xbf16> to vector<288x128xbf16>
    %c4 = arith.constant 4 : index
    %c0_38 = arith.constant 0 : index
    %c0_39 = arith.constant 0 : index
    %61 = vector.load %arg8[%c4, %c0_38, %c0_39] : memref<9x128x128xbf16, #tpu.memory_space<vmem>>, vector<1x128x128xbf16>
    %62 = vector.shape_cast %61 : vector<1x128x128xbf16> to vector<128x128xbf16>
    %cst_40 = arith.constant dense<0.000000e+00> : vector<288x128xf32>
    %63 = tpu.matmul %60, %62, %cst_40 {dimension_numbers = #tpu.dot_dimension_numbers<[1], [0], [0], [1], [0, 0, 1, 1], [], []>} : vector<288x128xbf16>, vector<128x128xbf16>, vector<288x128xf32> -> vector<288x128xf32>
    %64 = arith.addf %59, %63 : vector<288x128xf32>
    %65 = vector.extract_strided_slice %38 {offsets = [20, 0], sizes = [288, 128], strides = [1, 1]} : vector<342x128xbf16> to vector<288x128xbf16>
    %c5 = arith.constant 5 : index
    %c0_41 = arith.constant 0 : index
    %c0_42 = arith.constant 0 : index
    %66 = vector.load %arg8[%c5, %c0_41, %c0_42] : memref<9x128x128xbf16, #tpu.memory_space<vmem>>, vector<1x128x128xbf16>
    %67 = vector.shape_cast %66 : vector<1x128x128xbf16> to vector<128x128xbf16>
    %cst_43 = arith.constant dense<0.000000e+00> : vector<288x128xf32>
    %68 = tpu.matmul %65, %67, %cst_43 {dimension_numbers = #tpu.dot_dimension_numbers<[1], [0], [0], [1], [0, 0, 1, 1], [], []>} : vector<288x128xbf16>, vector<128x128xbf16>, vector<288x128xf32> -> vector<288x128xf32>
    %69 = arith.addf %64, %68 : vector<288x128xf32>
    %70 = vector.extract_strided_slice %38 {offsets = [36, 0], sizes = [288, 128], strides = [1, 1]} : vector<342x128xbf16> to vector<288x128xbf16>
    %c6 = arith.constant 6 : index
    %c0_44 = arith.constant 0 : index
    %c0_45 = arith.constant 0 : index
    %71 = vector.load %arg8[%c6, %c0_44, %c0_45] : memref<9x128x128xbf16, #tpu.memory_space<vmem>>, vector<1x128x128xbf16>
    %72 = vector.shape_cast %71 : vector<1x128x128xbf16> to vector<128x128xbf16>
    %cst_46 = arith.constant dense<0.000000e+00> : vector<288x128xf32>
    %73 = tpu.matmul %70, %72, %cst_46 {dimension_numbers = #tpu.dot_dimension_numbers<[1], [0], [0], [1], [0, 0, 1, 1], [], []>} : vector<288x128xbf16>, vector<128x128xbf16>, vector<288x128xf32> -> vector<288x128xf32>
    %74 = arith.addf %69, %73 : vector<288x128xf32>
    %75 = vector.extract_strided_slice %38 {offsets = [37, 0], sizes = [288, 128], strides = [1, 1]} : vector<342x128xbf16> to vector<288x128xbf16>
    %c7 = arith.constant 7 : index
    %c0_47 = arith.constant 0 : index
    %c0_48 = arith.constant 0 : index
    %76 = vector.load %arg8[%c7, %c0_47, %c0_48] : memref<9x128x128xbf16, #tpu.memory_space<vmem>>, vector<1x128x128xbf16>
    %77 = vector.shape_cast %76 : vector<1x128x128xbf16> to vector<128x128xbf16>
    %cst_49 = arith.constant dense<0.000000e+00> : vector<288x128xf32>
    %78 = tpu.matmul %75, %77, %cst_49 {dimension_numbers = #tpu.dot_dimension_numbers<[1], [0], [0], [1], [0, 0, 1, 1], [], []>} : vector<288x128xbf16>, vector<128x128xbf16>, vector<288x128xf32> -> vector<288x128xf32>
    %79 = arith.addf %74, %78 : vector<288x128xf32>
    %80 = vector.extract_strided_slice %38 {offsets = [38, 0], sizes = [288, 128], strides = [1, 1]} : vector<342x128xbf16> to vector<288x128xbf16>
    %c8 = arith.constant 8 : index
    %c0_50 = arith.constant 0 : index
    %c0_51 = arith.constant 0 : index
    %81 = vector.load %arg8[%c8, %c0_50, %c0_51] : memref<9x128x128xbf16, #tpu.memory_space<vmem>>, vector<1x128x128xbf16>
    %82 = vector.shape_cast %81 : vector<1x128x128xbf16> to vector<128x128xbf16>
    %cst_52 = arith.constant dense<0.000000e+00> : vector<288x128xf32>
    %83 = tpu.matmul %80, %82, %cst_52 {dimension_numbers = #tpu.dot_dimension_numbers<[1], [0], [0], [1], [0, 0, 1, 1], [], []>} : vector<288x128xbf16>, vector<128x128xbf16>, vector<288x128xf32> -> vector<288x128xf32>
    %84 = arith.addf %79, %83 : vector<288x128xf32>
    %c0_53 = arith.constant 0 : index
    %c0_54 = arith.constant 0 : index
    %85 = vector.load %arg9[%c0_53, %c0_54] : memref<1x128xf32, #tpu.memory_space<vmem>>, vector<1x128xf32>
    %86 = vector.broadcast %85 : vector<1x128xf32> to vector<288x128xf32>
    %87 = arith.addf %84, %86 : vector<288x128xf32>
    %cst_55 = arith.constant 0.000000e+00 : f32
    %88 = vector.broadcast %cst_55 : f32 to vector<288x128xf32>
    %89 = arith.maximumf %87, %88 : vector<288x128xf32>
    %c19 = arith.constant 19 : index
    %c0_56 = arith.constant 0 : index
    %90 = vector.load %arg10[%c19, %c0_56] : memref<342x1xf32, #tpu.memory_space<vmem>>, vector<288x1xf32>
    %91 = vector.broadcast %90 : vector<288x1xf32> to vector<288x128xf32>
    %92 = arith.mulf %89, %91 : vector<288x128xf32>
    %93 = arith.truncf %92 : vector<288x128xf32> to vector<288x128xbf16>
    %94 = arith.extf %93 : vector<288x128xbf16> to vector<288x128xf32>
    %c0_57 = arith.constant 0 : index
    %c0_58 = arith.constant 0 : index
    %95 = vector.load %arg12[%c0_57, %c0_58] : memref<8x128xf32, #tpu.memory_space<vmem>>, vector<1x128xf32>
    %cst_59 = arith.constant dense<0.000000e+00> : vector<128xf32>
    %96 = vector.multi_reduction <add>, %94, %cst_59 [0] : vector<288x128xf32> to vector<128xf32>
    %97 = vector.shape_cast %96 : vector<128xf32> to vector<1x128xf32>
    %98 = arith.addf %95, %97 : vector<1x128xf32>
    %c0_60 = arith.constant 0 : index
    %c0_61 = arith.constant 0 : index
    %99 = vector.load %arg12[%c0_60, %c0_61] : memref<8x128xf32, #tpu.memory_space<vmem>>, vector<1x128xf32>
    tpu.vector_store %arg12[%c0_60, %c0_61], %98 {strides = array<i32>} : memref<8x128xf32, #tpu.memory_space<vmem>>, vector<1x128xf32>,
    %c1_62 = arith.constant 1 : index
    %c0_63 = arith.constant 0 : index
    %100 = vector.load %arg12[%c1_62, %c0_63] : memref<8x128xf32, #tpu.memory_space<vmem>>, vector<1x128xf32>
    %101 = arith.mulf %94, %94 : vector<288x128xf32>
    %cst_64 = arith.constant dense<0.000000e+00> : vector<128xf32>
    %102 = vector.multi_reduction <add>, %101, %cst_64 [0] : vector<288x128xf32> to vector<128xf32>
    %103 = vector.shape_cast %102 : vector<128xf32> to vector<1x128xf32>
    %104 = arith.addf %100, %103 : vector<1x128xf32>
    %c1_65 = arith.constant 1 : index
    %c0_66 = arith.constant 0 : index
    %105 = vector.load %arg12[%c1_65, %c0_66] : memref<8x128xf32, #tpu.memory_space<vmem>>, vector<1x128xf32>
    tpu.vector_store %arg12[%c1_65, %c0_66], %104 {strides = array<i32>} : memref<8x128xf32, #tpu.memory_space<vmem>>, vector<1x128xf32>,
    %cst_67 = arith.constant 0.000000e+00 : bf16
    %106 = vector.broadcast %cst_67 : bf16 to vector<19x128xbf16>
    %c0_68 = arith.constant 0 : index
    %c0_69 = arith.constant 0 : index
    %c0_70 = arith.constant 0 : index
    %107 = vector.load %arg11[%c0_68, %c0_69, %c0_70] : memref<1x342x128xbf16, #tpu.memory_space<vmem>>, vector<1x19x128xbf16>
    %108 = vector.shape_cast %107 : vector<1x19x128xbf16> to vector<19x128xbf16>
    %109 = vector.shape_cast %106 : vector<19x128xbf16> to vector<1x19x128xbf16>
    tpu.vector_store %arg11[%c0_68, %c0_69, %c0_70], %109 {strides = array<i32>} : memref<1x342x128xbf16, #tpu.memory_space<vmem>>, vector<1x19x128xbf16>,
    %c0_71 = arith.constant 0 : index
    %c19_72 = arith.constant 19 : index
    %c0_73 = arith.constant 0 : index
    %110 = vector.load %arg11[%c0_71, %c19_72, %c0_73] : memref<1x342x128xbf16, #tpu.memory_space<vmem>>, vector<1x288x128xbf16>
    %111 = vector.shape_cast %110 : vector<1x288x128xbf16> to vector<288x128xbf16>
    %112 = vector.shape_cast %93 : vector<288x128xbf16> to vector<1x288x128xbf16>
    tpu.vector_store %arg11[%c0_71, %c19_72, %c0_73], %112 {strides = array<i32>} : memref<1x342x128xbf16, #tpu.memory_space<vmem>>, vector<1x288x128xbf16>,
    %cst_74 = arith.constant 0.000000e+00 : bf16
    %113 = vector.broadcast %cst_74 : bf16 to vector<35x128xbf16>
    %c0_75 = arith.constant 0 : index
    %c307 = arith.constant 307 : index
    %c0_76 = arith.constant 0 : index
    %114 = vector.load %arg11[%c0_75, %c307, %c0_76] : memref<1x342x128xbf16, #tpu.memory_space<vmem>>, vector<1x35x128xbf16>
    %115 = vector.shape_cast %114 : vector<1x35x128xbf16> to vector<35x128xbf16>
    %116 = vector.shape_cast %113 : vector<35x128xbf16> to vector<1x35x128xbf16>
    tpu.vector_store %arg11[%c0_75, %c307, %c0_76], %116 {strides = array<i32>} : memref<1x342x128xbf16, #tpu.memory_space<vmem>>, vector<1x35x128xbf16>,
    return
  }
  func.func @transform_0(%arg0: i32) -> (i32, i32, i32) {
    %c0_i32 = arith.constant 0 : i32
    %c0_i32_0 = arith.constant 0 : i32
    %c0_i32_1 = arith.constant 0 : i32
    return %arg0, %c0_i32, %c0_i32_0 : i32, i32, i32
  }
  func.func @transform_1(%arg0: i32) -> (i32, i32) {
    %c0_i32 = arith.constant 0 : i32
    %c0_i32_0 = arith.constant 0 : i32
    %c0_i32_1 = arith.constant 0 : i32
    return %c0_i32, %c0_i32_0 : i32, i32
  }
  func.func @transform_2(%arg0: i32) -> (i32, i32) {
    %c0_i32 = arith.constant 0 : i32
    %c0_i32_0 = arith.constant 0 : i32
    %c0_i32_1 = arith.constant 0 : i32
    return %c0_i32, %c0_i32_0 : i32, i32
  }
  func.func @transform_3(%arg0: i32) -> (i32, i32) {
    %c0_i32 = arith.constant 0 : i32
    %c0_i32_0 = arith.constant 0 : i32
    %c0_i32_1 = arith.constant 0 : i32
    return %c0_i32, %c0_i32_0 : i32, i32
  }
  func.func @transform_4(%arg0: i32) -> (i32, i32, i32) {
    %c0_i32 = arith.constant 0 : i32
    %c0_i32_0 = arith.constant 0 : i32
    %c0_i32_1 = arith.constant 0 : i32
    return %arg0, %c0_i32, %c0_i32_0 : i32, i32, i32
  }
  func.func @transform_5(%arg0: i32) -> (i32, i32) {
    %c0_i32 = arith.constant 0 : i32
    %c0_i32_0 = arith.constant 0 : i32
    %c0_i32_1 = arith.constant 0 : i32
    return %c0_i32, %c0_i32_0 : i32, i32
  }
  func.func @transform_6(%arg0: i32) -> (i32, i32) {
    %c0_i32 = arith.constant 0 : i32
    %c0_i32_0 = arith.constant 0 : i32
    %c0_i32_1 = arith.constant 0 : i32
    return %c0_i32, %c0_i32_0 : i32, i32
  }
  func.func @transform_7(%arg0: i32) -> (i32, i32, i32) {
    %c0_i32 = arith.constant 0 : i32
    %c0_i32_0 = arith.constant 0 : i32
    %c0_i32_1 = arith.constant 0 : i32
    %c0_i32_2 = arith.constant 0 : i32
    return %c0_i32, %c0_i32_0, %c0_i32_1 : i32, i32, i32
  }
  func.func @transform_8(%arg0: i32) -> (i32, i32) {
    %c0_i32 = arith.constant 0 : i32
    %c0_i32_0 = arith.constant 0 : i32
    %c0_i32_1 = arith.constant 0 : i32
    return %c0_i32, %c0_i32_0 : i32, i32
  }
  func.func @transform_9(%arg0: i32) -> (i32, i32) {
    %c0_i32 = arith.constant 0 : i32
    %c0_i32_0 = arith.constant 0 : i32
    %c0_i32_1 = arith.constant 0 : i32
    return %c0_i32, %c0_i32_0 : i32, i32
  }
  func.func @transform_10(%arg0: i32) -> (i32, i32, i32) {
    %c0_i32 = arith.constant 0 : i32
    %c0_i32_0 = arith.constant 0 : i32
    %c0_i32_1 = arith.constant 0 : i32
    return %arg0, %c0_i32, %c0_i32_0 : i32, i32, i32
  }
  func.func @transform_11(%arg0: i32) -> (i32, i32) {
    %c0_i32 = arith.constant 0 : i32
    %c0_i32_0 = arith.constant 0 : i32
    %c0_i32_1 = arith.constant 0 : i32
    return %c0_i32, %c0_i32_0 : i32, i32
  }
}

module attributes {stable_mosaic.version = 11 : i64} {
  func.func @kernel(%arg0: i32, %arg1: memref<1x4x90x128xbf16, #tpu.memory_space<vmem>>, %arg2: memref<8x128xf32, #tpu.memory_space<vmem>>, %arg3: memref<1x128xf32, #tpu.memory_space<vmem>>, %arg4: memref<1x128xf32, #tpu.memory_space<vmem>>, %arg5: memref<16x128x128xbf16, #tpu.memory_space<vmem>>, %arg6: memref<1x128xf32, #tpu.memory_space<vmem>>, %arg7: memref<4x90x1xf32, #tpu.memory_space<vmem>>, %arg8: memref<1x72x128xf32, #tpu.memory_space<vmem>>) attributes {dimension_semantics = [#tpu.dimension_semantics<parallel>], iteration_bounds = array<i64: 2>, scalar_prefetch = 0 : i64, scratch_operands = 0 : i64, tpu.core_type = #tpu.core_type<tc>, window_params = [{transform_indices = @transform_0, window_bounds = array<i64: 1, 4, 90, 128>}, {pipeline_mode = #tpu.pipeline_mode<synchronous>, transform_indices = @transform_1, window_bounds = array<i64: 8, 128>}, {pipeline_mode = #tpu.pipeline_mode<synchronous>, transform_indices = @transform_2, window_bounds = array<i64: 1, 128>}, {pipeline_mode = #tpu.pipeline_mode<synchronous>, transform_indices = @transform_3, window_bounds = array<i64: 1, 128>}, {pipeline_mode = #tpu.pipeline_mode<synchronous>, transform_indices = @transform_4, window_bounds = array<i64: 16, 128, 128>}, {pipeline_mode = #tpu.pipeline_mode<synchronous>, transform_indices = @transform_5, window_bounds = array<i64: 1, 128>}, {pipeline_mode = #tpu.pipeline_mode<synchronous>, transform_indices = @transform_6, window_bounds = array<i64: 4, 90, 1>}, {transform_indices = @transform_7, window_bounds = array<i64: 1, 72, 128>}]} {
    %c0 = arith.constant 0 : index
    %c0_0 = arith.constant 0 : index
    %0 = vector.load %arg2[%c0, %c0_0] : memref<8x128xf32, #tpu.memory_space<vmem>>, vector<1x128xf32>
    %cst = arith.constant 0.001953125 : f32
    %1 = vector.broadcast %cst : f32 to vector<1x128xf32>
    %2 = arith.mulf %0, %1 : vector<1x128xf32>
    %c1 = arith.constant 1 : index
    %c0_1 = arith.constant 0 : index
    %3 = vector.load %arg2[%c1, %c0_1] : memref<8x128xf32, #tpu.memory_space<vmem>>, vector<1x128xf32>
    %cst_2 = arith.constant 0.001953125 : f32
    %4 = vector.broadcast %cst_2 : f32 to vector<1x128xf32>
    %5 = arith.mulf %3, %4 : vector<1x128xf32>
    %6 = arith.mulf %2, %2 : vector<1x128xf32>
    %7 = arith.subf %5, %6 : vector<1x128xf32>
    %c0_3 = arith.constant 0 : index
    %c0_4 = arith.constant 0 : index
    %8 = vector.load %arg3[%c0_3, %c0_4] : memref<1x128xf32, #tpu.memory_space<vmem>>, vector<1x128xf32>
    %cst_5 = arith.constant 9.99999974E-6 : f32
    %9 = vector.broadcast %cst_5 : f32 to vector<1x128xf32>
    %10 = arith.addf %7, %9 : vector<1x128xf32>
    %11 = math.rsqrt %10 : vector<1x128xf32>
    %12 = arith.mulf %8, %11 : vector<1x128xf32>
    %c0_6 = arith.constant 0 : index
    %c0_7 = arith.constant 0 : index
    %13 = vector.load %arg4[%c0_6, %c0_7] : memref<1x128xf32, #tpu.memory_space<vmem>>, vector<1x128xf32>
    %14 = arith.mulf %2, %12 : vector<1x128xf32>
    %15 = arith.subf %13, %14 : vector<1x128xf32>
    %c0_8 = arith.constant 0 : index
    %c0_9 = arith.constant 0 : index
    %c0_10 = arith.constant 0 : index
    %c0_11 = arith.constant 0 : index
    %16 = vector.load %arg1[%c0_8, %c0_9, %c0_10, %c0_11] : memref<1x4x90x128xbf16, #tpu.memory_space<vmem>>, vector<1x1x90x128xbf16>
    %17 = vector.shape_cast %16 : vector<1x1x90x128xbf16> to vector<90x128xbf16>
    %18 = arith.extf %17 : vector<90x128xbf16> to vector<90x128xf32>
    %19 = vector.broadcast %12 : vector<1x128xf32> to vector<90x128xf32>
    %20 = arith.mulf %18, %19 : vector<90x128xf32>
    %21 = vector.broadcast %15 : vector<1x128xf32> to vector<90x128xf32>
    %22 = arith.addf %20, %21 : vector<90x128xf32>
    %c0_12 = arith.constant 0 : index
    %c0_13 = arith.constant 0 : index
    %c0_14 = arith.constant 0 : index
    %23 = vector.load %arg7[%c0_12, %c0_13, %c0_14] : memref<4x90x1xf32, #tpu.memory_space<vmem>>, vector<1x90x1xf32>
    %24 = vector.shape_cast %23 : vector<1x90x1xf32> to vector<90x1xf32>
    %25 = vector.broadcast %24 : vector<90x1xf32> to vector<90x128xf32>
    %26 = arith.mulf %22, %25 : vector<90x128xf32>
    %27 = arith.truncf %26 : vector<90x128xf32> to vector<90x128xbf16>
    %c0_15 = arith.constant 0 : index
    %c1_16 = arith.constant 1 : index
    %c0_17 = arith.constant 0 : index
    %c0_18 = arith.constant 0 : index
    %28 = vector.load %arg1[%c0_15, %c1_16, %c0_17, %c0_18] : memref<1x4x90x128xbf16, #tpu.memory_space<vmem>>, vector<1x1x90x128xbf16>
    %29 = vector.shape_cast %28 : vector<1x1x90x128xbf16> to vector<90x128xbf16>
    %30 = arith.extf %29 : vector<90x128xbf16> to vector<90x128xf32>
    %31 = vector.broadcast %12 : vector<1x128xf32> to vector<90x128xf32>
    %32 = arith.mulf %30, %31 : vector<90x128xf32>
    %33 = vector.broadcast %15 : vector<1x128xf32> to vector<90x128xf32>
    %34 = arith.addf %32, %33 : vector<90x128xf32>
    %c1_19 = arith.constant 1 : index
    %c0_20 = arith.constant 0 : index
    %c0_21 = arith.constant 0 : index
    %35 = vector.load %arg7[%c1_19, %c0_20, %c0_21] : memref<4x90x1xf32, #tpu.memory_space<vmem>>, vector<1x90x1xf32>
    %36 = vector.shape_cast %35 : vector<1x90x1xf32> to vector<90x1xf32>
    %37 = vector.broadcast %36 : vector<90x1xf32> to vector<90x128xf32>
    %38 = arith.mulf %34, %37 : vector<90x128xf32>
    %39 = arith.truncf %38 : vector<90x128xf32> to vector<90x128xbf16>
    %c0_22 = arith.constant 0 : index
    %c2 = arith.constant 2 : index
    %c0_23 = arith.constant 0 : index
    %c0_24 = arith.constant 0 : index
    %40 = vector.load %arg1[%c0_22, %c2, %c0_23, %c0_24] : memref<1x4x90x128xbf16, #tpu.memory_space<vmem>>, vector<1x1x90x128xbf16>
    %41 = vector.shape_cast %40 : vector<1x1x90x128xbf16> to vector<90x128xbf16>
    %42 = arith.extf %41 : vector<90x128xbf16> to vector<90x128xf32>
    %43 = vector.broadcast %12 : vector<1x128xf32> to vector<90x128xf32>
    %44 = arith.mulf %42, %43 : vector<90x128xf32>
    %45 = vector.broadcast %15 : vector<1x128xf32> to vector<90x128xf32>
    %46 = arith.addf %44, %45 : vector<90x128xf32>
    %c2_25 = arith.constant 2 : index
    %c0_26 = arith.constant 0 : index
    %c0_27 = arith.constant 0 : index
    %47 = vector.load %arg7[%c2_25, %c0_26, %c0_27] : memref<4x90x1xf32, #tpu.memory_space<vmem>>, vector<1x90x1xf32>
    %48 = vector.shape_cast %47 : vector<1x90x1xf32> to vector<90x1xf32>
    %49 = vector.broadcast %48 : vector<90x1xf32> to vector<90x128xf32>
    %50 = arith.mulf %46, %49 : vector<90x128xf32>
    %51 = arith.truncf %50 : vector<90x128xf32> to vector<90x128xbf16>
    %c0_28 = arith.constant 0 : index
    %c3 = arith.constant 3 : index
    %c0_29 = arith.constant 0 : index
    %c0_30 = arith.constant 0 : index
    %52 = vector.load %arg1[%c0_28, %c3, %c0_29, %c0_30] : memref<1x4x90x128xbf16, #tpu.memory_space<vmem>>, vector<1x1x90x128xbf16>
    %53 = vector.shape_cast %52 : vector<1x1x90x128xbf16> to vector<90x128xbf16>
    %54 = arith.extf %53 : vector<90x128xbf16> to vector<90x128xf32>
    %55 = vector.broadcast %12 : vector<1x128xf32> to vector<90x128xf32>
    %56 = arith.mulf %54, %55 : vector<90x128xf32>
    %57 = vector.broadcast %15 : vector<1x128xf32> to vector<90x128xf32>
    %58 = arith.addf %56, %57 : vector<90x128xf32>
    %c3_31 = arith.constant 3 : index
    %c0_32 = arith.constant 0 : index
    %c0_33 = arith.constant 0 : index
    %59 = vector.load %arg7[%c3_31, %c0_32, %c0_33] : memref<4x90x1xf32, #tpu.memory_space<vmem>>, vector<1x90x1xf32>
    %60 = vector.shape_cast %59 : vector<1x90x1xf32> to vector<90x1xf32>
    %61 = vector.broadcast %60 : vector<90x1xf32> to vector<90x128xf32>
    %62 = arith.mulf %58, %61 : vector<90x128xf32>
    %63 = arith.truncf %62 : vector<90x128xf32> to vector<90x128xbf16>
    %cst_34 = arith.constant 0.000000e+00 : f32
    %64 = vector.broadcast %cst_34 : f32 to vector<72x128xf32>
    %65 = vector.extract_strided_slice %27 {offsets = [0, 0], sizes = [72, 128], strides = [1, 1]} : vector<90x128xbf16> to vector<72x128xbf16>
    %c0_35 = arith.constant 0 : index
    %c0_36 = arith.constant 0 : index
    %c0_37 = arith.constant 0 : index
    %66 = vector.load %arg5[%c0_35, %c0_36, %c0_37] : memref<16x128x128xbf16, #tpu.memory_space<vmem>>, vector<1x128x128xbf16>
    %67 = vector.shape_cast %66 : vector<1x128x128xbf16> to vector<128x128xbf16>
    %cst_38 = arith.constant dense<0.000000e+00> : vector<72x128xf32>
    %68 = tpu.matmul %65, %67, %cst_38 {dimension_numbers = #tpu.dot_dimension_numbers<[1], [0], [0], [1], [0, 0, 1, 1], [], []>} : vector<72x128xbf16>, vector<128x128xbf16>, vector<72x128xf32> -> vector<72x128xf32>
    %69 = arith.addf %64, %68 : vector<72x128xf32>
    %70 = vector.extract_strided_slice %39 {offsets = [0, 0], sizes = [72, 128], strides = [1, 1]} : vector<90x128xbf16> to vector<72x128xbf16>
    %c1_39 = arith.constant 1 : index
    %c0_40 = arith.constant 0 : index
    %c0_41 = arith.constant 0 : index
    %71 = vector.load %arg5[%c1_39, %c0_40, %c0_41] : memref<16x128x128xbf16, #tpu.memory_space<vmem>>, vector<1x128x128xbf16>
    %72 = vector.shape_cast %71 : vector<1x128x128xbf16> to vector<128x128xbf16>
    %cst_42 = arith.constant dense<0.000000e+00> : vector<72x128xf32>
    %73 = tpu.matmul %70, %72, %cst_42 {dimension_numbers = #tpu.dot_dimension_numbers<[1], [0], [0], [1], [0, 0, 1, 1], [], []>} : vector<72x128xbf16>, vector<128x128xbf16>, vector<72x128xf32> -> vector<72x128xf32>
    %74 = arith.addf %69, %73 : vector<72x128xf32>
    %75 = vector.extract_strided_slice %27 {offsets = [1, 0], sizes = [72, 128], strides = [1, 1]} : vector<90x128xbf16> to vector<72x128xbf16>
    %c2_43 = arith.constant 2 : index
    %c0_44 = arith.constant 0 : index
    %c0_45 = arith.constant 0 : index
    %76 = vector.load %arg5[%c2_43, %c0_44, %c0_45] : memref<16x128x128xbf16, #tpu.memory_space<vmem>>, vector<1x128x128xbf16>
    %77 = vector.shape_cast %76 : vector<1x128x128xbf16> to vector<128x128xbf16>
    %cst_46 = arith.constant dense<0.000000e+00> : vector<72x128xf32>
    %78 = tpu.matmul %75, %77, %cst_46 {dimension_numbers = #tpu.dot_dimension_numbers<[1], [0], [0], [1], [0, 0, 1, 1], [], []>} : vector<72x128xbf16>, vector<128x128xbf16>, vector<72x128xf32> -> vector<72x128xf32>
    %79 = arith.addf %74, %78 : vector<72x128xf32>
    %80 = vector.extract_strided_slice %39 {offsets = [1, 0], sizes = [72, 128], strides = [1, 1]} : vector<90x128xbf16> to vector<72x128xbf16>
    %c3_47 = arith.constant 3 : index
    %c0_48 = arith.constant 0 : index
    %c0_49 = arith.constant 0 : index
    %81 = vector.load %arg5[%c3_47, %c0_48, %c0_49] : memref<16x128x128xbf16, #tpu.memory_space<vmem>>, vector<1x128x128xbf16>
    %82 = vector.shape_cast %81 : vector<1x128x128xbf16> to vector<128x128xbf16>
    %cst_50 = arith.constant dense<0.000000e+00> : vector<72x128xf32>
    %83 = tpu.matmul %80, %82, %cst_50 {dimension_numbers = #tpu.dot_dimension_numbers<[1], [0], [0], [1], [0, 0, 1, 1], [], []>} : vector<72x128xbf16>, vector<128x128xbf16>, vector<72x128xf32> -> vector<72x128xf32>
    %84 = arith.addf %79, %83 : vector<72x128xf32>
    %85 = vector.extract_strided_slice %51 {offsets = [0, 0], sizes = [72, 128], strides = [1, 1]} : vector<90x128xbf16> to vector<72x128xbf16>
    %c4 = arith.constant 4 : index
    %c0_51 = arith.constant 0 : index
    %c0_52 = arith.constant 0 : index
    %86 = vector.load %arg5[%c4, %c0_51, %c0_52] : memref<16x128x128xbf16, #tpu.memory_space<vmem>>, vector<1x128x128xbf16>
    %87 = vector.shape_cast %86 : vector<1x128x128xbf16> to vector<128x128xbf16>
    %cst_53 = arith.constant dense<0.000000e+00> : vector<72x128xf32>
    %88 = tpu.matmul %85, %87, %cst_53 {dimension_numbers = #tpu.dot_dimension_numbers<[1], [0], [0], [1], [0, 0, 1, 1], [], []>} : vector<72x128xbf16>, vector<128x128xbf16>, vector<72x128xf32> -> vector<72x128xf32>
    %89 = arith.addf %84, %88 : vector<72x128xf32>
    %90 = vector.extract_strided_slice %63 {offsets = [0, 0], sizes = [72, 128], strides = [1, 1]} : vector<90x128xbf16> to vector<72x128xbf16>
    %c5 = arith.constant 5 : index
    %c0_54 = arith.constant 0 : index
    %c0_55 = arith.constant 0 : index
    %91 = vector.load %arg5[%c5, %c0_54, %c0_55] : memref<16x128x128xbf16, #tpu.memory_space<vmem>>, vector<1x128x128xbf16>
    %92 = vector.shape_cast %91 : vector<1x128x128xbf16> to vector<128x128xbf16>
    %cst_56 = arith.constant dense<0.000000e+00> : vector<72x128xf32>
    %93 = tpu.matmul %90, %92, %cst_56 {dimension_numbers = #tpu.dot_dimension_numbers<[1], [0], [0], [1], [0, 0, 1, 1], [], []>} : vector<72x128xbf16>, vector<128x128xbf16>, vector<72x128xf32> -> vector<72x128xf32>
    %94 = arith.addf %89, %93 : vector<72x128xf32>
    %95 = vector.extract_strided_slice %51 {offsets = [1, 0], sizes = [72, 128], strides = [1, 1]} : vector<90x128xbf16> to vector<72x128xbf16>
    %c6 = arith.constant 6 : index
    %c0_57 = arith.constant 0 : index
    %c0_58 = arith.constant 0 : index
    %96 = vector.load %arg5[%c6, %c0_57, %c0_58] : memref<16x128x128xbf16, #tpu.memory_space<vmem>>, vector<1x128x128xbf16>
    %97 = vector.shape_cast %96 : vector<1x128x128xbf16> to vector<128x128xbf16>
    %cst_59 = arith.constant dense<0.000000e+00> : vector<72x128xf32>
    %98 = tpu.matmul %95, %97, %cst_59 {dimension_numbers = #tpu.dot_dimension_numbers<[1], [0], [0], [1], [0, 0, 1, 1], [], []>} : vector<72x128xbf16>, vector<128x128xbf16>, vector<72x128xf32> -> vector<72x128xf32>
    %99 = arith.addf %94, %98 : vector<72x128xf32>
    %100 = vector.extract_strided_slice %63 {offsets = [1, 0], sizes = [72, 128], strides = [1, 1]} : vector<90x128xbf16> to vector<72x128xbf16>
    %c7 = arith.constant 7 : index
    %c0_60 = arith.constant 0 : index
    %c0_61 = arith.constant 0 : index
    %101 = vector.load %arg5[%c7, %c0_60, %c0_61] : memref<16x128x128xbf16, #tpu.memory_space<vmem>>, vector<1x128x128xbf16>
    %102 = vector.shape_cast %101 : vector<1x128x128xbf16> to vector<128x128xbf16>
    %cst_62 = arith.constant dense<0.000000e+00> : vector<72x128xf32>
    %103 = tpu.matmul %100, %102, %cst_62 {dimension_numbers = #tpu.dot_dimension_numbers<[1], [0], [0], [1], [0, 0, 1, 1], [], []>} : vector<72x128xbf16>, vector<128x128xbf16>, vector<72x128xf32> -> vector<72x128xf32>
    %104 = arith.addf %99, %103 : vector<72x128xf32>
    %105 = vector.extract_strided_slice %27 {offsets = [9, 0], sizes = [72, 128], strides = [1, 1]} : vector<90x128xbf16> to vector<72x128xbf16>
    %c8 = arith.constant 8 : index
    %c0_63 = arith.constant 0 : index
    %c0_64 = arith.constant 0 : index
    %106 = vector.load %arg5[%c8, %c0_63, %c0_64] : memref<16x128x128xbf16, #tpu.memory_space<vmem>>, vector<1x128x128xbf16>
    %107 = vector.shape_cast %106 : vector<1x128x128xbf16> to vector<128x128xbf16>
    %cst_65 = arith.constant dense<0.000000e+00> : vector<72x128xf32>
    %108 = tpu.matmul %105, %107, %cst_65 {dimension_numbers = #tpu.dot_dimension_numbers<[1], [0], [0], [1], [0, 0, 1, 1], [], []>} : vector<72x128xbf16>, vector<128x128xbf16>, vector<72x128xf32> -> vector<72x128xf32>
    %109 = arith.addf %104, %108 : vector<72x128xf32>
    %110 = vector.extract_strided_slice %39 {offsets = [9, 0], sizes = [72, 128], strides = [1, 1]} : vector<90x128xbf16> to vector<72x128xbf16>
    %c9 = arith.constant 9 : index
    %c0_66 = arith.constant 0 : index
    %c0_67 = arith.constant 0 : index
    %111 = vector.load %arg5[%c9, %c0_66, %c0_67] : memref<16x128x128xbf16, #tpu.memory_space<vmem>>, vector<1x128x128xbf16>
    %112 = vector.shape_cast %111 : vector<1x128x128xbf16> to vector<128x128xbf16>
    %cst_68 = arith.constant dense<0.000000e+00> : vector<72x128xf32>
    %113 = tpu.matmul %110, %112, %cst_68 {dimension_numbers = #tpu.dot_dimension_numbers<[1], [0], [0], [1], [0, 0, 1, 1], [], []>} : vector<72x128xbf16>, vector<128x128xbf16>, vector<72x128xf32> -> vector<72x128xf32>
    %114 = arith.addf %109, %113 : vector<72x128xf32>
    %115 = vector.extract_strided_slice %27 {offsets = [10, 0], sizes = [72, 128], strides = [1, 1]} : vector<90x128xbf16> to vector<72x128xbf16>
    %c10 = arith.constant 10 : index
    %c0_69 = arith.constant 0 : index
    %c0_70 = arith.constant 0 : index
    %116 = vector.load %arg5[%c10, %c0_69, %c0_70] : memref<16x128x128xbf16, #tpu.memory_space<vmem>>, vector<1x128x128xbf16>
    %117 = vector.shape_cast %116 : vector<1x128x128xbf16> to vector<128x128xbf16>
    %cst_71 = arith.constant dense<0.000000e+00> : vector<72x128xf32>
    %118 = tpu.matmul %115, %117, %cst_71 {dimension_numbers = #tpu.dot_dimension_numbers<[1], [0], [0], [1], [0, 0, 1, 1], [], []>} : vector<72x128xbf16>, vector<128x128xbf16>, vector<72x128xf32> -> vector<72x128xf32>
    %119 = arith.addf %114, %118 : vector<72x128xf32>
    %120 = vector.extract_strided_slice %39 {offsets = [10, 0], sizes = [72, 128], strides = [1, 1]} : vector<90x128xbf16> to vector<72x128xbf16>
    %c11 = arith.constant 11 : index
    %c0_72 = arith.constant 0 : index
    %c0_73 = arith.constant 0 : index
    %121 = vector.load %arg5[%c11, %c0_72, %c0_73] : memref<16x128x128xbf16, #tpu.memory_space<vmem>>, vector<1x128x128xbf16>
    %122 = vector.shape_cast %121 : vector<1x128x128xbf16> to vector<128x128xbf16>
    %cst_74 = arith.constant dense<0.000000e+00> : vector<72x128xf32>
    %123 = tpu.matmul %120, %122, %cst_74 {dimension_numbers = #tpu.dot_dimension_numbers<[1], [0], [0], [1], [0, 0, 1, 1], [], []>} : vector<72x128xbf16>, vector<128x128xbf16>, vector<72x128xf32> -> vector<72x128xf32>
    %124 = arith.addf %119, %123 : vector<72x128xf32>
    %125 = vector.extract_strided_slice %51 {offsets = [9, 0], sizes = [72, 128], strides = [1, 1]} : vector<90x128xbf16> to vector<72x128xbf16>
    %c12 = arith.constant 12 : index
    %c0_75 = arith.constant 0 : index
    %c0_76 = arith.constant 0 : index
    %126 = vector.load %arg5[%c12, %c0_75, %c0_76] : memref<16x128x128xbf16, #tpu.memory_space<vmem>>, vector<1x128x128xbf16>
    %127 = vector.shape_cast %126 : vector<1x128x128xbf16> to vector<128x128xbf16>
    %cst_77 = arith.constant dense<0.000000e+00> : vector<72x128xf32>
    %128 = tpu.matmul %125, %127, %cst_77 {dimension_numbers = #tpu.dot_dimension_numbers<[1], [0], [0], [1], [0, 0, 1, 1], [], []>} : vector<72x128xbf16>, vector<128x128xbf16>, vector<72x128xf32> -> vector<72x128xf32>
    %129 = arith.addf %124, %128 : vector<72x128xf32>
    %130 = vector.extract_strided_slice %63 {offsets = [9, 0], sizes = [72, 128], strides = [1, 1]} : vector<90x128xbf16> to vector<72x128xbf16>
    %c13 = arith.constant 13 : index
    %c0_78 = arith.constant 0 : index
    %c0_79 = arith.constant 0 : index
    %131 = vector.load %arg5[%c13, %c0_78, %c0_79] : memref<16x128x128xbf16, #tpu.memory_space<vmem>>, vector<1x128x128xbf16>
    %132 = vector.shape_cast %131 : vector<1x128x128xbf16> to vector<128x128xbf16>
    %cst_80 = arith.constant dense<0.000000e+00> : vector<72x128xf32>
    %133 = tpu.matmul %130, %132, %cst_80 {dimension_numbers = #tpu.dot_dimension_numbers<[1], [0], [0], [1], [0, 0, 1, 1], [], []>} : vector<72x128xbf16>, vector<128x128xbf16>, vector<72x128xf32> -> vector<72x128xf32>
    %134 = arith.addf %129, %133 : vector<72x128xf32>
    %135 = vector.extract_strided_slice %51 {offsets = [10, 0], sizes = [72, 128], strides = [1, 1]} : vector<90x128xbf16> to vector<72x128xbf16>
    %c14 = arith.constant 14 : index
    %c0_81 = arith.constant 0 : index
    %c0_82 = arith.constant 0 : index
    %136 = vector.load %arg5[%c14, %c0_81, %c0_82] : memref<16x128x128xbf16, #tpu.memory_space<vmem>>, vector<1x128x128xbf16>
    %137 = vector.shape_cast %136 : vector<1x128x128xbf16> to vector<128x128xbf16>
    %cst_83 = arith.constant dense<0.000000e+00> : vector<72x128xf32>
    %138 = tpu.matmul %135, %137, %cst_83 {dimension_numbers = #tpu.dot_dimension_numbers<[1], [0], [0], [1], [0, 0, 1, 1], [], []>} : vector<72x128xbf16>, vector<128x128xbf16>, vector<72x128xf32> -> vector<72x128xf32>
    %139 = arith.addf %134, %138 : vector<72x128xf32>
    %140 = vector.extract_strided_slice %63 {offsets = [10, 0], sizes = [72, 128], strides = [1, 1]} : vector<90x128xbf16> to vector<72x128xbf16>
    %c15 = arith.constant 15 : index
    %c0_84 = arith.constant 0 : index
    %c0_85 = arith.constant 0 : index
    %141 = vector.load %arg5[%c15, %c0_84, %c0_85] : memref<16x128x128xbf16, #tpu.memory_space<vmem>>, vector<1x128x128xbf16>
    %142 = vector.shape_cast %141 : vector<1x128x128xbf16> to vector<128x128xbf16>
    %cst_86 = arith.constant dense<0.000000e+00> : vector<72x128xf32>
    %143 = tpu.matmul %140, %142, %cst_86 {dimension_numbers = #tpu.dot_dimension_numbers<[1], [0], [0], [1], [0, 0, 1, 1], [], []>} : vector<72x128xbf16>, vector<128x128xbf16>, vector<72x128xf32> -> vector<72x128xf32>
    %144 = arith.addf %139, %143 : vector<72x128xf32>
    %c0_87 = arith.constant 0 : index
    %c0_88 = arith.constant 0 : index
    %145 = vector.load %arg6[%c0_87, %c0_88] : memref<1x128xf32, #tpu.memory_space<vmem>>, vector<1x128xf32>
    %146 = vector.broadcast %145 : vector<1x128xf32> to vector<72x128xf32>
    %147 = arith.addf %144, %146 : vector<72x128xf32>
    %c0_89 = arith.constant 0 : index
    %c0_90 = arith.constant 0 : index
    %c0_91 = arith.constant 0 : index
    %148 = vector.load %arg8[%c0_89, %c0_90, %c0_91] : memref<1x72x128xf32, #tpu.memory_space<vmem>>, vector<1x72x128xf32>
    %149 = vector.shape_cast %148 : vector<1x72x128xf32> to vector<72x128xf32>
    %150 = vector.shape_cast %147 : vector<72x128xf32> to vector<1x72x128xf32>
    tpu.vector_store %arg8[%c0_89, %c0_90, %c0_91], %150 {strides = array<i32>} : memref<1x72x128xf32, #tpu.memory_space<vmem>>, vector<1x72x128xf32>,
    return
  }
  func.func @transform_0(%arg0: i32) -> (i32, i32, i32, i32) {
    %c0_i32 = arith.constant 0 : i32
    %c0_i32_0 = arith.constant 0 : i32
    %c0_i32_1 = arith.constant 0 : i32
    %c0_i32_2 = arith.constant 0 : i32
    return %arg0, %c0_i32, %c0_i32_0, %c0_i32_1 : i32, i32, i32, i32
  }
  func.func @transform_1(%arg0: i32) -> (i32, i32) {
    %c0_i32 = arith.constant 0 : i32
    %c0_i32_0 = arith.constant 0 : i32
    %c0_i32_1 = arith.constant 0 : i32
    return %c0_i32, %c0_i32_0 : i32, i32
  }
  func.func @transform_2(%arg0: i32) -> (i32, i32) {
    %c0_i32 = arith.constant 0 : i32
    %c0_i32_0 = arith.constant 0 : i32
    %c0_i32_1 = arith.constant 0 : i32
    return %c0_i32, %c0_i32_0 : i32, i32
  }
  func.func @transform_3(%arg0: i32) -> (i32, i32) {
    %c0_i32 = arith.constant 0 : i32
    %c0_i32_0 = arith.constant 0 : i32
    %c0_i32_1 = arith.constant 0 : i32
    return %c0_i32, %c0_i32_0 : i32, i32
  }
  func.func @transform_4(%arg0: i32) -> (i32, i32, i32) {
    %c0_i32 = arith.constant 0 : i32
    %c0_i32_0 = arith.constant 0 : i32
    %c0_i32_1 = arith.constant 0 : i32
    %c0_i32_2 = arith.constant 0 : i32
    return %c0_i32, %c0_i32_0, %c0_i32_1 : i32, i32, i32
  }
  func.func @transform_5(%arg0: i32) -> (i32, i32) {
    %c0_i32 = arith.constant 0 : i32
    %c0_i32_0 = arith.constant 0 : i32
    %c0_i32_1 = arith.constant 0 : i32
    return %c0_i32, %c0_i32_0 : i32, i32
  }
  func.func @transform_6(%arg0: i32) -> (i32, i32, i32) {
    %c0_i32 = arith.constant 0 : i32
    %c0_i32_0 = arith.constant 0 : i32
    %c0_i32_1 = arith.constant 0 : i32
    %c0_i32_2 = arith.constant 0 : i32
    return %c0_i32, %c0_i32_0, %c0_i32_1 : i32, i32, i32
  }
  func.func @transform_7(%arg0: i32) -> (i32, i32, i32) {
    %c0_i32 = arith.constant 0 : i32
    %c0_i32_0 = arith.constant 0 : i32
    %c0_i32_1 = arith.constant 0 : i32
    return %arg0, %c0_i32, %c0_i32_0 : i32, i32, i32
  }
}

</mosaic_0001>

<bundles_post_ra>
// kernel: block_forward.3
= control target key start
LH: loop header
LB: loop body
LE: loop exit
PB: predicated region body
PF: predicated region fallthrough
CT: control target
= control target key end

     0   :  { %s6612_s18 = smov 0   ;;  %s8051_s0 = inlined_call_operand.vmem [shape: bf16[2,342,128], index: 0, kind: input, shape index: {}]   ;;  %s8052_s1 = inlined_call_operand.vmem [shape: bf16[9,128,128], index: 1, kind: input, shape index: {}]   ;;  %s8053_s2 = inlined_call_operand.vmem [shape: f32[1,128], index: 2, kind: input, shape index: {}]   ;;  %s8054_s3 = inlined_call_operand.vmem [shape: f32[342,1], index: 3, kind: input, shape index: {}]   ;;  %s8055_s4 = inlined_call_operand.vmem [shape: bf16[2,342,128], index: 4, kind: output, shape index: {0}]   ;;  %s8056_s5 = inlined_call_operand.vmem [shape: f32[8,128], index: 5, kind: output, shape index: {1}]  }
   0x1 LB: > { %s5026_s19 = sadd.s32 4294967295, %s6578_s18   ;;  %p5030_p0 = scmp.ge.s32.totalorder %s6578_s18, 1  ;;  %s6578_s18 = sphi %s6612_s18, %s16_s18  }
   0x2   : > { %p185_p1 = scmp.lt.s32.totalorder %s6578_s18, 3 }
   0x4   : > { %p186_p2 = pnand %p5030_p0, %p185_p1 }
   0x6   : > { %189 = sbr.rel (%p186_p2) target bundleno = 692 (0x2b4), region = 36 }
   0xd   : > { %p213_p3 = scmp.lt.s32.totalorder %s5026_s19, 1  ;;  %p5033_p4 = scmp.ne.s32.totalorder %s5026_s19, 0 }
   0xe   : > { %v6580_v0 = vmov (!%p5033_p4), 0.0  }
   0xf   : > { %s214_s20 = scalar_select %p213_p3, %s5026_s19, 1 }
  0x10   : > { %227 = sbr.rel (%p5033_p4) target bundleno = 23 (0x17), region = 40  ;;  %228 = vst [vmem:[%s8056_s5] sm:$0xff] (!%p5033_p4), %v6580_v0 }
  0x11   : > { %s6377_s21 = smul.u32 172, %s214_s20 }
  0x13   : > { %s6623_s24 = scalar_lea.vmem %s8051_s0, %s6377_s21  ;;  %s6628_s27 = scalar_lea.vmem %s8055_s4, %s6377_s21 }
  0x17 PF: > { %v6390_v1 = vld [vmem:[%s8052_s1 + $0x40] sm:$0xff]   ;;  %v6392_v3 = vld [vmem:[%s8052_s1 + $0x48] sm:$0xff]   ;;  %v6394_v5 = vld [vmem:[%s8052_s1 + $0x50] sm:$0xff]   ;;  %vm392_vm0 = vsmask.f32 7424  ;;  %vm2320_vm2 = vcmask 1045504  }
  0x18   : > { %v6391_v2 = vld [vmem:[%s8052_s1 + $0x100] sm:$0xff]   ;;  %5605 = vmatprep.subr.bf16.mxu1 %v6390_v1  ;;  %v6393_v4 = vld [vmem:[%s8052_s1 + $0x108] sm:$0xff]   ;;  %v6395_v6 = vld [vmem:[%s8052_s1 + $0x110] sm:$0xff]   ;;  %vm1849_vm1 = vsmask.f32 6400  ;;  %vm1048_vm3 = vcmask 1046528  }
  0x19   : > { %5813 = vmatprep.subr.bf16.mxu0 %v6391_v2  ;;  %5606 = vmatpush3.bf16.msra.mxu1 %v6390_v1  ;;  %v6396_v7 = vld [vmem:[%s8052_s1 + $0x58] sm:$0xff]   ;;  %v6398_v9 = vld [vmem:[%s8052_s1 + $0x60] sm:$0xff]   ;;  %v6400_v11 = vld [vmem:[%s8052_s1 + $0x68] sm:$0xff]   ;;  %vm3121_vm4 = vsmask.f32 5376  ;;  %vm3592_vm5 = vcmask 1044480  }
  0x1a   : > { %5814 = vmatpush3.bf16.msra.mxu0 %v6391_v2  ;;  %5607 = vmatprep.subr.bf16.mxu1 %v6392_v3  ;;  %v6397_v8 = vld [vmem:[%s8052_s1 + $0x118] sm:$0xff]   ;;  %v6399_v10 = vld [vmem:[%s8052_s1 + $0x120] sm:$0xff]   ;;  %v6401_v12 = vld [vmem:[%s8052_s1 + $0x128] sm:$0xff]   ;;  %vm4420_vm6 = vcmask 1041408   ;;  %vm4421_vm7 = vsmask.f32 1280 }
  0x1b   : > { %5815 = vmatprep.subr.bf16.mxu0 %v6393_v4  ;;  %v229_v13 = vld [vmem:[%s6623_s24] sm:$0xf]  ;;  %v230_v14 = vld [vmem:[%s6623_s24 + $0x4] sm:$0xf]  ;;  %v6674_v16 = vld [vmem:[%s6623_s24 + $0x8] sm:$0xff]   ;;  %vm4914_vm9 = vcmask 1043457  }
  0x1c   : > { %v6671_v15 = vcombine.low %v229_v13, %v230_v14  ;;  %v6677_v17 = vld [vmem:[%s6623_s24 + $0x10] sm:$0xff]   ;;  %v1365_v19 = vld [vmem:[%s6623_s24 + $0x8] sm:$0xe]  ;;  %v6684_v20 = vld [vmem:[%s6623_s24 + $0xc] sm:$0xf]  ;;  %v401_v24 = vshll.u32 %v6674_v16, 16 }
  0x1d   : > { %5608 = vmatpush3.bf16.msra.mxu1 %v6392_v3  ;;  %v6402_v18 = vld [vmem:[%s8052_s1 + $0x70] sm:$0xff]   ;;  %v6693_v25 = vcombine.low %v1365_v19, %v6684_v20  ;;  %v1859_v27 = vshrl.u32 %v6677_v17, 16  ;;  %v1862_v28 = vshll.u32 %v6677_v17, 16  ;;  %v6404_v33 = vld [vmem:[%s8052_s1 + $0x78] sm:$0xff]   ;;  %v405_v41 = vshrl.u32 %v6674_v16, 16  ;;  %v6411_v49 = vld [vmem:[%s8052_s1] sm:$0xff]  }
  0x1e   : > { %5816 = vmatpush3.bf16.msra.mxu0 %v6393_v4  ;;  %5609 = vmatprep.subr.bf16.mxu1 %v6394_v5  ;;  %v6403_v21 = vld [vmem:[%s8052_s1 + $0x130] sm:$0xff]   ;;  %v394_v22 = vshrl.u32 %v6671_v15, 16  ;;  %v396_v23 = vshll.u32 %v6671_v15, 16  ;;  %v403_v30 = vrot.slane %v401_v24, 1  ;;  %v6405_v37 = vld [vmem:[%s8052_s1 + $0x138] sm:$0xff]   ;;  %v6413_v55 = vld [vmem:[%s8052_s1 + $0x140] sm:$0xff]  }
  0x1f   : > { %5817 = vmatprep.subr.bf16.mxu0 %v6395_v6  ;;  %v6696_v26 = vld [vmem:[%s6623_s24 + $0x10] sm:$0xff]   ;;  %v1851_v31 = vshrl.u32 %v6693_v25, 16  ;;  %v1854_v32 = vshll.u32 %v6693_v25, 16  ;;  %v1861_v34 = vrot.slane %v1859_v27, 1  ;;  %v1864_v35 = vrot.slane %v1862_v28, 2  ;;  %v6711_v42 = vld [vmem:[%s6623_s24 + $0x18] sm:$0xff]   ;;  %vm7562_vm8 = vmand %vm4420_vm6, %vm4421_vm7 }
  0x20   : > { %v398_v29 = vrot.slane %v396_v23, 1  ;;  %v409_v36 = vshll.u32 %v6696_v26, 16  ;;  %v1868_v46 = vshrl.u32 %v6711_v42, 16  ;;  %v1871_v47 = vshll.u32 %v6711_v42, 16  ;;  %v6725_v56 = vld [vmem:[%s6623_s24 + $0x18] sm:$0xff]   ;;  %v6728_v58 = vld [vmem:[%s6623_s24 + $0x20] sm:$0xff]  }
  0x21   : > { %5610 = vmatpush3.bf16.msra.mxu1 %v6394_v5  ;;  %v1853_v39 = vrot.slane %v1851_v31, 1  ;;  %v1856_v40 = vrot.slane %v1854_v32, 2  ;;  %v1865_v43 = vor.u32 %v1864_v35, %v1861_v34  ;;  %v413_v50 = vshrl.u32 %v6696_v26, 16  ;;  %v6732_v61 = vld [vmem:[%s6623_s24 + $0x20] sm:$0xff]   ;;  %v6736_v63 = vld [vmem:[%s6623_s24 + $0x28] sm:$0xff]   ;;  %v6765_v32 = vld [vmem:[%s6623_s24 + $0x30] sm:$0xff]  }
  0x22   : > { %5818 = vmatpush3.bf16.msra.mxu0 %v6395_v6  ;;  %5611 = vmatprep.subr.bf16.mxu1 %v6396_v7  ;;  %v399_v38 = vor.u32 %v398_v29, %v394_v22  ;;  %v411_v48 = vrot.slane %v409_v36, 1  ;;  %v407_v52 = vor.u32 %v405_v41, %v403_v30  ;;  %v1870_v53 = vrot.slane %v1868_v46, 1  ;;  %v6419_v22 = vld [vmem:[%s8052_s1 + $0x150] sm:$0xff]   ;;  %v6756_v23 = vld [vmem:[%s6623_s24 + $0x28] sm:$0xff]   ;;  %v6769_v34 = vld [vmem:[%s6623_s24 + $0x38] sm:$0xff]  }
  0x23   : > { %5819 = vmatprep.subr.bf16.mxu0 %v6397_v8  ;;  %v1857_v45 = vor.u32 %v1856_v40, %v1853_v39  ;;  %v1873_v54 = vrot.slane %v1871_v47, 2  ;;  %v417_v60 = vshll.u32 %v6725_v56, 16  ;;  %v421_v62 = vshrl.u32 %v6725_v56, 16  ;;  %v6761_v29 = vld [vmem:[%s6623_s24 + $0x30] sm:$0xff]  }
  0x24   : > { %v404_v44 = vsel %vm392_vm0, %v399_v38, %v403_v30  ;;  %v415_v59 = vor.u32 %v413_v50, %v411_v48  ;;  %v412_v0 = vsel %vm392_vm0, %v407_v52, %v411_v48  ;;  %v1877_v2 = vshrl.u32 %v6728_v58, 16  ;;  %v6427_v47 = vld [vmem:[%s8052_s1 + $0x10] sm:$0xff]  }
  0x25   : > { %5612 = vmatpush3.bf16.msra.mxu1 %v6396_v7  ;;  %5621 = vmatprep.mubr.bf16.mxu1 %v404_v44  ;;  %v1866_v51 = vsel %vm1849_vm1, %v1857_v45, %v1865_v43  ;;  %v1874_v57 = vor.u32 %v1873_v54, %v1870_v53  ;;  %v1880_v3 = vshll.u32 %v6728_v58, 16  ;;  %v419_v4 = vrot.slane %v417_v60, 1  ;;  %v6421_v44 = vld [vmem:[%s8052_s1 + $0x158] sm:$0xff]   ;;  %v6426_v54 = vld [vmem:[%s8052_s1 + $0x160] sm:$0xff]  }
  0x26   : > { %5820 = vmatpush3.bf16.msra.mxu0 %v6397_v8  ;;  %5613 = vmatprep.subr.bf16.mxu1 %v6398_v9  ;;  %v425_v5 = vshll.u32 %v6732_v61, 16  ;;  %v1886_v6 = vshrl.u32 %v6736_v63, 16  ;;  %v1889_v7 = vshll.u32 %v6736_v63, 16  ;;  %v6414_v8 = vld [vmem:[%s8052_s1 + $0x148] sm:$0xff]   ;;  %v429_v24 = vshrl.u32 %v6732_v61, 16 }
  0x27   : > { %5821 = vmatprep.subr.bf16.mxu0 %v6399_v10  ;;  %5829 = vmatprep.mubr.bf16.mxu0 %v1866_v51  ;;  %v1875_v1 = vsel %vm1849_vm1, %v1865_v43, %v1874_v57  ;;  %v433_v31 = vshll.u32 %v6756_v23, 16  ;;  %v1898_v38 = vshll.u32 %v6761_v29, 16  ;;  %v441_v40 = vshll.u32 %v6765_v32, 16 }
  0x28   : > { %v1888_v13 = vrot.slane %v1886_v6, 1  ;;  %v427_v19 = vrot.slane %v425_v5, 1  ;;  %v1904_v41 = vshrl.u32 %v6769_v34, 16  ;;  %v1907_v43 = vshll.u32 %v6769_v34, 16 }
  0x29   : > { %5614 = vmatpush3.bf16.msra.mxu1 %v6398_v9  ;;  %v1879_v9 = vrot.slane %v1877_v2, 1  ;;  %v435_v39 = vrot.slane %v433_v31, 1  ;;  %v1900_v46 = vrot.slane %v1898_v38, 2  ;;  %v443_v52 = vrot.slane %v441_v40, 1  ;;  %v6798_v2 = vld [vmem:[%s6623_s24 + $0x40] sm:$0xff]   ;;  %v6434_v31 = vld [vmem:[%s8052_s1 + $0x18] sm:$0xff]  }
  0x2a   : > { %5822 = vmatpush3.bf16.msra.mxu0 %v6399_v10  ;;  %5615 = vmatprep.subr.bf16.mxu1 %v6400_v11  ;;  %v1882_v10 = vrot.slane %v1880_v3, 2  ;;  %v431_v30 = vor.u32 %v429_v24, %v427_v19  ;;  %v1909_v53 = vrot.slane %v1907_v43, 2  ;;  %v2299_v38 = vld [vmem:[%s6623_s24 + $0x8] sm:$0xc]  ;;  %v2322_v40 = vrot.slane %v6677_v17, 2 }
  0x2b   : > { %5823 = vmatprep.subr.bf16.mxu0 %v6401_v12  ;;  %vm4915_vm10 = vsmask.f32 7942  ;;  %vm4516_vm11 = vsmask.f32 5392 }
  0x2c   : > { %v1883_v14 = vor.u32 %v1882_v10, %v1879_v9  ;;  %v436_v48 = vsel %vm392_vm0, %v431_v30, %v435_v39  ;;  %v6433_v30 = vld [vmem:[%s8052_s1 + $0x170] sm:$0xff]   ;;  %vm7603_vm12 = vmand %vm4914_vm9, %vm4915_vm10 }
  0x2d   : > { %5616 = vmatpush3.bf16.msra.mxu1 %v6400_v11  ;;  %v6420_v11 = vld [vmem:[%s8052_s1 + $0x8] sm:$0xff]   ;;  %vm7610_vm13 = vmor %vm4421_vm7, %vm4516_vm11 }
  0x2e   : > { %5824 = vmatpush3.bf16.msra.mxu0 %v6401_v12  ;;  %5617 = vmatprep.subr.bf16.mxu1 %v6402_v18  ;;  %v420_v12 = vsel %vm392_vm0, %v415_v59, %v419_v4  ;;  %v1884_v27 = vsel %vm1849_vm1, %v1874_v57, %v1883_v14  ;;  %v445_v57 = vshrl.u32 %v6765_v32, 16 }
  0x2f   : > { %5825 = vmatprep.subr.bf16.mxu0 %v6403_v21 }
  0x31   : > { %5618 = vmatpush3.bf16.msra.mxu1 %v6402_v18  ;;  %v423_v18 = vor.u32 %v421_v62, %v419_v4  ;;  %v6794_v62 = vld [vmem:[%s6623_s24 + $0x40] sm:$0xff]   ;;  %v6428_v4 = vld [vmem:[%s8052_s1 + $0x168] sm:$0xff]  }
  0x32   : > { %5826 = vmatpush3.bf16.msra.mxu0 %v6403_v21  ;;  %5619 = vmatprep.subr.bf16.mxu1 %v6404_v33  ;;  %v1891_v21 = vrot.slane %v1889_v7, 2  ;;  %v1913_v5 = vshrl.u32 %v6794_v62, 16  ;;  %v1916_v6 = vshll.u32 %v6794_v62, 16 }
  0x33   : > { %5827 = vmatprep.subr.bf16.mxu0 %v6405_v37  ;;  %v428_v35 = vsel %vm392_vm0, %v423_v18, %v427_v19 }
  0x34   : > { %v1892_v28 = vor.u32 %v1891_v21, %v1888_v13  ;;  %v1918_v13 = vrot.slane %v1916_v6, 2  ;;  %v2326_v6 = vrot.slane %v6728_v58, 2 }
  0x35   : > { %5620 = vmatpush3.bf16.msra.mxu1 %v6404_v33  ;;  %v437_v33 = vshrl.u32 %v6756_v23, 16 }
  0x36   : > { %5828 = vmatpush3.bf16.msra.mxu0 %v6405_v37  ;;  %5657 = vmatprep.subr.bf16.mxu1 %v6411_v49  ;;  %v1893_v36 = vsel %vm1849_vm1, %v1883_v14, %v1892_v28  ;;  %v1895_v37 = vshrl.u32 %v6761_v29, 16 }
  0x37   : > { %5865 = vmatprep.subr.bf16.mxu0 %v6413_v55  ;;  %v439_v51 = vor.u32 %v437_v33, %v435_v39  ;;  %v5194_v39 = vcombine.low %v2299_v38, %v6684_v20  ;;  %v6450_v38 = vld [vmem:[%s8052_s1 + $0x190] sm:$0xff]  }
  0x38   : > { %5622 = vmatmul.mubr.bf16.vlgmr.msra.gmra.mrb[0].mxu1 %v412_v0  ;;  %v1897_v45 = vrot.slane %v1895_v37, 1  ;;  %v447_v0 = vor.u32 %v445_v57, %v443_v52  ;;  %v461_v37 = vshrl.u32 %v6798_v2, 16 }
  0x39   : > { %5830 = vmatmul.mubr.bf16.vlgmr.msra.gmra.mrb[0].mxu0 %v1875_v1  ;;  %5658 = vmatpush3.bf16.msra.mxu1 %v6411_v49  ;;  %v1906_v49 = vrot.slane %v1904_v41, 1  ;;  %v444_v3 = vsel %vm392_vm0, %v439_v51, %v443_v52  ;;  %v6832_v41 = vld [vmem:[%s6623_s24 + $0x50] sm:$0xff]   ;;  %v2321_v20 = vrot.slane %v5194_v39, 2 }
  0x3a   : > { %5866 = vmatpush3.bf16.msra.mxu0 %v6413_v55  ;;  %5625 = vmatprep.mubr.bf16.mxu1 %v420_v12  ;;  %v1901_v50 = vor.u32 %v1900_v46, %v1897_v45  ;;  %v6789_v55 = vld [vmem:[%s6623_s24 + $0x38] sm:$0xff]   ;;  %v1915_v12 = vrot.slane %v1913_v5, 1  ;;  %v477_v52 = vshrl.u32 %v6832_v41, 16 }
  0x3b   : > { %5867 = vmatprep.subr.bf16.mxu0 %v6414_v8  ;;  %5659 = vmatprep.subr.bf16.mxu1 %v6420_v11  ;;  %v1910_v60 = vor.u32 %v1909_v53, %v1906_v49  ;;  %v449_v1 = vshll.u32 %v6789_v55, 16  ;;  %v453_v7 = vshrl.u32 %v6789_v55, 16  ;;  %v473_v49 = vshll.u32 %v6832_v41, 16 }
  0x3c   : > { %5833 = vmatprep.mubr.bf16.mxu0 %v1884_v27  ;;  %v1902_v59 = vsel %vm1849_vm1, %v1892_v28, %v1901_v50 }
  0x3d   : > { %5660 = vmatpush3.bf16.msra.mxu1 %v6420_v11  ;;  %v1911_v9 = vsel %vm1849_vm1, %v1901_v50, %v1910_v60  ;;  %v451_v10 = vrot.slane %v449_v1, 1  ;;  %v457_v11 = vshll.u32 %v6798_v2, 16  ;;  %v6435_v50 = vld [vmem:[%s8052_s1 + $0x178] sm:$0xff]   ;;  %v475_v57 = vrot.slane %v473_v49, 1 }
  0x3e   : > { %5868 = vmatpush3.bf16.msra.mxu0 %v6414_v8  ;;  %5661 = vmatprep.subr.bf16.mxu1 %v6427_v47  ;;  %v6808_v8 = vld [vmem:[%s6623_s24 + $0x48] sm:$0xff]   ;;  %v2324_v1 = vrot.slane %v6711_v42, 2  ;;  %v6456_v49 = vld [vmem:[%s8052_s1 + $0x198] sm:$0xff]  }
  0x3f   : > { %5869 = vmatprep.subr.bf16.mxu0 %v6419_v22  ;;  %v1922_v14 = vshrl.u32 %v6808_v8, 16  ;;  %v1925_v18 = vshll.u32 %v6808_v8, 16  ;;  %v452_v19 = vsel %vm392_vm0, %v447_v0, %v451_v10  ;;  %v459_v21 = vrot.slane %v457_v11, 1 }
  0x40   : > { %5626 = vmatmul.mubr.bf16.gmra.mrb[4].mxu1 %v428_v35  ;;  %v455_v24 = vor.u32 %v453_v7, %v451_v10  ;;  %v479_v5 = vor.u32 %v477_v52, %v475_v57  ;;  %v6442_v7 = vld [vmem:[%s8052_s1 + $0x180] sm:$0xff]   ;;  %v2325_v58 = vsel %vm2320_vm2, %v2322_v40, %v2324_v1 }
  0x41   : > { %5834 = vmatmul.mubr.bf16.gmra.mrb[4].mxu0 %v1893_v36  ;;  %5629 = vmatprep.mubr.bf16.mxu1 %v436_v48  ;;  %v1924_v27 = vrot.slane %v1922_v14, 1  ;;  %v1927_v28 = vrot.slane %v1925_v18, 2  ;;  %v6825_v36 = vld [vmem:[%s6623_s24 + $0x48] sm:$0xff]   ;;  %v6841_v48 = vld [vmem:[%s6623_s24 + $0x58] sm:$0xff]   ;;  %v6447_v18 = vld [vmem:[%s8052_s1 + $0x30] sm:$0xff]  }
  0x42   : > { %5870 = vmatpush3.bf16.msra.mxu0 %v6419_v22  ;;  %5662 = vmatpush3.bf16.msra.mxu1 %v6427_v47  ;;  %v1919_v22 = vor.u32 %v1918_v13, %v1915_v12  ;;  %v460_v43 = vsel %vm392_vm0, %v455_v24, %v459_v21  ;;  %v465_v45 = vshll.u32 %v6825_v36, 16  ;;  %v469_v46 = vshrl.u32 %v6825_v36, 16  ;;  %v6439_v47 = vld [vmem:[%s8052_s1 + $0x20] sm:$0xff]   ;;  %v6882_v24 = vld [vmem:[%s6623_s24 + $0x70] sm:$0xff]  }
  0x43   : > { %5871 = vmatprep.subr.bf16.mxu0 %v6421_v44  ;;  %5837 = vmatprep.mubr.bf16.mxu0 %v1902_v59  ;;  %v6822_v35 = vor.u32 %v1927_v28, %v1924_v27  ;;  %v481_v53 = vshll.u32 %v6841_v48, 16  ;;  %v6853_v59 = vld [vmem:[%s6623_s24 + $0x60] sm:$0xff]   ;;  %v485_v11 = vshrl.u32 %v6841_v48, 16  ;;  %v2328_v28 = vrot.slane %v6736_v63, 2 }
  0x44   : > { %v1920_v33 = vsel %vm1849_vm1, %v1910_v60, %v1919_v22  ;;  %5663 = vmatprep.subr.bf16.mxu1 %v6434_v31  ;;  %v467_v51 = vrot.slane %v465_v45, 1  ;;  %v489_v42 = vshll.u32 %v6853_v59, 16  ;;  %v493_v12 = vshrl.u32 %v6853_v59, 16 }
  0x45   : > { %v1929_v17 = vsel %vm1849_vm1, %v1919_v22, %v6822_v35  ;;  %v505_v39 = vshll.u32 %v6882_v24, 16  ;;  %v509_v45 = vshrl.u32 %v6882_v24, 16 }
  0x46   : > { %5872 = vmatpush3.bf16.msra.mxu0 %v6421_v44  ;;  %5664 = vmatpush3.bf16.msra.mxu1 %v6434_v31  ;;  %v463_v44 = vor.u32 %v461_v37, %v459_v21  ;;  %v471_v0 = vor.u32 %v469_v46, %v467_v51  ;;  %v6446_v21 = vld [vmem:[%s8052_s1 + $0x188] sm:$0xff]   ;;  %v491_v22 = vrot.slane %v489_v42, 1  ;;  %v2330_v37 = vrot.slane %v6761_v29, 2  ;;  %v6453_v42 = vld [vmem:[%s6623_s24 + $0x50] sm:$0xff]  }
  0x47   : > { %5873 = vmatprep.subr.bf16.mxu0 %v6426_v54  ;;  %5665 = vmatprep.subr.bf16.mxu1 %v6439_v47 }
  0x48   : > { %5630 = vmatmul.mubr.bf16.gmra.mrb[8].mxu1 %v444_v3  ;;  %v468_v60 = vsel %vm392_vm0, %v463_v44, %v467_v51  ;;  %v483_v3 = vrot.slane %v481_v53, 1  ;;  %v476_v10 = vsel %vm392_vm0, %v471_v0, %v475_v57  ;;  %v2329_v44 = vsel %vm2320_vm2, %v2326_v6, %v2328_v28 }
  0x49   : > { %5838 = vmatmul.mubr.bf16.gmra.mrb[8].mxu0 %v1911_v9  ;;  %5633 = vmatprep.mubr.bf16.mxu1 %v452_v19  ;;  %v6865_v9 = vld [vmem:[%s6623_s24 + $0x68] sm:$0xff]   ;;  %v2327_v19 = vsel %vm2320_vm2, %v2324_v1, %v2326_v6  ;;  %v2332_v51 = vrot.slane %v6769_v34, 2  ;;  %v2334_v57 = vrot.slane %v6794_v62, 2  ;;  %v6460_v62 = vld [vmem:[%s8052_s1 + $0x1a0] sm:$0xff]  }
  0x4a   : > { %5874 = vmatpush3.bf16.msra.mxu0 %v6426_v54  ;;  %5841 = vmatprep.mubr.bf16.mxu0 %v1920_v33  ;;  %v2323_v54 = vsel %vm2320_vm2, %v2321_v20, %v2322_v40  ;;  %v484_v13 = vsel %vm392_vm0, %v479_v5, %v483_v3  ;;  %v497_v14 = vshll.u32 %v6865_v9, 16  ;;  %v487_v27 = vor.u32 %v485_v11, %v483_v3  ;;  %v6886_v33 = vld [vmem:[%s6623_s24 + $0x78] sm:$0xff]  }
  0x4b   : > { %5875 = vmatprep.subr.bf16.mxu0 %v6428_v4  ;;  %5666 = vmatpush3.bf16.msra.mxu1 %v6439_v47  ;;  %v501_v63 = vshrl.u32 %v6865_v9, 16  ;;  %v513_v46 = vshll.u32 %v6886_v33, 16  ;;  %v2331_v47 = vsel %vm2320_vm2, %v2328_v28, %v2330_v37  ;;  %v507_v20 = vrot.slane %v505_v39, 1  ;;  %v6468_v28 = vld [vmem:[%s8052_s1 + $0x1b0] sm:$0xff]  }
  0x4c   : > { %v499_v31 = vrot.slane %v497_v14, 1  ;;  %v492_v40 = vsel %vm392_vm0, %v487_v27, %v491_v22  ;;  %v517_v1 = vshrl.u32 %v6886_v33, 16  ;;  %v2333_v3 = vsel %vm2320_vm2, %v2330_v37, %v2332_v51  ;;  %v6455_v37 = vld [vmem:[%s6623_s24 + $0x58] sm:$0xff]  }
  0x4d   : > { %v511_v52 = vor.u32 %v509_v45, %v507_v20  ;;  %v515_v53 = vrot.slane %v513_v46, 1  ;;  %v6459_v46 = vld [vmem:[%s6623_s24 + $0x68] sm:$0xff]  }
  0x4e   : > { %5876 = vmatpush3.bf16.msra.mxu0 %v6428_v4  ;;  %v6443_v4 = vld [vmem:[%s8052_s1 + $0x28] sm:$0xff]  }
  0x4f   : > { %5877 = vmatprep.subr.bf16.mxu0 %v6433_v30  ;;  %5667 = vmatprep.subr.bf16.mxu1 %v6443_v4 }
  0x50   : > { %5634 = vmatmul.mubr.bf16.gmra.mrb[12].mxu1 %v460_v43  ;;  %v6452_v43 = vld [vmem:[%s8052_s1 + $0x38] sm:$0xff]  }
  0x51   : > { %5842 = vmatmul.mubr.bf16.gmra.mrb[12].mxu0 %v1929_v17  ;;  %5637 = vmatprep.mubr.bf16.mxu1 %v468_v60  ;;  %v6904_v17 = vld [vmem:[%s6623_s24 + $0x80] sm:$0xff]  }
  0x52   : > { %5878 = vmatpush3.bf16.msra.mxu0 %v6433_v30  ;;  %5881 = vmatprep.mubr.bf16.mxu0 %v2323_v54  ;;  %v495_v30 = vor.u32 %v493_v12, %v491_v22  ;;  %v6911_v54 = vld [vmem:[%s6623_s24 + $0x88] sm:$0xff]   ;;  %v6917_v60 = vld [vmem:[%s8052_s1 + $0x80] sm:$0xff]   ;;  %v521_v0 = vshll.u32 %v6904_v17, 16  ;;  %v525_v5 = vshrl.u32 %v6904_v17, 16  ;;  %v519_v12 = vor.u32 %v517_v1, %v515_v53  ;;  %v6467_v1 = vld [vmem:[%s8052_s1 + $0x90] sm:$0xff]  }
  0x53   : > { %5879 = vmatprep.subr.bf16.mxu0 %v6435_v50  ;;  %5668 = vmatpush3.bf16.msra.mxu1 %v6443_v4  ;;  %v516_v4 = vsel %vm392_vm0, %v511_v52, %v515_v53  ;;  %v529_v6 = vshll.u32 %v6911_v54, 16  ;;  %v6462_v52 = vld [vmem:[%s6623_s24 + $0x78] sm:$0xff]  }
  0x54   : > { %5669 = vmatprep.subr.bf16.mxu1 %v6447_v18  ;;  %v500_v29 = vsel %vm392_vm0, %v495_v30, %v499_v31  ;;  %v523_v11 = vrot.slane %v521_v0, 1 }
  0x56   : > { %5880 = vmatpush3.bf16.msra.mxu0 %v6435_v50  ;;  %v503_v50 = vor.u32 %v501_v63, %v499_v31  ;;  %v527_v14 = vor.u32 %v525_v5, %v523_v11  ;;  %v524_v22 = vsel %vm392_vm0, %v519_v12, %v523_v11  ;;  %v6472_v63 = vld [vmem:[%s8052_s1 + $0x1b8] sm:$0xff]  }
  0x57   : > { %5917 = vmatprep.subr.bf16.mxu0 %v6442_v7  ;;  %5670 = vmatpush3.bf16.msra.mxu1 %v6447_v18  ;;  %v531_v18 = vrot.slane %v529_v6, 1  ;;  %v6471_v5 = vld [vmem:[%s8052_s1 + $0x98] sm:$0xff]   ;;  %v2637_v6 = vld [vmem:[%s6623_s24 + $0x10] sm:$0xc] }
  0x58   : > { %5638 = vmatmul.mubr.bf16.gmra.mrb[16].mxu1 %v476_v10  ;;  %5671 = vmatprep.subr.bf16.mxu1 %v6452_v43  ;;  %v508_v34 = vsel %vm392_vm0, %v503_v50, %v507_v20  ;;  %v6454_v10 = vld [vmem:[%s6623_s24 + $0x90] ss:$0 sps:$4 sm:$0x11]   ;;  %v2344_v50 = vrot.slane %v6459_v46, 2 }
  0x59   : > { %5882 = vmatmul.mubr.bf16.vlgmr.msra.gmra.mrb[0].mxu0 %v2325_v58  ;;  %5641 = vmatprep.mubr.bf16.mxu1 %v484_v13  ;;  %v6464_v58 = vld [vmem:[%s8052_s1 + $0x1a8] sm:$0xff]   ;;  %v2336_v13 = vrot.slane %v6808_v8, 2  ;;  %v537_v27 = vshll.u32 %v6454_v10, 16  ;;  %v532_v31 = vsel %vm392_vm0, %v527_v14, %v531_v18  ;;  %v6461_v20 = vld [vmem:[%s6623_s24 + $0x70] sm:$0xff]   ;;  %v6476_v10 = vld [vmem:[%s8052_s1 + $0xa0] sm:$0xff]  }
  0x5a   : > { %5885 = vmatprep.mubr.bf16.mxu0 %v2327_v19  ;;  %5918 = vmatpush3.bf16.msra.mxu0 %v6442_v7  ;;  %v2335_v7 = vsel %vm2320_vm2, %v2332_v51, %v2334_v57  ;;  %v2338_v19 = vrot.slane %v6453_v42, 2  ;;  %v2346_v51 = vrot.slane %v6461_v20, 2  ;;  %v6470_v11 = vld [vmem:[%s6623_s24 + $0x98] ss:$0 sps:$4 sm:$0x33]   ;;  %v6496_v20 = vld [vmem:[%s8052_s1 + $0x1e0] sm:$0xff]  }
  0x5b   : > { %5919 = vmatprep.subr.bf16.mxu0 %v6446_v21  ;;  %5672 = vmatpush3.bf16.msra.mxu1 %v6452_v43  ;;  %v2337_v30 = vsel %vm2320_vm2, %v2334_v57, %v2336_v13  ;;  %v2340_v43 = vrot.slane %v6455_v37, 2  ;;  %v6463_v57 = vld [vmem:[%s8052_s1 + $0x88] sm:$0xff]   ;;  %v2356_v14 = vrot.slane %v6470_v11, 2  ;;  %v7025_v37 = vld [vmem:[%s8052_s1 + $0xc0] sm:$0xff]   ;;  %v6526_v11 = vld [vmem:[%s6623_s24 + $0x10] sm:$0xff]  }
  0x5c   : > { %5709 = vmatprep.subr.bf16.mxu1 %v6917_v60  ;;  %v2339_v8 = vsel %vm2320_vm2, %v2336_v13, %v2338_v19  ;;  %v2347_v0 = vsel %vm2320_vm2, %v2344_v50, %v2346_v51  ;;  %v6480_v13 = vld [vmem:[%s8052_s1 + $0xa8] sm:$0xff]  }
  0x5d   : > { %v2341_v45 = vsel %vm2320_vm2, %v2338_v19, %v2340_v43 }
  0x5e   : > { %5920 = vmatpush3.bf16.msra.mxu0 %v6446_v21  ;;  %v533_v21 = vshrl.u32 %v6911_v54, 16 }
  0x5f   : > { %5921 = vmatprep.subr.bf16.mxu0 %v6450_v38 }
  0x60   : > { %5642 = vmatmul.mubr.bf16.gmra.mrb[20].mxu1 %v492_v40  ;;  %v535_v39 = vor.u32 %v533_v21, %v531_v18  ;;  %v539_v40 = vrot.slane %v537_v27, 1  ;;  %v6484_v21 = vld [vmem:[%s8052_s1 + $0xb0] sm:$0xff]   ;;  %v7009_v27 = vld [vmem:[%s6623_s24 + $0x20] sm:$0xff]  }
  0x61   : > { %5886 = vmatmul.mubr.bf16.gmra.mrb[4].mxu0 %v2329_v44  ;;  %5645 = vmatprep.mubr.bf16.mxu1 %v500_v29 }
  0x62   : > { %5889 = vmatprep.mubr.bf16.mxu0 %v2331_v47  ;;  %5922 = vmatpush3.bf16.msra.mxu0 %v6450_v38  ;;  %v6457_v38 = vld [vmem:[%s6623_s24 + $0x60] sm:$0xff]   ;;  %v540_v29 = vsel %vm392_vm0, %v535_v39, %v539_v40  ;;  %v6483_v39 = vld [vmem:[%s8052_s1 + $0x1c8] sm:$0xff]  }
  0x63   : > { %5923 = vmatprep.subr.bf16.mxu0 %v6456_v49  ;;  %v2342_v44 = vrot.slane %v6457_v38, 2  ;;  %v7029_v38 = vld [vmem:[%s6623_s24 + $0x30] sm:$0xff]  }
  0x64   : > { %v2791_v40 = vrot.slane %v7029_v38, 2 }
  0x65   : > { %v2343_v47 = vsel %vm2320_vm2, %v2340_v43, %v2342_v44  ;;  %v2345_v53 = vsel %vm2320_vm2, %v2342_v44, %v2344_v50  ;;  %v6487_v43 = vld [vmem:[%s8052_s1 + $0x1d0] sm:$0xff]  }
  0x66   : > { %5924 = vmatpush3.bf16.msra.mxu0 %v6456_v49  ;;  %v6958_v49 = vld [vmem:[%s8052_s1 + $0x1c0] sm:$0xff]   ;;  %v7067_v50 = vld [vmem:[%s6623_s24 + $0x50] sm:$0xff]  }
  0x67   : > { %5925 = vmatprep.subr.bf16.mxu0 %v6460_v62 }
  0x68   : > { %5646 = vmatmul.mubr.bf16.gmra.mrb[24].mxu1 %v508_v34  ;;  %v6465_v34 = vld [vmem:[%s6623_s24 + $0x80] sm:$0xff]  }
  0x69   : > { %5890 = vmatmul.mubr.bf16.gmra.mrb[8].mxu0 %v2333_v3  ;;  %5649 = vmatprep.mubr.bf16.mxu1 %v516_v4  ;;  %v6466_v3 = vld [vmem:[%s6623_s24 + $0x88] sm:$0xff]  }
  0x6a   : > { %5893 = vmatprep.mubr.bf16.mxu0 %v2335_v7  ;;  %5926 = vmatpush3.bf16.msra.mxu0 %v6460_v62  ;;  %v2350_v62 = vrot.slane %v6465_v34, 2  ;;  %v2638_v7 = vld [vmem:[%s6623_s24 + $0x14] sm:$0xf] }
  0x6b   : > { %5927 = vmatprep.subr.bf16.mxu0 %v6464_v58 }
  0x6e   : > { %5928 = vmatpush3.bf16.msra.mxu0 %v6464_v58  ;;  %v6991_v58 = vcombine.low %v2637_v6, %v2638_v7  ;;  %v7109_v7 = vld [vmem:[%s6623_s24 + $0x70] sm:$0xff]  }
  0x6f   : > { %5929 = vmatprep.subr.bf16.mxu0 %v6468_v28 }
  0x70   : > { %5650 = vmatmul.mubr.bf16.gmra.mrb[28].mxu1 %v524_v22  ;;  %v2784_v18 = vrot.slane %v6991_v58, 2 }
  0x71   : > { %5894 = vmatmul.mubr.bf16.gmra.mrb[12].mxu0 %v2337_v30  ;;  %5653 = vmatprep.mubr.bf16.mxu1 %v532_v31  ;;  %v2787_v30 = vrot.slane %v7009_v27, 2 }
  0x72   : > { %5897 = vmatprep.mubr.bf16.mxu0 %v2339_v8  ;;  %5930 = vmatpush3.bf16.msra.mxu0 %v6468_v28  ;;  %v6488_v28 = vld [vmem:[%s8052_s1 + $0xb8] sm:$0xff]  }
  0x73   : > { %5931 = vmatprep.subr.bf16.mxu0 %v6472_v63 }
  0x76   : > { %5932 = vmatpush3.bf16.msra.mxu0 %v6472_v63 }
  0x77   : > { %5969 = vmatprep.subr.bf16.mxu0 %v6958_v49 }
  0x78   : > { %5654 = vmatmul.mubr.bf16.gmra.mrb[32].mxu1 %v540_v29  ;;  %v7049_v29 = vld [vmem:[%s6623_s24 + $0x40] sm:$0xff]  }
  0x79   : > { %5898 = vmatmul.mubr.bf16.gmra.mrb[16].mxu0 %v2341_v45  ;;  %5673 = vmatprep.mubr.bf16.mxu1 %v6671_v15  ;;  %v2348_v15 = vrot.slane %v6462_v52, 2  ;;  %v6491_v45 = vld [vmem:[%s8052_s1 + $0x1d8] sm:$0xff]   ;;  %v2795_v46 = vrot.slane %v7049_v29, 2  ;;  %v2799_v52 = vrot.slane %v7067_v50, 2 }
  0x7a   : > { %5901 = vmatprep.mubr.bf16.mxu0 %v2343_v47 }
  0x7b   : > { %v2349_v4 = vsel %vm2320_vm2, %v2346_v51, %v2348_v15  ;;  %v6500_v51 = vld [vmem:[%s8052_s1 + $0x1e8] sm:$0xff]  }
  0x80   : > { %5674 = vmatmul.mubr.bf16.vlgmr.msra.gmra.mrb[0].mxu1 %v6674_v16  ;;  %v2351_v16 = vsel %vm2320_vm2, %v2348_v15, %v2350_v62  ;;  %v6524_v15 = vld [vmem:[%s6623_s24 + $0x4] sm:$0xf] }
  0x81   : > { %5902 = vmatmul.mubr.bf16.gmra.mrb[20].mxu0 %v2345_v53  ;;  %5710 = vmatpush3.bf16.msra.mxu1 %v6917_v60  ;;  %v2352_v60 = vrot.slane %v6466_v3, 2  ;;  %v6508_v3 = vld [vmem:[%s8052_s1 + $0x1f8] sm:$0xff]  }
  0x82   : > { %5677 = vmatprep.mubr.bf16.mxu1 %v6696_v26  ;;  %5905 = vmatprep.mubr.bf16.mxu0 %v2347_v0  ;;  %v6469_v26 = vld [vmem:[%s6623_s24 + $0x90] sm:$0xff]  }
  0x83   : > { %5711 = vmatprep.subr.bf16.mxu1 %v6463_v57  ;;  %v2354_v42 = vrot.slane %v6469_v26, 2  ;;  %v2353_v12 = vsel %vm2320_vm2, %v2350_v62, %v2352_v60  ;;  %v6504_v0 = vld [vmem:[%s8052_s1 + $0x1f0] sm:$0xff]   ;;  %v7091_v62 = vld [vmem:[%s6623_s24 + $0x68] sm:$0xff]  }
  0x85   : > { %5712 = vmatpush3.bf16.msra.mxu1 %v6463_v57  ;;  %v2357_v22 = vsel %vm2320_vm2, %v2354_v42, %v2356_v14  ;;  %v1027_v57 = vld [vmem:[%s6623_s24] sm:$0xe] }
  0x86   : > { %5713 = vmatprep.subr.bf16.mxu1 %v6467_v1 }
  0x88   : > { %5678 = vmatmul.mubr.bf16.gmra.mrb[4].mxu1 %v6725_v56  ;;  %v6994_v56 = vld [vmem:[%s6623_s24 + $0x18] sm:$0xff]  }
  0x89   : > { %5906 = vmatmul.mubr.bf16.gmra.mrb[24].mxu0 %v2349_v4  ;;  %5681 = vmatprep.mubr.bf16.mxu1 %v6732_v61  ;;  %v2355_v61 = vsel %vm2320_vm2, %v2352_v60, %v2354_v42  ;;  %v2785_v19 = vrot.slane %v6994_v56, 2  ;;  %v6525_v60 = vld [vmem:[%s6623_s24 + $0x8] sm:$0xff]  }
  0x8a   : > { %5909 = vmatprep.mubr.bf16.mxu0 %v2351_v16  ;;  %5714 = vmatpush3.bf16.msra.mxu1 %v6467_v1  ;;  %v5101_v1 = vcombine.low %v1027_v57, %v6524_v15  ;;  %v1050_v26 = vrot.slane %v6525_v60, 1  ;;  %v3989_v57 = vld [vmem:[%s8054_s3 + $0x1b] sm:$0xff] }
  0x8b   : > { %5715 = vmatprep.subr.bf16.mxu1 %v6471_v5  ;;  %v2788_v8 = vsel %vm2320_vm2, %v2785_v19, %v2787_v30  ;;  %v6509_v60 = vld [vmem:[%s8052_s1 + $0xe0] sm:$0xff]  }
  0x8c   : > { %v1049_v16 = vrot.slane %v5101_v1, 1  ;;  %v3123_v1 = vshrl.u32 %v6991_v58, 16 }
  0x8e   : > { %5716 = vmatpush3.bf16.msra.mxu1 %v6471_v5  ;;  %v2805_v5 = vrot.slane %v7091_v62, 2  ;;  %v1051_v6 = vsel %vm1048_vm3, %v1049_v16, %v1050_v26  ;;  %v3134_v16 = vshll.u32 %v6994_v56, 16 }
  0x8f   : > { %5717 = vmatprep.subr.bf16.mxu1 %v6476_v10 }
  0x90   : > { %5682 = vmatmul.mubr.bf16.gmra.mrb[8].mxu1 %v6756_v23  ;;  %v2786_v23 = vsel %vm2320_vm2, %v2784_v18, %v2785_v19 }
  0x91   : > { %5910 = vmatmul.mubr.bf16.gmra.mrb[28].mxu0 %v2353_v12  ;;  %5685 = vmatprep.mubr.bf16.mxu1 %v6765_v32  ;;  %v7013_v32 = vld [vmem:[%s6623_s24 + $0x28] sm:$0xff]   ;;  %v1052_v12 = vrot.slane %v6526_v11, 1 }
  0x92   : > { %5913 = vmatprep.mubr.bf16.mxu0 %v2355_v61  ;;  %5718 = vmatpush3.bf16.msra.mxu1 %v6476_v10  ;;  %v2789_v31 = vrot.slane %v7013_v32, 2  ;;  %v7113_v10 = vld [vmem:[%s6623_s24 + $0x78] sm:$0xff]   ;;  %v2807_v61 = vrot.slane %v7109_v7, 2 }
  0x93   : > { %5719 = vmatprep.subr.bf16.mxu1 %v6480_v13  ;;  %v2809_v18 = vrot.slane %v7113_v10, 2  ;;  %v1053_v19 = vsel %vm1048_vm3, %v1050_v26, %v1052_v12  ;;  %v3991_v26 = vld [vmem:[%s8054_s3 + $0x2b] sm:$0xff] }
  0x94   : > { %v2792_v44 = vsel %vm2320_vm2, %v2789_v31, %v2791_v40 }
  0x96   : > { %5720 = vmatpush3.bf16.msra.mxu1 %v6480_v13  ;;  %v6527_v13 = vld [vmem:[%s6623_s24 + $0x18] sm:$0xff]  }
  0x97   : > { %5721 = vmatprep.subr.bf16.mxu1 %v6484_v21  ;;  %v1054_v14 = vrot.slane %v6527_v13, 1  ;;  %v3136_v13 = vrot.slane %v3134_v16, 3 }
  0x98   : > { %5686 = vmatmul.mubr.bf16.gmra.mrb[12].mxu1 %v6789_v55  ;;  %v2790_v55 = vsel %vm2320_vm2, %v2787_v30, %v2789_v31  ;;  %v7132_v30 = vld [vmem:[%s6623_s24 + $0x88] sm:$0xff]   ;;  %v6528_v31 = vld [vmem:[%s6623_s24 + $0x20] sm:$0xff]  }
  0x99   : > { %5914 = vmatmul.mubr.bf16.gmra.mrb[32].mxu0 %v2357_v22  ;;  %5689 = vmatprep.mubr.bf16.mxu1 %v6798_v2  ;;  %v7033_v2 = vld [vmem:[%s6623_s24 + $0x38] sm:$0xff]   ;;  %v7124_v22 = vld [vmem:[%s6623_s24 + $0x80] sm:$0xff]  }
  0x9a   : > { %5933 = vmatprep.mubr.bf16.mxu0 %v2786_v23  ;;  %5722 = vmatpush3.bf16.msra.mxu1 %v6484_v21  ;;  %v2793_v63 = vrot.slane %v7033_v2, 2  ;;  %v2808_v21 = vsel %vm2320_vm2, %v2805_v5, %v2807_v61  ;;  %v2810_v23 = vsel %vm2320_vm2, %v2807_v61, %v2809_v18 }
  0x9b   : > { %5723 = vmatprep.subr.bf16.mxu1 %v6488_v28 }
  0x9e   : > { %5724 = vmatpush3.bf16.msra.mxu1 %v6488_v28  ;;  %v6499_v28 = vld [vmem:[%s8052_s1 + $0xc8] sm:$0xff]  }
  0x9f   : > { %5761 = vmatprep.subr.bf16.mxu1 %v7025_v37 }
  0xa0   : > { %5690 = vmatmul.mubr.bf16.gmra.mrb[16].mxu1 %v6825_v36  ;;  %v7052_v36 = vld [vmem:[%s6623_s24 + $0x48] sm:$0xff]  }
  0xa1   : > { %5934 = vmatmul.mubr.bf16.vlgmr.msra.gmra.mrb[0].mxu0 %v2788_v8  ;;  %5693 = vmatprep.mubr.bf16.mxu1 %v6832_v41  ;;  %v2794_v41 = vsel %vm2320_vm2, %v2791_v40, %v2793_v63  ;;  %v2797_v47 = vrot.slane %v7052_v36, 2  ;;  %v1056_v8 = vrot.slane %v6528_v31, 1 }
  0xa2   : > { %5937 = vmatprep.mubr.bf16.mxu0 %v2790_v55  ;;  %5970 = vmatpush3.bf16.msra.mxu0 %v6958_v49  ;;  %v2796_v49 = vsel %vm2320_vm2, %v2793_v63, %v2795_v46  ;;  %v2811_v55 = vrot.slane %v7124_v22, 2  ;;  %v6503_v63 = vld [vmem:[%s8052_s1 + $0xd0] sm:$0xff]  }
  0xa3   : > { %5971 = vmatprep.subr.bf16.mxu0 %v6483_v39  ;;  %v2800_v34 = vsel %vm2320_vm2, %v2797_v47, %v2799_v52 }
  0xa6   : > { %5972 = vmatpush3.bf16.msra.mxu0 %v6483_v39  ;;  %v6529_v39 = vld [vmem:[%s6623_s24 + $0x28] sm:$0xff]  }
  0xa7   : > { %5973 = vmatprep.subr.bf16.mxu0 %v6487_v43  ;;  %v1058_v40 = vrot.slane %v6529_v39, 1 }
  0xa8   : > { %5694 = vmatmul.mubr.bf16.gmra.mrb[20].mxu1 %v6841_v48  ;;  %v2798_v48 = vsel %vm2320_vm2, %v2795_v46, %v2797_v47  ;;  %v7155_v47 = vld [vmem:[%s6623_s24 + $0x90] sm:$0xff]  }
  0xa9   : > { %5938 = vmatmul.mubr.bf16.gmra.mrb[4].mxu0 %v2792_v44  ;;  %5697 = vmatprep.mubr.bf16.mxu1 %v6853_v59  ;;  %v7071_v59 = vld [vmem:[%s6623_s24 + $0x58] sm:$0xff]   ;;  %v2813_v44 = vrot.slane %v7132_v30, 2  ;;  %v1059_v46 = vsel %vm1048_vm3, %v1056_v8, %v1058_v40 }
  0xaa   : > { %5941 = vmatprep.mubr.bf16.mxu0 %v2794_v41  ;;  %5974 = vmatpush3.bf16.msra.mxu0 %v6487_v43  ;;  %v2801_v53 = vrot.slane %v7071_v59, 2  ;;  %v6581_v43 = vmov 0   ;;  %v1057_v41 = vsel %vm1048_vm3, %v1054_v14, %v1056_v8  ;;  %v3140_v8 = vshrl.u32 %v7009_v27, 16 }
  0xab   : > { %5975 = vmatprep.subr.bf16.mxu0 %v6491_v45  ;;  %4418 = vst [vmem:[%s6628_s27] sm:$0xf] %v6581_v43  ;;  %4419 = vst [vmem:[%s6628_s27 + $0x4] sm:$0xf] %v6581_v43  ;;  %6388 = vset.pattern.permute.xlu0 %v6581_v43 }
  0xac   : > { %4961 = vst [vmem:[%s6628_s27 + $0x9c] sm:$0xf] %v6581_v43  ;;  %4962 = vst [vmem:[%s6628_s27 + $0xa0] sm:$0xf] %v6581_v43  ;;  %6389 = vset.pattern.permute.xlu1 %v6581_v43 }
  0xad   : > { %4963 = vst [vmem:[%s6628_s27 + $0xa4] sm:$0xf] %v6581_v43  ;;  %4964 = vst [vmem:[%s6628_s27 + $0xa8] sm:$0x7] %v6581_v43  ;;  %v3152_v43 = vshll.u32 %v7013_v32, 16 }
  0xae   : > { %5976 = vmatpush3.bf16.msra.mxu0 %v6491_v45  ;;  %v2812_v45 = vsel %vm2320_vm2, %v2809_v18, %v2811_v55  ;;  %v6532_v18 = vld [vmem:[%s6623_s24 + $0x40] sm:$0xff]  }
  0xaf   : > { %5977 = vmatprep.subr.bf16.mxu0 %v6496_v20 }
  0xb0   : > { %5698 = vmatmul.mubr.bf16.gmra.mrb[24].mxu1 %v6865_v9  ;;  %v7086_v9 = vld [vmem:[%s6623_s24 + $0x60] sm:$0xff]  }
  0xb1   : > { %5942 = vmatmul.mubr.bf16.gmra.mrb[8].mxu0 %v2796_v49  ;;  %5701 = vmatprep.mubr.bf16.mxu1 %v6882_v24  ;;  %v2802_v24 = vsel %vm2320_vm2, %v2799_v52, %v2801_v53  ;;  %v2803_v4 = vrot.slane %v7086_v9, 2  ;;  %v7159_v49 = vld [vmem:[%s6623_s24 + $0x98] sm:$0xff]  }
  0xb2   : > { %5945 = vmatprep.mubr.bf16.mxu0 %v2798_v48  ;;  %5978 = vmatpush3.bf16.msra.mxu0 %v6496_v20  ;;  %v2814_v20 = vsel %vm2320_vm2, %v2811_v55, %v2813_v44  ;;  %v6507_v48 = vld [vmem:[%s8052_s1 + $0xd8] sm:$0xff]   ;;  %v3143_v55 = vshll.u32 %v7009_v27, 16 }
  0xb3   : > { %5979 = vmatprep.subr.bf16.mxu0 %v6500_v51  ;;  %v2806_v42 = vsel %vm2320_vm2, %v2803_v4, %v2805_v5 }
  0xb6   : > { %5980 = vmatpush3.bf16.msra.mxu0 %v6500_v51  ;;  %v6530_v51 = vld [vmem:[%s6623_s24 + $0x30] sm:$0xff]  }
  0xb7   : > { %5981 = vmatprep.subr.bf16.mxu0 %v6504_v0  ;;  %v1060_v52 = vrot.slane %v6530_v51, 1  ;;  %v3145_v51 = vrot.slane %v3143_v55, 3  ;;  %v4001_v55 = vld [vmem:[%s8054_s3 + $0x7b] sm:$0xff] }
  0xb8   : > { %5702 = vmatmul.mubr.bf16.gmra.mrb[28].mxu1 %v6886_v33  ;;  %v7104_v33 = vld [vmem:[%s8052_s1 + $0x200] sm:$0xff]  }
  0xb9   : > { %5946 = vmatmul.mubr.bf16.gmra.mrb[12].mxu0 %v2800_v34  ;;  %5705 = vmatprep.mubr.bf16.mxu1 %v6904_v17  ;;  %v2804_v17 = vsel %vm2320_vm2, %v2801_v53, %v2803_v4  ;;  %v3990_v53 = vld [vmem:[%s8054_s3 + $0x23] sm:$0xff]  ;;  %v6531_v34 = vld [vmem:[%s6623_s24 + $0x38] sm:$0xff]   ;;  %v3131_v4 = vshrl.u32 %v6994_v56, 16  ;;  %v1061_v5 = vsel %vm1048_vm3, %v1058_v40, %v1060_v52 }
  0xba   : > { %5949 = vmatprep.mubr.bf16.mxu0 %v2802_v24  ;;  %5982 = vmatpush3.bf16.msra.mxu0 %v6504_v0  ;;  %v2815_v0 = vrot.slane %v7155_v47, 2  ;;  %v1062_v15 = vrot.slane %v6531_v34, 1  ;;  %v2817_v24 = vrot.slane %v7159_v49, 2  ;;  %v6534_v34 = vld [vmem:[%s6623_s24 + $0x50] sm:$0xff]  }
  0xbb   : > { %5983 = vmatprep.subr.bf16.mxu0 %v6508_v3  ;;  %4036 = vperm.xlu1 %6389, %v3990_v53   ;;  %v3133_v61 = vrot.slane %v3131_v4, 2  ;;  %v6535_v4 = vld [vmem:[%s6623_s24 + $0x58] sm:$0xff]  }
  0xbc   : > { %v1063_v56 = vsel %vm1048_vm3, %v1060_v52, %v1062_v15  ;;  %v2818_v11 = vsel %vm2320_vm2, %v2815_v0, %v2817_v24  ;;  %v1070_v16 = vrot.slane %v6535_v4, 1 }
  0xbd   : > { %v3137_v40 = vor.u32 %v3136_v13, %v3133_v61 }
  0xbe   : > { %5984 = vmatpush3.bf16.msra.mxu0 %v6508_v3  ;;  %v3126_v3 = vshll.u32 %v6991_v58, 16  ;;  %v3992_v58 = vld [vmem:[%s8054_s3 + $0x33] sm:$0xff] }
  0xbf   : > { %6021 = vmatprep.subr.bf16.mxu0 %v7104_v33  ;;  %4041 = vperm.xlu1 %6389, %v3991_v26   ;;  %v3161_v26 = vshll.u32 %v7029_v38, 16 }
  0xc0   : > { %5706 = vmatmul.mubr.bf16.gmra.mrb[32].mxu1 %v6911_v54  ;;  %v1055_v54 = vsel %vm1048_vm3, %v1052_v12, %v1054_v14  ;;  %v3128_v12 = vrot.slane %v3126_v3, 3  ;;  %v6511_v14 = vld [vmem:[%s8052_s1 + $0xe8] sm:$0xff]  }
  0xc1   : > { %5950 = vmatmul.mubr.bf16.gmra.mrb[16].mxu0 %v2804_v17  ;;  %5725 = vmatprep.mubr.bf16.mxu1 %v1051_v6  ;;  %v2816_v17 = vsel %vm2320_vm2, %v2813_v44, %v2815_v0  ;;  %v6506_v6 = vld [vmem:[%s6623_s24 + $0xa0] ss:$0 sps:$4 sm:$0x33]   ;;  %v3995_v44 = vld [vmem:[%s8054_s3 + $0x4b] sm:$0xff]  ;;  %v6515_v0 = vld [vmem:[%s8052_s1 + $0xf8] sm:$0xff]   ;;  %v3163_v13 = vrot.slane %v3161_v26, 3 }
  0xc2   : > { %5953 = vmatprep.mubr.bf16.mxu0 %v2806_v42  ;;  %v3125_v42 = vrot.slane %v3123_v1, 2  ;;  %v3997_v1 = vld [vmem:[%s8054_s3 + $0x5b] sm:$0xff] }
  0xc3   : > { %v4005_v26 = vld [vmem:[%s8054_s3 + $0x9b] sm:$0xff] }
  0xc4   : > { %v3129_v39 = vor.u32 %v3128_v12, %v3125_v42  ;;  %v4000_v42 = vld [vmem:[%s8054_s3 + $0x73] sm:$0xff] }
  0xc6   : > { %v3138_v52 = vsel %vm3121_vm4, %v3129_v39, %v3137_v40  ;;  %v4002_v39 = vld [vmem:[%s8054_s3 + $0x83] sm:$0xff] }
  0xc8   : > { %5726 = vmatmul.mubr.bf16.vlgmr.msra.gmra.mrb[0].mxu1 %v1053_v19  ;;  %v1064_v19 = vrot.slane %v6532_v18, 1 }
  0xc9   : > { %5954 = vmatmul.mubr.bf16.gmra.mrb[20].mxu0 %v2808_v21  ;;  %5762 = vmatpush3.bf16.msra.mxu1 %v7025_v37  ;;  %v3988_v37 = vld [vmem:[%s8054_s3 + $0x13] sm:$0xff]  ;;  %v3993_v21 = vld [vmem:[%s8054_s3 + $0x3b] sm:$0xff] }
  0xca   : > { %5729 = vmatprep.mubr.bf16.mxu1 %v1055_v54  ;;  %5957 = vmatprep.mubr.bf16.mxu0 %v2810_v23  ;;  %v3994_v54 = vld [vmem:[%s8054_s3 + $0x43] sm:$0xff]  ;;  %v2819_v23 = vrot.slane %v6506_v6, 2 }
  0xcb   : > { %5763 = vmatprep.subr.bf16.mxu1 %v6499_v28  ;;  %4026 = vperm.xlu0 %6388, %v3988_v37   ;;  %v6513_v37 = vld [vmem:[%s8052_s1 + $0xf0] sm:$0xff]  }
  0xcc   : > { %4051 = vperm.xlu1 %6389, %v3993_v21   ;;  %v6512_v21 = vld [vmem:[%s8052_s1 + $0x208] sm:$0xff]  }
  0xcd   : > { %5764 = vmatpush3.bf16.msra.mxu1 %v6499_v28  ;;  %v6533_v28 = vld [vmem:[%s6623_s24 + $0x48] sm:$0xff]  }
  0xce   : > { %5765 = vmatprep.subr.bf16.mxu1 %v6503_v63  ;;  %v1066_v31 = vrot.slane %v6533_v28, 1 }
  0xcf   : > { %4031 = vperm.xlu0 %6388, %v3989_v57   ;;  %v3154_v57 = vrot.slane %v3152_v43, 3  ;;  %v3179_v43 = vshll.u32 %v7049_v29, 16 }
  0xd0   : > { %5730 = vmatmul.mubr.bf16.gmra.mrb[4].mxu1 %v1057_v41  ;;  %v1065_v41 = vsel %vm1048_vm3, %v1062_v15, %v1064_v19  ;;  %4061 = vperm.xlu1 %6389, %v3995_v44   ;;  %v1068_v15 = vrot.slane %v6534_v34, 1  ;;  %v3185_v44 = vshrl.u32 %v7052_v36, 16 }
  0xd1   : > { %5958 = vmatmul.mubr.bf16.gmra.mrb[24].mxu0 %v2812_v45  ;;  %5733 = vmatprep.mubr.bf16.mxu1 %v1059_v46  ;;  %v3996_v45 = vld [vmem:[%s8054_s3 + $0x53] sm:$0xff]  ;;  %v2820_v46 = vsel %vm2320_vm2, %v2817_v24, %v2819_v23  ;;  %v3998_v24 = vld [vmem:[%s8054_s3 + $0x63] sm:$0xff] }
  0xd2   : > { %5961 = vmatprep.mubr.bf16.mxu0 %v2814_v20  ;;  %5766 = vmatpush3.bf16.msra.mxu1 %v6503_v63  ;;  %v3149_v63 = vshrl.u32 %v7013_v32, 16  ;;  %v1067_v20 = vsel %vm1048_vm3, %v1064_v19, %v1066_v31  ;;  %v1069_v6 = vsel %vm1048_vm3, %v1066_v31, %v1068_v15  ;;  %v1071_v12 = vsel %vm1048_vm3, %v1068_v15, %v1070_v16  ;;  %v6537_v23 = vld [vmem:[%s6623_s24 + $0x60] sm:$0xff]   ;;  %v6538_v31 = vld [vmem:[%s6623_s24 + $0x68] sm:$0xff]  }
  0xd3   : > { %5767 = vmatprep.subr.bf16.mxu1 %v6507_v48  ;;  %4046 = vperm.xlu0 %6388, %v3992_v58   ;;  %v3167_v58 = vshrl.u32 %v7033_v2, 16  ;;  %v1072_v28 = vrot.slane %v6537_v23, 1 }
  0xd4   : > { %v3151_v53 = vrot.slane %v3149_v63, 2  ;;  %4071 = vperm.xlu1 %6389, %v3997_v1   ;;  %v3176_v63 = vshrl.u32 %v7049_v29, 16  ;;  %v3187_v1 = vrot.slane %v3185_v44, 2  ;;  %v4010_v44 = vld [vmem:[%s8054_s3 + $0xc3] sm:$0xff] }
  0xd5   : > { %v3169_v18 = vrot.slane %v3167_v58, 2 }
  0xd6   : > { %5768 = vmatpush3.bf16.msra.mxu1 %v6507_v48  ;;  %v3142_v48 = vrot.slane %v3140_v8, 2  ;;  %v1074_v8 = vrot.slane %v6538_v31, 1 }
  0xd7   : > { %5769 = vmatprep.subr.bf16.mxu1 %v6509_v60  ;;  %4056 = vperm.xlu0 %6388, %v3994_v54   ;;  %v7251_v54 = vld [vmem:[%s8052_s1 + $0x100] sm:$0xff]  }
  0xd8   : > { %5734 = vmatmul.mubr.bf16.gmra.mrb[8].mxu1 %v1061_v5  ;;  %v3146_v3 = vor.u32 %v3145_v51, %v3142_v48  ;;  %v3155_v5 = vor.u32 %v3154_v57, %v3151_v53  ;;  %v1073_v48 = vsel %vm1048_vm3, %v1070_v16, %v1072_v28  ;;  %v1075_v51 = vsel %vm1048_vm3, %v1072_v28, %v1074_v8  ;;  %v6539_v16 = vld [vmem:[%s6623_s24 + $0x70] sm:$0xff]  }
  0xd9   : > { %5962 = vmatmul.mubr.bf16.gmra.mrb[28].mxu0 %v2816_v17  ;;  %5737 = vmatprep.mubr.bf16.mxu1 %v1063_v56  ;;  %v3170_v17 = vshll.u32 %v7033_v2, 16  ;;  %v3999_v56 = vld [vmem:[%s8054_s3 + $0x6b] sm:$0xff]  ;;  %v3178_v57 = vrot.slane %v3176_v63, 2  ;;  %v4009_v63 = vld [vmem:[%s8054_s3 + $0xbb] sm:$0xff] }
  0xda   : > { %5965 = vmatprep.mubr.bf16.mxu0 %v2818_v11  ;;  %5770 = vmatpush3.bf16.msra.mxu1 %v6509_v60  ;;  %v3158_v60 = vshrl.u32 %v7029_v38, 16  ;;  %v3147_v11 = vsel %vm3121_vm4, %v3137_v40, %v3146_v3 }
  0xdb   : > { %5771 = vmatprep.subr.bf16.mxu1 %v6511_v14  ;;  %4066 = vperm.xlu0 %6388, %v3996_v45   ;;  %v3172_v19 = vrot.slane %v3170_v17, 3  ;;  %v6514_v45 = vld [vmem:[%s8052_s1 + $0x210] sm:$0xff]   ;;  %v6540_v17 = vld [vmem:[%s6623_s24 + $0x78] sm:$0xff]  }
  0xdc   : > { %v3160_v61 = vrot.slane %v3158_v60, 2  ;;  %4081 = vperm.xlu1 %6389, %v3999_v56   ;;  %v1076_v60 = vrot.slane %v6539_v16, 1  ;;  %v1078_v56 = vrot.slane %v6540_v17, 1  ;;  %v6521_v17 = vld [vmem:[%s8052_s1 + $0x238] sm:$0xff]  }
  0xde   : > { %5772 = vmatpush3.bf16.msra.mxu1 %v6511_v14  ;;  %v3156_v14 = vsel %vm3121_vm4, %v3146_v3, %v3155_v5  ;;  %v3164_v40 = vor.u32 %v3163_v13, %v3160_v61  ;;  %v6516_v3 = vld [vmem:[%s8052_s1 + $0x218] sm:$0xff]   ;;  %v3206_v61 = vshll.u32 %v7071_v59, 16  ;;  %v6517_v13 = vld [vmem:[%s8052_s1 + $0x220] sm:$0xff]   ;;  %v1079_v23 = vsel %vm1048_vm3, %v1076_v60, %v1078_v56 }
  0xdf   : > { %5773 = vmatprep.subr.bf16.mxu1 %v6513_v37  ;;  %4076 = vperm.xlu0 %6388, %v3998_v24  }
  0xe0   : > { %5738 = vmatmul.mubr.bf16.gmra.mrb[12].mxu1 %v1065_v41  ;;  %v3188_v41 = vshll.u32 %v7052_v36, 16  ;;  %4091 = vperm.xlu1 %6389, %v4001_v55   ;;  %v3165_v53 = vsel %vm3121_vm4, %v3155_v5, %v3164_v40  ;;  %v4006_v5 = vld [vmem:[%s8054_s3 + $0xa3] sm:$0xff] }
  0xe1   : > { %5966 = vmatmul.mubr.bf16.gmra.mrb[32].mxu0 %v2820_v46  ;;  %5741 = vmatprep.mubr.bf16.mxu1 %v1067_v20  ;;  %v7271_v46 = vld [vmem:[%s6623_s24 + $0xa0] ss:$0 sps:$4 sm:$0x77]   ;;  %v3626_v20 = vrot.slane %v7159_v49, 3 }
  0xe2   : > { %5985 = vmatprep.mubr.bf16.mxu0 %v3138_v52  ;;  %5774 = vmatpush3.bf16.msra.mxu1 %v6513_v37  ;;  %v3173_v37 = vor.u32 %v3172_v19, %v3169_v18  ;;  %v4004_v52 = vld [vmem:[%s8054_s3 + $0x93] sm:$0xff]  ;;  %v3628_v34 = vrot.slane %v7271_v46, 3  ;;  %v3190_v24 = vrot.slane %v3188_v41, 3  ;;  %v1077_v18 = vsel %vm1048_vm3, %v1074_v8, %v1076_v60  ;;  %v6518_v8 = vld [vmem:[%s8052_s1 + $0x228] sm:$0xff]  }
  0xe3   : > { %5775 = vmatprep.subr.bf16.mxu1 %v6515_v0  ;;  %4086 = vperm.xlu0 %6388, %v4000_v42   ;;  %v3197_v42 = vshll.u32 %v7067_v50, 16  ;;  %v4008_v19 = vld [vmem:[%s8054_s3 + $0xb3] sm:$0xff] }
  0xe4   : > { %v3174_v15 = vsel %vm3121_vm4, %v3164_v40, %v3173_v37  ;;  %v7291_v4 = vsel %vm3592_vm5, %v3626_v20, %v3628_v34  ;;  %v3208_v40 = vrot.slane %v3206_v61, 3  ;;  %v4011_v34 = vld [vmem:[%s8054_s3 + $0xcb] sm:$0xff] }
  0xe5   : > { %v3199_v31 = vrot.slane %v3197_v42, 3 }
  0xe6   : > { %5776 = vmatpush3.bf16.msra.mxu1 %v6515_v0  ;;  %v3181_v0 = vrot.slane %v3179_v43, 3  ;;  %v6541_v43 = vld [vmem:[%s6623_s24 + $0x80] sm:$0xff]  }
  0xe7   : > { %6073 = vmatprep.subr.bf16.mxu1 %v7251_v54  ;;  %4096 = vperm.xlu0 %6388, %v4002_v39  }
  0xe8   : > { %5742 = vmatmul.mubr.bf16.gmra.mrb[16].mxu1 %v1069_v6  ;;  %v3182_v58 = vor.u32 %v3181_v0, %v3178_v57  ;;  %v3194_v6 = vshrl.u32 %v7067_v50, 16  ;;  %v3224_v57 = vshll.u32 %v7091_v62, 16  ;;  %v6519_v0 = vld [vmem:[%s8052_s1 + $0x230] sm:$0xff]  }
  0xe9   : > { %5986 = vmatmul.mubr.bf16.vlgmr.msra.gmra.mrb[0].mxu0 %v3147_v11  ;;  %5745 = vmatprep.mubr.bf16.mxu1 %v1071_v12  ;;  %v3191_v11 = vor.u32 %v3190_v24, %v3187_v1  ;;  %v3203_v12 = vshrl.u32 %v7071_v59, 16  ;;  %v4012_v1 = vld [vmem:[%s8054_s3 + $0xd3] sm:$0xff] }
  0xea   : > { %5989 = vmatprep.mubr.bf16.mxu0 %v3156_v14  ;;  %6022 = vmatpush3.bf16.msra.mxu0 %v7104_v33  ;;  %v4003_v33 = vld [vmem:[%s8054_s3 + $0x8b] sm:$0xff]  ;;  %v3196_v28 = vrot.slane %v3194_v6, 2 }
  0xeb   : > { %6023 = vmatprep.subr.bf16.mxu0 %v6512_v21  ;;  %4101 = vperm.xlu1 %6389, %v4003_v33   ;;  %v4007_v14 = vld [vmem:[%s8054_s3 + $0xab] sm:$0xff]  ;;  %v3192_v55 = vsel %vm3121_vm4, %v3182_v58, %v3191_v11  ;;  %v3205_v39 = vrot.slane %v3203_v12, 2  ;;  %v4014_v12 = vld [vmem:[%s8054_s3 + $0xe3] sm:$0xff] }
  0xec   : > { %4106 = vperm.xlu0 %6388, %v4004_v52   ;;  %v3200_v41 = vor.u32 %v3199_v31, %v3196_v28  ;;  %v6543_v6 = vld [vmem:[%s6623_s24 + $0x90] ss:$0 sps:$4 sm:$0x11]   ;;  %v3242_v28 = vshll.u32 %v7113_v10, 16 }
  0xed   : > { %v3209_v52 = vor.u32 %v3208_v40, %v3205_v39  ;;  %v1084_v42 = vrot.slane %v6543_v6, 1 }
  0xee   : > { %6024 = vmatpush3.bf16.msra.mxu0 %v6512_v21  ;;  %v3183_v21 = vsel %vm3121_vm4, %v3173_v37, %v3182_v58  ;;  %v1080_v37 = vrot.slane %v6541_v43, 1  ;;  %v3201_v24 = vsel %vm3121_vm4, %v3191_v11, %v3200_v41  ;;  %v3226_v58 = vrot.slane %v3224_v57, 3  ;;  %v6546_v57 = vld [vmem:[%s6623_s24 + $0x20] sm:$0xff]  }
  0xef   : > { %6025 = vmatprep.subr.bf16.mxu0 %v6514_v45  ;;  %4111 = vperm.xlu1 %6389, %v4005_v26   ;;  %v3210_v26 = vsel %vm3121_vm4, %v3200_v41, %v3209_v52  ;;  %v1512_v11 = vrot.slane %v6693_v25, 1  ;;  %v4015_v25 = vld [vmem:[%s8054_s3 + $0xeb] sm:$0xff]  ;;  %v4017_v41 = vld [vmem:[%s8054_s3 + $0xfb] sm:$0xff] }
  0xf0   : > { %5746 = vmatmul.mubr.bf16.gmra.mrb[20].mxu1 %v1073_v48  ;;  %4116 = vperm.xlu0 %6388, %v4006_v5   ;;  %v3212_v48 = vshrl.u32 %v7086_v9, 16 }
  0xf1   : > { %5990 = vmatmul.mubr.bf16.gmra.mrb[4].mxu0 %v3165_v53  ;;  %5749 = vmatprep.mubr.bf16.mxu1 %v1075_v51  ;;  %v3215_v51 = vshll.u32 %v7086_v9, 16  ;;  %v3221_v53 = vshrl.u32 %v7091_v62, 16 }
  0xf2   : > { %5993 = vmatprep.mubr.bf16.mxu0 %v3174_v15  ;;  %6026 = vmatpush3.bf16.msra.mxu0 %v6514_v45  ;;  %v6542_v45 = vld [vmem:[%s6623_s24 + $0x88] sm:$0xff]   ;;  %v1081_v15 = vsel %vm1048_vm3, %v1078_v56, %v1080_v37  ;;  %v3214_v16 = vrot.slane %v3212_v48, 2  ;;  %v4013_v56 = vld [vmem:[%s8054_s3 + $0xdb] sm:$0xff] }
  0xf3   : > { %6027 = vmatprep.subr.bf16.mxu0 %v6516_v3  ;;  %4121 = vperm.xlu1 %6389, %v4007_v14   ;;  %v1082_v33 = vrot.slane %v6542_v45, 1  ;;  %v3217_v60 = vrot.slane %v3215_v51, 3  ;;  %v3223_v5 = vrot.slane %v3221_v53, 2  ;;  %v6545_v45 = vld [vmem:[%s6623_s24 + $0x18] sm:$0xff]   ;;  %v4018_v48 = vld [vmem:[%s8054_s3 + $0x103] sm:$0xff]  ;;  %v3251_v53 = vshll.u32 %v7124_v22, 16 }
  0xf4   : > { %4126 = vperm.xlu0 %6388, %v4008_v19   ;;  %v3233_v19 = vshll.u32 %v7109_v7, 16 }
  0xf5   : > { %v3218_v61 = vor.u32 %v3217_v60, %v3214_v16  ;;  %v1085_v31 = vsel %vm1048_vm3, %v1082_v33, %v1084_v42  ;;  %v4020_v16 = vld [vmem:[%s8054_s3 + $0x113] sm:$0xff]  ;;  %v4021_v42 = vld [vmem:[%s8054_s3 + $0x11b] sm:$0xff] }
  0xf6   : > { %6028 = vmatpush3.bf16.msra.mxu0 %v6516_v3  ;;  %v1083_v3 = vsel %vm1048_vm3, %v1080_v37, %v1082_v33  ;;  %v1515_v33 = vrot.slane %v6545_v45, 1  ;;  %v6551_v45 = vld [vmem:[%s6623_s24 + $0x38] sm:$0xff]  }
  0xf7   : > { %6029 = vmatprep.subr.bf16.mxu0 %v6517_v13  ;;  %4131 = vperm.xlu1 %6389, %v4009_v63   ;;  %v3219_v39 = vsel %vm3121_vm4, %v3209_v52, %v3218_v61  ;;  %v3235_v63 = vrot.slane %v3233_v19, 3  ;;  %v3248_v52 = vshrl.u32 %v7124_v22, 16  ;;  %v3266_v19 = vshrl.u32 %v7155_v47, 16 }
  0xf8   : > { %5750 = vmatmul.mubr.bf16.gmra.mrb[24].mxu1 %v1077_v18  ;;  %4136 = vperm.xlu0 %6388, %v4010_v44   ;;  %v3230_v18 = vshrl.u32 %v7109_v7, 16  ;;  %v3244_v44 = vrot.slane %v3242_v28, 3  ;;  %v3275_v28 = vshrl.u32 %v7159_v49, 16 }
  0xf9   : > { %5994 = vmatmul.mubr.bf16.gmra.mrb[8].mxu0 %v3183_v21  ;;  %5753 = vmatprep.mubr.bf16.mxu1 %v1079_v23  ;;  %v3227_v21 = vor.u32 %v3226_v58, %v3223_v5  ;;  %v3239_v23 = vshrl.u32 %v7113_v10, 16  ;;  %v3253_v5 = vrot.slane %v3251_v53, 3  ;;  %v3284_v53 = vshrl.u32 %v7271_v46, 16 }
  0xfa   : > { %5997 = vmatprep.mubr.bf16.mxu0 %v3192_v55  ;;  %6030 = vmatpush3.bf16.msra.mxu0 %v6517_v13  ;;  %v6544_v13 = vld [vmem:[%s6623_s24 + $0x10] sm:$0xff]  }
  0xfb   : > { %6031 = vmatprep.subr.bf16.mxu0 %v6518_v8  ;;  %4141 = vperm.xlu1 %6389, %v4011_v34   ;;  %v1513_v14 = vrot.slane %v6544_v13, 1  ;;  %v4016_v55 = vld [vmem:[%s8054_s3 + $0xf3] sm:$0xff]  ;;  %v3228_v43 = vsel %vm3121_vm4, %v3218_v61, %v3227_v21  ;;  %v3241_v37 = vrot.slane %v3239_v23, 2  ;;  %v4022_v61 = vld [vmem:[%s8054_s3 + $0x123] sm:$0xff] }
  0xfc   : > { %4146 = vperm.xlu0 %6388, %v4012_v1   ;;  %v3260_v1 = vshll.u32 %v7132_v30, 16  ;;  %v6549_v23 = vld [vmem:[%s8052_s1 + $0x108] sm:$0xff]  }
  0xfd   : > { %v1514_v40 = vsel %vm1048_vm3, %v1512_v11, %v1513_v14  ;;  %v3245_v34 = vor.u32 %v3244_v44, %v3241_v37  ;;  %v6547_v11 = vld [vmem:[%s6623_s24 + $0x28] sm:$0xff]   ;;  %v3277_v44 = vrot.slane %v3275_v28, 2  ;;  %v7453_v28 = vld [vmem:[%s6623_s24 + $0x58] sm:$0xff]  }
  0xfe   : > { %6032 = vmatpush3.bf16.msra.mxu0 %v6518_v8  ;;  %v3232_v8 = vrot.slane %v3230_v18, 2  ;;  %v3262_v6 = vrot.slane %v3260_v1, 3 }
  0xff   : > { %6033 = vmatprep.subr.bf16.mxu0 %v6519_v0  ;;  %4151 = vperm.xlu1 %6389, %v4013_v56  }
 0x100   : > { %5754 = vmatmul.mubr.bf16.gmra.mrb[28].mxu1 %v1081_v15  ;;  %4156 = vperm.xlu0 %6388, %v4014_v12   ;;  %v3236_v51 = vor.u32 %v3235_v63, %v3232_v8  ;;  %v3257_v15 = vshrl.u32 %v7132_v30, 16  ;;  %v1519_v12 = vrot.slane %v6547_v11, 1  ;;  %v3268_v8 = vrot.slane %v3266_v19, 2 }
 0x101   : > { %5998 = vmatmul.mubr.bf16.gmra.mrb[12].mxu0 %v3201_v24  ;;  %5757 = vmatprep.mubr.bf16.mxu1 %v1083_v3  ;;  %v4019_v24 = vld [vmem:[%s8054_s3 + $0x10b] sm:$0xff]  ;;  %v1516_v3 = vsel %vm1048_vm3, %v1513_v14, %v1515_v33 }
 0x102   : > { %6001 = vmatprep.mubr.bf16.mxu0 %v3210_v26  ;;  %6034 = vmatpush3.bf16.msra.mxu0 %v6519_v0  ;;  %v1517_v0 = vrot.slane %v6546_v57, 1  ;;  %v3237_v60 = vsel %vm3121_vm4, %v3227_v21, %v3236_v51  ;;  %v3250_v26 = vrot.slane %v3248_v52, 2  ;;  %v3259_v56 = vrot.slane %v3257_v15, 2  ;;  %v6548_v14 = vld [vmem:[%s6623_s24 + $0x30] sm:$0xff]  }
 0x103   : > { %6035 = vmatprep.subr.bf16.mxu0 %v6521_v17  ;;  %4161 = vperm.xlu1 %6389, %v4015_v25   ;;  %v1521_v18 = vrot.slane %v6548_v14, 1  ;;  %v3269_v21 = vshll.u32 %v7155_v47, 16  ;;  %v3278_v25 = vshll.u32 %v7159_v49, 16  ;;  %v3287_v57 = vshll.u32 %v7271_v46, 16  ;;  %v3571_v15 = vld [vmem:[%s6623_s24 + $0x10] sm:$0x8] }
 0x104   : > { %4166 = vperm.xlu0 %6388, %v4016_v55   ;;  %v1518_v58 = vsel %vm1048_vm3, %v1515_v33, %v1517_v0  ;;  %v3254_v13 = vor.u32 %v3253_v5, %v3250_v26  ;;  %v1520_v55 = vsel %vm1048_vm3, %v1517_v0, %v1519_v12  ;;  %v1523_v33 = vrot.slane %v6551_v45, 1  ;;  %v6554_v26 = vld [vmem:[%s6623_s24 + $0x14] sm:$0xf]  ;;  %v6559_v14 = vld [vmem:[%s8052_s1 + $0x128] sm:$0xff]  }
 0x105   : > { %v3271_v63 = vrot.slane %v3269_v21, 3  ;;  %v5287_v5 = vcombine.low %v3571_v15, %v6554_v26  ;;  %v7475_v45 = vld [vmem:[%s6623_s24 + $0x70] sm:$0xff]   ;;  %v3608_v26 = vrot.slane %v7067_v50, 3 }
 0x106   : > { %6036 = vmatpush3.bf16.msra.mxu0 %v6521_v17  ;;  %v3246_v17 = vsel %vm3121_vm4, %v3236_v51, %v3245_v34  ;;  %v6552_v51 = vld [vmem:[%s6623_s24 + $0x40] sm:$0xff]   ;;  %v1524_v1 = vsel %vm1048_vm3, %v1521_v18, %v1523_v33 }
 0x107   : > { %4171 = vperm.xlu1 %6389, %v4017_v41   ;;  %v3280_v41 = vrot.slane %v3278_v25, 3  ;;  %v1525_v52 = vrot.slane %v6552_v51, 1  ;;  %v1531_v25 = vrot.slane %v7453_v28, 1 }
 0x108   : > { %5758 = vmatmul.mubr.bf16.gmra.mrb[32].mxu1 %v1085_v31  ;;  %4176 = vperm.xlu0 %6388, %v4018_v48   ;;  %v4023_v31 = vld [vmem:[%s8054_s3 + $0x12b] sm:$0xff]  ;;  %v3272_v48 = vor.u32 %v3271_v63, %v3268_v8  ;;  %v6563_v8 = vld [vmem:[%s8052_s1 + $0x138] sm:$0xff]  }
 0x109   : > { %6002 = vmatmul.mubr.bf16.gmra.mrb[16].mxu0 %v3219_v39  ;;  %5777 = vmatprep.mubr.bf16.mxu1 %v1514_v40  ;;  %v3255_v39 = vsel %vm3121_vm4, %v3245_v34, %v3254_v13  ;;  %v1522_v40 = vsel %vm1048_vm3, %v1519_v12, %v1521_v18  ;;  %v3281_v0 = vor.u32 %v3280_v41, %v3277_v44  ;;  %v6553_v34 = vld [vmem:[%s8052_s1 + $0x118] sm:$0xff]   ;;  %v3593_v12 = vrot.slane %v5287_v5, 3  ;;  %v7470_v44 = vld [vmem:[%s6623_s24 + $0x68] sm:$0xff]  }
 0x10a   : > { %6005 = vmatprep.mubr.bf16.mxu0 %v3228_v43  ;;  %v6550_v43 = vld [vmem:[%s8052_s1 + $0x110] sm:$0xff]   ;;  %v3600_v41 = vrot.slane %v7029_v38, 3 }
 0x10b   : > { %4181 = vperm.xlu1 %6389, %v4019_v24   ;;  %v3282_v46 = vsel %vm3121_vm4, %v3272_v48, %v3281_v0 }
 0x10c   : > { %4186 = vperm.xlu0 %6388, %v4020_v16   ;;  %v3286_v16 = vrot.slane %v3284_v53, 2 }
 0x10f   : > { %4191 = vperm.xlu1 %6389, %v4021_v42   ;;  %v7438_v42 = vld [vmem:[%s6623_s24 + $0x50] sm:$0xff]  }
 0x110   : > { %5778 = vmatmul.mubr.bf16.vlgmr.msra.gmra.mrb[0].mxu1 %v1516_v3  ;;  %4196 = vperm.xlu0 %6388, %v4022_v61   ;;  %v1526_v3 = vsel %vm1048_vm3, %v1523_v33, %v1525_v52  ;;  %v1529_v11 = vrot.slane %v7438_v42, 1  ;;  %v6558_v61 = vld [vmem:[%s6623_s24 + $0x18] sm:$0xff]   ;;  %v1537_v33 = vrot.slane %v7475_v45, 1 }
 0x111   : > { %6006 = vmatmul.mubr.bf16.gmra.mrb[20].mxu0 %v3237_v60  ;;  %6081 = vmatpush3.bf16.msra.mxu1 %v7251_v54  ;;  %v3263_v54 = vor.u32 %v3262_v6, %v3259_v56  ;;  %v3289_v60 = vrot.slane %v3287_v57, 3 }
 0x112   : > { %5781 = vmatprep.mubr.bf16.mxu1 %v1518_v58  ;;  %6009 = vmatprep.mubr.bf16.mxu0 %v3246_v17  ;;  %v6555_v58 = vld [vmem:[%s8052_s1 + $0x120] sm:$0xff]   ;;  %v6556_v17 = vld [vmem:[%s6623_s24 + $0x48] sm:$0xff]   ;;  %v1532_v63 = vsel %vm1048_vm3, %v1529_v11, %v1531_v25 }
 0x113   : > { %6074 = vmatprep.subr.bf16.mxu1 %v6549_v23  ;;  %v3264_v37 = vsel %vm3121_vm4, %v3254_v13, %v3263_v54  ;;  %4201 = vperm.xlu1 %6389, %v4023_v31   ;;  %v3273_v24 = vsel %vm3121_vm4, %v3263_v54, %v3272_v48  ;;  %v1527_v56 = vrot.slane %v6556_v17, 1  ;;  %v3290_v6 = vor.u32 %v3289_v60, %v3286_v16  ;;  %v6560_v54 = vld [vmem:[%s8052_s1 + $0x130] sm:$0xff]  }
 0x114   : > { %v3594_v13 = vrot.slane %v6558_v61, 3  ;;  %v3596_v31 = vrot.slane %v7009_v27, 3  ;;  %v3602_v48 = vrot.slane %v7033_v2, 3  ;;  %v3604_v2 = vrot.slane %v7049_v29, 3 }
 0x115   : > { %6082 = vmatpush3.bf16.msra.mxu1 %v6549_v23  ;;  %v1528_v18 = vsel %vm1048_vm3, %v1525_v52, %v1527_v56  ;;  %v3291_v19 = vsel %vm3121_vm4, %v3281_v0, %v3290_v6  ;;  %v1530_v21 = vsel %vm1048_vm3, %v1527_v56, %v1529_v11  ;;  %v7484_v0 = vld [vmem:[%s6623_s24 + $0x78] sm:$0xff]   ;;  %v1934_v17 = vshll.u32 %v7438_v42, 16 }
 0x116   : > { %6075 = vmatprep.subr.bf16.mxu1 %v6550_v43  ;;  %v3595_v23 = vsel %vm3592_vm5, %v3593_v12, %v3594_v13  ;;  %v3603_v57 = vsel %vm3592_vm5, %v3600_v41, %v3602_v48  ;;  %v1539_v38 = vrot.slane %v7484_v0, 1  ;;  %v3610_v56 = vrot.slane %v7071_v59, 3  ;;  %v6523_v11 = vld [vmem:[%s6623_s24 + $0x98] ss:$0 sps:$4 sm:$0x11]  }
 0x117   : > { %v3612_v59 = vrot.slane %v7086_v9, 3 }
 0x118   : > { %5782 = vmatmul.mubr.bf16.gmra.mrb[4].mxu1 %v1520_v55  ;;  %v7458_v55 = vld [vmem:[%s6623_s24 + $0x60] sm:$0xff]   ;;  %v3611_v50 = vsel %vm3592_vm5, %v3608_v26, %v3610_v56 }
 0x119   : > { %6010 = vmatmul.mubr.bf16.gmra.mrb[24].mxu0 %v3255_v39  ;;  %5785 = vmatprep.mubr.bf16.mxu1 %v1522_v40  ;;  %v1533_v39 = vrot.slane %v7458_v55, 1  ;;  %v3598_v40 = vrot.slane %v7013_v32, 3  ;;  %v1535_v32 = vrot.slane %v7470_v44, 1 }
 0x11a   : > { %6013 = vmatprep.mubr.bf16.mxu0 %v3264_v37  ;;  %6083 = vmatpush3.bf16.msra.mxu1 %v6550_v43  ;;  %v3597_v43 = vsel %vm3592_vm5, %v3594_v13, %v3596_v31 }
 0x11b   : > { %6076 = vmatprep.subr.bf16.mxu1 %v6553_v34  ;;  %v1534_v37 = vsel %vm1048_vm3, %v1531_v25, %v1533_v39  ;;  %v3599_v27 = vsel %vm3592_vm5, %v3596_v31, %v3598_v40  ;;  %v1536_v51 = vsel %vm1048_vm3, %v1533_v39, %v1535_v32  ;;  %v3601_v52 = vsel %vm3592_vm5, %v3598_v40, %v3600_v41 }
 0x11c   : > { %v1538_v53 = vsel %vm1048_vm3, %v1535_v32, %v1537_v33  ;;  %v3614_v25 = vrot.slane %v7091_v62, 3  ;;  %v1961_v62 = vshll.u32 %v7470_v44, 16  ;;  %v1967_v41 = vshrl.u32 %v7475_v45, 16 }
 0x11e   : > { %6084 = vmatpush3.bf16.msra.mxu1 %v6553_v34  ;;  %v7489_v34 = vld [vmem:[%s6623_s24 + $0x80] sm:$0xff]   ;;  %v3615_v9 = vsel %vm3592_vm5, %v3612_v59, %v3614_v25 }
 0x11f   : > { %6077 = vmatprep.subr.bf16.mxu1 %v6555_v58  ;;  %v1541_v15 = vrot.slane %v7489_v34, 1 }
 0x120   : > { %5786 = vmatmul.mubr.bf16.gmra.mrb[8].mxu1 %v1524_v1  ;;  %v3606_v1 = vrot.slane %v7052_v36, 3  ;;  %v7503_v36 = vld [vmem:[%s6623_s24 + $0x90] sm:$0xff]  }
 0x121   : > { %6014 = vmatmul.mubr.bf16.gmra.mrb[28].mxu0 %v3273_v24  ;;  %5789 = vmatprep.mubr.bf16.mxu1 %v1526_v3  ;;  %v1540_v24 = vsel %vm1048_vm3, %v1537_v33, %v1539_v38  ;;  %v3605_v3 = vsel %vm3592_vm5, %v3602_v48, %v3604_v2  ;;  %v1542_v16 = vsel %vm1048_vm3, %v1539_v38, %v1541_v15  ;;  %v1545_v5 = vrot.slane %v7503_v36, 1 }
 0x122   : > { %6017 = vmatprep.mubr.bf16.mxu0 %v3282_v46  ;;  %6085 = vmatpush3.bf16.msra.mxu1 %v6555_v58  ;;  %v3607_v60 = vsel %vm3592_vm5, %v3604_v2, %v3606_v1  ;;  %v7498_v46 = vld [vmem:[%s6623_s24 + $0x88] sm:$0xff]   ;;  %v1931_v58 = vshrl.u32 %v7438_v42, 16  ;;  %v3609_v12 = vsel %vm3592_vm5, %v3606_v1, %v3608_v26  ;;  %v1943_v42 = vshll.u32 %v7453_v28, 16 }
 0x123   : > { %6078 = vmatprep.subr.bf16.mxu1 %v6559_v14  ;;  %v1543_v29 = vrot.slane %v7498_v46, 1  ;;  %v3618_v33 = vrot.slane %v7113_v10, 3  ;;  %v1969_v38 = vrot.slane %v1967_v41, 1  ;;  %v1979_v10 = vshll.u32 %v7484_v0, 16 }
 0x124   : > { %v1933_v13 = vrot.slane %v1931_v58, 1  ;;  %v1945_v40 = vrot.slane %v1943_v42, 2 }
 0x125   : > { %v1544_v6 = vsel %vm1048_vm3, %v1541_v15, %v1543_v29  ;;  %v1546_v61 = vsel %vm1048_vm3, %v1543_v29, %v1545_v5  ;;  %v3620_v15 = vrot.slane %v7124_v22, 3  ;;  %v1981_v26 = vrot.slane %v1979_v10, 2 }
 0x126   : > { %6086 = vmatpush3.bf16.msra.mxu1 %v6559_v14  ;;  %v1936_v14 = vrot.slane %v1934_v17, 2 }
 0x127   : > { %6079 = vmatprep.subr.bf16.mxu1 %v6560_v54 }
 0x128   : > { %5790 = vmatmul.mubr.bf16.gmra.mrb[12].mxu1 %v1528_v18  ;;  %v1547_v18 = vrot.slane %v6523_v11, 1 }
 0x129   : > { %6018 = vmatmul.mubr.bf16.gmra.mrb[32].mxu0 %v3291_v19  ;;  %5793 = vmatprep.mubr.bf16.mxu1 %v1530_v21  ;;  %v1940_v19 = vshrl.u32 %v7453_v28, 16  ;;  %v1937_v21 = vor.u32 %v1936_v14, %v1933_v13 }
 0x12a   : > { %6037 = vmatprep.mubr.bf16.mxu0 %v3595_v23  ;;  %6087 = vmatpush3.bf16.msra.mxu1 %v6560_v54  ;;  %v1949_v23 = vshrl.u32 %v7458_v55, 16  ;;  %v1952_v54 = vshll.u32 %v7458_v55, 16  ;;  %v1548_v31 = vsel %vm1048_vm3, %v1545_v5, %v1547_v18  ;;  %v1958_v55 = vshrl.u32 %v7470_v44, 16 }
 0x12b   : > { %6080 = vmatprep.subr.bf16.mxu1 %v6563_v8  ;;  %v1942_v39 = vrot.slane %v1940_v19, 1  ;;  %v3621_v5 = vsel %vm3592_vm5, %v3618_v33, %v3620_v15 }
 0x12c   : > { %v1951_v28 = vrot.slane %v1949_v23, 1 }
 0x12e   : > { %6088 = vmatpush3.bf16.msra.mxu1 %v6563_v8  ;;  %v3613_v8 = vsel %vm3592_vm5, %v3610_v56, %v3612_v59 }
 0x130   : > { %5794 = vmatmul.mubr.bf16.gmra.mrb[16].mxu1 %v1532_v63  ;;  %v1938_v63 = vsel %vm1849_vm1, %v6822_v35, %v1937_v21  ;;  %v1970_v35 = vshll.u32 %v7475_v45, 16  ;;  %v1976_v45 = vshrl.u32 %v7484_v0, 16 }
 0x131   : > { %6038 = vmatmul.mubr.bf16.vlgmr.msra.gmra.mrb[0].mxu0 %v3597_v43  ;;  %5797 = vmatprep.mubr.bf16.mxu1 %v1534_v37  ;;  %v1954_v43 = vrot.slane %v1952_v54, 2  ;;  %v1946_v37 = vor.u32 %v1945_v40, %v1942_v39 }
 0x132   : > { %6041 = vmatprep.mubr.bf16.mxu0 %v3599_v27  ;;  %v3616_v27 = vrot.slane %v7109_v7, 3  ;;  %v1972_v44 = vrot.slane %v1970_v35, 2  ;;  %v1978_v29 = vrot.slane %v1976_v45, 1 }
 0x133   : > { %v1955_v32 = vor.u32 %v1954_v43, %v1951_v28  ;;  %v1947_v48 = vsel %vm1849_vm1, %v1937_v21, %v1946_v37  ;;  %v6570_v21 = vld [vmem:[%s6623_s24 + $0x98] ss:$0 sps:$4 sm:$0x33]  }
 0x134   : > { %v3619_v2 = vsel %vm3592_vm5, %v3616_v27, %v3618_v33  ;;  %v1973_v1 = vor.u32 %v1972_v44, %v1969_v38  ;;  %v1982_v22 = vor.u32 %v1981_v26, %v1978_v29  ;;  %v2015_v23 = vshll.u32 %v6570_v21, 16 }
 0x136   : > { %v1983_v13 = vsel %vm1849_vm1, %v1973_v1, %v1982_v22  ;;  %v2017_v39 = vrot.slane %v2015_v23, 2 }
 0x138   : > { %5798 = vmatmul.mubr.bf16.gmra.mrb[20].mxu1 %v1536_v51  ;;  %v1960_v51 = vrot.slane %v1958_v55, 1 }
 0x139   : > { %6042 = vmatmul.mubr.bf16.gmra.mrb[4].mxu0 %v3601_v52  ;;  %5801 = vmatprep.mubr.bf16.mxu1 %v1538_v53  ;;  %v1963_v52 = vrot.slane %v1961_v62, 2  ;;  %v3617_v53 = vsel %vm3592_vm5, %v3614_v25, %v3616_v27 }
 0x13a   : > { %6045 = vmatprep.mubr.bf16.mxu0 %v3603_v57  ;;  %v1956_v57 = vsel %vm1849_vm1, %v1946_v37, %v1955_v32  ;;  %v4037_v10 = vpop.permute.xlu1 %4036 }
 0x13b   : > { %v1964_v7 = vor.u32 %v1963_v52, %v1960_v51 }
 0x13d   : > { %v1974_v58 = vsel %vm1849_vm1, %v1964_v7, %v1973_v1 }
 0x140   : > { %5802 = vmatmul.mubr.bf16.gmra.mrb[24].mxu1 %v1540_v24  ;;  %v1985_v24 = vshrl.u32 %v7489_v34, 16 }
 0x141   : > { %6046 = vmatmul.mubr.bf16.gmra.mrb[8].mxu0 %v3605_v3  ;;  %5805 = vmatprep.mubr.bf16.mxu1 %v1542_v16  ;;  %v1988_v3 = vshll.u32 %v7489_v34, 16  ;;  %v3622_v16 = vrot.slane %v7132_v30, 3  ;;  %v1994_v34 = vshrl.u32 %v7498_v46, 16  ;;  %v1997_v30 = vshll.u32 %v7498_v46, 16 }
 0x142   : > { %6049 = vmatprep.mubr.bf16.mxu0 %v3607_v60  ;;  %v1965_v60 = vsel %vm1849_vm1, %v1955_v32, %v1964_v7  ;;  %v1987_v17 = vrot.slane %v1985_v24, 1 }
 0x143   : > { %v1990_v0 = vrot.slane %v1988_v3, 2  ;;  %v3623_v56 = vsel %vm3592_vm5, %v3620_v15, %v3622_v16  ;;  %v1996_v14 = vrot.slane %v1994_v34, 1  ;;  %v4042_v34 = vpop.permute.xlu1 %4041 }
 0x145   : > { %v1991_v11 = vor.u32 %v1990_v0, %v1987_v17 }
 0x147   : > { %v1992_v19 = vsel %vm1849_vm1, %v1982_v22, %v1991_v11 }
 0x148   : > { %5806 = vmatmul.mubr.bf16.gmra.mrb[28].mxu1 %v1544_v6  ;;  %v3624_v6 = vrot.slane %v7155_v47, 3 }
 0x149   : > { %6050 = vmatmul.mubr.bf16.gmra.mrb[12].mxu0 %v3609_v12  ;;  %5809 = vmatprep.mubr.bf16.mxu1 %v1546_v61  ;;  %v2003_v12 = vshrl.u32 %v7503_v36, 16  ;;  %v2006_v61 = vshll.u32 %v7503_v36, 16  ;;  %v2012_v36 = vshrl.u32 %v6570_v21, 16 }
 0x14a   : > { %6053 = vmatprep.mubr.bf16.mxu0 %v3611_v50  ;;  %v1999_v50 = vrot.slane %v1997_v30, 2  ;;  %v3625_v18 = vsel %vm3592_vm5, %v3622_v16, %v3624_v6  ;;  %v3627_v47 = vsel %vm3592_vm5, %v3624_v6, %v3626_v20  ;;  %v4027_v38 = vpop.permute.xlu0 %4026 }
 0x14b   : > { %v2005_v42 = vrot.slane %v2003_v12, 1  ;;  %v2008_v59 = vrot.slane %v2006_v61, 2 }
 0x14c   : > { %v2000_v46 = vor.u32 %v1999_v50, %v1996_v14 }
 0x14d   : > { %v2009_v54 = vor.u32 %v2008_v59, %v2005_v42 }
 0x14e   : > { %v2001_v25 = vsel %vm1849_vm1, %v1991_v11, %v2000_v46 }
 0x14f   : > { %v2010_v40 = vsel %vm1849_vm1, %v2000_v46, %v2009_v54 }
 0x150   : > { %5810 = vmatmul.mubr.bf16.gmra.mrb[32].mxu1 %v1548_v31  ;;  %v2014_v31 = vrot.slane %v2012_v36, 1 }
 0x151   : > { %6054 = vmatmul.mubr.bf16.gmra.mrb[16].mxu0 %v3613_v8  ;;  %5845 = vmatprep.mubr.bf16.mxu1 %v1938_v63  ;;  %v8059_v8 = vmov 0  ;;  %v4423_v63 = vld [vmem:[%s6628_s27 + $0x8] sm:$0x3] }
 0x152   : > { %6057 = vmatprep.mubr.bf16.mxu0 %v3615_v9  ;;  %v2018_v49 = vor.u32 %v2017_v39, %v2014_v31  ;;  %v8060_v8 = vsel %vm7562_vm8, 4294967295, %v8059_v8  ;;  %v4424_v28 = vsel %vm7562_vm8, 0, %v4423_v63 }
 0x153   : > { %8061 = vst [vmem:[#allocation2_spill] sm:$0xff] %v8060_v8  ;;  %4425 = vst [vmem:[%s6628_s27 + $0x8] sm:$0x3] %v4424_v28 }
 0x154   : > { %v2019_v20 = vsel %vm1849_vm1, %v2009_v54, %v2018_v49 }
 0x158   : > { %5846 = vmatmul.mubr.bf16.vlgmr.msra.gmra.mrb[16].mxu1 %v1947_v48 }
 0x159   : > { %6058 = vmatmul.mubr.bf16.gmra.mrb[20].mxu0 %v3617_v53  ;;  %5849 = vmatprep.mubr.bf16.mxu1 %v1956_v57 }
 0x15a   : > { %6061 = vmatprep.mubr.bf16.mxu0 %v3619_v2  ;;  %v7593_v2 = vld [vmem:[%s8053_s2] ss:$0 sm:$0xff] }
 0x160   : > { %5850 = vmatmul.mubr.bf16.gmra.mrb[20].mxu1 %v1965_v60  ;;  %v4032_v60 = vpop.permute.xlu0 %4031 }
 0x161   : > { %6062 = vmatmul.mubr.bf16.gmra.mrb[24].mxu0 %v3621_v5  ;;  %5853 = vmatprep.mubr.bf16.mxu1 %v1974_v58 }
 0x162   : > { %6065 = vmatprep.mubr.bf16.mxu0 %v3623_v56 }
 0x164   : > { %v7599_v50 = vpop.permute.xlu0 %4046 }
 0x168   : > { %5854 = vmatmul.mubr.bf16.gmra.mrb[24].mxu1 %v1983_v13 }
 0x169   : > { %6066 = vmatmul.mubr.bf16.gmra.mrb[28].mxu0 %v3625_v18  ;;  %5857 = vmatprep.mubr.bf16.mxu1 %v1992_v19 }
 0x16a   : > { %6069 = vmatprep.mubr.bf16.mxu0 %v3627_v47 }
 0x170   : > { %5858 = vmatmul.mubr.bf16.gmra.mrb[28].mxu1 %v2001_v25 }
 0x171   : > { %6070 = vmatmul.mubr.bf16.gmra.mrb[32].mxu0 %v7291_v4  ;;  %5861 = vmatprep.mubr.bf16.mxu1 %v2010_v40 }
 0x178   : > { %5862 = vmatmul.mubr.bf16.gmra.mrb[32].mxu1 %v2019_v20 }
 0x1e3   : > { %v5779_v43 = vpop.f32.mrb[0].mxu1 }
 0x1e4   : > { %v1649_v9 = vpop.f32.mrb[1].mxu1 }
 0x1e5   : > { %v5780_v4 = vpop.f32.mrb[2].mxu1 }
 0x1e6   : > { %v1652_v37 = vpop.f32.mrb[3].mxu1 }
 0x1eb   : > { %v5783_v55 = vpop.f32.mrb[4].mxu1 }
 0x1ec   : > { %v1665_v62 = vpop.f32.mrb[5].mxu1 }
 0x1ed   : > { %v7570_v27 = vpop.f32.mrb[6].mxu1 }
 0x1ee   : > { %v7572_v32 = vpop.f32.mrb[7].mxu1 }
 0x1f3   : > { %v7574_v41 = vpop.f32.mrb[8].mxu1 }
 0x1f4   : > { %v7576_v35 = vpop.f32.mrb[9].mxu1 }
 0x1f5   : > { %v7578_v33 = vpop.f32.mrb[10].mxu1 }
 0x1f6   : > { %v7580_v48 = vpop.f32.mrb[11].mxu1 }
 0x1fb   : > { %v7582_v51 = vpop.f32.mrb[12].mxu1 }
 0x1fc   : > { %v7584_v52 = vpop.f32.mrb[13].mxu1 }
 0x1fd   : > { %v7586_v53 = vpop.f32.mrb[14].mxu1 }
 0x1fe   : > { %v7588_v57 = vpop.f32.mrb[15].mxu1 }
 0x204   : > { %v6039_v44 = vpop.f32.mrb[0].mxu0 }
 0x205   : > { %v6089_v7 = vadd.f32 %v6039_v44, %v5779_v43  ;;  %v3730_v45 = vpop.f32.mrb[1].mxu0 }
 0x206   : > { %v6090_v15 = vadd.f32 %v3730_v45, %v1649_v9  ;;  %v6040_v1 = vpop.f32.mrb[2].mxu0 }
 0x207   : > { %v3918_v24 = vadd.f32 %v6089_v7, %v7593_v2  ;;  %v6091_v3 = vadd.f32 %v6040_v1, %v5780_v4  ;;  %v3733_v16 = vpop.f32.mrb[3].mxu0  ;;  %v4057_v7 = vpop.permute.xlu0 %4056 }
 0x208   : > { %v3916_v29 = vadd.f32 %v6090_v15, %v7593_v2  ;;  %v6092_v26 = vadd.f32 %v3733_v16, %v1652_v37  ;;  %v8062_v37 = vmov 0  ;;  %v4294_v16 = vld [vmem:[%s8056_s5] sm:$0x1] }
 0x209   : > { %v3954_v5 = vmax.f32 %v3918_v24, 0.0  ;;  %v3919_v58 = vadd.f32 %v6091_v3, %v7593_v2  ;;  %v8063_v37 = vsel %vm7603_vm12, 4294967295, %v8062_v37 }
 0x20a   : > { %v3952_v17 = vmax.f32 %v3916_v29, 0.0  ;;  %v3917_v0 = vadd.f32 %v6092_v26, %v7593_v2  ;;  %8064 = vst [vmem:[#allocation3_spill] sm:$0xff] %v8063_v37 }
 0x20b   : > { %v4206_v56 = vmul.f32 %v4037_v10, %v3954_v5  ;;  %v3955_v22 = vmax.f32 %v3919_v58, 0.0 }
 0x20c   : > { %v4204_v30 = vmul.f32 %v4027_v38, %v3952_v17  ;;  %v3953_v6 = vmax.f32 %v3917_v0, 0.0  ;;  %v6043_v11 = vpop.f32.mrb[4].mxu0 }
 0x20d   : > { %v5337_v12 = vpack.c.bf16 %v4206_v56, %v4206_v56  ;;  %v4207_v61 = vmul.f32 %v4042_v34, %v3955_v22  ;;  %v6093_v13 = vadd.f32 %v6043_v11, %v5783_v55  ;;  %v3746_v14 = vpop.f32.mrb[5].mxu0  ;;  %v4917_v55 = vld [vmem:[%s6628_s27 + $0x8] sm:$0xe] }
 0x20e   : > { %v5335_v18 = vpack.c.bf16 %v4204_v30, %v4204_v30  ;;  %v4205_v19 = vmul.f32 %v4032_v60, %v3953_v6  ;;  %v6094_v42 = vadd.f32 %v3746_v14, %v1665_v62  ;;  %v6044_v59 = vpop.f32.mrb[6].mxu0 }
 0x20f   : > { %v4538_v47 = vshrl.u32 %v5337_v12, 16  ;;  %v4541_v46 = vshll.u32 %v5337_v12, 16  ;;  %v4241_v21 = vpack.c.bf16 %v4207_v61, %v4206_v56  ;;  %v5338_v36 = vpack.c.bf16 %v4207_v61, %v4207_v61  ;;  %v3749_v23 = vpop.f32.mrb[7].mxu0 }
 0x210   : > { %v4519_v54 = vshrl.u32 %v5335_v18, 16  ;;  %v4522_v25 = vshll.u32 %v5335_v18, 16  ;;  %v4240_v31 = vpack.c.bf16 %v4205_v19, %v4204_v30  ;;  %v5336_v20 = vpack.c.bf16 %v4205_v19, %v4205_v19 }
 0x211   : > { %v4540_v39 = vrot.slane %v4538_v47, 6  ;;  %v4543_v40 = vrot.slane %v4541_v46, 7  ;;  %v4260_v49 = vunpack.c.l.bf16 %v4241_v21  ;;  %v4548_v43 = vshrl.u32 %v5338_v36, 16  ;;  %v4052_v47 = vpop.permute.xlu1 %4051 }
 0x212   : > { %v4521_v63 = vrot.slane %v4519_v54, 6  ;;  %v4524_v28 = vrot.slane %v4522_v25, 7  ;;  %v4551_v9 = vshll.u32 %v5338_v36, 16  ;;  %v4261_v62 = vunpack.c.h.bf16 %v4241_v21  ;;  %v7628_v25 = vpop.permute.xlu0 %4066 }
 0x213   : > { %v4544_v4 = vor.u32 %v4543_v40, %v4540_v39  ;;  %v4341_v38 = vmul.f32 %v4260_v49, %v4260_v49  ;;  %v4258_v44 = vunpack.c.l.bf16 %v4240_v31  ;;  %v4550_v10 = vrot.slane %v4548_v43, 6 }
 0x214   : > { %v4525_v45 = vor.u32 %v4524_v28, %v4521_v63  ;;  %v4553_v15 = vrot.slane %v4551_v9, 7  ;;  %v4259_v1 = vunpack.c.h.bf16 %v4240_v31  ;;  %v6047_v24 = vpop.f32.mrb[8].mxu0  ;;  %v4528_v29 = vshrl.u32 %v5336_v20, 16 }
 0x215   : > { %v4546_v3 = vrot.slane %v4544_v4, 4  ;;  %v4339_v60 = vmul.f32 %v4258_v44, %v4258_v44  ;;  %v4531_v26 = vshll.u32 %v5336_v20, 16  ;;  %v3762_v5 = vpop.f32.mrb[9].mxu0  ;;  %v3922_v11 = vadd.f32 %v6093_v13, %v7593_v2 }
 0x216   : > { %v4526_v58 = vrot.slane %v4525_v45, 4  ;;  %v4918_v17 = vsel %vm7603_vm12, %v4525_v45, %v4917_v55  ;;  %v7616_v0 = vor.u32 %v4553_v15, %v4550_v10  ;;  %v4295_v56 = vadd.f32 %v4259_v1, %v4258_v44  ;;  %v6048_v22 = vpop.f32.mrb[10].mxu0  ;;  %v4062_v10 = vpop.permute.xlu1 %4061 }
 0x217   : > { %4919 = vst [vmem:[%s6628_s27 + $0x8] sm:$0xe] %v4918_v17  ;;  %v4340_v34 = vmul.f32 %v4259_v1, %v4259_v1  ;;  %v4530_v30 = vrot.slane %v4528_v29, 6  ;;  %v4533_v6 = vrot.slane %v4531_v26, 7  ;;  %v7620_v12 = vpop.f32.mrb[11].mxu0  ;;  %v4342_v61 = vmul.f32 %v4261_v62, %v4261_v62 }
 0x218   : > { %v4555_v14 = vsel %vm7610_vm13, %v4546_v3, %v7616_v0  ;;  %v4296_v18 = vadd.f32 %v4295_v56, %v4260_v49  ;;  %v3920_v19 = vadd.f32 %v6094_v42, %v7593_v2  ;;  %v3958_v36 = vmax.f32 %v3922_v11, 0.0 }
 0x219   : > { %4922 = vst [vmem:[%s6628_s27 + $0x14] sm:$0xf] %v4555_v14  ;;  %v4375_v46 = vadd.f32 %v4340_v34, %v4339_v60  ;;  %v4534_v21 = vor.u32 %v4533_v6, %v4530_v30  ;;  %v6095_v54 = vadd.f32 %v6044_v59, %v7570_v27  ;;  %v6096_v31 = vadd.f32 %v3749_v23, %v7572_v32 }
 0x21a   : > { %v3956_v13 = vmax.f32 %v3920_v19, 0.0  ;;  %v7631_v39 = vadd.f32 %v4296_v18, %v4261_v62  ;;  %v6097_v40 = vadd.f32 %v6047_v24, %v7574_v41  ;;  %v4210_v63 = vmul.f32 %v4057_v7, %v3958_v36 }
 0x21b   : > { %v4376_v49 = vadd.f32 %v4375_v46, %v4341_v38  ;;  %v4535_v42 = vsel %vm7610_vm13, %v4526_v58, %v4534_v21  ;;  %v4536_v20 = vrot.slane %v4534_v21, 4  ;;  %v3923_v27 = vadd.f32 %v6095_v54, %v7593_v2 }
 0x21c   : > { %4920 = vst [vmem:[%s6628_s27 + $0xc] sm:$0xf] %v4535_v42  ;;  %v4208_v28 = vmul.f32 %v7599_v50, %v3956_v13  ;;  %v3921_v59 = vadd.f32 %v6096_v31, %v7593_v2  ;;  %v3926_v32 = vadd.f32 %v6097_v40, %v7593_v2  ;;  %v7641_v23 = vpop.f32.mrb[12].mxu0  ;;  %v5341_v43 = vpack.c.bf16 %v4210_v63, %v4210_v63 }
 0x21d   : > { %v4545_v41 = vsel %vm7610_vm13, %v4536_v20, %v4544_v4  ;;  %v4377_v9 = vadd.f32 %v4376_v49, %v4342_v61  ;;  %v6098_v55 = vadd.f32 %v3762_v5, %v7576_v35  ;;  %v7646_v62 = vpop.f32.mrb[13].mxu0  ;;  %v3959_v50 = vmax.f32 %v3923_v27, 0.0  ;;  %v4077_v35 = vpop.permute.xlu0 %4076 }
 0x21e   : > { %4921 = vst [vmem:[%s6628_s27 + $0x10] sm:$0xf] %v4545_v41  ;;  %v5339_v38 = vpack.c.bf16 %v4208_v28, %v4208_v28  ;;  %v3957_v44 = vmax.f32 %v3921_v59, 0.0  ;;  %v3962_v7 = vmax.f32 %v3926_v32, 0.0  ;;  %v7649_v45 = vpop.f32.mrb[14].mxu0  ;;  %v4578_v15 = vshrl.u32 %v5341_v43, 16 }
 0x21f   : > { %v4581_v1 = vshll.u32 %v5341_v43, 16  ;;  %v3924_v24 = vadd.f32 %v6098_v55, %v7593_v2  ;;  %v7653_v4 = vadd.f32 %v6048_v22, %v7578_v33  ;;  %v7655_v3 = vpop.f32.mrb[15].mxu0  ;;  %v4211_v26 = vmul.f32 %v4062_v10, %v3959_v50 }
 0x220   : > { %v4558_v60 = vshrl.u32 %v5339_v38, 16  ;;  %v4561_v29 = vshll.u32 %v5339_v38, 16  ;;  %v4209_v5 = vmul.f32 %v4052_v47, %v3957_v44  ;;  %v4556_v58 = vrot.slane %v7616_v0, 4 }
 0x221   : > { %v4580_v17 = vrot.slane %v4578_v15, 6  ;;  %v4583_v56 = vrot.slane %v4581_v1, 7  ;;  %v7658_v34 = vmul.f32 %v4077_v35, %v3962_v7  ;;  %v4243_v11 = vpack.c.bf16 %v4211_v26, %v4210_v63 }
 0x222   : > { %v4560_v30 = vrot.slane %v4558_v60, 6  ;;  %v4563_v6 = vrot.slane %v4561_v29, 7  ;;  %v5342_v61 = vpack.c.bf16 %v4211_v26, %v4211_v26  ;;  %v4242_v33 = vpack.c.bf16 %v4209_v5, %v4208_v28 }
 0x223   : > { %v7660_v14 = vor.u32 %v4583_v56, %v4580_v17  ;;  %v5340_v22 = vpack.c.bf16 %v4209_v5, %v4209_v5  ;;  %v3960_v18 = vmax.f32 %v3924_v24, 0.0  ;;  %v4264_v46 = vunpack.c.l.bf16 %v4243_v11  ;;  %v4072_v24 = vpop.permute.xlu1 %4071 }
 0x224   : > { %v4564_v19 = vor.u32 %v4563_v6, %v4560_v30  ;;  %v4588_v21 = vshrl.u32 %v5342_v61, 16  ;;  %v5345_v0 = vpack.c.bf16 %v7658_v34, %v7658_v34  ;;  %v7664_v47 = vpop.f32.mrb[16].mxu0  ;;  %v4265_v36 = vunpack.c.h.bf16 %v4243_v11 }
 0x225   : > { %v4591_v54 = vshll.u32 %v5342_v61, 16  ;;  %v4262_v13 = vunpack.c.l.bf16 %v4242_v33  ;;  %v4263_v31 = vunpack.c.h.bf16 %v4242_v33  ;;  %v7666_v40 = vpop.f32.mrb[17].mxu0  ;;  %v4586_v49 = vrot.slane %v7660_v14, 4 }
 0x226   : > { %v4565_v42 = vsel %vm7610_vm13, %v4556_v58, %v4564_v19  ;;  %v4566_v20 = vrot.slane %v4564_v19, 4  ;;  %v4345_v63 = vmul.f32 %v4264_v46, %v4264_v46  ;;  %v7671_v28 = vpop.f32.mrb[18].mxu0  ;;  %v4590_v27 = vrot.slane %v4588_v21, 6 }
 0x227   : > { %4923 = vst [vmem:[%s6628_s27 + $0x18] sm:$0xf] %v4565_v42  ;;  %v4593_v59 = vrot.slane %v4591_v54, 7  ;;  %v4298_v32 = vadd.f32 %v7631_v39, %v4262_v13  ;;  %v4343_v41 = vmul.f32 %v4262_v13, %v4262_v13  ;;  %v7675_v43 = vpop.f32.mrb[19].mxu0  ;;  %v4344_v55 = vmul.f32 %v4263_v31, %v4263_v31  ;;  %v7682_v39 = vpop.permute.xlu0 %4086 }
 0x228   : > { %v4568_v38 = vshrl.u32 %v5340_v22, 16  ;;  %v4571_v50 = vshll.u32 %v5340_v22, 16  ;;  %v4618_v44 = vshrl.u32 %v5345_v0, 16  ;;  %v4621_v1 = vshll.u32 %v5345_v0, 16 }
 0x229   : > { %v7677_v7 = vor.u32 %v4593_v59, %v4590_v27  ;;  %v4299_v10 = vadd.f32 %v4298_v32, %v4263_v31  ;;  %v4378_v15 = vadd.f32 %v4377_v9, %v4343_v41  ;;  %v4346_v35 = vmul.f32 %v4265_v36, %v4265_v36 }
 0x22a   : > { %v4570_v60 = vrot.slane %v4568_v38, 6  ;;  %v4573_v29 = vrot.slane %v4571_v50, 7  ;;  %v7680_v26 = vmul.f32 %v7628_v25, %v3960_v18  ;;  %v4620_v56 = vrot.slane %v4618_v44, 6 }
 0x22b   : > { %v4595_v5 = vsel %vm7610_vm13, %v4586_v49, %v7677_v7  ;;  %v4300_v58 = vadd.f32 %v4299_v10, %v4264_v46  ;;  %v4379_v17 = vadd.f32 %v4378_v15, %v4344_v55  ;;  %v5847_v30 = vpop.f32.mrb[16].mxu1  ;;  %v4623_v6 = vrot.slane %v4621_v1, 7  ;;  %v4097_v15 = vpop.permute.xlu0 %4096 }
 0x22c   : > { %4926 = vst [vmem:[%s6628_s27 + $0x24] sm:$0xf] %v4595_v5  ;;  %v4574_v9 = vor.u32 %v4573_v29, %v4570_v60  ;;  %v5343_v11 = vpack.c.bf16 %v7680_v26, %v7680_v26  ;;  %v3927_v25 = vadd.f32 %v7653_v4, %v7593_v2  ;;  %v7692_v61 = vpop.f32.mrb[20].mxu0  ;;  %v7694_v33 = vpop.f32.mrb[17].mxu1  ;;  %v6100_v18 = vadd.f32 %v7620_v12, %v7580_v48 }
 0x22d   : > { %v4380_v22 = vadd.f32 %v4379_v17, %v4345_v63  ;;  %v7698_v19 = vadd.f32 %v4300_v58, %v4265_v36  ;;  %v6101_v46 = vadd.f32 %v7641_v23, %v7582_v51  ;;  %v7702_v21 = vpop.f32.mrb[21].mxu0  ;;  %v7704_v0 = vpop.f32.mrb[18].mxu1  ;;  %v4596_v54 = vrot.slane %v7677_v7, 4 }
 0x22e   : > { %v4575_v4 = vsel %vm7610_vm13, %v4566_v20, %v4574_v9  ;;  %v4576_v13 = vrot.slane %v4574_v9, 4  ;;  %v4598_v31 = vshrl.u32 %v5343_v11, 16  ;;  %v7709_v49 = vpop.f32.mrb[22].mxu0  ;;  %v7711_v48 = vpop.f32.mrb[19].mxu1  ;;  %v4601_v12 = vshll.u32 %v5343_v11, 16 }
 0x22f   : > { %4924 = vst [vmem:[%s6628_s27 + $0x1c] sm:$0xf] %v4575_v4  ;;  %v3963_v36 = vmax.f32 %v3927_v25, 0.0  ;;  %v3925_v51 = vadd.f32 %v6100_v18, %v7593_v2  ;;  %v7715_v23 = vadd.f32 %v4380_v22, %v4346_v35  ;;  %v7717_v42 = vpop.f32.mrb[23].mxu0  ;;  %v4082_v63 = vpop.permute.xlu1 %4081  ;;  %v7722_v27 = vor.u32 %v4623_v6, %v4620_v56 }
 0x230   : > { %v4585_v20 = vsel %vm7610_vm13, %v4576_v13, %v7660_v14  ;;  %v4600_v59 = vrot.slane %v4598_v31, 6  ;;  %v3930_v32 = vadd.f32 %v6101_v46, %v7593_v2  ;;  %v4603_v41 = vrot.slane %v4601_v12, 7 }
 0x231   : > { %4925 = vst [vmem:[%s6628_s27 + $0x20] sm:$0xf] %v4585_v20  ;;  %v4215_v55 = vmul.f32 %v4082_v63, %v3963_v36  ;;  %v3961_v38 = vmax.f32 %v3925_v51, 0.0  ;;  %v6102_v50 = vadd.f32 %v7646_v62, %v7584_v52  ;;  %v6103_v7 = vadd.f32 %v7649_v45, %v7586_v53 }
 0x232   : > { %v3966_v44 = vmax.f32 %v3930_v32, 0.0  ;;  %v6104_v10 = vadd.f32 %v7655_v3, %v7588_v57  ;;  %v7733_v14 = vadd.f32 %v7664_v47, %v5847_v30  ;;  %v7735_v1 = vor.u32 %v4603_v41, %v4600_v59 }
 0x233   : > { %v4245_v35 = vpack.c.bf16 %v4215_v55, %v7658_v34  ;;  %v5346_v60 = vpack.c.bf16 %v4215_v55, %v4215_v55  ;;  %v4213_v29 = vmul.f32 %v4072_v24, %v3961_v38  ;;  %v7738_v5 = vpop.f32.mrb[20].mxu1  ;;  %v4626_v52 = vrot.slane %v7722_v27, 4  ;;  %v4092_v63 = vpop.permute.xlu1 %4091 }
 0x234   : > { %v7741_v62 = vmul.f32 %v4097_v15, %v3966_v44  ;;  %v3928_v53 = vadd.f32 %v6102_v50, %v7593_v2  ;;  %v7745_v57 = vadd.f32 %v6103_v7, %v7593_v2  ;;  %v7747_v45 = vpop.f32.mrb[24].mxu0  ;;  %v7749_v3 = vpop.f32.mrb[21].mxu1  ;;  %v4605_v34 = vsel %vm7610_vm13, %v4596_v54, %v7735_v1 }
 0x235   : > { %v4268_v47 = vunpack.c.l.bf16 %v4245_v35  ;;  %v7754_v24 = vunpack.c.h.bf16 %v4245_v35  ;;  %v7757_v58 = vadd.f32 %v6104_v10, %v7593_v2  ;;  %v7759_v17 = vpop.f32.mrb[25].mxu0  ;;  %v7761_v56 = vpop.f32.mrb[22].mxu1  ;;  %4927 = vst [vmem:[%s6628_s27 + $0x28] sm:$0xf] %v4605_v34  ;;  %v4628_v30 = vshrl.u32 %v5346_v60, 16 }
 0x236   : > { %v4631_v9 = vshll.u32 %v5346_v60, 16  ;;  %v4244_v6 = vpack.c.bf16 %v4213_v29, %v7680_v26  ;;  %v5344_v11 = vpack.c.bf16 %v4213_v29, %v4213_v29  ;;  %v7765_v25 = vpop.f32.mrb[26].mxu0  ;;  %v7767_v22 = vpop.f32.mrb[23].mxu1  ;;  %v4606_v18 = vrot.slane %v7735_v1, 4 }
 0x237   : > { %v4349_v46 = vmul.f32 %v4268_v47, %v4268_v47  ;;  %v5349_v54 = vpack.c.bf16 %v7741_v62, %v7741_v62  ;;  %v3964_v4 = vmax.f32 %v3928_v53, 0.0  ;;  %v7772_v13 = vpop.f32.mrb[27].mxu0  ;;  %v4630_v31 = vrot.slane %v4628_v30, 6  ;;  %v7779_v44 = vpop.permute.xlu0 %4106 }
 0x238   : > { %v4633_v12 = vrot.slane %v4631_v9, 7  ;;  %v4266_v36 = vunpack.c.l.bf16 %v4244_v6  ;;  %v4267_v51 = vunpack.c.h.bf16 %v4244_v6  ;;  %v4608_v26 = vshrl.u32 %v5344_v11, 16 }
 0x239   : > { %v4611_v20 = vshll.u32 %v5344_v11, 16  ;;  %v4658_v59 = vshrl.u32 %v5349_v54, 16  ;;  %v4661_v32 = vshll.u32 %v5349_v54, 16  ;;  %v4350_v41 = vmul.f32 %v7754_v24, %v7754_v24 }
 0x23a   : > { %v7776_v55 = vor.u32 %v4633_v12, %v4630_v31  ;;  %v4302_v38 = vadd.f32 %v7698_v19, %v4266_v36  ;;  %v4347_v50 = vmul.f32 %v4266_v36, %v4266_v36  ;;  %v4610_v7 = vrot.slane %v4608_v26, 6 }
 0x23b   : > { %v4613_v10 = vrot.slane %v4611_v20, 7  ;;  %v4660_v15 = vrot.slane %v4658_v59, 6  ;;  %v4663_v1 = vrot.slane %v4661_v32, 7  ;;  %v7781_v35 = vpop.f32.mrb[24].mxu1  ;;  %v4348_v53 = vmul.f32 %v4267_v51, %v4267_v51  ;;  %v4102_v59 = vpop.permute.xlu1 %4101 }
 0x23c   : > { %v4635_v60 = vsel %vm7610_vm13, %v4626_v52, %v7776_v55  ;;  %v4303_v29 = vadd.f32 %v4302_v38, %v4267_v51  ;;  %v4382_v34 = vadd.f32 %v7715_v23, %v4347_v50  ;;  %v7787_v30 = vpop.f32.mrb[28].mxu0  ;;  %v7789_v19 = vpop.f32.mrb[25].mxu1  ;;  %v4636_v9 = vrot.slane %v7776_v55, 4 }
 0x23d   : > { %4930 = vst [vmem:[%s6628_s27 + $0x34] sm:$0xf] %v4635_v60  ;;  %v4614_v6 = vor.u32 %v4613_v10, %v4610_v7  ;;  %v4216_v11 = vmul.f32 %v7682_v39, %v3964_v4  ;;  %v3967_v54 = vmax.f32 %v7745_v57, 0.0  ;;  %v7795_v31 = vpop.f32.mrb[29].mxu0  ;;  %v7797_v52 = vpop.f32.mrb[26].mxu1  ;;  %v3965_v23 = vmax.f32 %v7757_v58, 0.0 }
 0x23e   : > { %v4304_v12 = vadd.f32 %v4303_v29, %v4268_v47  ;;  %v4383_v36 = vadd.f32 %v4382_v34, %v4348_v53  ;;  %v3934_v51 = vadd.f32 %v7733_v14, %v7593_v2  ;;  %v7802_v26 = vpop.f32.mrb[30].mxu0  ;;  %v7804_v20 = vpop.f32.mrb[27].mxu1  ;;  %v7808_v4 = vor.u32 %v4663_v1, %v4660_v15 }
 0x23f   : > { %v4615_v39 = vsel %vm7610_vm13, %v4606_v18, %v4614_v6  ;;  %v4616_v57 = vrot.slane %v4614_v6, 4  ;;  %v5347_v32 = vpack.c.bf16 %v4216_v11, %v4216_v11  ;;  %v7810_v47 = vpop.f32.mrb[31].mxu0  ;;  %v4219_v58 = vmul.f32 %v4102_v59, %v3967_v54  ;;  %v4117_v18 = vpop.permute.xlu0 %4116 }
 0x240   : > { %v4384_v55 = vadd.f32 %v4383_v36, %v4349_v46  ;;  %4928 = vst [vmem:[%s6628_s27 + $0x2c] sm:$0xf] %v4615_v39  ;;  %v4217_v38 = vmul.f32 %v4092_v63, %v3965_v23  ;;  %v4305_v14 = vadd.f32 %v4304_v12, %v7754_v24  ;;  %v3970_v60 = vmax.f32 %v3934_v51, 0.0 }
 0x241   : > { %v4625_v50 = vsel %vm7610_vm13, %v4616_v57, %v7722_v27  ;;  %v4638_v7 = vshrl.u32 %v5347_v32, 16  ;;  %v4641_v10 = vshll.u32 %v5347_v32, 16  ;;  %v4247_v15 = vpack.c.bf16 %v4219_v58, %v7741_v62 }
 0x242   : > { %4929 = vst [vmem:[%s6628_s27 + $0x30] sm:$0xf] %v4625_v50  ;;  %v5350_v1 = vpack.c.bf16 %v4219_v58, %v4219_v58  ;;  %v4246_v29 = vpack.c.bf16 %v4217_v38, %v4216_v11  ;;  %v4385_v53 = vadd.f32 %v4384_v55, %v4350_v41  ;;  %v5348_v6 = vpack.c.bf16 %v4217_v38, %v4217_v38 }
 0x243   : > { %v4640_v46 = vrot.slane %v4638_v7, 6  ;;  %v4643_v34 = vrot.slane %v4641_v10, 7  ;;  %v7819_v63 = vmul.f32 %v4117_v18, %v3970_v60  ;;  %v7821_v24 = vpop.f32.mrb[28].mxu1  ;;  %v4272_v54 = vunpack.c.l.bf16 %v4247_v15 }
 0x244   : > { %v4273_v12 = vunpack.c.h.bf16 %v4247_v15  ;;  %v4668_v27 = vshrl.u32 %v5350_v1, 16  ;;  %v4671_v36 = vshll.u32 %v5350_v1, 16  ;;  %v7823_v23 = vpop.f32.mrb[32].mxu0  ;;  %v7825_v51 = vpop.f32.mrb[29].mxu1  ;;  %v4270_v62 = vunpack.c.l.bf16 %v4246_v29 }
 0x245   : > { %v4644_v59 = vor.u32 %v4643_v34, %v4640_v46  ;;  %v4271_v11 = vunpack.c.h.bf16 %v4246_v29  ;;  %v4648_v41 = vshrl.u32 %v5348_v6, 16  ;;  %v7827_v39 = vpop.f32.mrb[33].mxu0  ;;  %v7829_v57 = vpop.f32.mrb[30].mxu1  ;;  %v4666_v32 = vrot.slane %v7808_v4, 4 }
 0x246   : > { %v4353_v55 = vmul.f32 %v4272_v54, %v4272_v54  ;;  %v4670_v58 = vrot.slane %v4668_v27, 6  ;;  %v4673_v38 = vrot.slane %v4671_v36, 7  ;;  %v7832_v50 = vpop.f32.mrb[34].mxu0  ;;  %v7834_v7 = vpop.f32.mrb[31].mxu1  ;;  %v4354_v60 = vmul.f32 %v4273_v12, %v4273_v12 }
 0x247   : > { %8067 = vst [vmem:[#allocation4_spill] sm:$0xff] %v7832_v50  ;;  %v4645_v10 = vsel %vm7610_vm13, %v4636_v9, %v4644_v59  ;;  %v4306_v18 = vadd.f32 %v4305_v14, %v4270_v62  ;;  %v4351_v15 = vmul.f32 %v4270_v62, %v4270_v62  ;;  %v7838_v1 = vpop.f32.mrb[35].mxu0  ;;  %v4352_v46 = vmul.f32 %v4271_v11, %v4271_v11  ;;  %v4112_v36 = vpop.permute.xlu1 %4111 }
 0x248   : > { %4931 = vst [vmem:[%s6628_s27 + $0x38] sm:$0xf] %v4645_v10  ;;  %v7841_v29 = vor.u32 %v4673_v38, %v4670_v58  ;;  %v4650_v34 = vrot.slane %v4648_v41, 6  ;;  %v4651_v27 = vshll.u32 %v5348_v6, 16  ;;  %v5353_v50 = vpack.c.bf16 %v7819_v63, %v7819_v63 }
 0x249   : > { %v4307_v37 = vadd.f32 %v4306_v18, %v4271_v11  ;;  %v4386_v8 = vadd.f32 %v4385_v53, %v4351_v15  ;;  %v6106_v9 = vadd.f32 %v7666_v40, %v7694_v33  ;;  %v4646_v14 = vrot.slane %v4644_v59, 4 }
 0x24a   : > { %v4675_v62 = vsel %vm7610_vm13, %v4666_v32, %v7841_v29  ;;  %v4653_v10 = vrot.slane %v4651_v27, 7  ;;  %v6107_v58 = vadd.f32 %v7671_v28, %v7704_v0  ;;  %v4698_v11 = vshrl.u32 %v5353_v50, 16 }
 0x24b   : > { %4934 = vst [vmem:[%s6628_s27 + $0x44] sm:$0xf] %v4675_v62  ;;  %v4308_v6 = vadd.f32 %v4307_v37, %v4272_v54  ;;  %v4387_v41 = vadd.f32 %v4386_v8, %v4352_v46  ;;  %v4701_v53 = vshll.u32 %v5353_v50, 16  ;;  %v7853_v38 = vpop.f32.mrb[32].mxu1  ;;  %v3932_v40 = vadd.f32 %v6106_v9, %v7593_v2  ;;  %v4122_v9 = vpop.permute.xlu1 %4121 }
 0x24c   : > { %v4654_v18 = vor.u32 %v4653_v10, %v4650_v34  ;;  %v3935_v33 = vadd.f32 %v6107_v58, %v7593_v2  ;;  %v6108_v59 = vadd.f32 %v7675_v43, %v7711_v48  ;;  %v7859_v32 = vpop.f32.mrb[33].mxu1  ;;  %v4700_v28 = vrot.slane %v4698_v11, 6 }
 0x24d   : > { %v4388_v15 = vadd.f32 %v4387_v41, %v4353_v55  ;;  %v4703_v0 = vrot.slane %v4701_v53, 7  ;;  %v4309_v37 = vadd.f32 %v4308_v6, %v4273_v12  ;;  %v7861_v8 = vpop.f32.mrb[34].mxu1  ;;  %v3968_v46 = vmax.f32 %v3932_v40, 0.0  ;;  %v7879_v6 = vpop.permute.xlu0 %4126 }
 0x24e   : > { %v4655_v54 = vsel %vm7610_vm13, %v4646_v14, %v4654_v18  ;;  %v4656_v50 = vrot.slane %v4654_v18, 4  ;;  %v3971_v34 = vmax.f32 %v3935_v33, 0.0  ;;  %v7865_v27 = vpop.f32.mrb[35].mxu1  ;;  %v3933_v48 = vadd.f32 %v6108_v59, %v7593_v2 }
 0x24f   : > { %4932 = vst [vmem:[%s6628_s27 + $0x3c] sm:$0xf] %v4655_v54  ;;  %v7868_v43 = vor.u32 %v4703_v0, %v4700_v28  ;;  %v4389_v55 = vadd.f32 %v4388_v15, %v4354_v60  ;;  %v6109_v12 = vadd.f32 %v7692_v61, %v7738_v5  ;;  %v4220_v62 = vmul.f32 %v7779_v44, %v3968_v46 }
 0x250   : > { %v4665_v14 = vsel %vm7610_vm13, %v4656_v50, %v7808_v4  ;;  %v4223_v10 = vmul.f32 %v4122_v9, %v3971_v34  ;;  %v6110_v58 = vadd.f32 %v7702_v21, %v7749_v3  ;;  %v4676_v41 = vrot.slane %v7841_v29, 4 }
 0x251   : > { %4933 = vst [vmem:[%s6628_s27 + $0x40] sm:$0xf] %v4665_v14  ;;  %v3969_v11 = vmax.f32 %v3933_v48, 0.0  ;;  %v3938_v60 = vadd.f32 %v6109_v12, %v7593_v2  ;;  %v6111_v61 = vadd.f32 %v7709_v49, %v7761_v56  ;;  %v4706_v5 = vrot.slane %v7868_v43, 4 }
 0x252   : > { %v5351_v4 = vpack.c.bf16 %v4220_v62, %v4220_v62  ;;  %v4249_v44 = vpack.c.bf16 %v4223_v10, %v7819_v63  ;;  %v5354_v53 = vpack.c.bf16 %v4223_v10, %v4223_v10  ;;  %v3936_v21 = vadd.f32 %v6110_v58, %v7593_v2 }
 0x253   : > { %v4221_v18 = vmul.f32 %v4112_v36, %v3969_v11  ;;  %v3974_v40 = vmax.f32 %v3938_v60, 0.0  ;;  %v6112_v3 = vadd.f32 %v7717_v42, %v7767_v22  ;;  %v3939_v63 = vadd.f32 %v6111_v61, %v7593_v2  ;;  %v4137_v36 = vpop.permute.xlu0 %4136  ;;  %v4132_v42 = vpop.permute.xlu1 %4131 }
 0x254   : > { %v4678_v29 = vshrl.u32 %v5351_v4, 16  ;;  %v4681_v33 = vshll.u32 %v5351_v4, 16  ;;  %v4276_v59 = vunpack.c.l.bf16 %v4249_v44  ;;  %v4277_v15 = vunpack.c.h.bf16 %v4249_v44 }
 0x255   : > { %v4708_v28 = vshrl.u32 %v5354_v53, 16  ;;  %v4711_v0 = vshll.u32 %v5354_v53, 16  ;;  %v4248_v49 = vpack.c.bf16 %v4221_v18, %v4220_v62  ;;  %v5352_v56 = vpack.c.bf16 %v4221_v18, %v4221_v18 }
 0x256   : > { %v4680_v54 = vrot.slane %v4678_v29, 6  ;;  %v4683_v50 = vrot.slane %v4681_v33, 7  ;;  %v4357_v46 = vmul.f32 %v4276_v59, %v4276_v59  ;;  %v4226_v58 = vmul.f32 %v4137_v36, %v3974_v40 }
 0x257   : > { %v4710_v34 = vrot.slane %v4708_v28, 6  ;;  %v4713_v9 = vrot.slane %v4711_v0, 7  ;;  %v4274_v48 = vunpack.c.l.bf16 %v4248_v49  ;;  %v4275_v12 = vunpack.c.h.bf16 %v4248_v49 }
 0x258   : > { %v4684_v22 = vor.u32 %v4683_v50, %v4680_v54  ;;  %v4688_v14 = vshrl.u32 %v5352_v56, 16  ;;  %v4691_v10 = vshll.u32 %v5352_v56, 16  ;;  %v4358_v11 = vmul.f32 %v4277_v15, %v4277_v15 }
 0x259   : > { %v7892_v62 = vor.u32 %v4713_v9, %v4710_v34  ;;  %v4310_v60 = vadd.f32 %v4309_v37, %v4274_v48  ;;  %v4355_v4 = vmul.f32 %v4274_v48, %v4274_v48  ;;  %v4356_v28 = vmul.f32 %v4275_v12, %v4275_v12  ;;  %v4142_v34 = vpop.permute.xlu1 %4141 }
 0x25a   : > { %v4685_v61 = vsel %vm7610_vm13, %v4676_v41, %v4684_v22  ;;  %v4686_v44 = vrot.slane %v4684_v22, 4  ;;  %v4690_v53 = vrot.slane %v4688_v14, 6  ;;  %v4693_v18 = vrot.slane %v4691_v10, 7 }
 0x25b   : > { %4935 = vst [vmem:[%s6628_s27 + $0x48] sm:$0xf] %v4685_v61  ;;  %v4715_v29 = vsel %vm7610_vm13, %v4706_v5, %v7892_v62  ;;  %v4311_v33 = vadd.f32 %v4310_v60, %v4275_v12  ;;  %v4390_v0 = vadd.f32 %v4389_v55, %v4355_v4  ;;  %v5357_v49 = vpack.c.bf16 %v4226_v58, %v4226_v58 }
 0x25c   : > { %4938 = vst [vmem:[%s6628_s27 + $0x54] sm:$0xf] %v4715_v29  ;;  %v4694_v40 = vor.u32 %v4693_v18, %v4690_v53  ;;  %v3972_v37 = vmax.f32 %v3936_v21, 0.0  ;;  %v3975_v56 = vmax.f32 %v3939_v63, 0.0  ;;  %v3937_v41 = vadd.f32 %v6112_v3, %v7593_v2  ;;  %v4147_v53 = vpop.permute.xlu0 %4146 }
 0x25d   : > { %v4312_v54 = vadd.f32 %v4311_v33, %v4276_v59  ;;  %v4391_v50 = vadd.f32 %v4390_v0, %v4356_v28  ;;  %v6113_v36 = vadd.f32 %v7747_v45, %v7781_v35  ;;  %v4738_v55 = vshrl.u32 %v5357_v49, 16 }
 0x25e   : > { %v4695_v5 = vsel %vm7610_vm13, %v4686_v44, %v4694_v40  ;;  %v4696_v9 = vrot.slane %v4694_v40, 4  ;;  %v4741_v48 = vshll.u32 %v5357_v49, 16  ;;  %v4224_v21 = vmul.f32 %v7879_v6, %v3972_v37 }
 0x25f   : > { %v4392_v12 = vadd.f32 %v4391_v50, %v4357_v46  ;;  %4936 = vst [vmem:[%s6628_s27 + $0x4c] sm:$0xf] %v4695_v5  ;;  %v4227_v63 = vmul.f32 %v4142_v34, %v3975_v56  ;;  %v3973_v59 = vmax.f32 %v3937_v41, 0.0  ;;  %v4740_v22 = vrot.slane %v4738_v55, 6 }
 0x260   : > { %v4705_v3 = vsel %vm7610_vm13, %v4696_v9, %v7868_v43  ;;  %v4743_v14 = vrot.slane %v4741_v48, 7  ;;  %v4313_v45 = vadd.f32 %v4312_v54, %v4277_v15  ;;  %v5355_v35 = vpack.c.bf16 %v4224_v21, %v4224_v21  ;;  %v4157_v55 = vpop.permute.xlu0 %4156 }
 0x261   : > { %4937 = vst [vmem:[%s6628_s27 + $0x50] sm:$0xf] %v4705_v3  ;;  %v4251_v10 = vpack.c.bf16 %v4227_v63, %v4226_v58  ;;  %v5358_v60 = vpack.c.bf16 %v4227_v63, %v4227_v63  ;;  %v4225_v4 = vmul.f32 %v4132_v42, %v3973_v59  ;;  %v4716_v61 = vrot.slane %v7892_v62, 4 }
 0x262   : > { %v7913_v46 = vor.u32 %v4743_v14, %v4740_v22  ;;  %v4393_v44 = vadd.f32 %v4392_v12, %v4358_v11  ;;  %v6114_v6 = vadd.f32 %v7759_v17, %v7789_v19  ;;  %v4718_v18 = vshrl.u32 %v5355_v35, 16 }
 0x263   : > { %v4721_v29 = vshll.u32 %v5355_v35, 16  ;;  %v4280_v43 = vunpack.c.l.bf16 %v4251_v10  ;;  %v3942_v33 = vadd.f32 %v6113_v36, %v7593_v2  ;;  %v4281_v15 = vunpack.c.h.bf16 %v4251_v10  ;;  %v4152_v35 = vpop.permute.xlu1 %4151 }
 0x264   : > { %v4748_v28 = vshrl.u32 %v5358_v60, 16  ;;  %v4751_v0 = vshll.u32 %v5358_v60, 16  ;;  %v4250_v58 = vpack.c.bf16 %v4225_v4, %v4224_v21  ;;  %v4746_v42 = vrot.slane %v7913_v46, 4 }
 0x265   : > { %v4720_v40 = vrot.slane %v4718_v18, 6  ;;  %v4723_v62 = vrot.slane %v4721_v29, 7  ;;  %v4361_v49 = vmul.f32 %v4280_v43, %v4280_v43  ;;  %v5356_v54 = vpack.c.bf16 %v4225_v4, %v4225_v4 }
 0x266   : > { %v4750_v37 = vrot.slane %v4748_v28, 6  ;;  %v4753_v11 = vrot.slane %v4751_v0, 7  ;;  %v4278_v56 = vunpack.c.l.bf16 %v4250_v58  ;;  %v4279_v17 = vunpack.c.h.bf16 %v4250_v58 }
 0x267   : > { %v4724_v19 = vor.u32 %v4723_v62, %v4720_v40  ;;  %v3978_v50 = vmax.f32 %v3942_v33, 0.0  ;;  %v3940_v41 = vadd.f32 %v6114_v6, %v7593_v2  ;;  %v4362_v36 = vmul.f32 %v4281_v15, %v4281_v15  ;;  %v7937_v62 = vpop.permute.xlu0 %4166 }
 0x268   : > { %v7920_v34 = vor.u32 %v4753_v11, %v4750_v37  ;;  %v4314_v5 = vadd.f32 %v4313_v45, %v4278_v56  ;;  %v4359_v9 = vmul.f32 %v4278_v56, %v4278_v56  ;;  %v4360_v12 = vmul.f32 %v4279_v17, %v4279_v17  ;;  %v7948_v56 = vld [vmem:[%s8053_s2] ss:$0 sm:$0xff] }
 0x269   : > { %v4725_v48 = vsel %vm7610_vm13, %v4716_v61, %v4724_v19  ;;  %v4728_v21 = vshrl.u32 %v5356_v54, 16  ;;  %v4731_v63 = vshll.u32 %v5356_v54, 16  ;;  %v4726_v59 = vrot.slane %v4724_v19, 4 }
 0x26a   : > { %4939 = vst [vmem:[%s6628_s27 + $0x58] sm:$0xf] %v4725_v48  ;;  %v4755_v3 = vsel %vm7610_vm13, %v4746_v42, %v7920_v34  ;;  %v4315_v22 = vadd.f32 %v4314_v5, %v4279_v17  ;;  %v4394_v14 = vadd.f32 %v4393_v44, %v4359_v9  ;;  %v4230_v60 = vmul.f32 %v4157_v55, %v3978_v50 }
 0x26b   : > { %4942 = vst [vmem:[%s6628_s27 + $0x64] sm:$0xf] %v4755_v3  ;;  %v4730_v10 = vrot.slane %v4728_v21, 6  ;;  %v4733_v45 = vrot.slane %v4731_v63, 7  ;;  %v3976_v4 = vmax.f32 %v3940_v41, 0.0  ;;  %v6115_v61 = vadd.f32 %v7765_v25, %v7797_v52  ;;  %v4177_v63 = vpop.permute.xlu0 %4176 }
 0x26c   : > { %v4316_v6 = vadd.f32 %v4315_v22, %v4280_v43  ;;  %v4395_v18 = vadd.f32 %v4394_v14, %v4360_v12  ;;  %v6116_v29 = vadd.f32 %v7772_v13, %v7804_v20  ;;  %v5361_v28 = vpack.c.bf16 %v4230_v60, %v4230_v60 }
 0x26d   : > { %v4734_v33 = vor.u32 %v4733_v45, %v4730_v10  ;;  %v4228_v0 = vmul.f32 %v4147_v53, %v3976_v4  ;;  %v6117_v44 = vadd.f32 %v7787_v30, %v7821_v24  ;;  %v3943_v42 = vadd.f32 %v6115_v61, %v7593_v2  ;;  %v4162_v24 = vpop.permute.xlu1 %4161 }
 0x26e   : > { %v4396_v58 = vadd.f32 %v4395_v18, %v4361_v49  ;;  %v3941_v40 = vadd.f32 %v6116_v29, %v7593_v2  ;;  %v4317_v43 = vadd.f32 %v4316_v6, %v4281_v15  ;;  %v4778_v13 = vshrl.u32 %v5361_v28, 16 }
 0x26f   : > { %v4735_v25 = vsel %vm7610_vm13, %v4726_v59, %v4734_v33  ;;  %v4736_v52 = vrot.slane %v4734_v33, 4  ;;  %v4781_v20 = vshll.u32 %v5361_v28, 16  ;;  %v5359_v53 = vpack.c.bf16 %v4228_v0, %v4228_v0 }
 0x270   : > { %4940 = vst [vmem:[%s6628_s27 + $0x5c] sm:$0xf] %v4735_v25  ;;  %v3979_v37 = vmax.f32 %v3943_v42, 0.0  ;;  %v3977_v11 = vmax.f32 %v3941_v40, 0.0  ;;  %v4397_v30 = vadd.f32 %v4396_v58, %v4362_v36  ;;  %v4780_v15 = vrot.slane %v4778_v13, 6 }
 0x271   : > { %v4745_v2 = vsel %vm7610_vm13, %v4736_v52, %v7913_v46  ;;  %v4783_v49 = vrot.slane %v4781_v20, 7  ;;  %v3946_v17 = vadd.f32 %v7948_v56, %v6117_v44  ;;  %v4758_v19 = vshrl.u32 %v5359_v53, 16 }
 0x272   : > { %4941 = vst [vmem:[%s6628_s27 + $0x60] sm:$0xf] %v4745_v2  ;;  %v4761_v54 = vshll.u32 %v5359_v53, 16  ;;  %v4231_v50 = vmul.f32 %v4162_v24, %v3979_v37  ;;  %v4229_v41 = vmul.f32 %v4152_v35, %v3977_v11  ;;  %v6118_v46 = vadd.f32 %v7795_v31, %v7825_v51 }
 0x273   : > { %v7952_v36 = vor.u32 %v4783_v49, %v4780_v15  ;;  %v3982_v5 = vmax.f32 %v3946_v17, 0.0  ;;  %v6119_v9 = vadd.f32 %v7802_v26, %v7829_v57  ;;  %v4760_v55 = vrot.slane %v4758_v19, 6 }
 0x274   : > { %v4763_v48 = vrot.slane %v4761_v54, 7  ;;  %v4253_v12 = vpack.c.bf16 %v4231_v50, %v4230_v60  ;;  %v5362_v21 = vpack.c.bf16 %v4231_v50, %v4231_v50  ;;  %v4756_v59 = vrot.slane %v7920_v34, 4 }
 0x275   : > { %v4786_v3 = vrot.slane %v7952_v36, 4  ;;  %v4252_v22 = vpack.c.bf16 %v4229_v41, %v4228_v0  ;;  %v5360_v14 = vpack.c.bf16 %v4229_v41, %v4229_v41  ;;  %v4234_v4 = vmul.f32 %v4177_v63, %v3982_v5  ;;  %v4172_v0 = vpop.permute.xlu1 %4171 }
 0x276   : > { %v4764_v35 = vor.u32 %v4763_v48, %v4760_v55  ;;  %v4284_v10 = vunpack.c.l.bf16 %v4253_v12  ;;  %v4788_v45 = vshrl.u32 %v5362_v21, 16  ;;  %v4791_v31 = vshll.u32 %v5362_v21, 16  ;;  %v4187_v21 = vpop.permute.xlu0 %4186 }
 0x277   : > { %v4282_v51 = vunpack.c.l.bf16 %v4252_v22  ;;  %v4283_v6 = vunpack.c.h.bf16 %v4252_v22  ;;  %v4768_v26 = vshrl.u32 %v5360_v14, 16  ;;  %v4285_v18 = vunpack.c.h.bf16 %v4253_v12 }
 0x278   : > { %v4765_v57 = vsel %vm7610_vm13, %v4756_v59, %v4764_v35  ;;  %v4766_v60 = vrot.slane %v4764_v35, 4  ;;  %v4365_v61 = vmul.f32 %v4284_v10, %v4284_v10  ;;  %v4790_v34 = vrot.slane %v4788_v45, 6 }
 0x279   : > { %4943 = vst [vmem:[%s6628_s27 + $0x68] sm:$0xf] %v4765_v57  ;;  %v4793_v29 = vrot.slane %v4791_v31, 7  ;;  %v4318_v33 = vadd.f32 %v4317_v43, %v4282_v51  ;;  %v4363_v28 = vmul.f32 %v4282_v51, %v4282_v51  ;;  %v4364_v44 = vmul.f32 %v4283_v6, %v4283_v6 }
 0x27a   : > { %v4770_v58 = vrot.slane %v4768_v26, 6  ;;  %v4771_v42 = vshll.u32 %v5360_v14, 16  ;;  %v5365_v40 = vpack.c.bf16 %v4234_v4, %v4234_v4  ;;  %v3944_v20 = vadd.f32 %v7948_v56, %v6118_v46 }
 0x27b   : > { %v7963_v25 = vor.u32 %v4793_v29, %v4790_v34  ;;  %v4319_v52 = vadd.f32 %v4318_v33, %v4283_v6  ;;  %v4398_v13 = vadd.f32 %v4397_v30, %v4363_v28  ;;  %v3947_v24 = vadd.f32 %v7948_v56, %v6119_v9  ;;  %v4182_v9 = vpop.permute.xlu1 %4181  ;;  %v4197_v34 = vpop.permute.xlu0 %4196 }
 0x27c   : > { %v4773_v53 = vrot.slane %v4771_v42, 7  ;;  %v4818_v37 = vshrl.u32 %v5365_v40, 16  ;;  %v4821_v11 = vshll.u32 %v5365_v40, 16  ;;  %v4366_v2 = vmul.f32 %v4285_v18, %v4285_v18 }
 0x27d   : > { %v4795_v43 = vsel %vm7610_vm13, %v4786_v3, %v7963_v25  ;;  %v4320_v15 = vadd.f32 %v4319_v52, %v4284_v10  ;;  %v4399_v49 = vadd.f32 %v4398_v13, %v4364_v44  ;;  %v3980_v30 = vmax.f32 %v3944_v20, 0.0 }
 0x27e   : > { %4946 = vst [vmem:[%s6628_s27 + $0x74] sm:$0xf] %v4795_v43  ;;  %v4774_v17 = vor.u32 %v4773_v53, %v4770_v58  ;;  %v4820_v19 = vrot.slane %v4818_v37, 6  ;;  %v4823_v54 = vrot.slane %v4821_v11, 7  ;;  %v3983_v41 = vmax.f32 %v3947_v24, 0.0 }
 0x27f   : > { %v4400_v50 = vadd.f32 %v4399_v49, %v4365_v61  ;;  %v6120_v5 = vadd.f32 %v7810_v47, %v7834_v7  ;;  %v4321_v46 = vadd.f32 %v4320_v15, %v4285_v18  ;;  %v4232_v12 = vmul.f32 %v7937_v62, %v3980_v30  ;;  %v4192_v58 = vpop.permute.xlu1 %4191 }
 0x280   : > { %v4775_v55 = vsel %vm7610_vm13, %v4766_v60, %v4774_v17  ;;  %v4776_v48 = vrot.slane %v4774_v17, 4  ;;  %v4235_v63 = vmul.f32 %v4182_v9, %v3983_v41  ;;  %v6121_v22 = vadd.f32 %v7823_v23, %v7853_v38  ;;  %v8068_v38 = vld [vmem:[#allocation4_spill] sm:$0xff] }
 0x281   : > { %4944 = vst [vmem:[%s6628_s27 + $0x6c] sm:$0xf] %v4775_v55  ;;  %v3945_v59 = vadd.f32 %v7948_v56, %v6120_v5  ;;  %v4401_v3 = vadd.f32 %v4400_v50, %v4366_v2  ;;  %v7983_v7 = vor.u32 %v4823_v54, %v4820_v19  ;;  %v5363_v14 = vpack.c.bf16 %v4232_v12, %v4232_v12 }
 0x282   : > { %v4785_v47 = vsel %vm7610_vm13, %v4776_v48, %v7952_v36  ;;  %v6122_v35 = vadd.f32 %v7827_v39, %v7859_v32  ;;  %v4255_v62 = vpack.c.bf16 %v4235_v63, %v4234_v4  ;;  %v5366_v10 = vpack.c.bf16 %v4235_v63, %v4235_v63 }
 0x283   : > { %4945 = vst [vmem:[%s6628_s27 + $0x70] sm:$0xf] %v4785_v47  ;;  %v3981_v45 = vmax.f32 %v3945_v59, 0.0  ;;  %v3950_v31 = vadd.f32 %v7948_v56, %v6121_v22  ;;  %v4796_v51 = vrot.slane %v7963_v25, 4  ;;  %v4798_v6 = vshrl.u32 %v5363_v14, 16  ;;  %v4202_v5 = vpop.permute.xlu1 %4201 }
 0x284   : > { %v4801_v23 = vshll.u32 %v5363_v14, 16  ;;  %v6123_v26 = vadd.f32 %v8068_v38, %v7861_v8  ;;  %v4288_v36 = vunpack.c.l.bf16 %v4255_v62  ;;  %v4828_v57 = vshrl.u32 %v5366_v10, 16 }
 0x285   : > { %v4831_v60 = vshll.u32 %v5366_v10, 16  ;;  %v3948_v18 = vadd.f32 %v7948_v56, %v6122_v35  ;;  %v4800_v61 = vrot.slane %v4798_v6, 6  ;;  %v4233_v32 = vmul.f32 %v4172_v0, %v3981_v45 }
 0x286   : > { %v4803_v39 = vrot.slane %v4801_v23, 7  ;;  %v3986_v4 = vmax.f32 %v3950_v31, 0.0  ;;  %v4826_v29 = vrot.slane %v7983_v7, 4  ;;  %v7994_v33 = vunpack.c.h.bf16 %v4255_v62 }
 0x287   : > { %v4830_v28 = vrot.slane %v4828_v57, 6  ;;  %v4833_v44 = vrot.slane %v4831_v60, 7  ;;  %v4254_v8 = vpack.c.bf16 %v4233_v32, %v4232_v12  ;;  %v5364_v40 = vpack.c.bf16 %v4233_v32, %v4233_v32 }
 0x288   : > { %v4804_v42 = vor.u32 %v4803_v39, %v4800_v61  ;;  %v4238_v25 = vmul.f32 %v4197_v34, %v3986_v4  ;;  %v3984_v13 = vmax.f32 %v3948_v18, 0.0  ;;  %v3951_v20 = vadd.f32 %v7948_v56, %v6123_v26 }
 0x289   : > { %v4834_v52 = vor.u32 %v4833_v44, %v4830_v28  ;;  %v6124_v0 = vadd.f32 %v7838_v1, %v7865_v27  ;;  %v4369_v37 = vmul.f32 %v4288_v36, %v4288_v36  ;;  %v4286_v11 = vunpack.c.l.bf16 %v4254_v8 }
 0x28a   : > { %v4805_v53 = vsel %vm7610_vm13, %v4796_v51, %v4804_v42  ;;  %v4287_v24 = vunpack.c.h.bf16 %v4254_v8  ;;  %v4806_v2 = vrot.slane %v4804_v42, 4  ;;  %v4808_v15 = vshrl.u32 %v5364_v40, 16 }
 0x28b   : > { %4947 = vst [vmem:[%s6628_s27 + $0x78] sm:$0xf] %v4805_v53  ;;  %v4835_v43 = vsel %vm7610_vm13, %v4826_v29, %v4834_v52  ;;  %v4811_v49 = vshll.u32 %v5364_v40, 16  ;;  %v4322_v17 = vadd.f32 %v4321_v46, %v4286_v11  ;;  %v4367_v19 = vmul.f32 %v4286_v11, %v4286_v11 }
 0x28c   : > { %4950 = vst [vmem:[%s6628_s27 + $0x84] sm:$0xf] %v4835_v43  ;;  %v4368_v54 = vmul.f32 %v4287_v24, %v4287_v24  ;;  %v5369_v30 = vpack.c.bf16 %v4238_v25, %v4238_v25  ;;  %v4810_v50 = vrot.slane %v4808_v15, 6  ;;  %v4236_v27 = vmul.f32 %v4187_v21, %v3984_v13 }
 0x28d   : > { %v4813_v1 = vrot.slane %v4811_v49, 7  ;;  %v3987_v41 = vmax.f32 %v3951_v20, 0.0  ;;  %v4323_v9 = vadd.f32 %v4322_v17, %v4287_v24  ;;  %v4402_v55 = vadd.f32 %v4401_v3, %v4367_v19  ;;  %v4955_v20 = vld [vmem:[%s6628_s27 + $0x98] sm:$0x3] }
 0x28e   : > { %v4858_v48 = vshrl.u32 %v5369_v30, 16  ;;  %v4861_v12 = vshll.u32 %v5369_v30, 16  ;;  %v5367_v59 = vpack.c.bf16 %v4236_v27, %v4236_v27  ;;  %v3949_v47 = vadd.f32 %v7948_v56, %v6124_v0 }
 0x28f   : > { %v4814_v63 = vor.u32 %v4813_v1, %v4810_v50  ;;  %v4239_v22 = vmul.f32 %v4202_v5, %v3987_v41  ;;  %v4324_v14 = vadd.f32 %v4323_v9, %v4288_v36  ;;  %v4403_v46 = vadd.f32 %v4402_v55, %v4368_v54 }
 0x290   : > { %v4860_v35 = vrot.slane %v4858_v48, 6  ;;  %v4863_v62 = vrot.slane %v4861_v12, 7  ;;  %v4838_v45 = vshrl.u32 %v5367_v59, 16  ;;  %v4841_v31 = vshll.u32 %v5367_v59, 16 }
 0x291   : > { %v4815_v21 = vsel %vm7610_vm13, %v4806_v2, %v4814_v63  ;;  %v4816_v10 = vrot.slane %v4814_v63, 4  ;;  %v4404_v3 = vadd.f32 %v4403_v46, %v4369_v37  ;;  %v4257_v6 = vpack.c.bf16 %v4239_v22, %v4238_v25 }
 0x292   : > { %4948 = vst [vmem:[%s6628_s27 + $0x7c] sm:$0xf] %v4815_v21  ;;  %v4864_v51 = vor.u32 %v4863_v62, %v4860_v35  ;;  %v5370_v23 = vpack.c.bf16 %v4239_v22, %v4239_v22  ;;  %v4840_v38 = vrot.slane %v4838_v45, 6  ;;  %v4843_v26 = vrot.slane %v4841_v31, 7 }
 0x293   : > { %v4825_v56 = vsel %vm7610_vm13, %v4816_v10, %v7983_v7  ;;  %v3985_v36 = vmax.f32 %v3949_v47, 0.0  ;;  %v4370_v57 = vmul.f32 %v7994_v33, %v7994_v33  ;;  %v4836_v60 = vrot.slane %v4834_v52, 4 }
 0x294   : > { %4949 = vst [vmem:[%s6628_s27 + $0x80] sm:$0xf] %v4825_v56  ;;  %v4868_v18 = vshrl.u32 %v5370_v23, 16  ;;  %v4844_v61 = vor.u32 %v4843_v26, %v4840_v38  ;;  %v4871_v39 = vshll.u32 %v5370_v23, 16  ;;  %v4325_v4 = vadd.f32 %v4324_v14, %v7994_v33  ;;  %v4338_v56 = vld [vmem:[%s8056_s5 + $0x1] sm:$0x1] }
 0x295   : > { %v4237_v32 = vmul.f32 %v4192_v58, %v3985_v36  ;;  %v4405_v29 = vadd.f32 %v4404_v3, %v4370_v57  ;;  %v4866_v28 = vrot.slane %v4864_v51, 4  ;;  %v4292_v13 = vunpack.c.l.bf16 %v4257_v6 }
 0x296   : > { %v4870_v34 = vrot.slane %v4868_v18, 6  ;;  %v4845_v7 = vsel %vm7610_vm13, %v4836_v60, %v4844_v61  ;;  %v4873_v44 = vrot.slane %v4871_v39, 7  ;;  %v4846_v24 = vrot.slane %v4844_v61, 4 }
 0x297   : > { %v4256_v42 = vpack.c.bf16 %v4237_v32, %v4236_v27  ;;  %4951 = vst [vmem:[%s6628_s27 + $0x88] sm:$0xf] %v4845_v7  ;;  %v5368_v8 = vpack.c.bf16 %v4237_v32, %v4237_v32  ;;  %v4293_v2 = vunpack.c.h.bf16 %v4257_v6  ;;  %v4373_v1 = vmul.f32 %v4292_v13, %v4292_v13 }
 0x298   : > { %v4874_v40 = vor.u32 %v4873_v44, %v4870_v34 }
 0x299   : > { %v4290_v25 = vunpack.c.l.bf16 %v4256_v42  ;;  %v4291_v52 = vunpack.c.h.bf16 %v4256_v42  ;;  %v4848_v58 = vshrl.u32 %v5368_v8, 16  ;;  %v4851_v0 = vshll.u32 %v5368_v8, 16 }
 0x29a   : > { %v4875_v33 = vsel %vm7610_vm13, %v4866_v28, %v4874_v40  ;;  %v4876_v53 = vrot.slane %v4874_v40, 4  ;;  %v4374_v55 = vmul.f32 %v4293_v2, %v4293_v2 }
 0x29b   : > { %v4326_v37 = vadd.f32 %v4325_v4, %v4290_v25  ;;  %v4371_v11 = vmul.f32 %v4290_v25, %v4290_v25  ;;  %4954 = vst [vmem:[%s6628_s27 + $0x94] sm:$0xf] %v4875_v33  ;;  %v4850_v43 = vrot.slane %v4848_v58, 6  ;;  %v4853_v15 = vrot.slane %v4851_v0, 7 }
 0x29c   : > { %v4956_v17 = vsel %vm7562_vm8, %v4876_v53, %v4955_v20  ;;  %v4372_v54 = vmul.f32 %v4291_v52, %v4291_v52 }
 0x29d   : > { %v4327_v19 = vadd.f32 %v4326_v37, %v4291_v52  ;;  %v4406_v30 = vadd.f32 %v4405_v29, %v4371_v11  ;;  %4957 = vst [vmem:[%s6628_s27 + $0x98] sm:$0x3] %v4956_v17  ;;  %v4854_v50 = vor.u32 %v4853_v15, %v4850_v43 }
 0x29f   : > { %v4328_v27 = vadd.f32 %v4327_v19, %v4292_v13  ;;  %v4407_v41 = vadd.f32 %v4406_v30, %v4372_v54  ;;  %v4855_v5 = vsel %vm7610_vm13, %v4846_v24, %v4854_v50  ;;  %v4856_v9 = vrot.slane %v4854_v50, 4 }
 0x2a0   : > { %4952 = vst [vmem:[%s6628_s27 + $0x8c] sm:$0xf] %v4855_v5 }
 0x2a1   : > { %v4329_v48 = vadd.f32 %v4328_v27, %v4293_v2  ;;  %v4408_v12 = vadd.f32 %v4407_v41, %v4373_v1  ;;  %v4865_v63 = vsel %vm7610_vm13, %v4856_v9, %v4864_v51 }
 0x2a2   : > { %4953 = vst [vmem:[%s6628_s27 + $0x90] sm:$0xf] %v4865_v63 }
 0x2a3   : > { %v4330_v59 = vrot.slane %v4329_v48, 4  ;;  %v4409_v22 = vadd.f32 %v4408_v12, %v4374_v55 }
 0x2a4   : > { %v4958_v47 = vld [vmem:[%s6628_s27 + $0x98] sm:$0xe] }
 0x2a5   : > { %v4331_v14 = vadd.f32 %v4330_v59, %v4329_v48  ;;  %v4410_v46 = vrot.slane %v4409_v22, 4  ;;  %v4959_v62 = vsel %vm7603_vm12, 0, %v4958_v47 }
 0x2a6   : > { %4960 = vst [vmem:[%s6628_s27 + $0x98] sm:$0xe] %v4959_v62 }
 0x2a7   : > { %v4332_v21 = vrot.slane %v4331_v14, 2  ;;  %v4411_v10 = vadd.f32 %v4410_v46, %v4409_v22 }
 0x2a9   : > { %v4333_v45 = vadd.f32 %v4332_v21, %v4331_v14  ;;  %v4412_v31 = vrot.slane %v4411_v10, 2 }
 0x2ab   : > { %v4334_v3 = vrot.slane %v4333_v45, 1  ;;  %v4413_v6 = vadd.f32 %v4412_v31, %v4411_v10 }
 0x2ad   : > { %v4335_v51 = vadd.f32 %v4334_v3, %v4333_v45  ;;  %v4414_v23 = vrot.slane %v4413_v6, 1 }
 0x2af   : > { %v4336_v38 = vadd.f32 %v4335_v51, %v4294_v16  ;;  %v4415_v26 = vadd.f32 %v4414_v23, %v4413_v6 }
 0x2b1   : > { %4337 = vst [vmem:[%s8056_s5] sm:$0x1] %v4336_v38  ;;  %v4416_v36 = vadd.f32 %v4415_v26, %v4338_v56 }
 0x2b3   : > { %4417 = vst [vmem:[%s8056_s5 + $0x1] sm:$0x1] %v4416_v36 }
 0x2b4 PF: > { %s16_s18 = sadd.s32 1, %s6578_s18  }
 0x2b5   : > { %p13_p5 = scmp.ge.s32.totalorder %s16_s18, 4  }
 0x2b7   :  { %15 = sbr.rel (!%p13_p5) target bundleno = 1 (0x1), region = 86 }

// kernel: block_forward.4
= control target key start
LH: loop header
LB: loop body
LE: loop exit
PB: predicated region body
PF: predicated region fallthrough
CT: control target
= control target key end

     0   :  { %s6746_s17 = smov 0   ;;  %s8994_s0 = inlined_call_operand.vmem [shape: bf16[2,342,128], index: 0, kind: input, shape index: {}]   ;;  %s8995_s1 = inlined_call_operand.vmem [shape: f32[8,128], index: 1, kind: input, shape index: {}]   ;;  %s8996_s2 = inlined_call_operand.vmem [shape: f32[1,128], index: 2, kind: input, shape index: {}]   ;;  %s8997_s3 = inlined_call_operand.vmem [shape: f32[1,128], index: 3, kind: input, shape index: {}]   ;;  %s8998_s4 = inlined_call_operand.vmem [shape: bf16[2,1,128], index: 4, kind: input, shape index: {}]   ;;  %s8999_s5 = inlined_call_operand.vmem [shape: bf16[128,128], index: 5, kind: input, shape index: {}]   ;;  %s9000_s6 = inlined_call_operand.vmem [shape: f32[1,128], index: 6, kind: input, shape index: {}]   ;;  %s9001_s7 = inlined_call_operand.vmem [shape: bf16[9,128,128], index: 7, kind: input, shape index: {}]   ;;  %s9002_s8 = inlined_call_operand.vmem [shape: f32[1,128], index: 8, kind: input, shape index: {}]   ;;  %s9003_s9 = inlined_call_operand.vmem [shape: f32[342,1], index: 9, kind: input, shape index: {}]   ;;  %s9004_s10 = inlined_call_operand.vmem [shape: bf16[2,342,128], index: 10, kind: output, shape index: {0}]   ;;  %s9005_s11 = inlined_call_operand.vmem [shape: f32[8,128], index: 11, kind: output, shape index: {1}]  }
   0x1 LB: > { %s5138_s18 = sadd.s32 4294967295, %s6680_s17   ;;  %p5142_p0 = scmp.ge.s32.totalorder %s6680_s17, 1  ;;  %s6680_s17 = sphi %s6746_s17, %s22_s17  }
   0x2   : > { %p343_p1 = scmp.lt.s32.totalorder %s6680_s17, 3 }
   0x4   : > { %p344_p2 = pnand %p5142_p0, %p343_p1 }
   0x6   : > { %347 = sbr.rel (%p344_p2) target bundleno = 980 (0x3d4), region = 60 }
   0xd   : > { %p386_p3 = scmp.lt.s32.totalorder %s5138_s18, 1  ;;  %p5145_p4 = scmp.ne.s32.totalorder %s5138_s18, 0 }
   0xe   : > { %v6682_v0 = vmov (!%p5145_p4), 0.0  }
   0xf   : > { %s6754_s19 = scalar_select %p386_p3, %s5138_s18, 1 }
  0x10   : > { %403 = sbr.rel (%p5145_p4) target bundleno = 23 (0x17), region = 64  ;;  %404 = vst [vmem:[%s9005_s11] sm:$0xff] (!%p5145_p4), %v6682_v0 }
  0x11   : > { %s6568_s20 = smul.u32 172, %s6754_s19  ;;  %s393_s23 = scalar_lea.vmem %s8998_s4, %s6754_s19 }
  0x13   : > { %s6764_s26 = scalar_lea.vmem %s8994_s0, %s6568_s20  ;;  %s6769_s29 = scalar_lea.vmem %s9004_s10, %s6568_s20 }
  0x17 PF: > { %v708_v1 = vld [vmem:[%s9003_s9 + $0x10] sm:$0xff]  ;;  %v706_v2 = vld [vmem:[%s9003_s9] sm:$0xff]  ;;  %v6683_v3 = vmov 0   ;;  %v6684_v5 = vmov 0.0   ;;  %v709_v6 = vld [vmem:[%s9003_s9 + $0x18] sm:$0xff]  ;;  %vm6685_vm0 = vmmov 0  }
  0x18   : > { %6582 = vset.pattern.permute.xlu1 %v6683_v3  ;;  %4521 = vst [vmem:[%s6769_s29] sm:$0xf] %v6683_v3  ;;  %4522 = vst [vmem:[%s6769_s29 + $0x4] sm:$0xf] %v6683_v3  ;;  %6581 = vset.pattern.permute.xlu0 %v6683_v3  ;;  %v6583_v4 = vld [vmem:[%s8999_s5] sm:$0xff]   ;;  %v707_v7 = vld [vmem:[%s9003_s9 + $0x8] sm:$0xff]  ;;  %vm2702_vm3 = vcmask 1045504  }
  0x19   : > { %5064 = vst [vmem:[%s6769_s29 + $0x9c] sm:$0xf] %v6683_v3  ;;  %5065 = vst [vmem:[%s6769_s29 + $0xa0] sm:$0xf] %v6683_v3  ;;  %760 = vperm.xlu1 %6582, %v708_v1   ;;  %750 = vperm.xlu0 %6581, %v706_v2   ;;  %v6584_v8 = vld [vmem:[%s8999_s5 + $0x8] sm:$0xff]   ;;  %v710_v10 = vld [vmem:[%s9003_s9 + $0x20] sm:$0xff] }
  0x1a   : > { %5066 = vst [vmem:[%s6769_s29 + $0xa4] sm:$0xf] %v6683_v3  ;;  %5067 = vst [vmem:[%s6769_s29 + $0xa8] sm:$0x7] %v6683_v3  ;;  %5776 = vmatprep.subr.bf16.mxu0 %v6684_v5  ;;  %5792 = vmatprep.mubr.msk.bf16.mxu0 %vm6685_vm0, %v6684_v5  ;;  %v711_v9 = vld [vmem:[%s9003_s9 + $0x28] sm:$0xff]  ;;  %v6585_v11 = vld [vmem:[%s8999_s5 + $0x10] sm:$0xff]  }
  0x1b   : > { %5777 = vmatpush3.bf16.msra.mxu0 %v6583_v4  ;;  %v713_v12 = vld [vmem:[%s9003_s9 + $0x38] sm:$0xff]  ;;  %v712_v13 = vld [vmem:[%s9003_s9 + $0x30] sm:$0xff]  ;;  %v715_v15 = vld [vmem:[%s9003_s9 + $0x48] sm:$0xff]  ;;  %vm1054_vm1 = vsmask.f32 7424  ;;  %vm1707_vm4 = vcmask 1046528  }
  0x1c   : > { %5778 = vmatprep.subr.bf16.mxu0 %v6684_v5  ;;  %v6586_v14 = vld [vmem:[%s8999_s5 + $0x18] sm:$0xff]   ;;  %v714_v16 = vld [vmem:[%s9003_s9 + $0x40] sm:$0xff]  ;;  %v716_v19 = vld [vmem:[%s9003_s9 + $0x50] sm:$0xff]  ;;  %vm2323_vm2 = vsmask.f32 6400  ;;  %vm3695_vm6 = vcmask 1044480  }
  0x1d   : > { %765 = vperm.xlu1 %6582, %v709_v6   ;;  %755 = vperm.xlu0 %6581, %v707_v7   ;;  %v6587_v17 = vld [vmem:[%s8999_s5 + $0x20] sm:$0xff]   ;;  %v717_v18 = vld [vmem:[%s9003_s9 + $0x58] sm:$0xff]  ;;  %v6588_v20 = vld [vmem:[%s8999_s5 + $0x28] sm:$0xff]   ;;  %vm3318_vm5 = vsmask.f32 5376  ;;  %vm4523_vm7 = vcmask 1041408  }
  0x1e   : > { %v719_v21 = vld [vmem:[%s9003_s9 + $0x68] sm:$0xff]  ;;  %v718_v22 = vld [vmem:[%s9003_s9 + $0x60] sm:$0xff]  ;;  %v6589_v23 = vld [vmem:[%s8999_s5 + $0x30] sm:$0xff]   ;;  %vm4524_vm8 = vsmask.f32 1280  ;;  %vm5017_vm10 = vcmask 1043457  }
  0x1f   : > { %5779 = vmatpush3.bf16.msra.mxu0 %v6584_v8  ;;  %v721_v24 = vld [vmem:[%s9003_s9 + $0x78] sm:$0xff]  ;;  %v720_v25 = vld [vmem:[%s9003_s9 + $0x70] sm:$0xff]  ;;  %v723_v27 = vld [vmem:[%s9003_s9 + $0x88] sm:$0xff]  ;;  %vm5018_vm11 = vsmask.f32 7942 }
  0x20   : > { %5780 = vmatprep.subr.bf16.mxu0 %v6684_v5  ;;  %v6590_v26 = vld [vmem:[%s8999_s5 + $0x38] sm:$0xff]   ;;  %v722_v28 = vld [vmem:[%s9003_s9 + $0x80] sm:$0xff]  ;;  %v724_v31 = vld [vmem:[%s9003_s9 + $0x90] sm:$0xff]  ;;  %vm4619_vm12 = vsmask.f32 5392 }
  0x21   : > { %775 = vperm.xlu1 %6582, %v711_v9   ;;  %770 = vperm.xlu0 %6581, %v710_v10   ;;  %v415_v29 = vld [vmem:[%s393_s23] sm:$0x1]  ;;  %v725_v30 = vld [vmem:[%s9003_s9 + $0x98] sm:$0xff]  ;;  %v727_v32 = vld [vmem:[%s9003_s9 + $0xa8] sm:$0xff] }
  0x22   : > { %v726_v33 = vld [vmem:[%s9003_s9 + $0xa0] sm:$0xff]  ;;  %v729_v34 = vld [vmem:[%s9003_s9 + $0xb8] sm:$0xff]  ;;  %v728_v35 = vld [vmem:[%s9003_s9 + $0xb0] sm:$0xff] }
  0x23   : > { %5781 = vmatpush3.bf16.msra.mxu0 %v6585_v11  ;;  %v731_v36 = vld [vmem:[%s9003_s9 + $0xc8] sm:$0xff]  ;;  %v730_v37 = vld [vmem:[%s9003_s9 + $0xc0] sm:$0xff]  ;;  %v733_v38 = vld [vmem:[%s9003_s9 + $0xd8] sm:$0xff] }
  0x24   : > { %5782 = vmatprep.subr.bf16.mxu0 %v6684_v5  ;;  %v732_v39 = vld [vmem:[%s9003_s9 + $0xd0] sm:$0xff]  ;;  %v735_v40 = vld [vmem:[%s9003_s9 + $0xe8] sm:$0xff]  ;;  %v734_v41 = vld [vmem:[%s9003_s9 + $0xe0] sm:$0xff] }
  0x25   : > { %785 = vperm.xlu1 %6582, %v713_v12   ;;  %780 = vperm.xlu0 %6581, %v712_v13   ;;  %v737_v42 = vld [vmem:[%s9003_s9 + $0xf8] sm:$0xff]  ;;  %v736_v43 = vld [vmem:[%s9003_s9 + $0xf0] sm:$0xff]  ;;  %v739_v44 = vld [vmem:[%s9003_s9 + $0x108] sm:$0xff] }
  0x26   : > { %v738_v45 = vld [vmem:[%s9003_s9 + $0x100] sm:$0xff]  ;;  %v741_v46 = vld [vmem:[%s9003_s9 + $0x118] sm:$0xff]  ;;  %v740_v47 = vld [vmem:[%s9003_s9 + $0x110] sm:$0xff] }
  0x27   : > { %5783 = vmatpush3.bf16.msra.mxu0 %v6586_v14  ;;  %v743_v48 = vld [vmem:[%s9003_s9 + $0x128] sm:$0xff]  ;;  %v742_v49 = vld [vmem:[%s9003_s9 + $0x120] sm:$0xff]  ;;  %v745_v50 = vld [vmem:[%s9003_s9 + $0x138] sm:$0xff] }
  0x28   : > { %5784 = vmatprep.subr.bf16.mxu0 %v6684_v5  ;;  %v744_v51 = vld [vmem:[%s9003_s9 + $0x130] sm:$0xff]  ;;  %v747_v52 = vld [vmem:[%s9003_s9 + $0x148] sm:$0xff]  ;;  %v746_v53 = vld [vmem:[%s9003_s9 + $0x140] sm:$0xff] }
  0x29   : > { %795 = vperm.xlu1 %6582, %v715_v15   ;;  %790 = vperm.xlu0 %6581, %v714_v16   ;;  %v4092_v54 = vld [vmem:[%s9003_s9 + $0x1b] sm:$0xff]  ;;  %v4091_v55 = vld [vmem:[%s9003_s9 + $0x13] sm:$0xff]  ;;  %v4094_v56 = vld [vmem:[%s9003_s9 + $0x2b] sm:$0xff] }
  0x2a   : > { %v4093_v57 = vld [vmem:[%s9003_s9 + $0x23] sm:$0xff]  ;;  %v4096_v58 = vld [vmem:[%s9003_s9 + $0x3b] sm:$0xff]  ;;  %v4095_v59 = vld [vmem:[%s9003_s9 + $0x33] sm:$0xff] }
  0x2b   : > { %5785 = vmatpush3.bf16.msra.mxu0 %v6587_v17  ;;  %v4098_v60 = vld [vmem:[%s9003_s9 + $0x4b] sm:$0xff]  ;;  %v4097_v61 = vld [vmem:[%s9003_s9 + $0x43] sm:$0xff]  ;;  %v4100_v62 = vld [vmem:[%s9003_s9 + $0x5b] sm:$0xff] }
  0x2c   : > { %5786 = vmatprep.subr.bf16.mxu0 %v6684_v5  ;;  %v4099_v63 = vld [vmem:[%s9003_s9 + $0x53] sm:$0xff]  ;;  %v4102_v0 = vld [vmem:[%s9003_s9 + $0x6b] sm:$0xff]  ;;  %v4101_v1 = vld [vmem:[%s9003_s9 + $0x63] sm:$0xff] }
  0x2d   : > { %805 = vperm.xlu1 %6582, %v717_v18   ;;  %800 = vperm.xlu0 %6581, %v716_v19   ;;  %v6591_v2 = vld [vmem:[%s9001_s7 + $0x40] sm:$0xff]   ;;  %v6593_v6 = vld [vmem:[%s9001_s7 + $0x48] sm:$0xff]   ;;  %v6595_v10 = vld [vmem:[%s9001_s7 + $0x50] sm:$0xff]  }
  0x2e   : > { %v6592_v3 = vld [vmem:[%s9001_s7 + $0x100] sm:$0xff]   ;;  %v6594_v7 = vld [vmem:[%s9001_s7 + $0x108] sm:$0xff]   ;;  %v6596_v11 = vld [vmem:[%s9001_s7 + $0x110] sm:$0xff]  }
  0x2f   : > { %5787 = vmatpush3.bf16.msra.mxu0 %v6588_v20  ;;  %v4104_v4 = vld [vmem:[%s9003_s9 + $0x7b] sm:$0xff]  ;;  %6264 = vmatprep.subr.bf16.mxu1 %v6592_v3  ;;  %v4106_v8 = vld [vmem:[%s9003_s9 + $0x8b] sm:$0xff]  ;;  %v4105_v9 = vld [vmem:[%s9003_s9 + $0x83] sm:$0xff] }
  0x30   : > { %5788 = vmatprep.subr.bf16.mxu0 %v6684_v5  ;;  %6272 = vmatpush3.bf16.msra.mxu1 %v6592_v3  ;;  %v4108_v12 = vld [vmem:[%s9003_s9 + $0x9b] sm:$0xff]  ;;  %v4107_v13 = vld [vmem:[%s9003_s9 + $0x93] sm:$0xff]  ;;  %v4110_v14 = vld [vmem:[%s9003_s9 + $0xab] sm:$0xff] }
  0x31   : > { %815 = vperm.xlu1 %6582, %v719_v21   ;;  %810 = vperm.xlu0 %6581, %v718_v22   ;;  %v4109_v15 = vld [vmem:[%s9003_s9 + $0xa3] sm:$0xff]  ;;  %v4112_v16 = vld [vmem:[%s9003_s9 + $0xbb] sm:$0xff]  ;;  %v4111_v17 = vld [vmem:[%s9003_s9 + $0xb3] sm:$0xff] }
  0x32   : > { %6265 = vmatprep.subr.bf16.mxu1 %v6594_v7  ;;  %v4114_v18 = vld [vmem:[%s9003_s9 + $0xcb] sm:$0xff]  ;;  %v4113_v19 = vld [vmem:[%s9003_s9 + $0xc3] sm:$0xff]  ;;  %v4116_v20 = vld [vmem:[%s9003_s9 + $0xdb] sm:$0xff] }
  0x33   : > { %5789 = vmatpush3.bf16.msra.mxu0 %v6589_v23  ;;  %v4115_v21 = vld [vmem:[%s9003_s9 + $0xd3] sm:$0xff]  ;;  %v4118_v22 = vld [vmem:[%s9003_s9 + $0xeb] sm:$0xff]  ;;  %v4117_v23 = vld [vmem:[%s9003_s9 + $0xe3] sm:$0xff] }
  0x34   : > { %5790 = vmatprep.subr.bf16.mxu0 %v6684_v5  ;;  %v4103_v5 = vld [vmem:[%s9003_s9 + $0x73] sm:$0xff]  ;;  %6273 = vmatpush3.bf16.msra.mxu1 %v6594_v7  ;;  %vm8379_vm9 = vmand %vm4523_vm7, %vm4524_vm8 }
  0x35   : > { %825 = vperm.xlu1 %6582, %v721_v24   ;;  %820 = vperm.xlu0 %6581, %v720_v25   ;;  %v4120_v24 = vld [vmem:[%s9003_s9 + $0xfb] sm:$0xff]  ;;  %v4119_v25 = vld [vmem:[%s9003_s9 + $0xf3] sm:$0xff]  ;;  %vm8500_vm13 = vmand %vm5017_vm10, %vm5018_vm11 }
  0x36   : > { %6266 = vmatprep.subr.bf16.mxu1 %v6596_v11  ;;  %vm8536_vm14 = vmor %vm4524_vm8, %vm4619_vm12 }
  0x37   : > { %5791 = vmatpush3.bf16.msra.mxu0 %v6590_v26  ;;  %v6597_v26 = vld [vmem:[%s9001_s7 + $0x58] sm:$0xff]  }
  0x38   : > { %5796 = vmatprep.subr.bf16.mxu0 %v6591_v2  ;;  %6274 = vmatpush3.bf16.msra.mxu1 %v6596_v11 }
  0x39   : > { %835 = vperm.xlu1 %6582, %v723_v27   ;;  %830 = vperm.xlu0 %6581, %v722_v28   ;;  %v6598_v27 = vld [vmem:[%s9001_s7 + $0x118] sm:$0xff]   ;;  %v4122_v28 = vld [vmem:[%s9003_s9 + $0x10b] sm:$0xff] }
  0x3a   : > { %5793 = vmatmul.mubr.bf16.vlgmr.msra.gmra.mrb[0].mxu0 %v415_v29  ;;  %v4121_v29 = vld [vmem:[%s9003_s9 + $0x103] sm:$0xff]  ;;  %6267 = vmatprep.subr.bf16.mxu1 %v6598_v27 }
  0x3b   : > { %5797 = vmatpush3.bf16.msra.mxu0 %v6591_v2  ;;  %v407_v2 = vld [vmem:[%s8995_s1 + $0x1] sm:$0x1] }
  0x3c   : > { %5798 = vmatprep.subr.bf16.mxu0 %v6593_v6  ;;  %6275 = vmatpush3.bf16.msra.mxu1 %v6598_v27 }
  0x3d   : > { %845 = vperm.xlu1 %6582, %v725_v30   ;;  %840 = vperm.xlu0 %6581, %v724_v31   ;;  %v6599_v30 = vld [vmem:[%s9001_s7 + $0x60] sm:$0xff]  }
  0x3e   : > { %v6600_v31 = vld [vmem:[%s9001_s7 + $0x120] sm:$0xff]  }
  0x3f   : > { %5799 = vmatpush3.bf16.msra.mxu0 %v6593_v6  ;;  %6268 = vmatprep.subr.bf16.mxu1 %v6600_v31 }
  0x40   : > { %5800 = vmatprep.subr.bf16.mxu0 %v6595_v10  ;;  %6276 = vmatpush3.bf16.msra.mxu1 %v6600_v31  ;;  %v5518_v31 = vld [vmem:[%s6764_s26 + $0x30] sm:$0xff]  }
  0x41   : > { %855 = vperm.xlu1 %6582, %v727_v32   ;;  %850 = vperm.xlu0 %6581, %v726_v33   ;;  %v4124_v32 = vld [vmem:[%s9003_s9 + $0x11b] sm:$0xff]  ;;  %v4123_v33 = vld [vmem:[%s9003_s9 + $0x113] sm:$0xff] }
  0x43   : > { %5801 = vmatpush3.bf16.msra.mxu0 %v6595_v10 }
  0x44   : > { %5802 = vmatprep.subr.bf16.mxu0 %v6597_v26 }
  0x45   : > { %865 = vperm.xlu1 %6582, %v729_v34   ;;  %860 = vperm.xlu0 %6581, %v728_v35   ;;  %v6601_v34 = vld [vmem:[%s9001_s7 + $0x68] sm:$0xff]  }
  0x46   : > { %v6602_v35 = vld [vmem:[%s9001_s7 + $0x128] sm:$0xff]  }
  0x47   : > { %5803 = vmatpush3.bf16.msra.mxu0 %v6597_v26  ;;  %6269 = vmatprep.subr.bf16.mxu1 %v6602_v35 }
  0x48   : > { %5804 = vmatprep.subr.bf16.mxu0 %v6599_v30  ;;  %6277 = vmatpush3.bf16.msra.mxu1 %v6602_v35 }
  0x49   : > { %875 = vperm.xlu1 %6582, %v731_v36   ;;  %870 = vperm.xlu0 %6581, %v730_v37   ;;  %v4126_v36 = vld [vmem:[%s9003_s9 + $0x12b] sm:$0xff]  ;;  %v4125_v37 = vld [vmem:[%s9003_s9 + $0x123] sm:$0xff] }
  0x4b   : > { %5805 = vmatpush3.bf16.msra.mxu0 %v6599_v30 }
  0x4c   : > { %5806 = vmatprep.subr.bf16.mxu0 %v6601_v34 }
  0x4d   : > { %885 = vperm.xlu1 %6582, %v733_v38   ;;  %880 = vperm.xlu0 %6581, %v732_v39   ;;  %v6603_v38 = vld [vmem:[%s9001_s7 + $0x70] sm:$0xff]  }
  0x4e   : > { %v6604_v39 = vld [vmem:[%s9001_s7 + $0x130] sm:$0xff]  }
  0x4f   : > { %5807 = vmatpush3.bf16.msra.mxu0 %v6601_v34  ;;  %6270 = vmatprep.subr.bf16.mxu1 %v6604_v39 }
  0x50   : > { %5808 = vmatprep.subr.bf16.mxu0 %v6603_v38  ;;  %6278 = vmatpush3.bf16.msra.mxu1 %v6604_v39 }
  0x51   : > { %895 = vperm.xlu1 %6582, %v735_v40   ;;  %890 = vperm.xlu0 %6581, %v734_v41   ;;  %v6605_v40 = vld [vmem:[%s9001_s7 + $0x78] sm:$0xff]  }
  0x52   : > { %v6606_v41 = vld [vmem:[%s9001_s7 + $0x138] sm:$0xff]  }
  0x53   : > { %5809 = vmatpush3.bf16.msra.mxu0 %v6603_v38  ;;  %6271 = vmatprep.subr.bf16.mxu1 %v6606_v41  ;;  %v5520_v38 = vld [vmem:[%s6764_s26 + $0x40] sm:$0xff]  }
  0x54   : > { %5810 = vmatprep.subr.bf16.mxu0 %v6605_v40  ;;  %6279 = vmatpush3.bf16.msra.mxu1 %v6606_v41 }
  0x55   : > { %905 = vperm.xlu1 %6582, %v737_v42   ;;  %900 = vperm.xlu0 %6581, %v736_v43  }
  0x57   : > { %5811 = vmatpush3.bf16.msra.mxu0 %v6605_v40 }
  0x59   : > { %915 = vperm.xlu1 %6582, %v739_v44   ;;  %910 = vperm.xlu0 %6581, %v738_v45   ;;  %v7098_v44 = vld [vmem:[%s9001_s7] sm:$0xff]  }
  0x5a   : > { %9059 = vst [vmem:[#allocation2_spill] sm:$0xff] %v7098_v44  ;;  %5848 = vmatprep.subr.bf16.mxu0 %v7098_v44  ;;  %v7209_v44 = vld [vmem:[%s6764_s26 + $0x68] sm:$0xff]  }
  0x5d   : > { %925 = vperm.xlu1 %6582, %v741_v46   ;;  %920 = vperm.xlu0 %6581, %v740_v47  }
  0x61   : > { %935 = vperm.xlu1 %6582, %v743_v48   ;;  %930 = vperm.xlu0 %6581, %v742_v49  }
  0x65   : > { %945 = vperm.xlu1 %6582, %v745_v50   ;;  %940 = vperm.xlu0 %6581, %v744_v51   ;;  %v7116_v51 = vld [vmem:[%s9001_s7 + $0x140] sm:$0xff]  }
  0x66   : > { %9060 = vst [vmem:[#allocation3_spill] sm:$0xff] %v7116_v51  ;;  %6056 = vmatprep.subr.bf16.mxu1 %v7116_v51 }
  0x69   : > { %955 = vperm.xlu1 %6582, %v747_v52   ;;  %950 = vperm.xlu0 %6581, %v746_v53  }
  0x6d   : > { %4134 = vperm.xlu1 %6582, %v4092_v54   ;;  %4129 = vperm.xlu0 %6581, %v4091_v55  }
  0x71   : > { %4144 = vperm.xlu1 %6582, %v4094_v56   ;;  %4139 = vperm.xlu0 %6581, %v4093_v57  }
  0x75   : > { %4154 = vperm.xlu1 %6582, %v4096_v58   ;;  %4149 = vperm.xlu0 %6581, %v4095_v59  }
  0x79   : > { %4164 = vperm.xlu1 %6582, %v4098_v60   ;;  %4159 = vperm.xlu0 %6581, %v4097_v61  }
  0x7d   : > { %4174 = vperm.xlu1 %6582, %v4100_v62   ;;  %4169 = vperm.xlu0 %6581, %v4099_v63   ;;  %v405_v62 = vld [vmem:[%s8995_s1] sm:$0x1] }
  0x81   : > { %4184 = vperm.xlu1 %6582, %v4102_v0   ;;  %4179 = vperm.xlu0 %6581, %v4101_v1   ;;  %v7146_v1 = vmul.f32 0.001953125, %v405_v62 }
  0x85   : > { %4194 = vperm.xlu1 %6582, %v4104_v4   ;;  %4189 = vperm.xlu0 %6581, %v4103_v5   ;;  %v408_v4 = vmul.f32 0.001953125, %v407_v2  ;;  %v409_v5 = vmul.f32 %v7146_v1, %v7146_v1  ;;  %v5521_v2 = vld [vmem:[%s6764_s26 + $0x48] sm:$0xff]  }
  0x87   : > { %v410_v7 = vsub.f32 %v408_v4, %v409_v5  ;;  %v5522_v4 = vld [vmem:[%s6764_s26 + $0x50] sm:$0xff]  }
  0x88   : > { %v5471_v51 = vunpack.c.l.bf16 %v5522_v4 }
  0x89   : > { %4204 = vperm.xlu1 %6582, %v4106_v8   ;;  %4199 = vperm.xlu0 %6581, %v4105_v9   ;;  %v412_v10 = vadd.f32 1e-05, %v410_v7 }
  0x8b   : > { %6663 = vrsqrt.f32 %v412_v10  ;;  %v5456_v10 = vunpack.c.h.bf16 %v5518_v31 }
  0x8d   : > { %4214 = vperm.xlu1 %6582, %v4108_v12   ;;  %4209 = vperm.xlu0 %6581, %v4107_v13   ;;  %v611_v13 = vlaneseq }
  0x91   : > { %4224 = vperm.xlu1 %6582, %v4110_v14   ;;  %4219 = vperm.xlu0 %6581, %v4109_v15  }
  0x95   : > { %4234 = vperm.xlu1 %6582, %v4112_v16   ;;  %4229 = vperm.xlu0 %6581, %v4111_v17   ;;  %v7169_v16 = vshrl.u32 %v611_v13, 7  ;;  %v5513_v17 = vld [vmem:[%s6764_s26 + $0x8] sm:$0xff]   ;;  %v5455_v13 = vunpack.c.l.bf16 %v5518_v31 }
  0x96   : > { %v5435_v27 = vunpack.c.l.bf16 %v5513_v17 }
  0x98   : > { %v7091_v42 = vpop.permute.xlu1 %760  ;;  %v7093_v43 = vpop.permute.xlu0 %750 }
  0x99   : > { %4244 = vperm.xlu1 %6582, %v4114_v18   ;;  %4239 = vperm.xlu0 %6581, %v4113_v19   ;;  %v5430_v18 = vld [vmem:[%s6764_s26] sm:$0xff]   ;;  %v6664_v19 = vpop.eup %6663 }
  0x9a   : > { %v5432_v30 = vunpack.c.h.bf16 %v5430_v18 }
  0x9c   : > { %v7100_v45 = vpop.permute.xlu1 %765  ;;  %v7102_v46 = vpop.permute.xlu0 %755 }
  0x9d   : > { %4254 = vperm.xlu1 %6582, %v4116_v20   ;;  %4249 = vperm.xlu0 %6581, %v4115_v21   ;;  %v411_v20 = vld [vmem:[%s8996_s2] sm:$0x1]  ;;  %v5514_v21 = vld [vmem:[%s6764_s26 + $0x10] sm:$0xff]  }
  0x9e   : > { %v5440_v34 = vunpack.c.h.bf16 %v5514_v21  ;;  %v5439_v35 = vunpack.c.l.bf16 %v5514_v21  ;;  %v5464_v21 = vunpack.c.h.bf16 %v5520_v38 }
  0xa0   : > { %v7105_v47 = vpop.permute.xlu1 %775  ;;  %v7107_v48 = vpop.permute.xlu0 %770 }
  0xa1   : > { %4264 = vperm.xlu1 %6582, %v4118_v22   ;;  %4259 = vperm.xlu0 %6581, %v4117_v23   ;;  %v5515_v22 = vld [vmem:[%s6764_s26 + $0x18] sm:$0xff]   ;;  %v9006_v23 = vsub.s32 0, %v7169_v16 }
  0xa2   : > { %v5443_v39 = vunpack.c.l.bf16 %v5515_v22 }
  0xa4   : > { %v7109_v49 = vpop.permute.xlu1 %785  ;;  %v7111_v50 = vpop.permute.xlu0 %780 }
  0xa5   : > { %4274 = vperm.xlu1 %6582, %v4120_v24   ;;  %4269 = vperm.xlu0 %6581, %v4119_v25   ;;  %v5516_v24 = vld [vmem:[%s6764_s26 + $0x20] sm:$0xff]   ;;  %v7181_v25 = vld [vmem:[%s6764_s26 + $0x28] sm:$0xff]  }
  0xa6   : > { %v5448_v40 = vunpack.c.h.bf16 %v5516_v24  ;;  %v5447_v41 = vunpack.c.l.bf16 %v5516_v24  ;;  %v5452_v62 = vunpack.c.h.bf16 %v7181_v25  ;;  %v5451_v7 = vunpack.c.l.bf16 %v7181_v25  ;;  %v432_v24 = vld [vmem:[%s9000_s6] sm:$0x1] }
  0xa8   : > { %v7119_v52 = vpop.permute.xlu1 %795  ;;  %v7121_v53 = vpop.permute.xlu0 %790 }
  0xa9   : > { %4284 = vperm.xlu1 %6582, %v4122_v28   ;;  %4279 = vperm.xlu0 %6581, %v4121_v29   ;;  %9061 = vst [vmem:[#allocation4_spill] sm:$0xff] %v7119_v52  ;;  %v5431_v28 = vunpack.c.l.bf16 %v5430_v18  ;;  %v5436_v29 = vunpack.c.h.bf16 %v5513_v17  ;;  %v5523_v17 = vld [vmem:[%s6764_s26 + $0x58] sm:$0xff]   ;;  %v7200_v18 = vld [vmem:[%s6764_s26 + $0x60] sm:$0xff]  }
  0xaa   : > { %v5476_v25 = vunpack.c.h.bf16 %v5523_v17  ;;  %v5475_v31 = vunpack.c.l.bf16 %v5523_v17  ;;  %v522_v17 = vld [vmem:[%s8997_s3] sm:$0x1] }
  0xac   : > { %v7123_v54 = vpop.permute.xlu1 %805  ;;  %v7125_v55 = vpop.permute.xlu0 %800 }
  0xad   : > { %4294 = vperm.xlu1 %6582, %v4124_v32   ;;  %4289 = vperm.xlu0 %6581, %v4123_v33   ;;  %9062 = vst [vmem:[#allocation5_spill] sm:$0xff] %v7123_v54  ;;  %9063 = vst [vmem:[#allocation6_spill] sm:$0xff] %v7125_v55  ;;  %v414_v33 = vmul.f32 %v6664_v19, %v411_v20 }
  0xaf   : > { %v7195_v5 = vrot.slane %v414_v33, %v9006_v23  ;;  %v5472_v23 = vunpack.c.h.bf16 %v5522_v4  ;;  %v5479_v4 = vunpack.c.l.bf16 %v7200_v18 }
  0xb0   : > { %v7127_v56 = vpop.permute.xlu1 %815  ;;  %v7129_v57 = vpop.permute.xlu0 %810 }
  0xb1   : > { %4304 = vperm.xlu1 %6582, %v4126_v36   ;;  %4299 = vperm.xlu0 %6581, %v4125_v37   ;;  %9064 = vst [vmem:[#allocation7_spill] sm:$0xff] %v7127_v56  ;;  %9065 = vst [vmem:[#allocation8_spill] sm:$0xff] %v7129_v57  ;;  %v5444_v36 = vunpack.c.h.bf16 %v5515_v22  ;;  %v5519_v37 = vld [vmem:[%s6764_s26 + $0x38] sm:$0xff]   ;;  %v5463_v22 = vunpack.c.l.bf16 %v5520_v38  ;;  %v523_v38 = vmul.f32 %v414_v33, %v7146_v1 }
  0xb2   : > { %9082 = vst [vmem:[#allocation25_spill] sm:$0xff] %v7195_v5  ;;  %v5460_v19 = vunpack.c.h.bf16 %v5519_v37  ;;  %v5459_v20 = vunpack.c.l.bf16 %v5519_v37  ;;  %v7231_v1 = vmul.f32 %v5440_v34, %v7195_v5  ;;  %v7247_v34 = vmul.f32 %v5447_v41, %v7195_v5 }
  0xb3   : > { %v7237_v33 = vmul.f32 %v5444_v36, %v7195_v5  ;;  %v524_v36 = vsub.f32 %v522_v17, %v523_v38  ;;  %v7289_v17 = vmul.f32 %v5471_v51, %v7195_v5 }
  0xb4   : > { %v7131_v58 = vpop.permute.xlu1 %825  ;;  %v7133_v59 = vpop.permute.xlu0 %820  ;;  %v7265_v41 = vmul.f32 %v5459_v20, %v7195_v5 }
  0xb5   : > { %9066 = vst [vmem:[#allocation9_spill] sm:$0xff] %v7131_v58  ;;  %9067 = vst [vmem:[#allocation10_spill] sm:$0xff] %v7133_v59 }
  0xb8   : > { %v7135_v60 = vpop.permute.xlu1 %835  ;;  %v7137_v61 = vpop.permute.xlu0 %830 }
  0xb9   : > { %9068 = vst [vmem:[#allocation11_spill] sm:$0xff] %v7135_v60  ;;  %9069 = vst [vmem:[#allocation12_spill] sm:$0xff] %v7137_v61 }
  0xbc   : > { %v7142_v63 = vpop.permute.xlu1 %845  ;;  %v7144_v0 = vpop.permute.xlu0 %840 }
  0xbd   : > { %9070 = vst [vmem:[#allocation13_spill] sm:$0xff] %v7142_v63  ;;  %9071 = vst [vmem:[#allocation14_spill] sm:$0xff] %v7144_v0 }
  0xc0   : > { %v7151_v3 = vpop.permute.xlu1 %855  ;;  %v7155_v6 = vpop.permute.xlu0 %850 }
  0xc1   : > { %9072 = vst [vmem:[#allocation15_spill] sm:$0xff] %v7151_v3  ;;  %9073 = vst [vmem:[#allocation16_spill] sm:$0xff] %v7155_v6  ;;  %v7295_v3 = vmul.f32 %v5476_v25, %v7195_v5  ;;  %v5532_v6 = vld [vmem:[%s6764_s26 + $0xa0] sm:$0xff]  }
  0xc2   : > { %v5512_v25 = vunpack.c.h.bf16 %v5532_v6  ;;  %v5511_v54 = vunpack.c.l.bf16 %v5532_v6 }
  0xc4   : > { %v7157_v8 = vpop.permute.xlu1 %865  ;;  %v7159_v9 = vpop.permute.xlu0 %860 }
  0xc5   : > { %9074 = vst [vmem:[#allocation17_spill] sm:$0xff] %v7157_v8  ;;  %9075 = vst [vmem:[#allocation18_spill] sm:$0xff] %v7159_v9  ;;  %v7225_v9 = vmul.f32 %v5436_v29, %v7195_v5  ;;  %v5484_v29 = vunpack.c.h.bf16 %v7209_v44 }
  0xc8   : > { %v7161_v11 = vpop.permute.xlu1 %875  ;;  %v7163_v12 = vpop.permute.xlu0 %870 }
  0xc9   : > { %9076 = vst [vmem:[#allocation19_spill] sm:$0xff] %v7161_v11  ;;  %9077 = vst [vmem:[#allocation20_spill] sm:$0xff] %v7163_v12  ;;  %v7215_v12 = vmul.f32 %v5435_v27, %v7195_v5  ;;  %v7234_v27 = vmul.f32 %v5439_v35, %v7195_v5  ;;  %v7250_v35 = vmul.f32 %v5452_v62, %v7195_v5 }
  0xca   : > { %v7271_v62 = vmul.f32 %v5463_v22, %v7195_v5  ;;  %v5483_v22 = vunpack.c.l.bf16 %v7209_v44 }
  0xcc   : > { %v7165_v14 = vpop.permute.xlu1 %885  ;;  %v7167_v15 = vpop.permute.xlu0 %880  ;;  %v642_v55 = vmul.f32 %v5483_v22, %v7195_v5 }
  0xcd   : > { %9078 = vst [vmem:[#allocation21_spill] sm:$0xff] %v7165_v14  ;;  %9079 = vst [vmem:[#allocation22_spill] sm:$0xff] %v7167_v15  ;;  %v5480_v15 = vunpack.c.h.bf16 %v7200_v18  ;;  %v7240_v18 = vmul.f32 %v5443_v39, %v7195_v5  ;;  %v7256_v39 = vmul.f32 %v5456_v10, %v7195_v5  ;;  %v5526_v10 = vld [vmem:[%s6764_s26 + $0x70] sm:$0xff]  }
  0xce   : > { %v5487_v0 = vunpack.c.l.bf16 %v5526_v10 }
  0xd0   : > { %v7183_v26 = vpop.permute.xlu1 %895  ;;  %v7186_v32 = vpop.permute.xlu0 %890 }
  0xd1   : > { %9080 = vst [vmem:[#allocation23_spill] sm:$0xff] %v7183_v26  ;;  %9081 = vst [vmem:[#allocation24_spill] sm:$0xff] %v7186_v32  ;;  %v5468_v26 = vunpack.c.h.bf16 %v5521_v2  ;;  %v5467_v32 = vunpack.c.l.bf16 %v5521_v2  ;;  %v7218_v2 = vmul.f32 %v5431_v28, %v7195_v5 }
  0xd3   : > { %v7283_v20 = vmul.f32 %v5467_v32, %v7195_v5  ;;  %v5530_v32 = vld [vmem:[%s6764_s26 + $0x90] sm:$0xff]  }
  0xd4   : > { %v7205_v14 = vpop.permute.xlu1 %905  ;;  %v7211_v11 = vpop.permute.xlu0 %900  ;;  %v5504_v56 = vunpack.c.h.bf16 %v5530_v32  ;;  %v5503_v57 = vunpack.c.l.bf16 %v5530_v32 }
  0xd5   : > { %9083 = vst [vmem:[#allocation26_spill] sm:$0xff] %v7205_v14  ;;  %9084 = vst [vmem:[#allocation27_spill] sm:$0xff] %v7211_v11  ;;  %v7228_v11 = vmul.f32 %v5432_v30, %v7195_v5 }
  0xd8   : > { %v7278_v38 = vpop.permute.xlu1 %915 }
  0xd9   : > { %9085 = vst [vmem:[#allocation28_spill] sm:$0xff] %v7278_v38  ;;  %v638_v38 = vmul.f32 %v5475_v31, %v7195_v5  ;;  %v640_v31 = vmul.f32 %v5479_v4, %v7195_v5 }
  0xdc   : > { %v7306_v52 = vpop.permute.xlu1 %925 }
 0x10d   : > { %v515_v37 = vpop.f32.mrb[0].mxu0 }
 0x10e   : > { %v516_v14 = vadd.f32 %v515_v37, %v432_v24  ;;  %v5794_v8 = vpop.f32.mrb[1].mxu0  ;;  %v7253_v37 = vmul.f32 %v5451_v7, %v7195_v5  ;;  %v7274_v7 = vmul.f32 %v5468_v26, %v7195_v5  ;;  %v5529_v26 = vld [vmem:[%s6764_s26 + $0x88] sm:$0xff]  }
 0x10f   : > { %v518_v28 = vpop.f32.mrb[2].mxu0  ;;  %v7243_v8 = vmul.f32 %v5448_v40, %v7195_v5  ;;  %v7259_v40 = vmul.f32 %v5455_v13, %v7195_v5  ;;  %v5527_v13 = vld [vmem:[%s6764_s26 + $0x78] sm:$0xff]   ;;  %v5500_v44 = vunpack.c.h.bf16 %v5529_v26  ;;  %v5499_v59 = vunpack.c.l.bf16 %v5529_v26 }
 0x110   : > { %v5795_v30 = vpop.f32.mrb[3].mxu0  ;;  %v521_v24 = vmax.f32 %v516_v14, 0.0  ;;  %v7262_v28 = vmul.f32 %v5460_v19, %v7195_v5  ;;  %v7268_v14 = vmul.f32 %v5464_v21, %v7195_v5  ;;  %v7280_v19 = vpop.permute.xlu0 %910  ;;  %v7286_v21 = vmul.f32 %v5472_v23, %v7195_v5 }
 0x111   : > { %9086 = vst [vmem:[#allocation29_spill] sm:$0xff] %v7280_v19  ;;  %v5528_v30 = vld [vmem:[%s6764_s26 + $0x80] sm:$0xff]   ;;  %v7299_v19 = vmul.f32 %v5480_v15, %v7195_v5  ;;  %v5488_v23 = vunpack.c.h.bf16 %v5526_v10  ;;  %v5492_v60 = vunpack.c.h.bf16 %v5527_v13  ;;  %v5491_v51 = vunpack.c.l.bf16 %v5527_v13 }
 0x112   : > { %v525_v63 = vadd.f32 %v524_v36, %v521_v24  ;;  %v5496_v61 = vunpack.c.h.bf16 %v5528_v30  ;;  %v5495_v58 = vunpack.c.l.bf16 %v5528_v30  ;;  %v643_v15 = vmul.f32 %v5484_v29, %v7195_v5 }
 0x113   : > { %v9087_v36 = vsub.s32 0, %v7169_v16  ;;  %v645_v13 = vmul.f32 %v5488_v23, %v7195_v5  ;;  %v644_v30 = vmul.f32 %v5487_v0, %v7195_v5  ;;  %v647_v6 = vmul.f32 %v5492_v60, %v7195_v5 }
 0x114   : > { %v7308_v24 = vpop.permute.xlu0 %920  ;;  %v646_v4 = vmul.f32 %v5491_v51, %v7195_v5  ;;  %v649_v29 = vmul.f32 %v5496_v61, %v7195_v5  ;;  %v648_v22 = vmul.f32 %v5495_v58, %v7195_v5  ;;  %v7321_v26 = vmul.f32 %v5500_v44, %v7195_v5  ;;  %v7350_v51 = vpop.permute.xlu1 %935 }
 0x115   : > { %v7312_v10 = vrot.slane %v525_v63, %v9087_v36  ;;  %v7324_v32 = vmul.f32 %v5499_v59, %v7195_v5  ;;  %v7327_v63 = vmul.f32 %v5504_v56, %v7195_v5  ;;  %v7330_v16 = vmul.f32 %v5503_v57, %v7195_v5  ;;  %9088 = vst [vmem:[#allocation30_spill] sm:$0xff] %v7350_v51 }
 0x116   : > { %v657_v60 = vmul.f32 %v5512_v25, %v7195_v5  ;;  %v656_v0 = vmul.f32 %v5511_v54, %v7195_v5 }
 0x117   : > { %v664_v61 = vadd.f32 %v7312_v10, %v7218_v2  ;;  %v665_v58 = vadd.f32 %v7312_v10, %v7228_v11  ;;  %v666_v59 = vadd.f32 %v7312_v10, %v7215_v12  ;;  %v667_v56 = vadd.f32 %v7312_v10, %v7225_v9 }
 0x118   : > { %v668_v57 = vadd.f32 %v7312_v10, %v7234_v27  ;;  %v669_v23 = vadd.f32 %v7312_v10, %v7231_v1  ;;  %v670_v54 = vadd.f32 %v7312_v10, %v7240_v18  ;;  %v671_v2 = vadd.f32 %v7312_v10, %v7237_v33  ;;  %v7352_v11 = vpop.permute.xlu0 %930 }
 0x119   : > { %9089 = vst [vmem:[#allocation31_spill] sm:$0xff] %v7352_v11  ;;  %v672_v12 = vadd.f32 %v7312_v10, %v7247_v34  ;;  %v673_v9 = vadd.f32 %v7312_v10, %v7243_v8  ;;  %v674_v27 = vadd.f32 %v7312_v10, %v7253_v37  ;;  %v675_v1 = vadd.f32 %v7312_v10, %v7250_v35  ;;  %v9093_v11 = vld [vmem:[#allocation6_spill] sm:$0xff] }
 0x11a   : > { %v676_v18 = vadd.f32 %v7312_v10, %v7259_v40  ;;  %v677_v33 = vadd.f32 %v7312_v10, %v7256_v39  ;;  %v704_v44 = vadd.f32 %v7312_v10, %v656_v0  ;;  %v705_v25 = vadd.f32 %v7312_v10, %v657_v60 }
 0x11b   : > { %v678_v34 = vadd.f32 %v7312_v10, %v7265_v41  ;;  %v679_v8 = vadd.f32 %v7312_v10, %v7262_v28  ;;  %v680_v37 = vadd.f32 %v7312_v10, %v7271_v62  ;;  %v681_v35 = vadd.f32 %v7312_v10, %v7268_v14 }
 0x11c   : > { %v682_v40 = vadd.f32 %v7312_v10, %v7283_v20  ;;  %v683_v39 = vadd.f32 %v7312_v10, %v7274_v7  ;;  %v684_v36 = vadd.f32 %v7312_v10, %v7289_v17  ;;  %v685_v41 = vadd.f32 %v7312_v10, %v7286_v21 }
 0x11d   : > { %v686_v28 = vadd.f32 %v7312_v10, %v638_v38  ;;  %v687_v62 = vadd.f32 %v7312_v10, %v7295_v3  ;;  %v688_v60 = vadd.f32 %v7312_v10, %v640_v31  ;;  %v689_v14 = vadd.f32 %v7312_v10, %v7299_v19  ;;  %v7402_v38 = vpop.permute.xlu1 %945  ;;  %v7404_v3 = vpop.permute.xlu0 %940 }
 0x11e   : > { %v7391_v20 = vadd.f32 %v7312_v10, %v642_v55  ;;  %v7394_v7 = vadd.f32 %v7312_v10, %v643_v15  ;;  %v7397_v17 = vadd.f32 %v7312_v10, %v644_v30  ;;  %v7400_v21 = vadd.f32 %v7312_v10, %v645_v13  ;;  %9090 = vst [vmem:[#allocation32_spill] sm:$0xff] %v7402_v38 }
 0x11f   : > { %9091 = vst [vmem:[#allocation33_spill] sm:$0xff] %v7404_v3  ;;  %v7407_v31 = vadd.f32 %v7312_v10, %v646_v4  ;;  %v7410_v19 = vadd.f32 %v7312_v10, %v647_v6  ;;  %v7413_v55 = vadd.f32 %v7312_v10, %v648_v22  ;;  %v7416_v15 = vadd.f32 %v7312_v10, %v649_v29  ;;  %v9092_v29 = vld [vmem:[#allocation4_spill] sm:$0xff] }
 0x120   : > { %v958_v30 = vmul.f32 %v7093_v43, %v664_v61  ;;  %v959_v13 = vmul.f32 %v7102_v46, %v665_v58  ;;  %v960_v0 = vmul.f32 %v7091_v42, %v666_v59  ;;  %v961_v38 = vmul.f32 %v7100_v45, %v667_v56  ;;  %v9094_v61 = vld [vmem:[#allocation5_spill] sm:$0xff]  ;;  %v9095_v58 = vld [vmem:[#allocation8_spill] sm:$0xff]  ;;  %v9096_v59 = vld [vmem:[#allocation7_spill] sm:$0xff] }
 0x121   : > { %v962_v4 = vmul.f32 %v7107_v48, %v668_v57  ;;  %v963_v3 = vmul.f32 %v7105_v47, %v669_v23  ;;  %v964_v6 = vmul.f32 %v7111_v50, %v670_v54  ;;  %v965_v22 = vmul.f32 %v7109_v49, %v671_v2  ;;  %v9097_v56 = vld [vmem:[#allocation10_spill] sm:$0xff]  ;;  %v9098_v57 = vld [vmem:[#allocation9_spill] sm:$0xff]  ;;  %v9099_v23 = vld [vmem:[#allocation12_spill] sm:$0xff] }
 0x122   : > { %v966_v5 = vmul.f32 %v7121_v53, %v672_v12  ;;  %v967_v51 = vmul.f32 %v9092_v29, %v673_v9  ;;  %v968_v43 = vmul.f32 %v9093_v11, %v674_v27  ;;  %v969_v46 = vmul.f32 %v9094_v61, %v675_v1  ;;  %v9100_v54 = vld [vmem:[#allocation11_spill] sm:$0xff]  ;;  %v9101_v2 = vld [vmem:[#allocation14_spill] sm:$0xff]  ;;  %v9102_v12 = vld [vmem:[#allocation13_spill] sm:$0xff]  ;;  %v956_v29 = vpop.permute.xlu1 %955  ;;  %v951_v11 = vpop.permute.xlu0 %950 }
 0x123   : > { %v970_v42 = vmul.f32 %v9095_v58, %v676_v18  ;;  %v971_v45 = vmul.f32 %v9096_v59, %v677_v33  ;;  %v972_v48 = vmul.f32 %v9097_v56, %v678_v34  ;;  %v973_v47 = vmul.f32 %v9098_v57, %v679_v8  ;;  %v9103_v27 = vld [vmem:[#allocation16_spill] sm:$0xff]  ;;  %v9104_v61 = vld [vmem:[#allocation15_spill] sm:$0xff]  ;;  %v9105_v58 = vld [vmem:[#allocation18_spill] sm:$0xff] }
 0x124   : > { %v974_v50 = vmul.f32 %v9099_v23, %v680_v37  ;;  %v975_v49 = vmul.f32 %v9100_v54, %v681_v35  ;;  %v976_v53 = vmul.f32 %v9101_v2, %v682_v40  ;;  %v977_v9 = vmul.f32 %v9102_v12, %v683_v39  ;;  %v9106_v59 = vld [vmem:[#allocation17_spill] sm:$0xff]  ;;  %v9107_v40 = vld [vmem:[#allocation20_spill] sm:$0xff]  ;;  %v9108_v57 = vld [vmem:[#allocation19_spill] sm:$0xff] }
 0x125   : > { %v978_v1 = vmul.f32 %v9103_v27, %v684_v36  ;;  %v979_v18 = vmul.f32 %v9104_v61, %v685_v41  ;;  %v980_v33 = vmul.f32 %v9105_v58, %v686_v28  ;;  %v981_v34 = vmul.f32 %v9106_v59, %v687_v62 }
 0x126   : > { %v998_v8 = vmul.f32 %v951_v11, %v704_v44  ;;  %v999_v56 = vmul.f32 %v956_v29, %v705_v25  ;;  %v7442_v37 = vpack.c.bf16 %v959_v13, %v958_v30  ;;  %v7444_v35 = vpack.c.bf16 %v961_v38, %v960_v0 }
 0x127   : > { %v7447_v39 = vmul.f32 %v9107_v40, %v688_v60  ;;  %v7450_v23 = vmul.f32 %v9108_v57, %v689_v14  ;;  %v7452_v36 = vpack.c.bf16 %v969_v46, %v968_v43  ;;  %v7454_v41 = vpack.c.bf16 %v971_v45, %v970_v42 }
 0x128   : > { %v7456_v28 = vpack.c.bf16 %v963_v3, %v962_v4  ;;  %v7458_v62 = vpack.c.bf16 %v965_v22, %v964_v6  ;;  %v7460_v44 = vpack.c.bf16 %v967_v51, %v966_v5  ;;  %v7462_v25 = vpack.c.bf16 %v973_v47, %v972_v48 }
 0x129   : > { %v7464_v38 = vpack.c.bf16 %v975_v49, %v974_v50  ;;  %v7466_v30 = vpack.c.bf16 %v977_v9, %v976_v53  ;;  %v7468_v60 = vpack.c.bf16 %v979_v18, %v978_v1  ;;  %v7470_v14 = vpack.c.bf16 %v981_v34, %v980_v33  ;;  %v6608_v33 = vld [vmem:[%s9001_s7 + $0x8] sm:$0xff]  }
 0x12a   : > { %v7472_v13 = vpack.c.bf16 %v999_v56, %v998_v8  ;;  %v1056_v0 = vshrl.u32 %v7442_v37, 16  ;;  %v1058_v3 = vshll.u32 %v7442_v37, 16  ;;  %v9011_v4 = vshll.u32 %v7444_v35, 16 }
 0x12b   : > { %9109 = vst [vmem:[#allocation4_spill] sm:$0xff] %v7466_v30  ;;  %9110 = vst [vmem:[#allocation6_spill] sm:$0xff] %v7468_v60  ;;  %v7478_v5 = vshll.u32 %v7452_v36, 16  ;;  %v7481_v51 = vshrl.u32 %v7452_v36, 16  ;;  %v7484_v6 = vshll.u32 %v7454_v41, 16  ;;  %v7487_v22 = vshrl.u32 %v7454_v41, 16 }
 0x12c   : > { %9111 = vst [vmem:[#allocation5_spill] sm:$0xff] %v7470_v14  ;;  %v1060_v43 = vrot.slane %v1058_v3, 1  ;;  %v1065_v46 = vrot.slane %v9011_v4, 1  ;;  %v9012_v42 = vshrl.u32 %v7444_v35, 16  ;;  %v7493_v45 = vshll.u32 %v7456_v28, 16  ;;  %v9121_v4 = vld [vmem:[#allocation21_spill] sm:$0xff] }
 0x12d   : > { %v2339_v48 = vrot.slane %v7481_v51, 1  ;;  %v2340_v47 = vrot.slane %v7478_v5, 2  ;;  %v2343_v50 = vrot.slane %v7487_v22, 1  ;;  %v2344_v54 = vrot.slane %v7484_v6, 2 }
 0x12e   : > { %9112 = vst [vmem:[#allocation8_spill] sm:$0xff] %v7493_v45  ;;  %v1061_v49 = vor.u32 %v1060_v43, %v1056_v0  ;;  %v1069_v2 = vor.u32 %v9012_v42, %v1065_v46  ;;  %v1073_v53 = vrot.slane %v7493_v45, 1  ;;  %v7503_v12 = vshll.u32 %v7462_v25, 16  ;;  %v9118_v43 = vld [vmem:[#allocation2_spill] sm:$0xff] }
 0x12f   : > { %v7505_v9 = vor.u32 %v2340_v47, %v2339_v48  ;;  %v2345_v29 = vor.u32 %v2344_v54, %v2343_v50  ;;  %v7508_v11 = vshrl.u32 %v7462_v25, 16  ;;  %v7511_v27 = vshrl.u32 %v7456_v28, 16 }
 0x130   : > { %v1066_v1 = vsel %vm1054_vm1, %v1061_v49, %v1065_v46  ;;  %v1074_v61 = vsel %vm1054_vm1, %v1069_v2, %v1073_v53  ;;  %v2348_v18 = vrot.slane %v7503_v12, 2  ;;  %v7517_v58 = vshll.u32 %v7458_v62, 16 }
 0x131   : > { %9113 = vst [vmem:[#allocation7_spill] sm:$0xff] %v7505_v9  ;;  %9114 = vst [vmem:[#allocation10_spill] sm:$0xff] %v7511_v27  ;;  %5812 = vmatprep.mubr.bf16.mxu0 %v1066_v1  ;;  %v2346_v59 = vsel %vm2323_vm2, %v7505_v9, %v2345_v29  ;;  %v2347_v34 = vrot.slane %v7508_v11, 1  ;;  %v1077_v8 = vor.u32 %v7511_v27, %v1073_v53  ;;  %v7527_v56 = vshll.u32 %v7464_v38, 16  ;;  %v6610_v1 = vld [vmem:[%s9001_s7 + $0x10] sm:$0xff]  }
 0x132   : > { %9115 = vst [vmem:[#allocation9_spill] sm:$0xff] %v7517_v58  ;;  %6028 = vmatprep.mubr.bf16.mxu1 %v2346_v59  ;;  %5813 = vmatmul.mubr.bf16.vlgmr.msra.gmra.mrb[4].mxu0 %v1074_v61  ;;  %v1081_v40 = vrot.slane %v7517_v58, 1  ;;  %v7531_v57 = vshrl.u32 %v7464_v38, 16  ;;  %v7534_v0 = vshrl.u32 %v7458_v62, 16  ;;  %v7537_v3 = vshll.u32 %v7460_v44, 16  ;;  %v6611_v61 = vld [vmem:[%s9001_s7 + $0x148] sm:$0xff]  }
 0x133   : > { %5849 = vmatpush3.bf16.msra.mxu0 %v9118_v43  ;;  %v2349_v46 = vor.u32 %v2348_v18, %v2347_v34  ;;  %v2352_v48 = vrot.slane %v7527_v56, 2  ;;  %v7542_v47 = vshll.u32 %v7466_v30, 16  ;;  %v7545_v50 = vshrl.u32 %v7466_v30, 16 }
 0x134   : > { %9116 = vst [vmem:[#allocation12_spill] sm:$0xff] %v7534_v0  ;;  %9117 = vst [vmem:[#allocation11_spill] sm:$0xff] %v7537_v3  ;;  %v1082_v54 = vsel %vm1054_vm1, %v1077_v8, %v1081_v40  ;;  %v2351_v49 = vrot.slane %v7531_v57, 1  ;;  %v1085_v2 = vor.u32 %v7534_v0, %v1081_v40  ;;  %v1089_v53 = vrot.slane %v7537_v3, 1  ;;  %5850 = vmatprep.subr.bf16.mxu0 %v6608_v33  ;;  %v9120_v40 = vld [vmem:[#allocation22_spill] sm:$0xff] }
 0x135   : > { %v2350_v18 = vsel %vm2323_vm2, %v2345_v29, %v2349_v46  ;;  %5816 = vmatprep.mubr.bf16.mxu0 %v1082_v54  ;;  %v2355_v59 = vrot.slane %v7545_v50, 1  ;;  %v2356_v34 = vrot.slane %v7542_v47, 2  ;;  %v7561_v8 = vshrl.u32 %v7460_v44, 16 }
 0x136   : > { %v984_v43 = vmul.f32 %v9120_v40, %v7391_v20  ;;  %v985_v42 = vmul.f32 %v9121_v4, %v7394_v7  ;;  %6029 = vmatmul.mubr.bf16.vlgmr.msra.gmra.mrb[0].mxu1 %v2350_v18  ;;  %v2353_v9 = vor.u32 %v2352_v48, %v2351_v49  ;;  %v7568_v3 = vshll.u32 %v7468_v60, 16  ;;  %v9123_v20 = vld [vmem:[#allocation3_spill] sm:$0xff] }
 0x137   : > { %9119 = vst [vmem:[#allocation14_spill] sm:$0xff] %v7561_v8  ;;  %v7572_v29 = vpack.c.bf16 %v7450_v23, %v7447_v39  ;;  %v1090_v54 = vsel %vm1054_vm1, %v1085_v2, %v1089_v53  ;;  %v1093_v58 = vor.u32 %v7561_v8, %v1089_v53  ;;  %5851 = vmatpush3.bf16.msra.mxu0 %v6608_v33  ;;  %v7577_v0 = vshrl.u32 %v7468_v60, 16  ;;  %v6612_v39 = vld [vmem:[%s9001_s7 + $0x18] sm:$0xff]   ;;  %v6613_v53 = vld [vmem:[%s9001_s7 + $0x150] sm:$0xff]   ;;  %v9125_v40 = vld [vmem:[#allocation23_spill] sm:$0xff] }
 0x138   : > { %6057 = vmatpush3.bf16.msra.mxu1 %v9123_v20  ;;  %v2354_v7 = vsel %vm2323_vm2, %v2349_v46, %v2353_v9  ;;  %v2357_v4 = vor.u32 %v2356_v34, %v2355_v59  ;;  %v1097_v48 = vrot.slane %v7478_v5, 1  ;;  %v2360_v49 = vrot.slane %v7568_v3, 2  ;;  %5852 = vmatprep.subr.bf16.mxu0 %v6610_v1  ;;  %v9124_v59 = vld [vmem:[#allocation24_spill] sm:$0xff] }
 0x139   : > { %9122 = vst [vmem:[#allocation13_spill] sm:$0xff] %v7572_v29  ;;  %6058 = vmatprep.subr.bf16.mxu1 %v6611_v61  ;;  %6032 = vmatprep.mubr.bf16.mxu1 %v2354_v7  ;;  %v2359_v23 = vrot.slane %v7577_v0, 1  ;;  %v1105_v33 = vrot.slane %v7484_v6, 1  ;;  %v7589_v2 = vshll.u32 %v7470_v14, 16  ;;  %v7592_v46 = vshrl.u32 %v7470_v14, 16 }
 0x13a   : > { %v698_v18 = vadd.f32 %v7312_v10, %v7324_v32  ;;  %v986_v34 = vmul.f32 %v9124_v59, %v7397_v17  ;;  %v987_v20 = vmul.f32 %v9125_v40, %v7400_v21  ;;  %5817 = vmatmul.mubr.bf16.gmra.mrb[8].mxu0 %v1090_v54  ;;  %v1098_v7 = vsel %vm1054_vm1, %v1093_v58, %v1097_v48  ;;  %v9129_v40 = vld [vmem:[#allocation26_spill] sm:$0xff] }
 0x13b   : > { %v699_v8 = vadd.f32 %v7312_v10, %v7321_v26  ;;  %5820 = vmatprep.mubr.bf16.mxu0 %v1098_v7  ;;  %v2361_v45 = vor.u32 %v2360_v49, %v2359_v23  ;;  %v7607_v27 = vshll.u32 %v7572_v29, 16  ;;  %v7610_v14 = vshrl.u32 %v7572_v29, 16  ;;  %5853 = vmatpush3.bf16.msra.mxu0 %v6610_v1  ;;  %v6614_v26 = vld [vmem:[%s9001_s7 + $0x20] sm:$0xff]   ;;  %v9128_v23 = vld [vmem:[#allocation27_spill] sm:$0xff]  ;;  %v9131_v29 = vld [vmem:[#allocation28_spill] sm:$0xff] }
 0x13c   : > { %v700_v32 = vadd.f32 %v7312_v10, %v7330_v16  ;;  %v7614_v17 = vpack.c.bf16 %v985_v42, %v984_v43  ;;  %v1101_v21 = vor.u32 %v7481_v51, %v1097_v48  ;;  %6059 = vmatpush3.bf16.msra.mxu1 %v6611_v61  ;;  %5854 = vmatprep.subr.bf16.mxu0 %v6612_v39  ;;  %v2363_v54 = vrot.slane %v7592_v46, 1  ;;  %v6615_v16 = vld [vmem:[%s9001_s7 + $0x158] sm:$0xff]  }
 0x13d   : > { %v2358_v58 = vsel %vm2323_vm2, %v2353_v9, %v2357_v4  ;;  %v2364_v1 = vrot.slane %v7589_v2, 2  ;;  %v1109_v49 = vor.u32 %v7487_v22, %v1105_v33  ;;  %6060 = vmatprep.subr.bf16.mxu1 %v6613_v53  ;;  %v7627_v42 = vpack.c.bf16 %v987_v20, %v986_v34  ;;  %v5531_v20 = vld [vmem:[%s6764_s26 + $0x98] sm:$0xff]  }
 0x13e   : > { %9126 = vst [vmem:[#allocation16_spill] sm:$0xff] %v7614_v17  ;;  %6033 = vmatmul.mubr.bf16.gmra.mrb[4].mxu1 %v2358_v58  ;;  %v2362_v61 = vsel %vm2323_vm2, %v2357_v4, %v2361_v45  ;;  %v2367_v43 = vrot.slane %v7610_v14, 1  ;;  %v2368_v9 = vrot.slane %v7607_v27, 2  ;;  %v701_v48 = vadd.f32 %v7312_v10, %v7327_v63  ;;  %v9130_v4 = vld [vmem:[#allocation29_spill] sm:$0xff]  ;;  %v6617_v63 = vld [vmem:[%s9001_s7 + $0x28] sm:$0xff]  }
 0x13f   : > { %9127 = vst [vmem:[#allocation15_spill] sm:$0xff] %v7627_v42  ;;  %v988_v59 = vmul.f32 %v9128_v23, %v7407_v31  ;;  %v989_v7 = vmul.f32 %v9129_v40, %v7410_v19  ;;  %6036 = vmatprep.mubr.bf16.mxu1 %v2362_v61  ;;  %v1113_v34 = vrot.slane %v7503_v12, 1  ;;  %5855 = vmatpush3.bf16.msra.mxu0 %v6612_v39  ;;  %v7650_v39 = vshll.u32 %v7614_v17, 16 }
 0x140   : > { %v990_v58 = vmul.f32 %v9130_v4, %v7413_v55  ;;  %v991_v60 = vmul.f32 %v9131_v29, %v7416_v15  ;;  %v1106_v30 = vsel %vm1054_vm1, %v1101_v21, %v1105_v33  ;;  %6061 = vmatpush3.bf16.msra.mxu1 %v6613_v53  ;;  %5856 = vmatprep.subr.bf16.mxu0 %v6614_v26  ;;  %v7653_v61 = vshrl.u32 %v7614_v17, 16  ;;  %v6616_v55 = vld [vmem:[%s9001_s7 + $0x160] sm:$0xff]  }
 0x141   : > { %v2365_v31 = vor.u32 %v2364_v1, %v2363_v54  ;;  %v1114_v19 = vsel %vm1054_vm1, %v1109_v49, %v1113_v34  ;;  %6062 = vmatprep.subr.bf16.mxu1 %v6615_v16  ;;  %v2369_v15 = vor.u32 %v2368_v9, %v2367_v43  ;;  %v1121_v29 = vrot.slane %v7527_v56, 1  ;;  %v9132_v49 = vld [vmem:[#allocation31_spill] sm:$0xff] }
 0x142   : > { %5821 = vmatmul.mubr.bf16.gmra.mrb[12].mxu0 %v1106_v30  ;;  %v7660_v33 = vshll.u32 %v7627_v42, 16  ;;  %v7663_v53 = vshrl.u32 %v7627_v42, 16  ;;  %v5508_v21 = vunpack.c.h.bf16 %v5531_v20  ;;  %v992_v54 = vmul.f32 %v7308_v24, %v698_v18  ;;  %v9133_v30 = vld [vmem:[#allocation30_spill] sm:$0xff]  ;;  %v6621_v42 = vld [vmem:[%s9001_s7 + $0x30] sm:$0xff]  }
 0x143   : > { %v993_v1 = vmul.f32 %v7306_v52, %v699_v8  ;;  %v994_v23 = vmul.f32 %v9132_v49, %v700_v32  ;;  %5824 = vmatprep.mubr.bf16.mxu0 %v1114_v19  ;;  %5857 = vmatpush3.bf16.msra.mxu0 %v6614_v26  ;;  %v5507_v40 = vunpack.c.l.bf16 %v5531_v20  ;;  %v995_v43 = vmul.f32 %v9133_v30, %v701_v48  ;;  %v6618_v32 = vld [vmem:[%s9001_s7 + $0x168] sm:$0xff]   ;;  %v6622_v19 = vld [vmem:[%s9001_s7 + $0x38] sm:$0xff]  }
 0x144   : > { %v7669_v9 = vpack.c.bf16 %v989_v7, %v988_v59  ;;  %v1117_v4 = vor.u32 %v7508_v11, %v1113_v34  ;;  %6063 = vmatpush3.bf16.msra.mxu1 %v6615_v16  ;;  %5858 = vmatprep.subr.bf16.mxu0 %v6617_v63  ;;  %v7675_v24 = vpack.c.bf16 %v991_v60, %v990_v58  ;;  %v2371_v8 = vrot.slane %v7653_v61, 1  ;;  %v9136_v59 = vld [vmem:[#allocation25_spill] sm:$0xff] }
 0x145   : > { %v2366_v52 = vsel %vm2323_vm2, %v2361_v45, %v2365_v31  ;;  %v2372_v18 = vrot.slane %v7650_v39, 2  ;;  %6064 = vmatprep.subr.bf16.mxu1 %v6616_v55  ;;  %v2370_v26 = vsel %vm2323_vm2, %v2365_v31, %v2369_v15  ;;  %v1125_v16 = vor.u32 %v7531_v57, %v1121_v29 }
 0x146   : > { %9134 = vst [vmem:[#allocation18_spill] sm:$0xff] %v7669_v9  ;;  %9135 = vst [vmem:[#allocation17_spill] sm:$0xff] %v7675_v24  ;;  %6037 = vmatmul.mubr.bf16.gmra.mrb[8].mxu1 %v2366_v52  ;;  %v2375_v48 = vrot.slane %v7663_v53, 1  ;;  %v2376_v60 = vrot.slane %v7660_v33, 2  ;;  %v655_v45 = vmul.f32 %v5508_v21, %v9136_v59  ;;  %v7688_v7 = vpack.c.bf16 %v993_v1, %v992_v54 }
 0x147   : > { %6040 = vmatprep.mubr.bf16.mxu1 %v2370_v26  ;;  %5859 = vmatpush3.bf16.msra.mxu0 %v6617_v63  ;;  %v654_v34 = vmul.f32 %v5507_v40, %v9136_v59  ;;  %v7691_v20 = vpack.c.bf16 %v995_v43, %v994_v23  ;;  %v1122_v58 = vsel %vm1054_vm1, %v1117_v4, %v1121_v29  ;;  %v1129_v31 = vrot.slane %v7542_v47, 1  ;;  %v6619_v29 = vld [vmem:[%s9001_s7 + $0x170] sm:$0xff]  }
 0x148   : > { %6065 = vmatpush3.bf16.msra.mxu1 %v6616_v55  ;;  %5860 = vmatprep.subr.bf16.mxu0 %v6621_v42  ;;  %v2373_v49 = vor.u32 %v2372_v18, %v2371_v8  ;;  %v1137_v21 = vrot.slane %v7568_v3, 1  ;;  %v7700_v54 = vshll.u32 %v7669_v9, 16  ;;  %v7703_v63 = vshrl.u32 %v7669_v9, 16  ;;  %v7724_v8 = vld [vmem:[%s9001_s7 + $0x80] sm:$0xff]  }
 0x149   : > { %9137 = vst [vmem:[#allocation20_spill] sm:$0xff] %v7691_v20  ;;  %6066 = vmatprep.subr.bf16.mxu1 %v6618_v32  ;;  %v1130_v55 = vsel %vm1054_vm1, %v1125_v16, %v1129_v31  ;;  %v2377_v1 = vor.u32 %v2376_v60, %v2375_v48  ;;  %v7710_v23 = vshll.u32 %v7675_v24, 16  ;;  %v7713_v40 = vshrl.u32 %v7675_v24, 16 }
 0x14a   : > { %5825 = vmatmul.mubr.bf16.gmra.mrb[16].mxu0 %v1122_v58  ;;  %v7716_v30 = vshll.u32 %v7688_v7, 16  ;;  %v702_v43 = vadd.f32 %v7312_v10, %v654_v34  ;;  %v703_v4 = vadd.f32 %v7312_v10, %v655_v45  ;;  %v1133_v52 = vor.u32 %v7545_v50, %v1129_v31  ;;  %v6620_v10 = vld [vmem:[%s9001_s7 + $0x178] sm:$0xff]   ;;  %v9139_v31 = vld [vmem:[#allocation32_spill] sm:$0xff] }
 0x14b   : > { %5828 = vmatprep.mubr.bf16.mxu0 %v1130_v55  ;;  %5861 = vmatpush3.bf16.msra.mxu0 %v6621_v42  ;;  %v2374_v18 = vsel %vm2323_vm2, %v2369_v15, %v2373_v49  ;;  %v2379_v26 = vrot.slane %v7703_v63, 1  ;;  %v2380_v16 = vrot.slane %v7700_v54, 2  ;;  %v7730_v42 = vshll.u32 %v7691_v20, 16  ;;  %v9138_v34 = vld [vmem:[#allocation33_spill] sm:$0xff] }
 0x14c   : > { %6067 = vmatpush3.bf16.msra.mxu1 %v6618_v32  ;;  %5862 = vmatprep.subr.bf16.mxu0 %v6622_v19  ;;  %v2378_v32 = vsel %vm2323_vm2, %v2373_v49, %v2377_v1  ;;  %v1141_v48 = vor.u32 %v7577_v0, %v1137_v21  ;;  %v2383_v60 = vrot.slane %v7713_v40, 1  ;;  %v2384_v15 = vrot.slane %v7710_v23, 2 }
 0x14d   : > { %6068 = vmatprep.subr.bf16.mxu1 %v6619_v29  ;;  %v7740_v59 = vshrl.u32 %v7688_v7, 16  ;;  %v9041_v45 = vrot.slane %v7716_v30, 1  ;;  %v996_v58 = vmul.f32 %v9138_v34, %v702_v43  ;;  %v997_v55 = vmul.f32 %v9139_v31, %v703_v4  ;;  %v7756_v43 = vld [vmem:[%s9001_s7 + $0x180] sm:$0xff]  }
 0x14e   : > { %6041 = vmatmul.mubr.bf16.gmra.mrb[12].mxu1 %v2374_v18  ;;  %v1138_v18 = vsel %vm1054_vm1, %v1133_v52, %v1137_v21  ;;  %v1145_v49 = vrot.slane %v7589_v2, 1  ;;  %v2381_v24 = vor.u32 %v2380_v16, %v2379_v26  ;;  %v9040_v4 = vshrl.u32 %v7691_v20, 16 }
 0x14f   : > { %6044 = vmatprep.mubr.bf16.mxu1 %v2378_v32  ;;  %5863 = vmatpush3.bf16.msra.mxu0 %v6622_v19  ;;  %v1153_v32 = vrot.slane %v7607_v27, 1  ;;  %v1197_v9 = vor.u32 %v7740_v59, %v9041_v45  ;;  %v1201_v19 = vrot.slane %v7730_v42, 1  ;;  %v7763_v26 = vpack.c.bf16 %v997_v55, %v996_v58 }
 0x150   : > { %6069 = vmatpush3.bf16.msra.mxu1 %v6619_v29  ;;  %5900 = vmatprep.subr.bf16.mxu0 %v7724_v8  ;;  %v1146_v21 = vsel %vm1054_vm1, %v1141_v48, %v1145_v49  ;;  %v2385_v29 = vor.u32 %v2384_v15, %v2383_v60  ;;  %v1149_v16 = vor.u32 %v7592_v46, %v1145_v49  ;;  %v2387_v31 = vrot.slane %v7740_v59, 1 }
 0x151   : > { %6070 = vmatprep.subr.bf16.mxu1 %v6620_v10  ;;  %v7761_v52 = vsel %vm1054_vm1, %v1197_v9, %v1201_v19  ;;  %v2382_v34 = vsel %vm2323_vm2, %v2377_v1, %v2381_v24  ;;  %v1157_v48 = vor.u32 %v7610_v14, %v1153_v32  ;;  %v2393_v9 = vrot.slane %v9040_v4, 1 }
 0x152   : > { %5829 = vmatmul.mubr.bf16.gmra.mrb[20].mxu0 %v1138_v18  ;;  %v2388_v18 = vrot.slane %v7716_v30, 2  ;;  %v2386_v60 = vsel %vm2323_vm2, %v2381_v24, %v2385_v29  ;;  %v2394_v15 = vrot.slane %v7730_v42, 2  ;;  %v9042_v1 = vrot.slane %v7688_v7, 2 }
 0x153   : > { %5832 = vmatprep.mubr.bf16.mxu0 %v1146_v21  ;;  %v1154_v58 = vsel %vm1054_vm1, %v1149_v16, %v1153_v32  ;;  %v2736_v55 = vrot.slane %v7691_v20, 2  ;;  %v2738_v49 = vrot.slane %v7763_v26, 2  ;;  %v9043_v21 = vshrl.u32 %v7763_v26, 16 }
 0x154   : > { %6071 = vmatpush3.bf16.msra.mxu1 %v6620_v10  ;;  %v1161_v10 = vrot.slane %v7650_v39, 1  ;;  %v2389_v19 = vor.u32 %v2388_v18, %v2387_v31  ;;  %v1169_v4 = vrot.slane %v7660_v33, 1 }
 0x155   : > { %6108 = vmatprep.subr.bf16.mxu1 %v7756_v43  ;;  %v7787_v45 = vsel %vm2702_vm3, %v9042_v1, %v2736_v55  ;;  %v7790_v32 = vsel %vm2702_vm3, %v2736_v55, %v2738_v49  ;;  %v2400_v18 = vrot.slane %v9043_v21, 1  ;;  %v1185_v55 = vrot.slane %v7710_v23, 1 }
 0x156   : > { %6045 = vmatmul.mubr.bf16.gmra.mrb[16].mxu1 %v2382_v34  ;;  %v1162_v24 = vsel %vm1054_vm1, %v1157_v48, %v1161_v10  ;;  %v9044_v34 = vshll.u32 %v7763_v26, 16  ;;  %9140 = vst [vmem:[#allocation19_spill] sm:$0xff] %v7787_v45  ;;  %9141 = vst [vmem:[#allocation2_spill] sm:$0xff] %v7790_v32  ;;  %v1165_v16 = vor.u32 %v7653_v61, %v1161_v10  ;;  %v2703_v10 = vrot.slane %v7444_v35, 2 }
 0x157   : > { %6048 = vmatprep.mubr.bf16.mxu1 %v2386_v60  ;;  %v2395_v60 = vor.u32 %v2394_v15, %v2393_v9  ;;  %v2390_v31 = vsel %vm2323_vm2, %v2385_v29, %v2389_v19  ;;  %v1177_v9 = vrot.slane %v7700_v54, 1  ;;  %v2704_v29 = vrot.slane %v7456_v28, 2 }
 0x158   : > { %v2403_v48 = vrot.slane %v9044_v34, 2  ;;  %v1170_v1 = vsel %vm1054_vm1, %v1165_v16, %v1169_v4  ;;  %v1189_v32 = vor.u32 %v7713_v40, %v1185_v55  ;;  %v2708_v45 = vrot.slane %v7460_v44, 2 }
 0x159   : > { %v2396_v15 = vsel %vm2323_vm2, %v2389_v19, %v2395_v60  ;;  %v1181_v34 = vor.u32 %v7703_v63, %v1177_v9  ;;  %v9048_v16 = vrot.slane %v7688_v7, 1 }
 0x15a   : > { %5833 = vmatmul.mubr.bf16.gmra.mrb[24].mxu0 %v1154_v58  ;;  %v1173_v58 = vor.u32 %v7663_v53, %v1169_v4  ;;  %v2404_v21 = vor.u32 %v2403_v48, %v2400_v18  ;;  %v2705_v4 = vsel %vm2702_vm3, %v2703_v10, %v2704_v29  ;;  %v3330_v18 = vrot.slane %v7481_v51, 2 }
 0x15b   : > { %5836 = vmatprep.mubr.bf16.mxu0 %v1162_v24  ;;  %v3037_v24 = vrot.slane %v7472_v13, 2  ;;  %v3334_v10 = vrot.slane %v7487_v22, 2  ;;  %v3335_v51 = vrot.slane %v7484_v6, 3  ;;  %v3338_v22 = vrot.slane %v7508_v11, 2 }
 0x15c   : > { %v1178_v19 = vsel %vm1054_vm1, %v1173_v58, %v1177_v9  ;;  %v2405_v48 = vsel %vm2323_vm2, %v2395_v60, %v2404_v21  ;;  %v1743_v58 = vrot.slane %v7691_v20, 1  ;;  %v2712_v6 = vrot.slane %v7454_v41, 2 }
 0x15e   : > { %6049 = vmatmul.mubr.bf16.gmra.mrb[20].mxu1 %v2390_v31  ;;  %v2706_v31 = vrot.slane %v7458_v62, 2  ;;  %v7842_v60 = vsel %vm1707_vm4, %v9048_v16, %v1743_v58  ;;  %v9159_v16 = vld [vmem:[#allocation8_spill] sm:$0xff] }
 0x15f   : > { %6052 = vmatprep.mubr.bf16.mxu1 %v2396_v15  ;;  %v7810_v15 = vsel %vm2702_vm3, %v2738_v49, %v3037_v24  ;;  %v1186_v49 = vsel %vm1054_vm1, %v1181_v34, %v1185_v55  ;;  %v2710_v24 = vrot.slane %v7452_v36, 2  ;;  %v3336_v55 = vor.u32 %v3335_v51, %v3334_v10 }
 0x160   : > { %v7821_v9 = vsel %vm2702_vm3, %v2704_v29, %v2706_v31  ;;  %v7835_v34 = vsel %vm2702_vm3, %v2706_v31, %v2708_v45  ;;  %v3339_v29 = vrot.slane %v7503_v12, 3  ;;  %v3346_v31 = vrot.slane %v7545_v50, 2 }
 0x161   : > { %v3351_v10 = vrot.slane %v7568_v3, 3  ;;  %v3354_v12 = vrot.slane %v7592_v46, 2  ;;  %v3358_v50 = vrot.slane %v7610_v14, 2  ;;  %v3362_v3 = vrot.slane %v7653_v61, 2 }
 0x162   : > { %5837 = vmatmul.mubr.bf16.gmra.mrb[28].mxu0 %v1170_v1  ;;  %v3331_v1 = vrot.slane %v7478_v5, 3  ;;  %v9142_v5 = vrot.slane %v7716_v30, 1  ;;  %v3340_v11 = vor.u32 %v3339_v29, %v3338_v22  ;;  %v3363_v14 = vrot.slane %v7650_v39, 3 }
 0x163   : > { %5840 = vmatprep.mubr.bf16.mxu0 %v1178_v19  ;;  %v3366_v29 = vrot.slane %v7663_v53, 2  ;;  %v3370_v39 = vrot.slane %v7703_v63, 2  ;;  %v3378_v63 = vrot.slane %v7740_v59, 2 }
 0x164   : > { %v7825_v19 = vor.u32 %v3331_v1, %v3330_v18  ;;  %v1194_v21 = vsel %vm1054_vm1, %v1189_v32, %v9142_v5  ;;  %v3342_v32 = vrot.slane %v7531_v57, 2  ;;  %v3347_v18 = vrot.slane %v7542_v47, 3 }
 0x165   : > { %v3350_v1 = vrot.slane %v7577_v0, 2  ;;  %v6626_v0 = vld [vmem:[%s9001_s7 + $0x188] sm:$0xff]   ;;  %v7864_v47 = vsel %vm3318_vm5, %v3336_v55, %v3340_v11  ;;  %v3359_v5 = vrot.slane %v7607_v27, 3  ;;  %v3367_v27 = vrot.slane %v7660_v33, 3 }
 0x166   : > { %6053 = vmatmul.mubr.bf16.gmra.mrb[24].mxu1 %v2405_v48  ;;  %v7854_v48 = vsel %vm3318_vm5, %v7825_v19, %v3336_v55  ;;  %v3348_v51 = vor.u32 %v3347_v18, %v3346_v31  ;;  %v6628_v31 = vld [vmem:[%s9001_s7 + $0x190] sm:$0xff]   ;;  %v3374_v18 = vrot.slane %v7713_v40, 2  ;;  %v3383_v40 = vrot.slane %v7730_v42, 3 }
 0x167   : > { %6072 = vmatprep.mubr.bf16.mxu1 %v2705_v4  ;;  %v3343_v4 = vrot.slane %v7527_v56, 3  ;;  %v3355_v56 = vrot.slane %v7589_v2, 3  ;;  %v3360_v55 = vor.u32 %v3359_v5, %v3358_v50  ;;  %v3368_v33 = vor.u32 %v3367_v27, %v3366_v29 }
 0x168   : > { %v7940_v29 = vsel %vm2702_vm3, %v2710_v24, %v2712_v6 }
 0x169   : > { %v3344_v57 = vor.u32 %v3343_v4, %v3342_v32  ;;  %v3356_v2 = vor.u32 %v3355_v56, %v3354_v12  ;;  %v3364_v32 = vor.u32 %v3363_v14, %v3362_v3  ;;  %v3371_v4 = vrot.slane %v7700_v54, 3 }
 0x16a   : > { %5841 = vmatmul.mubr.bf16.gmra.mrb[32].mxu0 %v1186_v49  ;;  %v3352_v49 = vor.u32 %v3351_v10, %v3350_v1  ;;  %v3379_v54 = vrot.slane %v7716_v30, 3  ;;  %v9144_v30 = vshrl.u32 %v7763_v26, 16  ;;  %v3394_v3 = vshll.u32 %v7472_v13, 16 }
 0x16b   : > { %5844 = vmatprep.mubr.bf16.mxu0 %v1194_v21  ;;  %v7869_v46 = vsel %vm3318_vm5, %v3340_v11, %v3344_v57  ;;  %v7872_v21 = vsel %vm3318_vm5, %v3344_v57, %v3348_v51  ;;  %v7892_v53 = vsel %vm3318_vm5, %v3356_v2, %v3360_v55  ;;  %v7897_v1 = vsel %vm3318_vm5, %v3360_v55, %v3364_v32 }
 0x16c   : > { %v7877_v22 = vsel %vm3318_vm5, %v3348_v51, %v3352_v49  ;;  %v7884_v61 = vsel %vm3318_vm5, %v3352_v49, %v3356_v2  ;;  %v3372_v11 = vor.u32 %v3371_v4, %v3370_v39  ;;  %v7903_v10 = vsel %vm3318_vm5, %v3364_v32, %v3368_v33  ;;  %v6630_v49 = vld [vmem:[%s9001_s7 + $0x198] sm:$0xff]  }
 0x16d   : > { %v9143_v57 = vshrl.u32 %v7691_v20, 16  ;;  %v3380_v59 = vor.u32 %v3379_v54, %v3378_v63  ;;  %v3386_v56 = vrot.slane %v9144_v30, 2  ;;  %v7929_v2 = vsel %vm2702_vm3, %v2708_v45, %v2710_v24  ;;  %v6627_v54 = vld [vmem:[%s9001_s7 + $0x90] sm:$0xff]  }
 0x16e   : > { %6073 = vmatmul.mubr.bf16.vlgmr.msra.gmra.mrb[28].mxu1 %v7821_v9  ;;  %v3396_v39 = vrot.slane %v3394_v3, 3  ;;  %v2042_v4 = vrot.slane %v7763_v26, 1 }
 0x16f   : > { %6076 = vmatprep.mubr.bf16.mxu1 %v7835_v34  ;;  %6109 = vmatpush3.bf16.msra.mxu1 %v7756_v43  ;;  %v3375_v43 = vrot.slane %v7710_v23, 3  ;;  %v3382_v51 = vrot.slane %v9143_v57, 2  ;;  %v7910_v23 = vsel %vm3318_vm5, %v3368_v33, %v3372_v11  ;;  %v6625_v33 = vld [vmem:[%s9001_s7 + $0x88] sm:$0xff]   ;;  %v6629_v57 = vld [vmem:[%s9001_s7 + $0x98] sm:$0xff]  }
 0x170   : > { %6110 = vmatprep.subr.bf16.mxu1 %v6626_v0 }
 0x171   : > { %v3376_v12 = vor.u32 %v3375_v43, %v3374_v18  ;;  %v3384_v5 = vor.u32 %v3383_v40, %v3382_v51  ;;  %v2714_v18 = vrot.slane %v7462_v25, 2  ;;  %v6632_v43 = vld [vmem:[%s9001_s7 + $0x1a0] sm:$0xff]   ;;  %v6635_v40 = vld [vmem:[%s9001_s7 + $0x1b0] sm:$0xff]  }
 0x172   : > { %5845 = vmatmul.mubr.bf16.gmra.mrb[36].mxu0 %v7761_v52  ;;  %v9145_v52 = vshll.u32 %v7763_v26, 16 }
 0x173   : > { %5864 = vmatprep.mubr.bf16.mxu0 %v7442_v37  ;;  %6111 = vmatpush3.bf16.msra.mxu1 %v6626_v0  ;;  %v7920_v42 = vsel %vm3318_vm5, %v3372_v11, %v3376_v12  ;;  %v3391_v0 = vshrl.u32 %v7472_v13, 16  ;;  %v7932_v14 = vsel %vm3318_vm5, %v3376_v12, %v3380_v59  ;;  %v7943_v27 = vsel %vm3318_vm5, %v3380_v59, %v3384_v5  ;;  %v6634_v12 = vld [vmem:[%s9001_s7 + $0x1a8] sm:$0xff]   ;;  %v9147_v59 = vld [vmem:[#allocation6_spill] sm:$0xff] }
 0x174   : > { %v3387_v50 = vrot.slane %v9145_v52, 3  ;;  %6112 = vmatprep.subr.bf16.mxu1 %v6628_v31  ;;  %v2716_v11 = vrot.slane %v7464_v38, 2  ;;  %v2720_v30 = vrot.slane %v9147_v59, 2  ;;  %v3729_v52 = vrot.slane %v7763_v26, 3  ;;  %v6636_v26 = vld [vmem:[%s9001_s7 + $0x1b8] sm:$0xff]  }
 0x175   : > { %v3393_v32 = vrot.slane %v3391_v0, 2 }
 0x176   : > { %v3388_v55 = vor.u32 %v3387_v50, %v3386_v56  ;;  %6077 = vmatmul.mubr.bf16.gmra.mrb[32].mxu1 %v7929_v2  ;;  %v9047_v56 = vrot.slane %v7691_v20, 3  ;;  %v3731_v50 = vrot.slane %v7472_v13, 3 }
 0x177   : > { %6080 = vmatprep.mubr.bf16.mxu1 %v7940_v29  ;;  %6113 = vmatpush3.bf16.msra.mxu1 %v6628_v31  ;;  %v3397_v24 = vor.u32 %v3396_v39, %v3393_v32  ;;  %v7960_v31 = vsel %vm1707_vm4, %v1743_v58, %v2042_v4  ;;  %v7975_v58 = vsel %vm2702_vm3, %v2712_v6, %v2714_v18  ;;  %v9146_v6 = vld [vmem:[#allocation4_spill] sm:$0xff]  ;;  %v9150_v32 = vld [vmem:[#allocation5_spill] sm:$0xff]  ;;  %v6640_v4 = vld [vmem:[%s9001_s7 + $0x1c0] sm:$0xff]  }
 0x178   : > { %v7947_v45 = vsel %vm3318_vm5, %v3384_v5, %v3388_v55  ;;  %6114 = vmatprep.subr.bf16.mxu1 %v6630_v49  ;;  %v2718_v51 = vrot.slane %v9146_v6, 2  ;;  %v8004_v5 = vsel %vm3695_vm6, %v9047_v56, %v3729_v52  ;;  %v8013_v13 = vsel %vm3695_vm6, %v3729_v52, %v3731_v50  ;;  %v9153_v50 = vld [vmem:[#allocation18_spill] sm:$0xff] }
 0x179   : > { %v7965_v63 = vsel %vm3318_vm5, %v3388_v55, %v3397_v24  ;;  %9148 = vst [vmem:[#allocation22_spill] sm:$0xff] %v8004_v5  ;;  %9149 = vst [vmem:[#allocation21_spill] sm:$0xff] %v8013_v13  ;;  %v6633_v55 = vld [vmem:[%s9001_s7 + $0xa8] sm:$0xff]   ;;  %v2722_v39 = vrot.slane %v9150_v32, 2  ;;  %v9160_v13 = vld [vmem:[#allocation12_spill] sm:$0xff] }
 0x17a   : > { %5865 = vmatmul.mubr.bf16.vlgmr.msra.gmra.mrb[4].mxu0 %v7444_v35  ;;  %v8007_v0 = vsel %vm2702_vm3, %v2716_v11, %v2718_v51  ;;  %v8017_v3 = vsel %vm2702_vm3, %v2718_v51, %v2720_v30  ;;  %v9161_v5 = vld [vmem:[#allocation9_spill] sm:$0xff] }
 0x17b   : > { %5901 = vmatpush3.bf16.msra.mxu0 %v7724_v8  ;;  %5868 = vmatprep.mubr.bf16.mxu0 %v7456_v28  ;;  %v7982_v8 = vsel %vm2702_vm3, %v2714_v18, %v2716_v11  ;;  %v6637_v18 = vld [vmem:[%s9001_s7 + $0xb0] sm:$0xff]   ;;  %v3323_v20 = vrot.slane %v9161_v5, 3 }
 0x17c   : > { %5902 = vmatprep.subr.bf16.mxu0 %v6625_v33  ;;  %6115 = vmatpush3.bf16.msra.mxu1 %v6630_v49  ;;  %v6631_v49 = vld [vmem:[%s9001_s7 + $0xa0] sm:$0xff]  }
 0x17d   : > { %6116 = vmatprep.subr.bf16.mxu1 %v6632_v43 }
 0x17e   : > { %6081 = vmatmul.mubr.bf16.gmra.mrb[0].mxu1 %v7975_v58 }
 0x17f   : > { %6084 = vmatprep.mubr.bf16.mxu1 %v7982_v8  ;;  %5903 = vmatpush3.bf16.msra.mxu0 %v6625_v33  ;;  %v9151_v33 = vld [vmem:[#allocation13_spill] sm:$0xff] }
 0x180   : > { %5904 = vmatprep.subr.bf16.mxu0 %v6627_v54  ;;  %6117 = vmatpush3.bf16.msra.mxu1 %v6632_v43  ;;  %v2724_v24 = vrot.slane %v9151_v33, 2  ;;  %v8034_v43 = vsel %vm2702_vm3, %v2720_v30, %v2722_v39 }
 0x181   : > { %6118 = vmatprep.subr.bf16.mxu1 %v6634_v12 }
 0x182   : > { %5869 = vmatmul.mubr.bf16.gmra.mrb[8].mxu0 %v7458_v62  ;;  %v8038_v11 = vsel %vm2702_vm3, %v2722_v39, %v2724_v24 }
 0x183   : > { %5872 = vmatprep.mubr.bf16.mxu0 %v7460_v44  ;;  %5905 = vmatpush3.bf16.msra.mxu0 %v6627_v54  ;;  %v6638_v54 = vld [vmem:[%s9001_s7 + $0xb8] sm:$0xff]  }
 0x184   : > { %5906 = vmatprep.subr.bf16.mxu0 %v6629_v57  ;;  %6119 = vmatpush3.bf16.msra.mxu1 %v6634_v12  ;;  %v2726_v12 = vrot.slane %v7614_v17, 2 }
 0x185   : > { %6120 = vmatprep.subr.bf16.mxu1 %v6635_v40 }
 0x186   : > { %6085 = vmatmul.mubr.bf16.gmra.mrb[4].mxu1 %v8007_v0  ;;  %v8052_v30 = vsel %vm2702_vm3, %v2724_v24, %v2726_v12 }
 0x187   : > { %6088 = vmatprep.mubr.bf16.mxu1 %v8017_v3  ;;  %5907 = vmatpush3.bf16.msra.mxu0 %v6629_v57  ;;  %v9152_v57 = vld [vmem:[#allocation15_spill] sm:$0xff] }
 0x188   : > { %5908 = vmatprep.subr.bf16.mxu0 %v6631_v49  ;;  %6121 = vmatpush3.bf16.msra.mxu1 %v6635_v40  ;;  %v2728_v51 = vrot.slane %v9152_v57, 2  ;;  %v6639_v40 = vld [vmem:[%s9001_s7 + $0xc0] sm:$0xff]  }
 0x189   : > { %6122 = vmatprep.subr.bf16.mxu1 %v6636_v26 }
 0x18a   : > { %5873 = vmatmul.mubr.bf16.gmra.mrb[12].mxu0 %v7452_v36  ;;  %v8056_v52 = vsel %vm2702_vm3, %v2726_v12, %v2728_v51  ;;  %v9156_v12 = vld [vmem:[#allocation19_spill] sm:$0xff] }
 0x18b   : > { %5876 = vmatprep.mubr.bf16.mxu0 %v7454_v41  ;;  %5909 = vmatpush3.bf16.msra.mxu0 %v6631_v49  ;;  %v2730_v49 = vrot.slane %v9153_v50, 2 }
 0x18c   : > { %5910 = vmatprep.subr.bf16.mxu0 %v6633_v55  ;;  %6123 = vmatpush3.bf16.msra.mxu1 %v6636_v26  ;;  %v9154_v26 = vld [vmem:[#allocation17_spill] sm:$0xff] }
 0x18d   : > { %6160 = vmatprep.subr.bf16.mxu1 %v6640_v4  ;;  %v8064_v39 = vsel %vm2702_vm3, %v2728_v51, %v2730_v49  ;;  %v9157_v51 = vld [vmem:[#allocation2_spill] sm:$0xff] }
 0x18e   : > { %6089 = vmatmul.mubr.bf16.gmra.mrb[8].mxu1 %v8034_v43 }
 0x18f   : > { %6092 = vmatprep.mubr.bf16.mxu1 %v8038_v11  ;;  %5911 = vmatpush3.bf16.msra.mxu0 %v6633_v55  ;;  %v2732_v55 = vrot.slane %v9154_v26, 2 }
 0x190   : > { %5912 = vmatprep.subr.bf16.mxu0 %v6637_v18 }
 0x191   : > { %v8068_v24 = vsel %vm2702_vm3, %v2730_v49, %v2732_v55  ;;  %v6642_v49 = vld [vmem:[%s9001_s7 + $0x1c8] sm:$0xff]  }
 0x192   : > { %5877 = vmatmul.mubr.bf16.gmra.mrb[16].mxu0 %v7462_v25 }
 0x193   : > { %5880 = vmatprep.mubr.bf16.mxu0 %v7464_v38  ;;  %5913 = vmatpush3.bf16.msra.mxu0 %v6637_v18  ;;  %v9155_v18 = vrot.slane %v7688_v7, 2 }
 0x194   : > { %5914 = vmatprep.subr.bf16.mxu0 %v6638_v54 }
 0x196   : > { %6093 = vmatmul.mubr.bf16.gmra.mrb[12].mxu1 %v8052_v30 }
 0x197   : > { %6096 = vmatprep.mubr.bf16.mxu1 %v8056_v52  ;;  %5915 = vmatpush3.bf16.msra.mxu0 %v6638_v54  ;;  %v8076_v54 = vsel %vm2702_vm3, %v2732_v55, %v9155_v18  ;;  %v1708_v55 = vrot.slane %v7442_v37, 1  ;;  %v1709_v18 = vrot.slane %v7444_v35, 1  ;;  %v6646_v37 = vld [vmem:[%s9001_s7 + $0x1d8] sm:$0xff]  }
 0x198   : > { %5952 = vmatprep.subr.bf16.mxu0 %v6639_v40 }
 0x199   : > { %v1710_v56 = vsel %vm1707_vm4, %v1708_v55, %v1709_v18  ;;  %v1715_v55 = vrot.slane %v7460_v44, 1 }
 0x19a   : > { %5881 = vmatmul.mubr.bf16.gmra.mrb[20].mxu0 %v9146_v6 }
 0x19b   : > { %5884 = vmatprep.mubr.bf16.mxu0 %v9147_v59 }
 0x19e   : > { %6097 = vmatmul.mubr.bf16.gmra.mrb[16].mxu1 %v8064_v39 }
 0x19f   : > { %6100 = vmatprep.mubr.bf16.mxu1 %v8068_v24 }
 0x1a2   : > { %5885 = vmatmul.mubr.bf16.gmra.mrb[24].mxu0 %v9150_v32 }
 0x1a3   : > { %5888 = vmatprep.mubr.bf16.mxu0 %v9151_v33 }
 0x1a6   : > { %6101 = vmatmul.mubr.bf16.gmra.mrb[20].mxu1 %v8076_v54 }
 0x1a7   : > { %6104 = vmatprep.mubr.bf16.mxu1 %v9156_v12 }
 0x1aa   : > { %5889 = vmatmul.mubr.bf16.gmra.mrb[28].mxu0 %v7614_v17 }
 0x1ab   : > { %5892 = vmatprep.mubr.bf16.mxu0 %v9152_v57 }
 0x1ae   : > { %6105 = vmatmul.mubr.bf16.gmra.mrb[24].mxu1 %v9157_v51 }
 0x1af   : > { %6124 = vmatprep.mubr.bf16.mxu1 %v7821_v9  ;;  %v6644_v9 = vld [vmem:[%s9001_s7 + $0x1d0] sm:$0xff]  }
 0x1b2   : > { %5893 = vmatmul.mubr.bf16.gmra.mrb[32].mxu0 %v9153_v50 }
 0x1b3   : > { %5896 = vmatprep.mubr.bf16.mxu0 %v9154_v26 }
 0x1b6   : > { %6125 = vmatmul.mubr.bf16.vlgmr.msra.gmra.mrb[28].mxu1 %v7835_v34  ;;  %v1711_v34 = vrot.slane %v7456_v28, 1 }
 0x1b7   : > { %6128 = vmatprep.mubr.bf16.mxu1 %v7929_v2  ;;  %6161 = vmatpush3.bf16.msra.mxu1 %v6640_v4  ;;  %v1713_v2 = vrot.slane %v7458_v62, 1  ;;  %v6641_v4 = vld [vmem:[%s9001_s7 + $0xc8] sm:$0xff]  }
 0x1b8   : > { %6162 = vmatprep.subr.bf16.mxu1 %v6642_v49 }
 0x1ba   : > { %5897 = vmatmul.mubr.bf16.gmra.mrb[36].mxu0 %v7688_v7 }
 0x1bb   : > { %5916 = vmatprep.mubr.bf16.mxu0 %v1710_v56  ;;  %6163 = vmatpush3.bf16.msra.mxu1 %v6642_v49  ;;  %v8109_v56 = vsel %vm1707_vm4, %v1709_v18, %v1711_v34  ;;  %v6648_v49 = vld [vmem:[%s9001_s7 + $0x1e0] sm:$0xff]   ;;  %v6650_v18 = vld [vmem:[%s9001_s7 + $0x1e8] sm:$0xff]  }
 0x1bc   : > { %6164 = vmatprep.subr.bf16.mxu1 %v6644_v9 }
 0x1be   : > { %6129 = vmatmul.mubr.bf16.gmra.mrb[32].mxu1 %v7940_v29  ;;  %v8116_v29 = vsel %vm1707_vm4, %v1711_v34, %v1713_v2  ;;  %v6651_v34 = vld [vmem:[%s9001_s7 + $0x1f0] sm:$0xff]  }
 0x1bf   : > { %6132 = vmatprep.mubr.bf16.mxu1 %v7975_v58  ;;  %6165 = vmatpush3.bf16.msra.mxu1 %v6644_v9  ;;  %v6643_v58 = vld [vmem:[%s9001_s7 + $0xd0] sm:$0xff]   ;;  %v1717_v9 = vrot.slane %v7452_v36, 1 }
 0x1c0   : > { %6166 = vmatprep.subr.bf16.mxu1 %v6646_v37 }
 0x1c2   : > { %5917 = vmatmul.mubr.bf16.vlgmr.msra.gmra.mrb[4].mxu0 %v8109_v56 }
 0x1c3   : > { %5953 = vmatpush3.bf16.msra.mxu0 %v6639_v40  ;;  %5920 = vmatprep.mubr.bf16.mxu0 %v8116_v29  ;;  %v6645_v40 = vld [vmem:[%s9001_s7 + $0xd8] sm:$0xff]  }
 0x1c4   : > { %5954 = vmatprep.subr.bf16.mxu0 %v6641_v4  ;;  %6167 = vmatpush3.bf16.msra.mxu1 %v6646_v37  ;;  %v8133_v37 = vsel %vm1707_vm4, %v1713_v2, %v1715_v55  ;;  %v1719_v2 = vrot.slane %v7454_v41, 1 }
 0x1c5   : > { %6168 = vmatprep.subr.bf16.mxu1 %v6648_v49 }
 0x1c6   : > { %6133 = vmatmul.mubr.bf16.gmra.mrb[0].mxu1 %v7982_v8  ;;  %v8140_v8 = vsel %vm1707_vm4, %v1715_v55, %v1717_v9  ;;  %v8157_v55 = vsel %vm1707_vm4, %v1717_v9, %v1719_v2  ;;  %v1723_v9 = vrot.slane %v7464_v38, 1 }
 0x1c7   : > { %6136 = vmatprep.mubr.bf16.mxu1 %v8007_v0  ;;  %5955 = vmatpush3.bf16.msra.mxu0 %v6641_v4  ;;  %v6647_v0 = vld [vmem:[%s9001_s7 + $0xe0] sm:$0xff]   ;;  %v6652_v4 = vld [vmem:[%s9001_s7 + $0x1f8] sm:$0xff]  }
 0x1c8   : > { %5956 = vmatprep.subr.bf16.mxu0 %v6643_v58  ;;  %6169 = vmatpush3.bf16.msra.mxu1 %v6648_v49  ;;  %v1721_v49 = vrot.slane %v7462_v25, 1 }
 0x1c9   : > { %6170 = vmatprep.subr.bf16.mxu1 %v6650_v18 }
 0x1ca   : > { %5921 = vmatmul.mubr.bf16.gmra.mrb[8].mxu0 %v8133_v37 }
 0x1cb   : > { %5924 = vmatprep.mubr.bf16.mxu0 %v8140_v8  ;;  %5957 = vmatpush3.bf16.msra.mxu0 %v6643_v58  ;;  %v6649_v58 = vld [vmem:[%s9001_s7 + $0xe8] sm:$0xff]  }
 0x1cc   : > { %5958 = vmatprep.subr.bf16.mxu0 %v6645_v40  ;;  %6171 = vmatpush3.bf16.msra.mxu1 %v6650_v18  ;;  %v8162_v18 = vld [vmem:[%s9001_s7 + $0x200] sm:$0xff]  }
 0x1cd   : > { %6172 = vmatprep.subr.bf16.mxu1 %v6651_v34 }
 0x1ce   : > { %6137 = vmatmul.mubr.bf16.gmra.mrb[4].mxu1 %v8017_v3  ;;  %v8166_v3 = vsel %vm1707_vm4, %v1719_v2, %v1721_v49 }
 0x1cf   : > { %6140 = vmatprep.mubr.bf16.mxu1 %v8034_v43  ;;  %5959 = vmatpush3.bf16.msra.mxu0 %v6645_v40  ;;  %v6653_v43 = vld [vmem:[%s9001_s7 + $0xf0] sm:$0xff]   ;;  %v1725_v40 = vrot.slane %v9146_v6, 1 }
 0x1d0   : > { %5960 = vmatprep.subr.bf16.mxu0 %v6647_v0  ;;  %6173 = vmatpush3.bf16.msra.mxu1 %v6651_v34  ;;  %v6654_v34 = vld [vmem:[%s9001_s7 + $0xf8] sm:$0xff]  }
 0x1d1   : > { %6174 = vmatprep.subr.bf16.mxu1 %v6652_v4  ;;  %v8185_v2 = vsel %vm1707_vm4, %v1723_v9, %v1725_v40 }
 0x1d2   : > { %5925 = vmatmul.mubr.bf16.gmra.mrb[12].mxu0 %v8157_v55 }
 0x1d3   : > { %5928 = vmatprep.mubr.bf16.mxu0 %v8166_v3  ;;  %5961 = vmatpush3.bf16.msra.mxu0 %v6647_v0  ;;  %v8181_v0 = vsel %vm1707_vm4, %v1721_v49, %v1723_v9 }
 0x1d4   : > { %5962 = vmatprep.subr.bf16.mxu0 %v6649_v58  ;;  %6175 = vmatpush3.bf16.msra.mxu1 %v6652_v4  ;;  %v6665_v4 = vld [vmem:[%s9001_s7 + $0x100] sm:$0xff]  }
 0x1d5   : > { %6212 = vmatprep.subr.bf16.mxu1 %v8162_v18 }
 0x1d6   : > { %6141 = vmatmul.mubr.bf16.gmra.mrb[8].mxu1 %v8038_v11  ;;  %v1727_v11 = vrot.slane %v9147_v59, 1  ;;  %v9163_v59 = vld [vmem:[#allocation11_spill] sm:$0xff] }
 0x1d7   : > { %6144 = vmatprep.mubr.bf16.mxu1 %v8052_v30  ;;  %5963 = vmatpush3.bf16.msra.mxu0 %v6649_v58  ;;  %v1729_v30 = vrot.slane %v9150_v32, 1  ;;  %v3327_v6 = vrot.slane %v9163_v59, 3 }
 0x1d8   : > { %5964 = vmatprep.subr.bf16.mxu0 %v6653_v43  ;;  %v8196_v49 = vsel %vm1707_vm4, %v1725_v40, %v1727_v11  ;;  %v1735_v40 = vrot.slane %v9152_v57, 1 }
 0x1d9   : > { %v8200_v58 = vsel %vm1707_vm4, %v1727_v11, %v1729_v30 }
 0x1da   : > { %5929 = vmatmul.mubr.bf16.gmra.mrb[16].mxu0 %v8181_v0 }
 0x1db   : > { %5932 = vmatprep.mubr.bf16.mxu0 %v8185_v2  ;;  %5965 = vmatpush3.bf16.msra.mxu0 %v6653_v43 }
 0x1dc   : > { %5966 = vmatprep.subr.bf16.mxu0 %v6654_v34 }
 0x1de   : > { %6145 = vmatmul.mubr.bf16.gmra.mrb[12].mxu1 %v8056_v52  ;;  %v1731_v52 = vrot.slane %v9151_v33, 1  ;;  %v9162_v33 = vld [vmem:[#allocation14_spill] sm:$0xff] }
 0x1df   : > { %6148 = vmatprep.mubr.bf16.mxu1 %v8064_v39  ;;  %5967 = vmatpush3.bf16.msra.mxu0 %v6654_v34  ;;  %v1733_v39 = vrot.slane %v7614_v17, 1  ;;  %v1737_v34 = vrot.slane %v9153_v50, 1  ;;  %v1739_v17 = vrot.slane %v9154_v26, 1  ;;  %v3326_v32 = vrot.slane %v9162_v33, 2 }
 0x1e0   : > { %6004 = vmatprep.subr.bf16.mxu0 %v6665_v4  ;;  %v8208_v43 = vsel %vm1707_vm4, %v1729_v30, %v1731_v52  ;;  %v3322_v30 = vrot.slane %v9160_v13, 2 }
 0x1e1   : > { %v8212_v9 = vsel %vm1707_vm4, %v1731_v52, %v1733_v39  ;;  %v8224_v52 = vsel %vm1707_vm4, %v1733_v39, %v1735_v40  ;;  %v8228_v57 = vsel %vm1707_vm4, %v1735_v40, %v1737_v34  ;;  %v8237_v39 = vsel %vm1707_vm4, %v1737_v34, %v1739_v17 }
 0x1e2   : > { %5933 = vmatmul.mubr.bf16.gmra.mrb[20].mxu0 %v8196_v49  ;;  %v3328_v40 = vor.u32 %v3327_v6, %v3326_v32  ;;  %v6658_v6 = vld [vmem:[%s9001_s7 + $0x218] sm:$0xff]   ;;  %v6666_v32 = vld [vmem:[%s9001_s7 + $0x108] sm:$0xff]  }
 0x1e3   : > { %5936 = vmatprep.mubr.bf16.mxu0 %v8200_v58 }
 0x1e4   : > { %v3333_v34 = vsel %vm3318_vm5, %v3328_v40, %v7825_v19  ;;  %v6659_v19 = vld [vmem:[%s9001_s7 + $0x220] sm:$0xff]  }
 0x1e6   : > { %6149 = vmatmul.mubr.bf16.gmra.mrb[16].mxu1 %v8068_v24  ;;  %v9158_v24 = vld [vmem:[#allocation10_spill] sm:$0xff] }
 0x1e7   : > { %6152 = vmatprep.mubr.bf16.mxu1 %v8076_v54  ;;  %v3319_v11 = vrot.slane %v9158_v24, 2  ;;  %v3320_v54 = vrot.slane %v9159_v16, 3 }
 0x1e9   : > { %v3321_v50 = vor.u32 %v3320_v54, %v3319_v11 }
 0x1ea   : > { %5937 = vmatmul.mubr.bf16.gmra.mrb[24].mxu0 %v8208_v43 }
 0x1eb   : > { %5940 = vmatprep.mubr.bf16.mxu0 %v8212_v9 }
 0x1ee   : > { %6153 = vmatmul.mubr.bf16.gmra.mrb[20].mxu1 %v9156_v12  ;;  %v3324_v12 = vor.u32 %v3323_v20, %v3322_v30  ;;  %v9164_v20 = vrot.slane %v7688_v7, 1  ;;  %v9170_v30 = vld [vmem:[#allocation5_spill] sm:$0xff] }
 0x1ef   : > { %6156 = vmatprep.mubr.bf16.mxu1 %v9157_v51 }
 0x1f0   : > { %v3325_v51 = vsel %vm3318_vm5, %v3321_v50, %v3324_v12  ;;  %v8243_v11 = vsel %vm1707_vm4, %v1739_v17, %v9164_v20  ;;  %v3329_v50 = vsel %vm3318_vm5, %v3324_v12, %v3328_v40  ;;  %v6657_v17 = vld [vmem:[%s9001_s7 + $0x210] sm:$0xff]  }
 0x1f1   : > { %v9172_v40 = vld [vmem:[#allocation16_spill] sm:$0xff] }
 0x1f2   : > { %5941 = vmatmul.mubr.bf16.gmra.mrb[28].mxu0 %v8224_v52  ;;  %v3717_v20 = vrot.slane %v9172_v40, 3 }
 0x1f3   : > { %5944 = vmatprep.mubr.bf16.mxu0 %v8228_v57 }
 0x1f6   : > { %6157 = vmatmul.mubr.bf16.gmra.mrb[24].mxu1 %v7810_v15  ;;  %v6656_v15 = vld [vmem:[%s9001_s7 + $0x208] sm:$0xff]  }
 0x1f7   : > { %6176 = vmatprep.mubr.bf16.mxu1 %v3325_v51  ;;  %v9171_v51 = vld [vmem:[#allocation13_spill] sm:$0xff] }
 0x1fa   : > { %5945 = vmatmul.mubr.bf16.gmra.mrb[32].mxu0 %v8237_v39 }
 0x1fb   : > { %5948 = vmatprep.mubr.bf16.mxu0 %v8243_v11 }
 0x1fe   : > { %6177 = vmatmul.mubr.bf16.vlgmr.msra.gmra.mrb[28].mxu1 %v3329_v50  ;;  %v9173_v50 = vld [vmem:[#allocation15_spill] sm:$0xff] }
 0x1ff   : > { %6180 = vmatprep.mubr.bf16.mxu1 %v3333_v34  ;;  %6213 = vmatpush3.bf16.msra.mxu1 %v8162_v18  ;;  %v2331_v18 = vrot.slane %v9160_v13, 1  ;;  %v3719_v34 = vrot.slane %v9173_v50, 3 }
 0x200   : > { %6214 = vmatprep.subr.bf16.mxu1 %v6656_v15 }
 0x202   : > { %5949 = vmatmul.mubr.bf16.gmra.mrb[36].mxu0 %v7842_v60 }
 0x203   : > { %5968 = vmatprep.mubr.bf16.mxu0 %v8109_v56  ;;  %6215 = vmatpush3.bf16.msra.mxu1 %v6656_v15  ;;  %v6661_v56 = vld [vmem:[%s9001_s7 + $0x230] sm:$0xff]  }
 0x204   : > { %6216 = vmatprep.subr.bf16.mxu1 %v6657_v17 }
 0x206   : > { %6181 = vmatmul.mubr.bf16.gmra.mrb[32].mxu1 %v7854_v48  ;;  %v6660_v48 = vld [vmem:[%s9001_s7 + $0x228] sm:$0xff]  }
 0x207   : > { %6184 = vmatprep.mubr.bf16.mxu1 %v7864_v47  ;;  %6217 = vmatpush3.bf16.msra.mxu1 %v6657_v17  ;;  %v6667_v47 = vld [vmem:[%s9001_s7 + $0x110] sm:$0xff]   ;;  %v9174_v17 = vld [vmem:[#allocation18_spill] sm:$0xff] }
 0x208   : > { %6218 = vmatprep.subr.bf16.mxu1 %v6658_v6 }
 0x20a   : > { %5969 = vmatmul.mubr.bf16.vlgmr.msra.gmra.mrb[4].mxu0 %v8116_v29  ;;  %v6669_v29 = vld [vmem:[%s9001_s7 + $0x120] sm:$0xff]  }
 0x20b   : > { %6005 = vmatpush3.bf16.msra.mxu0 %v6665_v4  ;;  %5972 = vmatprep.mubr.bf16.mxu0 %v8133_v37  ;;  %v6670_v37 = vld [vmem:[%s9001_s7 + $0x128] sm:$0xff]  }
 0x20c   : > { %6006 = vmatprep.subr.bf16.mxu0 %v6666_v32  ;;  %6219 = vmatpush3.bf16.msra.mxu1 %v6658_v6  ;;  %v3721_v6 = vrot.slane %v9174_v17, 3 }
 0x20d   : > { %6220 = vmatprep.subr.bf16.mxu1 %v6659_v19 }
 0x20e   : > { %6185 = vmatmul.mubr.bf16.gmra.mrb[0].mxu1 %v7869_v46  ;;  %v6668_v46 = vld [vmem:[%s9001_s7 + $0x118] sm:$0xff]  }
 0x20f   : > { %6188 = vmatprep.mubr.bf16.mxu1 %v7872_v21  ;;  %6007 = vmatpush3.bf16.msra.mxu0 %v6666_v32  ;;  %v6662_v21 = vld [vmem:[%s9001_s7 + $0x238] sm:$0xff]   ;;  %v3722_v32 = vsel %vm3695_vm6, %v3719_v34, %v3721_v6 }
 0x210   : > { %6008 = vmatprep.subr.bf16.mxu0 %v6667_v47  ;;  %6221 = vmatpush3.bf16.msra.mxu1 %v6659_v19  ;;  %v3720_v19 = vsel %vm3695_vm6, %v3717_v20, %v3719_v34 }
 0x211   : > { %6222 = vmatprep.subr.bf16.mxu1 %v6660_v48 }
 0x212   : > { %5973 = vmatmul.mubr.bf16.gmra.mrb[8].mxu0 %v8140_v8 }
 0x213   : > { %5976 = vmatprep.mubr.bf16.mxu0 %v8157_v55  ;;  %6009 = vmatpush3.bf16.msra.mxu0 %v6667_v47  ;;  %v3703_v55 = vrot.slane %v7454_v41, 3  ;;  %v3725_v47 = vrot.slane %v7688_v7, 3  ;;  %v9179_v7 = vmov 0 }
 0x214   : > { %6010 = vmatprep.subr.bf16.mxu0 %v6668_v46  ;;  %6223 = vmatpush3.bf16.msra.mxu1 %v6660_v48  ;;  %v3723_v48 = vrot.slane %v9154_v26, 3  ;;  %v4526_v26 = vld [vmem:[%s6769_s29 + $0x8] sm:$0x3]  ;;  %v9180_v7 = vsel %vm8379_vm9, 4294967295, %v9179_v7 }
 0x215   : > { %6224 = vmatprep.subr.bf16.mxu1 %v6661_v56  ;;  %9181 = vst [vmem:[#allocation3_spill] sm:$0xff] %v9180_v7 }
 0x216   : > { %6189 = vmatmul.mubr.bf16.gmra.mrb[4].mxu1 %v7877_v22  ;;  %v6671_v22 = vld [vmem:[%s9001_s7 + $0x130] sm:$0xff]  }
 0x217   : > { %6192 = vmatprep.mubr.bf16.mxu1 %v7884_v61  ;;  %6011 = vmatpush3.bf16.msra.mxu0 %v6668_v46  ;;  %v6672_v61 = vld [vmem:[%s9001_s7 + $0x138] sm:$0xff]   ;;  %v3726_v46 = vsel %vm3695_vm6, %v3723_v48, %v3725_v47 }
 0x218   : > { %6012 = vmatprep.subr.bf16.mxu0 %v6669_v29  ;;  %6225 = vmatpush3.bf16.msra.mxu1 %v6661_v56  ;;  %v3724_v56 = vsel %vm3695_vm6, %v3721_v6, %v3723_v48 }
 0x219   : > { %6226 = vmatprep.subr.bf16.mxu1 %v6662_v21 }
 0x21a   : > { %5977 = vmatmul.mubr.bf16.gmra.mrb[12].mxu0 %v8166_v3  ;;  %v2335_v3 = vrot.slane %v9162_v33, 1 }
 0x21b   : > { %5980 = vmatprep.mubr.bf16.mxu0 %v8181_v0  ;;  %6013 = vmatpush3.bf16.msra.mxu0 %v6669_v29  ;;  %v2336_v0 = vrot.slane %v9163_v59, 2 }
 0x21c   : > { %6014 = vmatprep.subr.bf16.mxu0 %v6670_v37  ;;  %6227 = vmatpush3.bf16.msra.mxu1 %v6662_v21  ;;  %v9175_v21 = vld [vmem:[#allocation20_spill] sm:$0xff] }
 0x21d   : > { %v2337_v13 = vor.u32 %v2336_v0, %v2335_v3  ;;  %v9176_v29 = vrot.slane %v9175_v21, 3  ;;  %v4130_v0 = vpop.permute.xlu0 %4129 }
 0x21e   : > { %6193 = vmatmul.mubr.bf16.gmra.mrb[8].mxu1 %v7892_v53  ;;  %v3696_v53 = vrot.slane %v7456_v28, 3  ;;  %v9166_v28 = vshll.u32 %v7444_v35, 16 }
 0x21f   : > { %6196 = vmatprep.mubr.bf16.mxu1 %v7897_v1  ;;  %6015 = vmatpush3.bf16.msra.mxu0 %v6670_v37  ;;  %v3697_v1 = vrot.slane %v7458_v62, 3  ;;  %v2327_v62 = vrot.slane %v9158_v24, 1  ;;  %v9169_v24 = vld [vmem:[#allocation6_spill] sm:$0xff]  ;;  %v3728_v37 = vsel %vm3695_vm6, %v3725_v47, %v9176_v29 }
 0x220   : > { %6016 = vmatprep.subr.bf16.mxu0 %v6671_v22  ;;  %v3711_v54 = vrot.slane %v9169_v24, 3 }
 0x222   : > { %5981 = vmatmul.mubr.bf16.gmra.mrb[16].mxu0 %v8185_v2 }
 0x223   : > { %5984 = vmatprep.mubr.bf16.mxu0 %v8196_v49  ;;  %6017 = vmatpush3.bf16.msra.mxu0 %v6671_v22  ;;  %v9167_v49 = vld [vmem:[#allocation4_spill] sm:$0xff]  ;;  %v9177_v22 = vld [vmem:[#allocation22_spill] sm:$0xff] }
 0x224   : > { %6018 = vmatprep.subr.bf16.mxu0 %v6672_v61  ;;  %v3709_v33 = vrot.slane %v9167_v49, 3  ;;  %v4135_v49 = vpop.permute.xlu1 %4134 }
 0x226   : > { %6197 = vmatmul.mubr.bf16.gmra.mrb[12].mxu1 %v7903_v10  ;;  %v3698_v10 = vsel %vm3695_vm6, %v3696_v53, %v3697_v1  ;;  %v4527_v53 = vsel %vm8379_vm9, 0, %v4526_v26 }
 0x227   : > { %6200 = vmatprep.mubr.bf16.mxu1 %v7910_v23  ;;  %6019 = vmatpush3.bf16.msra.mxu0 %v6672_v61  ;;  %v3699_v23 = vrot.slane %v7460_v44, 3  ;;  %v9178_v61 = vld [vmem:[#allocation21_spill] sm:$0xff]  ;;  %4528 = vst [vmem:[%s6769_s29 + $0x8] sm:$0x3] %v4527_v53 }
 0x22a   : > { %5985 = vmatmul.mubr.bf16.gmra.mrb[20].mxu0 %v8200_v58 }
 0x22b   : > { %5988 = vmatprep.mubr.bf16.mxu0 %v8208_v43  ;;  %v9168_v43 = vld [vmem:[#allocation7_spill] sm:$0xff] }
 0x22e   : > { %6201 = vmatmul.mubr.bf16.gmra.mrb[16].mxu1 %v7920_v42  ;;  %v3701_v42 = vrot.slane %v7452_v36, 3  ;;  %v5020_v7 = vld [vmem:[%s6769_s29 + $0x8] sm:$0xe] }
 0x22f   : > { %6204 = vmatprep.mubr.bf16.mxu1 %v7932_v14  ;;  %v9165_v14 = vshrl.u32 %v7444_v35, 16  ;;  %v2332_v35 = vrot.slane %v9161_v5, 2 }
 0x230   : > { %v3702_v44 = vsel %vm3695_vm6, %v3699_v23, %v3701_v42  ;;  %v3704_v2 = vsel %vm3695_vm6, %v3701_v42, %v3703_v55 }
 0x231   : > { %v2333_v4 = vor.u32 %v2332_v35, %v2331_v18 }
 0x232   : > { %5989 = vmatmul.mubr.bf16.gmra.mrb[24].mxu0 %v8212_v9  ;;  %v2342_v9 = vsel %vm2323_vm2, %v2337_v13, %v9168_v43 }
 0x233   : > { %5992 = vmatprep.mubr.bf16.mxu0 %v8224_v52  ;;  %v3712_v52 = vsel %vm3695_vm6, %v3709_v33, %v3711_v54 }
 0x236   : > { %6205 = vmatmul.mubr.bf16.gmra.mrb[20].mxu1 %v7943_v27  ;;  %v2324_v27 = vrot.slane %v9165_v14, 1 }
 0x237   : > { %6208 = vmatprep.mubr.bf16.mxu1 %v7947_v45  ;;  %v2325_v45 = vrot.slane %v9166_v28, 2 }
 0x239   : > { %v2326_v36 = vor.u32 %v2325_v45, %v2324_v27 }
 0x23a   : > { %5993 = vmatmul.mubr.bf16.gmra.mrb[28].mxu0 %v8228_v57  ;;  %v2328_v57 = vrot.slane %v9159_v16, 2 }
 0x23b   : > { %5996 = vmatprep.mubr.bf16.mxu0 %v8237_v39  ;;  %v3715_v39 = vrot.slane %v9171_v51, 3 }
 0x23c   : > { %v2329_v8 = vor.u32 %v2328_v57, %v2327_v62 }
 0x23d   : > { %v3718_v15 = vsel %vm3695_vm6, %v3715_v39, %v3717_v20  ;;  %v8453_v20 = vld [vmem:[%s9002_s8] ss:$0 sm:$0xff] }
 0x23e   : > { %6209 = vmatmul.mubr.bf16.gmra.mrb[24].mxu1 %v7965_v63  ;;  %v3700_v63 = vsel %vm3695_vm6, %v3697_v1, %v3699_v23  ;;  %v2330_v16 = vsel %vm2323_vm2, %v2326_v36, %v2329_v8  ;;  %v2334_v5 = vsel %vm2323_vm2, %v2329_v8, %v2333_v4 }
 0x23f   : > { %6228 = vmatprep.mubr.bf16.mxu1 %v3698_v10 }
 0x242   : > { %5997 = vmatmul.mubr.bf16.gmra.mrb[32].mxu0 %v8243_v11 }
 0x243   : > { %6000 = vmatprep.mubr.bf16.mxu0 %v7842_v60  ;;  %v3705_v60 = vrot.slane %v7462_v25, 3  ;;  %v2338_v25 = vsel %vm2323_vm2, %v2333_v4, %v2337_v13 }
 0x245   : > { %v3706_v41 = vsel %vm3695_vm6, %v3703_v55, %v3705_v60 }
 0x246   : > { %6229 = vmatmul.mubr.bf16.vlgmr.msra.gmra.mrb[28].mxu1 %v3700_v63 }
 0x247   : > { %6232 = vmatprep.mubr.bf16.mxu1 %v3702_v44 }
 0x24a   : > { %6001 = vmatmul.mubr.bf16.gmra.mrb[36].mxu0 %v7960_v31  ;;  %v3707_v31 = vrot.slane %v7464_v38, 3  ;;  %v3713_v38 = vrot.slane %v9170_v30, 3  ;;  %v4145_v30 = vpop.permute.xlu1 %4144 }
 0x24b   : > { %6020 = vmatprep.mubr.bf16.mxu0 %v2330_v16 }
 0x24c   : > { %v3708_v59 = vsel %vm3695_vm6, %v3705_v60, %v3707_v31  ;;  %v3710_v58 = vsel %vm3695_vm6, %v3707_v31, %v3709_v33  ;;  %v3714_v12 = vsel %vm3695_vm6, %v3711_v54, %v3713_v38  ;;  %v3716_v11 = vsel %vm3695_vm6, %v3713_v38, %v3715_v39 }
 0x24e   : > { %6233 = vmatmul.mubr.bf16.gmra.mrb[32].mxu1 %v3704_v2  ;;  %v8455_v50 = vpop.permute.xlu1 %4154 }
 0x24f   : > { %6236 = vmatprep.mubr.bf16.mxu1 %v3706_v41  ;;  %v4140_v41 = vpop.permute.xlu0 %4139 }
 0x252   : > { %6021 = vmatmul.mubr.bf16.vlgmr.msra.gmra.mrb[4].mxu0 %v2334_v5 }
 0x253   : > { %6024 = vmatprep.mubr.bf16.mxu0 %v2338_v25 }
 0x256   : > { %6237 = vmatmul.mubr.bf16.gmra.mrb[0].mxu1 %v3708_v59 }
 0x257   : > { %6240 = vmatprep.mubr.bf16.mxu1 %v3710_v58  ;;  %v8430_v58 = vpop.permute.xlu0 %4149 }
 0x25a   : > { %6025 = vmatmul.mubr.bf16.gmra.mrb[8].mxu0 %v2342_v9 }
 0x25e   : > { %6241 = vmatmul.mubr.bf16.gmra.mrb[4].mxu1 %v3712_v52 }
 0x25f   : > { %6244 = vmatprep.mubr.bf16.mxu1 %v3714_v12  ;;  %v8444_v12 = vpop.permute.xlu0 %4159 }
 0x263   : > { %v4170_v48 = vpop.permute.xlu0 %4169 }
 0x266   : > { %6245 = vmatmul.mubr.bf16.gmra.mrb[8].mxu1 %v3716_v11 }
 0x267   : > { %6248 = vmatprep.mubr.bf16.mxu1 %v3718_v15 }
 0x26e   : > { %6249 = vmatmul.mubr.bf16.gmra.mrb[12].mxu1 %v3720_v19 }
 0x26f   : > { %6252 = vmatprep.mubr.bf16.mxu1 %v3722_v32 }
 0x276   : > { %6253 = vmatmul.mubr.bf16.gmra.mrb[16].mxu1 %v3724_v56 }
 0x277   : > { %6256 = vmatprep.mubr.bf16.mxu1 %v3726_v46 }
 0x27e   : > { %6257 = vmatmul.mubr.bf16.gmra.mrb[20].mxu1 %v3728_v37 }
 0x27f   : > { %6260 = vmatprep.mubr.bf16.mxu1 %v9177_v22 }
 0x286   : > { %6261 = vmatmul.mubr.bf16.gmra.mrb[24].mxu1 %v9178_v61 }
 0x2ed   : > { %v5978_v1 = vpop.f32.mrb[12].mxu0 }
 0x2ee   : > { %v2159_v10 = vpop.f32.mrb[13].mxu0 }
 0x2ef   : > { %v8386_v23 = vpop.f32.mrb[14].mxu0 }
 0x2f0   : > { %v8388_v42 = vpop.f32.mrb[15].mxu0 }
 0x2f5   : > { %v8390_v14 = vpop.f32.mrb[16].mxu0 }
 0x2f6   : > { %v8392_v27 = vpop.f32.mrb[17].mxu0 }
 0x2f7   : > { %v8394_v28 = vpop.f32.mrb[18].mxu0 }
 0x2f8   : > { %v8396_v45 = vpop.f32.mrb[19].mxu0 }
 0x2fd   : > { %v8398_v62 = vpop.f32.mrb[20].mxu0 }
 0x2fe   : > { %v8400_v57 = vpop.f32.mrb[21].mxu0 }
 0x2ff   : > { %v8402_v63 = vpop.f32.mrb[22].mxu0 }
 0x300   : > { %v8404_v44 = vpop.f32.mrb[23].mxu0 }
 0x305   : > { %v8406_v36 = vpop.f32.mrb[24].mxu0 }
 0x306   : > { %v8408_v8 = vpop.f32.mrb[25].mxu0 }
 0x307   : > { %9182 = vst [vmem:[#allocation24_spill] sm:$0xff] %v8408_v8  ;;  %v8410_v55 = vpop.f32.mrb[26].mxu0 }
 0x308   : > { %9183 = vst [vmem:[#allocation23_spill] sm:$0xff] %v8410_v55  ;;  %v8412_v18 = vpop.f32.mrb[27].mxu0 }
 0x309   : > { %9184 = vst [vmem:[#allocation27_spill] sm:$0xff] %v8412_v18 }
 0x30d   : > { %v8414_v35 = vpop.f32.mrb[28].mxu0 }
 0x30e   : > { %9185 = vst [vmem:[#allocation26_spill] sm:$0xff] %v8414_v35  ;;  %v8416_v16 = vpop.f32.mrb[29].mxu0 }
 0x30f   : > { %9186 = vst [vmem:[#allocation29_spill] sm:$0xff] %v8416_v16  ;;  %v8418_v60 = vpop.f32.mrb[30].mxu0 }
 0x310   : > { %9187 = vst [vmem:[#allocation28_spill] sm:$0xff] %v8418_v60  ;;  %v8420_v3 = vpop.f32.mrb[31].mxu0 }
 0x311   : > { %9188 = vst [vmem:[#allocation31_spill] sm:$0xff] %v8420_v3 }
 0x315   : > { %v8422_v2 = vpop.f32.mrb[32].mxu0 }
 0x316   : > { %9189 = vst [vmem:[#allocation30_spill] sm:$0xff] %v8422_v2  ;;  %v8424_v4 = vpop.f32.mrb[33].mxu0 }
 0x317   : > { %9190 = vst [vmem:[#allocation25_spill] sm:$0xff] %v8424_v4  ;;  %v8426_v13 = vpop.f32.mrb[34].mxu0 }
 0x318   : > { %9191 = vst [vmem:[#allocation33_spill] sm:$0xff] %v8426_v13  ;;  %v8428_v5 = vpop.f32.mrb[35].mxu0 }
 0x319   : > { %9192 = vst [vmem:[#allocation32_spill] sm:$0xff] %v8428_v5  ;;  %v6230_v31 = vpop.f32.mrb[28].mxu1 }
 0x31a   : > { %v3833_v25 = vpop.f32.mrb[29].mxu1 }
 0x31b   : > { %v6231_v33 = vpop.f32.mrb[30].mxu1 }
 0x31c   : > { %v3836_v59 = vpop.f32.mrb[31].mxu1 }
 0x31d   : > { %v8432_v43 = vpop.f32.mrb[36].mxu0 }
 0x31e   : > { %9193 = vst [vmem:[#allocation17_spill] sm:$0xff] %v8432_v43  ;;  %v8434_v9 = vpop.f32.mrb[37].mxu0 }
 0x31f   : > { %9194 = vst [vmem:[#allocation19_spill] sm:$0xff] %v8434_v9  ;;  %v8436_v24 = vpop.f32.mrb[38].mxu0 }
 0x320   : > { %9195 = vst [vmem:[#allocation2_spill] sm:$0xff] %v8436_v24  ;;  %v8438_v54 = vpop.f32.mrb[39].mxu0 }
 0x321   : > { %9196 = vst [vmem:[#allocation10_spill] sm:$0xff] %v8438_v54  ;;  %v8440_v38 = vpop.f32.mrb[32].mxu1 }
 0x322   : > { %v8442_v52 = vpop.f32.mrb[33].mxu1 }
 0x323   : > { %v8446_v51 = vpop.f32.mrb[34].mxu1 }
 0x324   : > { %v8448_v39 = vpop.f32.mrb[35].mxu1 }
 0x325   : > { %v6022_v40 = vpop.f32.mrb[4].mxu0 }
 0x326   : > { %v6280_v11 = vadd.f32 %v6230_v31, %v6022_v40  ;;  %v2506_v15 = vpop.f32.mrb[5].mxu0 }
 0x327   : > { %v6281_v34 = vadd.f32 %v3833_v25, %v2506_v15  ;;  %v6023_v17 = vpop.f32.mrb[6].mxu0 }
 0x328   : > { %v4021_v6 = vadd.f32 %v6280_v11, %v8453_v20  ;;  %v6282_v19 = vadd.f32 %v6231_v33, %v6023_v17  ;;  %v2509_v32 = vpop.f32.mrb[7].mxu0 }
 0x329   : > { %v6238_v47 = vpop.f32.mrb[0].mxu1  ;;  %v4019_v56 = vadd.f32 %v6281_v34, %v8453_v20  ;;  %v6283_v46 = vadd.f32 %v3836_v59, %v2509_v32  ;;  %v8463_v34 = vpop.permute.xlu1 %4164 }
 0x32a   : > { %v4057_v21 = vmax.f32 %v4021_v6, 0.0  ;;  %v6288_v29 = vadd.f32 %v6238_v47, %v5978_v1  ;;  %v3865_v37 = vpop.f32.mrb[1].mxu1  ;;  %v4022_v22 = vadd.f32 %v6282_v19, %v8453_v20 }
 0x32b   : > { %v4055_v61 = vmax.f32 %v4019_v56, 0.0  ;;  %v6289_v26 = vadd.f32 %v3865_v37, %v2159_v10  ;;  %v6239_v53 = vpop.f32.mrb[2].mxu1  ;;  %v4020_v31 = vadd.f32 %v6283_v46, %v8453_v20  ;;  %v4180_v56 = vpop.permute.xlu0 %4179 }
 0x32c   : > { %v4309_v25 = vmul.f32 %v4140_v41, %v4057_v21  ;;  %v4029_v33 = vadd.f32 %v6288_v29, %v8453_v20  ;;  %v4058_v40 = vmax.f32 %v4022_v22, 0.0  ;;  %v6290_v11 = vadd.f32 %v6239_v53, %v8386_v23  ;;  %v3868_v15 = vpop.f32.mrb[3].mxu1 }
 0x32d   : > { %v8465_v59 = vmul.f32 %v4130_v0, %v4055_v61  ;;  %v4027_v1 = vadd.f32 %v6289_v26, %v8453_v20  ;;  %v4056_v17 = vmax.f32 %v4020_v31, 0.0  ;;  %v6291_v6 = vadd.f32 %v3868_v15, %v8388_v42  ;;  %v8469_v10 = vpop.f32.mrb[8].mxu0 }
 0x32e   : > { %v5395_v19 = vpack.c.bf16 %v4309_v25, %v4309_v25  ;;  %v4065_v32 = vmax.f32 %v4029_v33, 0.0  ;;  %v4310_v41 = vmul.f32 %v4145_v30, %v4058_v40  ;;  %v8471_v47 = vpop.f32.mrb[9].mxu0  ;;  %v4030_v0 = vadd.f32 %v6290_v11, %v8453_v20 }
 0x32f   : > { %v5393_v23 = vpack.c.bf16 %v8465_v59, %v8465_v59  ;;  %v4063_v46 = vmax.f32 %v4027_v1, 0.0  ;;  %v4308_v21 = vmul.f32 %v4135_v49, %v4056_v17  ;;  %v8476_v29 = vpop.f32.mrb[10].mxu0 }
 0x330   : > { %v4641_v37 = vshrl.u32 %v5395_v19, 16  ;;  %v4644_v42 = vshll.u32 %v5395_v19, 16  ;;  %v4317_v22 = vmul.f32 %v4180_v56, %v4065_v32  ;;  %v4344_v61 = vpack.c.bf16 %v4310_v41, %v4309_v25  ;;  %v8478_v26 = vpop.f32.mrb[11].mxu0  ;;  %v8488_v19 = vpop.permute.xlu1 %4174 }
 0x331   : > { %v4622_v30 = vshrl.u32 %v5393_v23, 16  ;;  %v4625_v53 = vshll.u32 %v5393_v23, 16  ;;  %v8480_v31 = vmul.f32 %v4170_v48, %v4063_v46  ;;  %v5396_v33 = vpack.c.bf16 %v4310_v41, %v4310_v41  ;;  %v8482_v40 = vpop.f32.mrb[4].mxu1 }
 0x332   : > { %v4643_v15 = vrot.slane %v4641_v37, 6  ;;  %v4646_v11 = vrot.slane %v4644_v42, 7  ;;  %v5403_v49 = vpack.c.bf16 %v4317_v22, %v4317_v22  ;;  %v8484_v1 = vunpack.c.l.bf16 %v4344_v61  ;;  %v8486_v17 = vpop.f32.mrb[5].mxu1 }
 0x333   : > { %v4624_v25 = vrot.slane %v4622_v30, 6  ;;  %v4627_v32 = vrot.slane %v4625_v53, 7  ;;  %v5401_v56 = vpack.c.bf16 %v8480_v31, %v8480_v31  ;;  %v8492_v48 = vunpack.c.h.bf16 %v4344_v61  ;;  %v8494_v41 = vpop.f32.mrb[6].mxu1 }
 0x334   : > { %v8496_v23 = vor.u32 %v4646_v11, %v4643_v15  ;;  %v4721_v46 = vshrl.u32 %v5403_v49, 16  ;;  %v4724_v37 = vshll.u32 %v5403_v49, 16  ;;  %v9197_v42 = vmov 0  ;;  %v8506_v53 = vpop.f32.mrb[7].mxu1 }
 0x335   : > { %v9198_v42 = vsel %vm8500_vm13, 4294967295, %v9197_v42  ;;  %v4028_v30 = vadd.f32 %v6291_v6, %v8453_v20  ;;  %v8508_v61 = vor.u32 %v4627_v32, %v4624_v25  ;;  %v4701_v54 = vshrl.u32 %v5401_v56, 16 }
 0x336   : > { %9199 = vst [vmem:[#allocation8_spill] sm:$0xff] %v9198_v42  ;;  %v4704_v24 = vshll.u32 %v5401_v56, 16  ;;  %v4444_v15 = vmul.f32 %v8484_v1, %v8484_v1  ;;  %v4723_v11 = vrot.slane %v4721_v46, 6  ;;  %v4726_v49 = vrot.slane %v4724_v37, 7  ;;  %v4185_v37 = vpop.permute.xlu1 %4184 }
 0x337   : > { %v8514_v9 = vmul.f32 %v8492_v48, %v8492_v48  ;;  %v4651_v43 = vshrl.u32 %v5396_v33, 16  ;;  %v4649_v5 = vrot.slane %v8496_v23, 4  ;;  %v5021_v6 = vsel %vm8500_vm13, %v8508_v61, %v5020_v7 }
 0x338   : > { %v4703_v25 = vrot.slane %v4701_v54, 6  ;;  %v4706_v32 = vrot.slane %v4704_v24, 7  ;;  %v8520_v13 = vor.u32 %v4726_v49, %v4723_v11  ;;  %5022 = vst [vmem:[%s6769_s29 + $0x8] sm:$0xe] %v5021_v6  ;;  %v4654_v4 = vshll.u32 %v5396_v33, 16 }
 0x339   : > { %v4653_v56 = vrot.slane %v4651_v43, 6  ;;  %v4066_v46 = vmax.f32 %v4030_v0, 0.0  ;;  %v4629_v2 = vrot.slane %v8508_v61, 4  ;;  %v4343_v60 = vpack.c.bf16 %v4308_v21, %v8465_v59  ;;  %v8527_v35 = vpop.f32.mrb[8].mxu1  ;;  %v4397_v0 = vld [vmem:[%s9005_s11] sm:$0x1] }
 0x33a   : > { %v8524_v3 = vor.u32 %v4706_v32, %v4703_v25  ;;  %v5394_v16 = vpack.c.bf16 %v4308_v21, %v4308_v21  ;;  %v4656_v42 = vrot.slane %v4654_v4, 7  ;;  %v4064_v54 = vmax.f32 %v4028_v30, 0.0  ;;  %v8531_v11 = vpop.f32.mrb[9].mxu1 }
 0x33b   : > { %v4318_v7 = vmul.f32 %v4185_v37, %v4066_v46  ;;  %v6284_v24 = vadd.f32 %v8440_v38, %v8469_v10  ;;  %v4729_v43 = vrot.slane %v8520_v13, 4  ;;  %v4361_v59 = vunpack.c.l.bf16 %v4343_v60  ;;  %v8540_v4 = vpop.f32.mrb[10].mxu1 }
 0x33c   : > { %v4362_v21 = vunpack.c.h.bf16 %v4343_v60  ;;  %v4631_v33 = vshrl.u32 %v5394_v16, 16  ;;  %v8542_v30 = vor.u32 %v4656_v42, %v4653_v56  ;;  %v4634_v10 = vshll.u32 %v5394_v16, 16  ;;  %v8544_v49 = vpop.f32.mrb[11].mxu1 }
 0x33d   : > { %v4348_v61 = vpack.c.bf16 %v4318_v7, %v4317_v22  ;;  %v5404_v38 = vpack.c.bf16 %v4318_v7, %v4318_v7  ;;  %v4442_v32 = vmul.f32 %v4361_v59, %v4361_v59 }
 0x33e   : > { %v4398_v25 = vadd.f32 %v4362_v21, %v4361_v59  ;;  %v4443_v46 = vmul.f32 %v4362_v21, %v4362_v21  ;;  %v4658_v60 = vsel %vm8536_vm14, %v4649_v5, %v8542_v30  ;;  %v4633_v42 = vrot.slane %v4631_v33, 6 }
 0x33f   : > { %v8551_v18 = vunpack.c.l.bf16 %v4348_v61  ;;  %5025 = vst [vmem:[%s6769_s29 + $0x14] sm:$0xf] %v4658_v60  ;;  %v4731_v22 = vshrl.u32 %v5404_v38, 16  ;;  %v4734_v56 = vshll.u32 %v5404_v38, 16  ;;  %v8557_v6 = vunpack.c.h.bf16 %v4348_v61 }
 0x340   : > { %v8555_v16 = vadd.f32 %v4398_v25, %v8484_v1  ;;  %v4478_v7 = vadd.f32 %v4443_v46, %v4442_v32  ;;  %v4636_v21 = vrot.slane %v4634_v10, 7  ;;  %v4316_v5 = vmul.f32 %v8488_v19, %v4064_v54 }
 0x341   : > { %v8561_v59 = vmul.f32 %v8551_v18, %v8551_v18  ;;  %v4733_v37 = vrot.slane %v4731_v22, 6  ;;  %v4736_v55 = vrot.slane %v4734_v56, 7  ;;  %v4025_v33 = vadd.f32 %v6284_v24, %v8453_v20  ;;  %v8567_v38 = vpop.f32.mrb[12].mxu1 }
 0x342   : > { %v8564_v8 = vadd.f32 %v4478_v7, %v4444_v15  ;;  %v4637_v1 = vor.u32 %v4636_v21, %v4633_v42  ;;  %v4347_v25 = vpack.c.bf16 %v4316_v5, %v8480_v31  ;;  %v5402_v61 = vpack.c.bf16 %v4316_v5, %v4316_v5  ;;  %v8572_v46 = vpop.f32.mrb[13].mxu1  ;;  %v4190_v31 = vpop.permute.xlu0 %4189 }
 0x343   : > { %v6292_v32 = vadd.f32 %v8482_v40, %v8390_v14  ;;  %v8574_v10 = vor.u32 %v4736_v55, %v4733_v37  ;;  %v4061_v19 = vmax.f32 %v4025_v33, 0.0  ;;  %v6285_v15 = vadd.f32 %v8442_v52, %v8471_v47  ;;  %v8580_v24 = vpop.f32.mrb[14].mxu1 }
 0x344   : > { %v6293_v54 = vadd.f32 %v8486_v17, %v8392_v27  ;;  %v8584_v60 = vmul.f32 %v8557_v6, %v8557_v6  ;;  %v4638_v14 = vsel %vm8536_vm14, %v4629_v2, %v4637_v1  ;;  %v4639_v55 = vrot.slane %v4637_v1, 4  ;;  %v8590_v37 = vpop.f32.mrb[15].mxu1 }
 0x345   : > { %v8588_v40 = vunpack.c.l.bf16 %v4347_v25  ;;  %v4738_v27 = vsel %vm8536_vm14, %v4729_v43, %v8574_v10  ;;  %5023 = vst [vmem:[%s6769_s29 + $0xc] sm:$0xf] %v4638_v14  ;;  %v8596_v52 = vunpack.c.h.bf16 %v4347_v25  ;;  %v4711_v47 = vshrl.u32 %v5402_v61, 16 }
 0x346   : > { %v4714_v17 = vshll.u32 %v5402_v61, 16  ;;  %5033 = vst [vmem:[%s6769_s29 + $0x34] sm:$0xf] %v4738_v27  ;;  %v4648_v2 = vsel %vm8536_vm14, %v4639_v55, %v8496_v23  ;;  %v4313_v56 = vmul.f32 %v8444_v12, %v4061_v19  ;;  %v4033_v21 = vadd.f32 %v6292_v32, %v8453_v20  ;;  %v4200_v32 = vpop.permute.xlu0 %4199 }
 0x347   : > { %v8605_v22 = vmul.f32 %v8588_v40, %v8588_v40  ;;  %5024 = vst [vmem:[%s6769_s29 + $0x10] sm:$0xf] %v4648_v2  ;;  %v4713_v43 = vrot.slane %v4711_v47, 6  ;;  %v4023_v5 = vadd.f32 %v6285_v15, %v8453_v20  ;;  %v4031_v1 = vadd.f32 %v6293_v54, %v8453_v20 }
 0x348   : > { %v4716_v7 = vrot.slane %v4714_v17, 7  ;;  %v5399_v33 = vpack.c.bf16 %v4313_v56, %v4313_v56  ;;  %v6286_v25 = vadd.f32 %v8446_v51, %v8476_v29  ;;  %v6294_v23 = vadd.f32 %v8494_v41, %v8394_v28 }
 0x349   : > { %v4069_v14 = vmax.f32 %v4033_v21, 0.0  ;;  %v4059_v12 = vmax.f32 %v4023_v5, 0.0  ;;  %v6287_v19 = vadd.f32 %v8448_v39, %v8478_v26  ;;  %v8618_v55 = vpop.f32.mrb[16].mxu1  ;;  %v4067_v47 = vmax.f32 %v4031_v1, 0.0 }
 0x34a   : > { %v4717_v61 = vor.u32 %v4716_v7, %v4713_v43  ;;  %v4681_v15 = vshrl.u32 %v5399_v33, 16  ;;  %v4684_v27 = vshll.u32 %v5399_v33, 16  ;;  %v4026_v54 = vadd.f32 %v6286_v25, %v8453_v20  ;;  %v8621_v17 = vpop.f32.mrb[17].mxu1 }
 0x34b   : > { %v9202_v51 = vrot.slane %v8524_v3, 4  ;;  %v8627_v41 = vmul.f32 %v4200_v32, %v4069_v14  ;;  %v8630_v39 = vmul.f32 %v8430_v58, %v4059_v12  ;;  %v8632_v26 = vpop.f32.mrb[18].mxu1  ;;  %v8635_v7 = vmul.f32 %v4190_v31, %v4067_v47  ;;  %v8657_v32 = vpop.permute.xlu1 %4194 }
 0x34c   : > { %v4719_v29 = vrot.slane %v4717_v61, 4  ;;  %9203 = vst [vmem:[#allocation12_spill] sm:$0xff] %v8632_v26  ;;  %v4683_v2 = vrot.slane %v4681_v15, 6  ;;  %v4686_v43 = vrot.slane %v4684_v27, 7  ;;  %v4062_v21 = vmax.f32 %v4026_v54, 0.0  ;;  %v8637_v5 = vpop.f32.mrb[19].mxu1 }
 0x34d   : > { %v4718_v28 = vsel %vm8536_vm14, %v9202_v51, %v4717_v61  ;;  %9204 = vst [vmem:[#allocation9_spill] sm:$0xff] %v8637_v5  ;;  %v8641_v33 = vmul.f32 %v8596_v52, %v8596_v52  ;;  %v5407_v58 = vpack.c.bf16 %v8627_v41, %v8627_v41  ;;  %v5397_v25 = vpack.c.bf16 %v8630_v39, %v8630_v39 }
 0x34e   : > { %5031 = vst [vmem:[%s6769_s29 + $0x2c] sm:$0xf] %v4718_v28  ;;  %v4728_v1 = vsel %vm8536_vm14, %v4719_v29, %v8520_v13  ;;  %v8651_v31 = vor.u32 %v4686_v43, %v4683_v2  ;;  %v5405_v61 = vpack.c.bf16 %v8635_v7, %v8635_v7  ;;  %v4314_v14 = vmul.f32 %v8463_v34, %v4062_v21 }
 0x34f   : > { %5032 = vst [vmem:[%s6769_s29 + $0x30] sm:$0xf] %v4728_v1  ;;  %v4034_v12 = vadd.f32 %v6294_v23, %v8453_v20  ;;  %v4761_v15 = vshrl.u32 %v5407_v58, 16  ;;  %v4764_v13 = vshll.u32 %v5407_v58, 16  ;;  %v4661_v27 = vshrl.u32 %v5397_v25, 16 }
 0x350   : > { %v4664_v47 = vshll.u32 %v5397_v25, 16  ;;  %v4741_v54 = vshrl.u32 %v5405_v61, 16  ;;  %v4744_v51 = vshll.u32 %v5405_v61, 16  ;;  %v4346_v28 = vpack.c.bf16 %v4314_v14, %v4313_v56 }
 0x351   : > { %v4024_v29 = vadd.f32 %v6287_v19, %v8453_v20  ;;  %v4763_v2 = vrot.slane %v4761_v15, 6  ;;  %v4766_v43 = vrot.slane %v4764_v13, 7  ;;  %v4663_v1 = vrot.slane %v4661_v27, 6  ;;  %v8660_v5 = vpop.f32.mrb[20].mxu1 }
 0x352   : > { %v4666_v42 = vrot.slane %v4664_v47, 7  ;;  %9205 = vst [vmem:[#allocation14_spill] sm:$0xff] %v8660_v5  ;;  %v4743_v34 = vrot.slane %v4741_v54, 6  ;;  %v4746_v21 = vrot.slane %v4744_v51, 7  ;;  %v8662_v23 = vunpack.c.l.bf16 %v4346_v28  ;;  %v8666_v58 = vpop.f32.mrb[21].mxu1 }
 0x353   : > { %v8664_v26 = vunpack.c.h.bf16 %v4346_v28  ;;  %9206 = vst [vmem:[#allocation11_spill] sm:$0xff] %v8666_v58  ;;  %v8668_v25 = vor.u32 %v4766_v43, %v4763_v2  ;;  %v5400_v19 = vpack.c.bf16 %v4314_v14, %v4314_v14  ;;  %v4070_v61 = vmax.f32 %v4034_v12, 0.0  ;;  %v8672_v15 = vpop.f32.mrb[22].mxu1  ;;  %v4205_v28 = vpop.permute.xlu1 %4204 }
 0x354   : > { %v8670_v56 = vor.u32 %v4666_v42, %v4663_v1  ;;  %9207 = vst [vmem:[#allocation4_spill] sm:$0xff] %v8672_v15  ;;  %v4689_v13 = vrot.slane %v8651_v31, 4  ;;  %v8675_v27 = vor.u32 %v4746_v21, %v4743_v34  ;;  %v8679_v47 = vmul.f32 %v8662_v23, %v8662_v23  ;;  %v8681_v51 = vpop.f32.mrb[23].mxu1 }
 0x355   : > { %v4060_v54 = vmax.f32 %v4024_v29, 0.0  ;;  %9208 = vst [vmem:[#allocation7_spill] sm:$0xff] %v8681_v51  ;;  %v4769_v42 = vrot.slane %v8668_v25, 4  ;;  %v9209_v14 = vrot.slane %v8542_v30, 4  ;;  %v8691_v2 = vmul.f32 %v8664_v26, %v8664_v26 }
 0x356   : > { %v4691_v43 = vshrl.u32 %v5400_v19, 16  ;;  %v9210_v29 = vrot.slane %v8574_v10, 4  ;;  %v4694_v21 = vshll.u32 %v5400_v19, 16  ;;  %v4322_v51 = vmul.f32 %v4205_v28, %v4070_v61 }
 0x357   : > { %v4668_v12 = vsel %vm8536_vm14, %v9209_v14, %v8670_v56  ;;  %v4312_v14 = vmul.f32 %v8455_v50, %v4060_v54  ;;  %v4400_v15 = vadd.f32 %v8555_v16, %v8492_v48  ;;  %v4480_v58 = vadd.f32 %v8564_v8, %v8514_v9 }
 0x358   : > { %5026 = vst [vmem:[%s6769_s29 + $0x18] sm:$0xf] %v4668_v12  ;;  %v4748_v34 = vsel %vm8536_vm14, %v9210_v29, %v8675_v27  ;;  %v4693_v30 = vrot.slane %v4691_v43, 6  ;;  %v4696_v1 = vrot.slane %v4694_v21, 7  ;;  %v4350_v12 = vpack.c.bf16 %v4322_v51, %v8627_v41  ;;  %v4210_v29 = vpop.permute.xlu0 %4209 }
 0x359   : > { %5034 = vst [vmem:[%s6769_s29 + $0x38] sm:$0xf] %v4748_v34  ;;  %v5408_v5 = vpack.c.bf16 %v4322_v51, %v4322_v51  ;;  %v6295_v10 = vadd.f32 %v8506_v53, %v8396_v45  ;;  %v4345_v19 = vpack.c.bf16 %v4312_v14, %v8630_v39  ;;  %v5398_v61 = vpack.c.bf16 %v4312_v14, %v4312_v14  ;;  %v8714_v48 = vpop.f32.mrb[24].mxu1 }
 0x35a   : > { %v6296_v28 = vadd.f32 %v8527_v35, %v8398_v62  ;;  %v6297_v50 = vadd.f32 %v8531_v11, %v8400_v57  ;;  %v4697_v9 = vor.u32 %v4696_v1, %v4693_v30  ;;  %v8717_v16 = vunpack.c.l.bf16 %v4350_v12  ;;  %v8719_v54 = vpop.f32.mrb[25].mxu1 }
 0x35b   : > { %v4771_v41 = vshrl.u32 %v5408_v5, 16  ;;  %v4774_v45 = vshll.u32 %v5408_v5, 16  ;;  %v4365_v53 = vunpack.c.l.bf16 %v4345_v19  ;;  %v4366_v39 = vunpack.c.h.bf16 %v4345_v19  ;;  %v8721_v43 = vpop.f32.mrb[26].mxu1 }
 0x35c   : > { %v4671_v51 = vshrl.u32 %v5398_v61, 16  ;;  %9211 = vst [vmem:[#allocation6_spill] sm:$0xff] %v8721_v43  ;;  %v4698_v62 = vsel %vm8536_vm14, %v4689_v13, %v4697_v9  ;;  %v4699_v57 = vrot.slane %v4697_v9, 4  ;;  %v8725_v35 = vunpack.c.h.bf16 %v4350_v12  ;;  %v8731_v1 = vpop.f32.mrb[27].mxu1 }
 0x35d   : > { %v8729_v11 = vmul.f32 %v8717_v16, %v8717_v16  ;;  %9212 = vst [vmem:[#allocation5_spill] sm:$0xff] %v8731_v1  ;;  %5029 = vst [vmem:[%s6769_s29 + $0x24] sm:$0xf] %v4698_v62  ;;  %v4773_v5 = vrot.slane %v4771_v41, 6  ;;  %v4776_v34 = vrot.slane %v4774_v45, 7  ;;  %v4401_v21 = vadd.f32 %v4400_v15, %v4365_v53 }
 0x35e   : > { %v4446_v30 = vmul.f32 %v4365_v53, %v4365_v53  ;;  %v4708_v14 = vsel %vm8536_vm14, %v4699_v57, %v8524_v3  ;;  %v4447_v13 = vmul.f32 %v4366_v39, %v4366_v39  ;;  %v4673_v19 = vrot.slane %v4671_v51, 6  ;;  %v8745_v3 = vpop.permute.xlu1 %4214 }
 0x35f   : > { %v4674_v12 = vshll.u32 %v5398_v61, 16  ;;  %5030 = vst [vmem:[%s6769_s29 + $0x28] sm:$0xf] %v4708_v14  ;;  %v8738_v9 = vor.u32 %v4776_v34, %v4773_v5  ;;  %v4402_v8 = vadd.f32 %v4401_v21, %v4366_v39  ;;  %v4032_v1 = vadd.f32 %v6295_v10, %v8453_v20 }
 0x360   : > { %v4481_v43 = vadd.f32 %v4480_v58, %v4446_v30  ;;  %v4037_v41 = vadd.f32 %v6296_v28, %v8453_v20  ;;  %v4035_v15 = vadd.f32 %v6297_v50, %v8453_v20  ;;  %v6298_v45 = vadd.f32 %v8540_v4, %v8402_v63  ;;  %v4220_v63 = vpop.permute.xlu0 %4219 }
 0x361   : > { %v4676_v62 = vrot.slane %v4674_v12, 7  ;;  %v8749_v61 = vmul.f32 %v8725_v35, %v8725_v35  ;;  %v4778_v58 = vsel %vm8536_vm14, %v4769_v42, %v8738_v9  ;;  %v4403_v10 = vadd.f32 %v4402_v8, %v8662_v23 }
 0x362   : > { %v4482_v53 = vadd.f32 %v4481_v43, %v4447_v13  ;;  %5037 = vst [vmem:[%s6769_s29 + $0x44] sm:$0xf] %v4778_v58  ;;  %v4068_v50 = vmax.f32 %v4032_v1, 0.0  ;;  %v4073_v39 = vmax.f32 %v4037_v41, 0.0  ;;  %v4071_v51 = vmax.f32 %v4035_v15, 0.0  ;;  %v4225_v13 = vpop.permute.xlu1 %4224 }
 0x363   : > { %v4677_v28 = vor.u32 %v4676_v62, %v4673_v19  ;;  %v4404_v4 = vadd.f32 %v4403_v10, %v8664_v26  ;;  %v4038_v5 = vadd.f32 %v6298_v45, %v8453_v20  ;;  %v8761_v34 = vadd.f32 %v8544_v49, %v8404_v44 }
 0x364   : > { %v4483_v57 = vadd.f32 %v4482_v53, %v8679_v47  ;;  %v9213_v23 = vrot.slane %v8670_v56, 4  ;;  %v4320_v43 = vmul.f32 %v8657_v32, %v4068_v50  ;;  %v4325_v1 = vmul.f32 %v4220_v63, %v4073_v39 }
 0x365   : > { %v4679_v8 = vrot.slane %v4677_v28, 4  ;;  %v4405_v26 = vadd.f32 %v4404_v4, %v8588_v40  ;;  %v8771_v21 = vmul.f32 %v4210_v29, %v4071_v51  ;;  %v4074_v30 = vmax.f32 %v4038_v5, 0.0 }
 0x366   : > { %v4678_v42 = vsel %vm8536_vm14, %v9213_v23, %v4677_v28  ;;  %v4484_v47 = vadd.f32 %v4483_v57, %v8691_v2  ;;  %v4349_v49 = vpack.c.bf16 %v4320_v43, %v8635_v7  ;;  %v5406_v56 = vpack.c.bf16 %v4320_v43, %v4320_v43 }
 0x367   : > { %5027 = vst [vmem:[%s6769_s29 + $0x1c] sm:$0xf] %v4678_v42  ;;  %v4688_v44 = vsel %vm8536_vm14, %v4679_v8, %v8651_v31  ;;  %v5411_v14 = vpack.c.bf16 %v4325_v1, %v4325_v1  ;;  %v4779_v32 = vrot.slane %v8738_v9, 4  ;;  %v4406_v40 = vadd.f32 %v4405_v26, %v8596_v52 }
 0x368   : > { %v4485_v19 = vadd.f32 %v4484_v47, %v8605_v22  ;;  %5028 = vst [vmem:[%s6769_s29 + $0x20] sm:$0xf] %v4688_v44  ;;  %v5409_v2 = vpack.c.bf16 %v8771_v21, %v8771_v21  ;;  %v4373_v29 = vunpack.c.l.bf16 %v4349_v49  ;;  %v4751_v12 = vshrl.u32 %v5406_v56, 16 }
 0x369   : > { %v4754_v62 = vshll.u32 %v5406_v56, 16  ;;  %v4326_v41 = vmul.f32 %v4225_v13, %v4074_v30  ;;  %v4407_v31 = vadd.f32 %v4406_v40, %v8551_v18  ;;  %v4801_v15 = vshrl.u32 %v5411_v14, 16 }
 0x36a   : > { %v4486_v7 = vadd.f32 %v4485_v19, %v8641_v33  ;;  %v4804_v45 = vshll.u32 %v5411_v14, 16  ;;  %v4374_v58 = vunpack.c.h.bf16 %v4349_v49  ;;  %v4454_v9 = vmul.f32 %v4373_v29, %v4373_v29 }
 0x36b   : > { %v4753_v10 = vrot.slane %v4751_v12, 6  ;;  %v4756_v22 = vrot.slane %v4754_v62, 7  ;;  %v4408_v53 = vadd.f32 %v4407_v31, %v8557_v6  ;;  %v4803_v28 = vrot.slane %v4801_v15, 6  ;;  %v4230_v12 = vpop.permute.xlu0 %4229 }
 0x36c   : > { %v4487_v52 = vadd.f32 %v4486_v7, %v8561_v59  ;;  %v4806_v50 = vrot.slane %v4804_v45, 7  ;;  %v4781_v51 = vshrl.u32 %v5409_v2, 16  ;;  %v4784_v63 = vshll.u32 %v5409_v2, 16  ;;  %v9215_v7 = vld [vmem:[#allocation24_spill] sm:$0xff]  ;;  %v9216_v45 = vld [vmem:[#allocation23_spill] sm:$0xff] }
 0x36d   : > { %v4757_v39 = vor.u32 %v4756_v22, %v4753_v10  ;;  %v4352_v4 = vpack.c.bf16 %v4326_v41, %v4325_v1  ;;  %v4409_v18 = vadd.f32 %v4408_v53, %v4373_v29  ;;  %v5412_v5 = vpack.c.bf16 %v4326_v41, %v4326_v41  ;;  %v4235_v29 = vpop.permute.xlu1 %4234  ;;  %v9218_v53 = vld [vmem:[#allocation26_spill] sm:$0xff] }
 0x36e   : > { %v4488_v33 = vadd.f32 %v4487_v52, %v8584_v60  ;;  %v8788_v57 = vor.u32 %v4806_v50, %v4803_v28  ;;  %v9214_v23 = vrot.slane %v8675_v27, 4  ;;  %v4783_v42 = vrot.slane %v4781_v51, 6 }
 0x36f   : > { %v4759_v59 = vrot.slane %v4757_v39, 4  ;;  %v4786_v8 = vrot.slane %v4784_v63, 7  ;;  %v4410_v43 = vadd.f32 %v4409_v18, %v4374_v58  ;;  %v4455_v26 = vmul.f32 %v4374_v58, %v4374_v58 }
 0x370   : > { %v4758_v6 = vsel %vm8536_vm14, %v9214_v23, %v4757_v39  ;;  %v4489_v47 = vadd.f32 %v4488_v33, %v4454_v9  ;;  %v8795_v1 = vunpack.c.l.bf16 %v4352_v4  ;;  %v4809_v27 = vrot.slane %v8788_v57, 4  ;;  %v9217_v9 = vld [vmem:[#allocation27_spill] sm:$0xff]  ;;  %v9219_v23 = vld [vmem:[#allocation29_spill] sm:$0xff] }
 0x371   : > { %5035 = vst [vmem:[%s6769_s29 + $0x3c] sm:$0xf] %v4758_v6  ;;  %v4768_v60 = vsel %vm8536_vm14, %v4759_v59, %v8668_v25  ;;  %v8801_v30 = vor.u32 %v4786_v8, %v4783_v42  ;;  %v4811_v44 = vshrl.u32 %v5412_v5, 16  ;;  %v4411_v49 = vadd.f32 %v4410_v43, %v8717_v16  ;;  %v4245_v63 = vpop.permute.xlu1 %4244 }
 0x372   : > { %v4490_v56 = vadd.f32 %v4489_v47, %v4455_v26  ;;  %5036 = vst [vmem:[%s6769_s29 + $0x40] sm:$0xf] %v4768_v60  ;;  %v8805_v14 = vunpack.c.h.bf16 %v4352_v4  ;;  %v4814_v13 = vshll.u32 %v5412_v5, 16  ;;  %v8813_v25 = vmul.f32 %v8795_v1, %v8795_v1  ;;  %v4240_v4 = vpop.permute.xlu0 %4239 }
 0x373   : > { %v4788_v19 = vsel %vm8536_vm14, %v4779_v32, %v8801_v30  ;;  %v4789_v40 = vrot.slane %v8801_v30, 4  ;;  %v4813_v2 = vrot.slane %v4811_v44, 6  ;;  %v4036_v41 = vadd.f32 %v8761_v34, %v8453_v20 }
 0x374   : > { %v4491_v16 = vadd.f32 %v4490_v56, %v8729_v11  ;;  %5038 = vst [vmem:[%s6769_s29 + $0x48] sm:$0xf] %v4788_v19  ;;  %v4816_v62 = vrot.slane %v4814_v13, 7  ;;  %v4412_v31 = vadd.f32 %v4411_v49, %v8725_v35  ;;  %v6300_v32 = vadd.f32 %v8567_v38, %v8406_v36 }
 0x375   : > { %v6301_v15 = vadd.f32 %v8572_v46, %v9215_v7  ;;  %v6302_v58 = vadd.f32 %v8580_v24, %v9216_v45  ;;  %v6303_v11 = vadd.f32 %v8590_v37, %v9217_v9  ;;  %v4072_v22 = vmax.f32 %v4036_v41, 0.0 }
 0x376   : > { %v8828_v10 = vor.u32 %v4816_v62, %v4813_v2  ;;  %v4492_v34 = vadd.f32 %v4491_v16, %v8749_v61  ;;  %v6304_v35 = vadd.f32 %v8618_v55, %v9218_v53  ;;  %v4041_v36 = vadd.f32 %v6300_v32, %v8453_v20 }
 0x377   : > { %v4039_v38 = vadd.f32 %v6301_v15, %v8453_v20  ;;  %v4042_v46 = vadd.f32 %v6302_v58, %v8453_v20  ;;  %v4040_v52 = vadd.f32 %v6303_v11, %v8453_v20  ;;  %v8839_v24 = vmul.f32 %v8805_v14, %v8805_v14  ;;  %v4250_v15 = vpop.permute.xlu0 %4249 }
 0x378   : > { %v4818_v37 = vsel %vm8536_vm14, %v4809_v27, %v8828_v10  ;;  %v4819_v61 = vrot.slane %v8828_v10, 4  ;;  %v4324_v55 = vmul.f32 %v8745_v3, %v4072_v22  ;;  %v4077_v28 = vmax.f32 %v4041_v36, 0.0 }
 0x379   : > { %5041 = vst [vmem:[%s6769_s29 + $0x54] sm:$0xf] %v4818_v37  ;;  %v4075_v50 = vmax.f32 %v4039_v38, 0.0  ;;  %v4078_v39 = vmax.f32 %v4042_v46, 0.0  ;;  %v4076_v51 = vmax.f32 %v4040_v52, 0.0  ;;  %v4045_v5 = vadd.f32 %v6304_v35, %v8453_v20 }
 0x37a   : > { %v4351_v18 = vpack.c.bf16 %v4324_v55, %v8771_v21  ;;  %v5410_v33 = vpack.c.bf16 %v4324_v55, %v4324_v55  ;;  %v6305_v6 = vadd.f32 %v8621_v17, %v9219_v23  ;;  %v4329_v59 = vmul.f32 %v4240_v4, %v4077_v28 }
 0x37b   : > { %v4327_v42 = vmul.f32 %v4230_v12, %v4075_v50  ;;  %v4330_v8 = vmul.f32 %v4245_v63, %v4078_v39  ;;  %v4328_v43 = vmul.f32 %v4235_v29, %v4076_v51  ;;  %v4081_v38 = vmax.f32 %v4045_v5, 0.0  ;;  %v4260_v63 = vpop.permute.xlu0 %4259 }
 0x37c   : > { %v4377_v3 = vunpack.c.l.bf16 %v4351_v18  ;;  %v4378_v26 = vunpack.c.h.bf16 %v4351_v18  ;;  %v4791_v47 = vshrl.u32 %v5410_v33, 16  ;;  %v4794_v60 = vshll.u32 %v5410_v33, 16 }
 0x37d   : > { %v5415_v27 = vpack.c.bf16 %v4329_v59, %v4329_v59  ;;  %v5413_v44 = vpack.c.bf16 %v4327_v42, %v4327_v42  ;;  %v4354_v49 = vpack.c.bf16 %v4330_v8, %v4329_v59  ;;  %v5416_v56 = vpack.c.bf16 %v4330_v8, %v4330_v8  ;;  %v9221_v8 = vld [vmem:[#allocation12_spill] sm:$0xff] }
 0x37e   : > { %v4413_v13 = vadd.f32 %v4412_v31, %v4377_v3  ;;  %v4458_v21 = vmul.f32 %v4377_v3, %v4377_v3  ;;  %v4459_v19 = vmul.f32 %v4378_v26, %v4378_v26  ;;  %v4793_v2 = vrot.slane %v4791_v47, 6 }
 0x37f   : > { %v4796_v16 = vrot.slane %v4794_v60, 7  ;;  %v4841_v62 = vshrl.u32 %v5415_v27, 16  ;;  %v4844_v41 = vshll.u32 %v5415_v27, 16  ;;  %v4821_v17 = vshrl.u32 %v5413_v44, 16  ;;  %v4255_v60 = vpop.permute.xlu1 %4254 }
 0x380   : > { %v4414_v32 = vadd.f32 %v4413_v13, %v4378_v26  ;;  %v4493_v12 = vadd.f32 %v4492_v34, %v4458_v21  ;;  %v4824_v7 = vshll.u32 %v5413_v44, 16  ;;  %v4383_v29 = vunpack.c.l.bf16 %v4354_v49 }
 0x381   : > { %v4797_v45 = vor.u32 %v4796_v16, %v4793_v2  ;;  %v4843_v58 = vrot.slane %v4841_v62, 6  ;;  %v4846_v9 = vrot.slane %v4844_v41, 7  ;;  %v4823_v11 = vrot.slane %v4821_v17, 6 }
 0x382   : > { %v4415_v10 = vadd.f32 %v4414_v32, %v8795_v1  ;;  %v4494_v31 = vadd.f32 %v4493_v12, %v4459_v19  ;;  %v4826_v22 = vrot.slane %v4824_v7, 7  ;;  %v4384_v53 = vunpack.c.h.bf16 %v4354_v49 }
 0x383   : > { %v4798_v35 = vsel %vm8536_vm14, %v4789_v40, %v4797_v45  ;;  %v4799_v34 = vrot.slane %v4797_v45, 4  ;;  %v8856_v36 = vor.u32 %v4846_v9, %v4843_v58  ;;  %v4464_v37 = vmul.f32 %v4383_v29, %v4383_v29  ;;  %v9222_v58 = vld [vmem:[#allocation31_spill] sm:$0xff]  ;;  %v9223_v9 = vld [vmem:[#allocation9_spill] sm:$0xff] }
 0x384   : > { %v4495_v46 = vadd.f32 %v4494_v31, %v8813_v25  ;;  %5039 = vst [vmem:[%s6769_s29 + $0x4c] sm:$0xf] %v4798_v35  ;;  %v4827_v52 = vor.u32 %v4826_v22, %v4823_v11  ;;  %v4851_v1 = vshrl.u32 %v5416_v56, 16  ;;  %v4465_v28 = vmul.f32 %v4384_v53, %v4384_v53 }
 0x385   : > { %v4808_v55 = vsel %vm8536_vm14, %v4799_v34, %v8788_v57  ;;  %v4854_v30 = vshll.u32 %v5416_v56, 16  ;;  %v4353_v50 = vpack.c.bf16 %v4328_v43, %v4327_v42  ;;  %v4849_v40 = vrot.slane %v8856_v36, 4  ;;  %v9220_v42 = vld [vmem:[#allocation28_spill] sm:$0xff]  ;;  %v4265_v34 = vpop.permute.xlu1 %4264 }
 0x386   : > { %5040 = vst [vmem:[%s6769_s29 + $0x50] sm:$0xf] %v4808_v55  ;;  %v4828_v39 = vsel %vm8536_vm14, %v4819_v61, %v4827_v52  ;;  %v4853_v51 = vrot.slane %v4851_v1, 6  ;;  %v4416_v25 = vadd.f32 %v4415_v10, %v8805_v14  ;;  %v4496_v5 = vadd.f32 %v4495_v46, %v8839_v24 }
 0x387   : > { %5042 = vst [vmem:[%s6769_s29 + $0x58] sm:$0xf] %v4828_v39  ;;  %v4856_v4 = vrot.slane %v4854_v30, 7  ;;  %v4381_v18 = vunpack.c.l.bf16 %v4353_v50  ;;  %v4382_v33 = vunpack.c.h.bf16 %v4353_v50  ;;  %v5414_v57 = vpack.c.bf16 %v4328_v43, %v4328_v43  ;;  %v4270_v30 = vpop.permute.xlu0 %4269  ;;  %v9225_v39 = vld [vmem:[#allocation14_spill] sm:$0xff] }
 0x388   : > { %v4333_v23 = vmul.f32 %v4260_v63, %v4081_v38  ;;  %v4043_v59 = vadd.f32 %v6305_v6, %v8453_v20  ;;  %v6306_v3 = vadd.f32 %v9221_v8, %v9220_v42  ;;  %v4829_v26 = vrot.slane %v4827_v52, 4  ;;  %v9229_v42 = vld [vmem:[#allocation4_spill] sm:$0xff] }
 0x389   : > { %v8873_v61 = vor.u32 %v4856_v4, %v4853_v51  ;;  %v4417_v47 = vadd.f32 %v4416_v25, %v4381_v18  ;;  %v4462_v14 = vmul.f32 %v4381_v18, %v4381_v18  ;;  %v4831_v27 = vshrl.u32 %v5414_v57, 16 }
 0x38a   : > { %v4834_v44 = vshll.u32 %v5414_v57, 16  ;;  %v5419_v49 = vpack.c.bf16 %v4333_v23, %v4333_v23  ;;  %v4079_v56 = vmax.f32 %v4043_v59, 0.0  ;;  %v4463_v13 = vmul.f32 %v4382_v33, %v4382_v33  ;;  %v9228_v59 = vld [vmem:[#allocation33_spill] sm:$0xff] }
 0x38b   : > { %v4858_v24 = vsel %vm8536_vm14, %v4849_v40, %v8873_v61  ;;  %v4418_v43 = vadd.f32 %v4417_v47, %v4382_v33  ;;  %v4497_v6 = vadd.f32 %v4496_v5, %v4462_v14  ;;  %v4833_v21 = vrot.slane %v4831_v27, 6  ;;  %v9224_v40 = vld [vmem:[#allocation30_spill] sm:$0xff]  ;;  %v9227_v5 = vld [vmem:[#allocation11_spill] sm:$0xff] }
 0x38c   : > { %5045 = vst [vmem:[%s6769_s29 + $0x64] sm:$0xf] %v4858_v24  ;;  %v4836_v19 = vrot.slane %v4834_v44, 7  ;;  %v4881_v2 = vshrl.u32 %v5419_v49, 16  ;;  %v4884_v16 = vshll.u32 %v5419_v49, 16  ;;  %v4331_v17 = vmul.f32 %v4250_v15, %v4079_v56 }
 0x38d   : > { %v4419_v62 = vadd.f32 %v4418_v43, %v4383_v29  ;;  %v4498_v41 = vadd.f32 %v4497_v6, %v4463_v13  ;;  %v4046_v32 = vadd.f32 %v6306_v3, %v8453_v20  ;;  %v6307_v11 = vadd.f32 %v9223_v9, %v9222_v58  ;;  %v4280_v13 = vpop.permute.xlu0 %4279 }
 0x38e   : > { %v4837_v12 = vor.u32 %v4836_v19, %v4833_v21  ;;  %v4883_v7 = vrot.slane %v4881_v2, 6  ;;  %v4886_v45 = vrot.slane %v4884_v16, 7  ;;  %v5417_v31 = vpack.c.bf16 %v4331_v17, %v4331_v17 }
 0x38f   : > { %v4499_v10 = vadd.f32 %v4498_v41, %v4464_v37  ;;  %v4082_v22 = vmax.f32 %v4046_v32, 0.0  ;;  %v4420_v35 = vadd.f32 %v4419_v62, %v4384_v53  ;;  %v4044_v15 = vadd.f32 %v6307_v11, %v8453_v20 }
 0x390   : > { %v4838_v29 = vsel %vm8536_vm14, %v4829_v26, %v4837_v12  ;;  %v4839_v38 = vrot.slane %v4837_v12, 4  ;;  %v4861_v46 = vshrl.u32 %v5417_v31, 16  ;;  %v4864_v52 = vshll.u32 %v5417_v31, 16 }
 0x391   : > { %5043 = vst [vmem:[%s6769_s29 + $0x5c] sm:$0xf] %v4838_v29  ;;  %v4334_v1 = vmul.f32 %v4265_v34, %v4082_v22  ;;  %v4500_v55 = vadd.f32 %v4499_v10, %v4465_v28  ;;  %v8889_v50 = vor.u32 %v4886_v45, %v4883_v7  ;;  %v4080_v53 = vmax.f32 %v4044_v15, 0.0  ;;  %v8897_v28 = vld [vmem:[%s9002_s8] ss:$0 sm:$0xff]  ;;  %v4275_v45 = vpop.permute.xlu1 %4274 }
 0x392   : > { %v4848_v37 = vsel %vm8536_vm14, %v4839_v38, %v8856_v36  ;;  %v6308_v51 = vadd.f32 %v9225_v39, %v9224_v40  ;;  %v4863_v25 = vrot.slane %v4861_v46, 6  ;;  %v4866_v63 = vrot.slane %v4864_v52, 7  ;;  %v9226_v36 = vld [vmem:[#allocation25_spill] sm:$0xff]  ;;  %v9231_v40 = vld [vmem:[#allocation7_spill] sm:$0xff] }
 0x393   : > { %5044 = vst [vmem:[%s6769_s29 + $0x60] sm:$0xf] %v4848_v37  ;;  %v4356_v20 = vpack.c.bf16 %v4334_v1, %v4333_v23  ;;  %v5420_v4 = vpack.c.bf16 %v4334_v1, %v4334_v1  ;;  %v4332_v18 = vmul.f32 %v4255_v60, %v4080_v53  ;;  %v6309_v57 = vadd.f32 %v9227_v5, %v9226_v36  ;;  %v9230_v53 = vld [vmem:[#allocation32_spill] sm:$0xff] }
 0x394   : > { %v4049_v33 = vadd.f32 %v8897_v28, %v6308_v51  ;;  %v6310_v8 = vadd.f32 %v9229_v42, %v9228_v59  ;;  %v4859_v3 = vrot.slane %v8873_v61, 4  ;;  %v4867_v26 = vor.u32 %v4866_v63, %v4863_v25  ;;  %v9232_v42 = vld [vmem:[#allocation17_spill] sm:$0xff] }
 0x395   : > { %v4387_v23 = vunpack.c.l.bf16 %v4356_v20  ;;  %v4891_v47 = vshrl.u32 %v5420_v4, 16  ;;  %v4894_v14 = vshll.u32 %v5420_v4, 16  ;;  %v4355_v60 = vpack.c.bf16 %v4332_v18, %v4331_v17  ;;  %v4285_v36 = vpop.permute.xlu1 %4284 }
 0x396   : > { %v5418_v27 = vpack.c.bf16 %v4332_v18, %v4332_v18  ;;  %v4085_v44 = vmax.f32 %v4049_v33, 0.0  ;;  %v4889_v49 = vrot.slane %v8889_v50, 4  ;;  %v4868_v56 = vsel %vm8536_vm14, %v4859_v3, %v4867_v26 }
 0x397   : > { %v4869_v24 = vrot.slane %v4867_v26, 4  ;;  %v4388_v43 = vunpack.c.h.bf16 %v4356_v20  ;;  %5046 = vst [vmem:[%s6769_s29 + $0x68] sm:$0xf] %v4868_v56  ;;  %v4893_v6 = vrot.slane %v4891_v47, 6  ;;  %v4896_v21 = vrot.slane %v4894_v14, 7  ;;  %v8921_v20 = vpop.permute.xlu0 %4289 }
 0x398   : > { %v4385_v19 = vunpack.c.l.bf16 %v4355_v60  ;;  %v4386_v61 = vunpack.c.h.bf16 %v4355_v60  ;;  %v4871_v2 = vshrl.u32 %v5418_v27, 16  ;;  %v4874_v16 = vshll.u32 %v5418_v27, 16 }
 0x399   : > { %v4337_v62 = vmul.f32 %v4280_v13, %v4085_v44  ;;  %v4047_v41 = vadd.f32 %v8897_v28, %v6309_v57  ;;  %v4468_v17 = vmul.f32 %v4387_v23, %v4387_v23  ;;  %v8910_v32 = vor.u32 %v4896_v21, %v4893_v6  ;;  %v9233_v44 = vld [vmem:[#allocation19_spill] sm:$0xff]  ;;  %v9234_v21 = vld [vmem:[#allocation2_spill] sm:$0xff] }
 0x39a   : > { %v4421_v12 = vadd.f32 %v4420_v35, %v4385_v19  ;;  %v4466_v7 = vmul.f32 %v4385_v19, %v4385_v19  ;;  %v4873_v58 = vrot.slane %v4871_v2, 6  ;;  %v4876_v9 = vrot.slane %v4874_v16, 7  ;;  %v9235_v19 = vld [vmem:[#allocation6_spill] sm:$0xff] }
 0x39b   : > { %v5423_v11 = vpack.c.bf16 %v4337_v62, %v4337_v62  ;;  %v4083_v10 = vmax.f32 %v4047_v41, 0.0  ;;  %v4898_v31 = vsel %vm8536_vm14, %v4889_v49, %v8910_v32  ;;  %v4467_v34 = vmul.f32 %v4386_v61, %v4386_v61  ;;  %v4300_v2 = vpop.permute.xlu0 %4299 }
 0x39c   : > { %v4422_v22 = vadd.f32 %v4421_v12, %v4386_v61  ;;  %v4501_v29 = vadd.f32 %v4500_v55, %v4466_v7  ;;  %5049 = vst [vmem:[%s6769_s29 + $0x74] sm:$0xf] %v4898_v31  ;;  %v4877_v38 = vor.u32 %v4876_v9, %v4873_v58  ;;  %v4050_v37 = vadd.f32 %v8897_v28, %v6310_v8 }
 0x39d   : > { %v4921_v15 = vshrl.u32 %v5423_v11, 16  ;;  %v4924_v46 = vshll.u32 %v5423_v11, 16  ;;  %v4335_v52 = vmul.f32 %v4270_v30, %v4083_v10  ;;  %v6311_v39 = vadd.f32 %v9231_v40, %v9230_v53  ;;  %v4295_v53 = vpop.permute.xlu1 %4294 }
 0x39e   : > { %v4423_v35 = vadd.f32 %v4422_v22, %v4387_v23  ;;  %v4502_v1 = vadd.f32 %v4501_v29, %v4467_v34  ;;  %v4878_v51 = vsel %vm8536_vm14, %v4869_v24, %v4877_v38  ;;  %v4879_v25 = vrot.slane %v4877_v38, 4 }
 0x39f   : > { %v4923_v63 = vrot.slane %v4921_v15, 6  ;;  %v4926_v55 = vrot.slane %v4924_v46, 7  ;;  %5047 = vst [vmem:[%s6769_s29 + $0x6c] sm:$0xf] %v4878_v51  ;;  %v5421_v18 = vpack.c.bf16 %v4335_v52, %v4335_v52  ;;  %v4086_v30 = vmax.f32 %v4050_v37, 0.0 }
 0x3a0   : > { %v4503_v4 = vadd.f32 %v4502_v1, %v4468_v17  ;;  %v4048_v33 = vadd.f32 %v8897_v28, %v6311_v39  ;;  %v4469_v5 = vmul.f32 %v4388_v43, %v4388_v43  ;;  %v4888_v57 = vsel %vm8536_vm14, %v4879_v25, %v8889_v50 }
 0x3a1   : > { %v4424_v59 = vadd.f32 %v4423_v35, %v4388_v43  ;;  %v6312_v8 = vadd.f32 %v8714_v48, %v9232_v42  ;;  %5048 = vst [vmem:[%s6769_s29 + $0x70] sm:$0xf] %v4888_v57  ;;  %v4901_v3 = vshrl.u32 %v5421_v18, 16  ;;  %v4904_v26 = vshll.u32 %v5421_v18, 16 }
 0x3a2   : > { %v4338_v23 = vmul.f32 %v4285_v36, %v4086_v30  ;;  %v4084_v47 = vmax.f32 %v4048_v33, 0.0  ;;  %v8931_v14 = vor.u32 %v4926_v55, %v4923_v63  ;;  %v4504_v60 = vadd.f32 %v4503_v4, %v4469_v5 }
 0x3a3   : > { %v4053_v27 = vadd.f32 %v8897_v28, %v6312_v8  ;;  %v6313_v49 = vadd.f32 %v8719_v54, %v9233_v44  ;;  %v4903_v56 = vrot.slane %v4901_v3, 6  ;;  %v4906_v24 = vrot.slane %v4904_v26, 7  ;;  %v9236_v8 = vld [vmem:[#allocation10_spill] sm:$0xff]  ;;  %v9237_v3 = vld [vmem:[#allocation5_spill] sm:$0xff] }
 0x3a4   : > { %v4358_v50 = vpack.c.bf16 %v4338_v23, %v4337_v62  ;;  %v5424_v43 = vpack.c.bf16 %v4338_v23, %v4338_v23  ;;  %v4899_v13 = vrot.slane %v8910_v32, 4  ;;  %v4336_v48 = vmul.f32 %v4275_v45, %v4084_v47 }
 0x3a5   : > { %v4089_v6 = vmax.f32 %v4053_v27, 0.0  ;;  %v6314_v61 = vadd.f32 %v9235_v19, %v9234_v21  ;;  %v4907_v16 = vor.u32 %v4906_v24, %v4903_v56  ;;  %v4051_v12 = vadd.f32 %v8897_v28, %v6313_v49  ;;  %v4305_v24 = vpop.permute.xlu1 %4304 }
 0x3a6   : > { %v4391_v41 = vunpack.c.l.bf16 %v4358_v50  ;;  %v4931_v17 = vshrl.u32 %v5424_v43, 16  ;;  %v4934_v7 = vshll.u32 %v5424_v43, 16  ;;  %v4357_v54 = vpack.c.bf16 %v4336_v48, %v4335_v52 }
 0x3a7   : > { %v5422_v58 = vpack.c.bf16 %v4336_v48, %v4336_v48  ;;  %v4341_v9 = vmul.f32 %v4300_v2, %v4089_v6  ;;  %v4929_v62 = vrot.slane %v8931_v14, 4  ;;  %v4908_v32 = vsel %vm8536_vm14, %v4899_v13, %v4907_v16 }
 0x3a8   : > { %v4909_v45 = vrot.slane %v4907_v16, 4  ;;  %v4392_v11 = vunpack.c.h.bf16 %v4358_v50  ;;  %5050 = vst [vmem:[%s6769_s29 + $0x78] sm:$0xf] %v4908_v32  ;;  %v4933_v10 = vrot.slane %v4931_v17, 6  ;;  %v4936_v31 = vrot.slane %v4934_v7, 7 }
 0x3a9   : > { %v4389_v22 = vunpack.c.l.bf16 %v4357_v54  ;;  %v4390_v34 = vunpack.c.h.bf16 %v4357_v54  ;;  %v4911_v29 = vshrl.u32 %v5422_v58, 16  ;;  %v4914_v38 = vshll.u32 %v5422_v58, 16 }
 0x3aa   : > { %v5427_v15 = vpack.c.bf16 %v4341_v9, %v4341_v9  ;;  %v4087_v46 = vmax.f32 %v4051_v12, 0.0  ;;  %v4472_v52 = vmul.f32 %v4391_v41, %v4391_v41  ;;  %v4937_v35 = vor.u32 %v4936_v31, %v4933_v10 }
 0x3ab   : > { %v4425_v1 = vadd.f32 %v4424_v59, %v4389_v22  ;;  %v4470_v37 = vmul.f32 %v4389_v22, %v4389_v22  ;;  %v4913_v40 = vrot.slane %v4911_v29, 6  ;;  %v4916_v39 = vrot.slane %v4914_v38, 7  ;;  %v5058_v38 = vld [vmem:[%s6769_s29 + $0x98] sm:$0x3] }
 0x3ac   : > { %v4961_v51 = vshrl.u32 %v5427_v15, 16  ;;  %v4964_v25 = vshll.u32 %v5427_v15, 16  ;;  %v4938_v63 = vsel %vm8536_vm14, %v4929_v62, %v4937_v35  ;;  %v4471_v4 = vmul.f32 %v4390_v34, %v4390_v34 }
 0x3ad   : > { %v4426_v55 = vadd.f32 %v4425_v1, %v4390_v34  ;;  %v4505_v18 = vadd.f32 %v4504_v60, %v4470_v37  ;;  %v4473_v30 = vmul.f32 %v4392_v11, %v4392_v11  ;;  %5053 = vst [vmem:[%s6769_s29 + $0x84] sm:$0xf] %v4938_v63  ;;  %v4917_v33 = vor.u32 %v4916_v39, %v4913_v40 }
 0x3ae   : > { %v4963_v36 = vrot.slane %v4961_v51, 6  ;;  %v4339_v5 = vmul.f32 %v8921_v20, %v4087_v46  ;;  %v4054_v42 = vadd.f32 %v8897_v28, %v6314_v61  ;;  %v6315_v26 = vadd.f32 %v9237_v3, %v9236_v8 }
 0x3af   : > { %v4427_v57 = vadd.f32 %v4426_v55, %v4391_v41  ;;  %v4506_v59 = vadd.f32 %v4505_v18, %v4471_v4  ;;  %v4918_v23 = vsel %vm8536_vm14, %v4909_v45, %v4917_v33  ;;  %v4919_v47 = vrot.slane %v4917_v33, 4 }
 0x3b0   : > { %v4966_v27 = vrot.slane %v4964_v25, 7  ;;  %v5425_v60 = vpack.c.bf16 %v4339_v5, %v4339_v5  ;;  %5051 = vst [vmem:[%s6769_s29 + $0x7c] sm:$0xf] %v4918_v23  ;;  %v4090_v49 = vmax.f32 %v4054_v42, 0.0  ;;  %v4052_v56 = vadd.f32 %v8897_v28, %v6315_v26 }
 0x3b1   : > { %v4507_v44 = vadd.f32 %v4506_v59, %v4472_v52  ;;  %v4428_v20 = vadd.f32 %v4427_v57, %v4392_v11  ;;  %v4928_v50 = vsel %vm8536_vm14, %v4919_v47, %v8931_v14  ;;  %v4939_v28 = vrot.slane %v4937_v35, 4 }
 0x3b2   : > { %v4941_v43 = vshrl.u32 %v5425_v60, 16  ;;  %v4944_v13 = vshll.u32 %v5425_v60, 16  ;;  %5052 = vst [vmem:[%s6769_s29 + $0x80] sm:$0xf] %v4928_v50  ;;  %v4342_v48 = vmul.f32 %v4305_v24, %v4090_v49  ;;  %v4088_v6 = vmax.f32 %v4052_v56, 0.0 }
 0x3b3   : > { %v4508_v21 = vadd.f32 %v4507_v44, %v4473_v30  ;;  %v4967_v2 = vor.u32 %v4966_v27, %v4963_v36 }
 0x3b4   : > { %v4943_v19 = vrot.slane %v4941_v43, 6  ;;  %v4946_v61 = vrot.slane %v4944_v13, 7  ;;  %v4360_v16 = vpack.c.bf16 %v4342_v48, %v4341_v9  ;;  %v5428_v41 = vpack.c.bf16 %v4342_v48, %v4342_v48 }
 0x3b5   : > { %v4340_v17 = vmul.f32 %v4295_v53, %v4088_v6  ;;  %v4969_v32 = vrot.slane %v4967_v2, 4  ;;  %v4441_v6 = vld [vmem:[%s9005_s11 + $0x1] sm:$0x1] }
 0x3b6   : > { %v4947_v12 = vor.u32 %v4946_v61, %v4943_v19  ;;  %v4971_v7 = vshrl.u32 %v5428_v41, 16  ;;  %v4974_v54 = vshll.u32 %v5428_v41, 16  ;;  %v4395_v29 = vunpack.c.l.bf16 %v4360_v16 }
 0x3b7   : > { %v4359_v58 = vpack.c.bf16 %v4340_v17, %v4339_v5  ;;  %v5426_v62 = vpack.c.bf16 %v4340_v17, %v4340_v17  ;;  %v4396_v40 = vunpack.c.h.bf16 %v4360_v16 }
 0x3b8   : > { %v4948_v14 = vsel %vm8536_vm14, %v4939_v28, %v4947_v12  ;;  %v4973_v45 = vrot.slane %v4971_v7, 6  ;;  %v4976_v11 = vrot.slane %v4974_v54, 7  ;;  %v4949_v35 = vrot.slane %v4947_v12, 4 }
 0x3b9   : > { %5054 = vst [vmem:[%s6769_s29 + $0x88] sm:$0xf] %v4948_v14  ;;  %v4393_v10 = vunpack.c.l.bf16 %v4359_v58  ;;  %v4394_v31 = vunpack.c.h.bf16 %v4359_v58  ;;  %v4951_v9 = vshrl.u32 %v5426_v62, 16  ;;  %v4954_v22 = vshll.u32 %v5426_v62, 16 }
 0x3ba   : > { %v4977_v34 = vor.u32 %v4976_v11, %v4973_v45  ;;  %v4476_v18 = vmul.f32 %v4395_v29, %v4395_v29  ;;  %v4477_v57 = vmul.f32 %v4396_v40, %v4396_v40 }
 0x3bb   : > { %v4429_v15 = vadd.f32 %v4428_v20, %v4393_v10  ;;  %v4474_v46 = vmul.f32 %v4393_v10, %v4393_v10  ;;  %v4953_v52 = vrot.slane %v4951_v9, 6  ;;  %v4956_v53 = vrot.slane %v4954_v22, 7 }
 0x3bc   : > { %v4978_v1 = vsel %vm8536_vm14, %v4969_v32, %v4977_v34  ;;  %v4979_v37 = vrot.slane %v4977_v34, 4  ;;  %v4475_v51 = vmul.f32 %v4394_v31, %v4394_v31 }
 0x3bd   : > { %5057 = vst [vmem:[%s6769_s29 + $0x94] sm:$0xf] %v4978_v1  ;;  %v4430_v39 = vadd.f32 %v4429_v15, %v4394_v31  ;;  %v4509_v25 = vadd.f32 %v4508_v21, %v4474_v46  ;;  %v4957_v4 = vor.u32 %v4956_v53, %v4953_v52 }
 0x3be   : > { %v5059_v55 = vsel %vm8379_vm9, %v4979_v37, %v5058_v38 }
 0x3bf   : > { %5060 = vst [vmem:[%s6769_s29 + $0x98] sm:$0x3] %v5059_v55  ;;  %v4431_v30 = vadd.f32 %v4430_v39, %v4395_v29  ;;  %v4510_v33 = vadd.f32 %v4509_v25, %v4475_v51  ;;  %v4958_v36 = vsel %vm8536_vm14, %v4949_v35, %v4957_v4  ;;  %v4959_v5 = vrot.slane %v4957_v4, 4 }
 0x3c0   : > { %5055 = vst [vmem:[%s6769_s29 + $0x8c] sm:$0xf] %v4958_v36 }
 0x3c1   : > { %v4432_v59 = vadd.f32 %v4431_v30, %v4396_v40  ;;  %v4511_v42 = vadd.f32 %v4510_v33, %v4476_v18  ;;  %v4968_v8 = vsel %vm8536_vm14, %v4959_v5, %v4967_v2 }
 0x3c2   : > { %5056 = vst [vmem:[%s6769_s29 + $0x90] sm:$0xf] %v4968_v8 }
 0x3c3   : > { %v4433_v3 = vrot.slane %v4432_v59, 4  ;;  %v4512_v26 = vadd.f32 %v4511_v42, %v4477_v57 }
 0x3c5   : > { %v4434_v23 = vadd.f32 %v4433_v3, %v4432_v59  ;;  %v4513_v47 = vrot.slane %v4512_v26, 4 }
 0x3c6   : > { %v5061_v27 = vld [vmem:[%s6769_s29 + $0x98] sm:$0xe] }
 0x3c7   : > { %v5062_v44 = vsel %vm8500_vm13, 0, %v5061_v27  ;;  %v4435_v49 = vrot.slane %v4434_v23, 2  ;;  %v4514_v56 = vadd.f32 %v4513_v47, %v4512_v26 }
 0x3c8   : > { %5063 = vst [vmem:[%s6769_s29 + $0x98] sm:$0xe] %v5062_v44 }
 0x3c9   : > { %v4436_v20 = vadd.f32 %v4435_v49, %v4434_v23  ;;  %v4515_v24 = vrot.slane %v4514_v56, 2 }
 0x3cb   : > { %v4437_v50 = vrot.slane %v4436_v20, 1  ;;  %v4516_v43 = vadd.f32 %v4515_v24, %v4514_v56 }
 0x3cd   : > { %v4438_v13 = vadd.f32 %v4437_v50, %v4436_v20  ;;  %v4517_v48 = vrot.slane %v4516_v43, 1 }
 0x3cf   : > { %v4439_v21 = vadd.f32 %v4438_v13, %v4397_v0  ;;  %v4518_v19 = vadd.f32 %v4517_v48, %v4516_v43 }
 0x3d1   : > { %4440 = vst [vmem:[%s9005_s11] sm:$0x1] %v4439_v21  ;;  %v4519_v61 = vadd.f32 %v4518_v19, %v4441_v6 }
 0x3d3   : > { %4520 = vst [vmem:[%s9005_s11 + $0x1] sm:$0x1] %v4519_v61 }
 0x3d4 PF: > { %s22_s17 = sadd.s32 1, %s6680_s17  }
 0x3d5   : > { %p19_p5 = scmp.ge.s32.totalorder %s22_s17, 4  }
 0x3d7   :  { %21 = sbr.rel (!%p19_p5) target bundleno = 1 (0x1), region = 113 }

// kernel: block_forward.5
= control target key start
LH: loop header
LB: loop body
LE: loop exit
PB: predicated region body
PF: predicated region fallthrough
CT: control target
= control target key end

     0   :  { %s5172_s24 = smov 0   ;;  %s6887_s0 = inlined_call_operand.vmem [shape: bf16[2,4,90,128], index: 0, kind: input, shape index: {}]   ;;  %s6888_s1 = inlined_call_operand.vmem [shape: f32[8,128], index: 1, kind: input, shape index: {}]   ;;  %s6889_s2 = inlined_call_operand.vmem [shape: f32[1,128], index: 2, kind: input, shape index: {}]   ;;  %s6890_s3 = inlined_call_operand.vmem [shape: f32[1,128], index: 3, kind: input, shape index: {}]   ;;  %s6891_s4 = inlined_call_operand.vmem [shape: bf16[16,128,128], index: 4, kind: input, shape index: {}]   ;;  %s6892_s5 = inlined_call_operand.vmem [shape: f32[1,128], index: 5, kind: input, shape index: {}]   ;;  %s6893_s6 = inlined_call_operand.vmem [shape: f32[4,90,1], index: 6, kind: input, shape index: {}]   ;;  %s6894_s7 = inlined_call_operand.vmem [shape: f32[2,72,128], index: 7, kind: output, shape index: {}]  }
   0x1 LB: > { %s3643_s25 = sadd.s32 4294967295, %s5127_s24   ;;  %p3647_p0 = scmp.ge.s32.totalorder %s5127_s24, 1  ;;  %s5127_s24 = sphi %s5172_s24, %s17_s24  }
   0x2   : > { %p237_p1 = scmp.lt.s32.totalorder %s5127_s24, 3 }
   0x4   : > { %p238_p2 = pnand %p3647_p0, %p237_p1 }
   0x6   : > { %241 = sbr.rel (%p238_p2) target bundleno = 687 (0x2af), region = 48 }
   0xd   : > { %v3662_v0 = vld [vmem:[%s6893_s6 + $0x60] sm:$0xff]  ;;  %v5129_v2 = vmov 0   ;;  %v3663_v3 = vld [vmem:[%s6893_s6 + $0x68] sm:$0xff]  ;;  %v6903_v5 = vmov 0.0   ;;  %v3664_v6 = vld [vmem:[%s6893_s6 + $0x70] sm:$0xff]  ;;  %vm5131_vm0 = vmmov 0   ;;  %v318_v53 = vlaneseq }
   0xe   : > { %v353_v1 = vld [vmem:[%s6893_s6] sm:$0xff]  ;;  %4990 = vset.pattern.permute.xlu1 %v5129_v2  ;;  %4989 = vset.pattern.permute.xlu0 %v5129_v2  ;;  %v354_v4 = vld [vmem:[%s6893_s6 + $0x8] sm:$0xff]  ;;  %v3665_v7 = vld [vmem:[%s6893_s6 + $0x78] sm:$0xff]  ;;  %p269_p3 = scmp.lt.s32.totalorder %s3643_s25, 1  ;;  %vm2206_vm1 = vsmask.f32 3328 }
   0xf   : > { %507 = vperm.xlu0 %4989, %v3662_v0   ;;  %367 = vperm.xlu1 %4990, %v353_v1   ;;  %v355_v8 = vld [vmem:[%s6893_s6 + $0x10] sm:$0xff]  ;;  %v356_v9 = vld [vmem:[%s6893_s6 + $0x18] sm:$0xff]  ;;  %v3666_v10 = vld [vmem:[%s6893_s6 + $0x80] sm:$0xff]  ;;  %v319_v57 = vshrl.u32 %v318_v53, 7  ;;  %vm2563_vm2 = vcmask 1042432  }
  0x10   : > { %4400 = vmatprep.subr.bf16.mxu0 %v6903_v5  ;;  %4436 = vmatprep.subr.bf16.mxu1 %v6903_v5  ;;  %v3667_v11 = vld [vmem:[%s6893_s6 + $0x88] sm:$0xff]  ;;  %v4991_v12 = vld [vmem:[%s6891_s4 + $0x40] sm:$0xff]   ;;  %v3668_v18 = vld [vmem:[%s6893_s6 + $0x90] sm:$0xff]  ;;  %s7009_s25 = smov (!%p269_p3, %s3643_s25), 1  ;;  %vm1153_vm3 = vsmask.f32 7424 }
  0x11   : > { %4416 = vmatprep.mubr.msk.bf16.mxu0 %vm5131_vm0, %v6903_v5  ;;  %4452 = vmatprep.mubr.msk.bf16.mxu1 %vm5131_vm0, %v6903_v5  ;;  %v357_v13 = vld [vmem:[%s6893_s6 + $0x20] sm:$0xff]  ;;  %v358_v14 = vld [vmem:[%s6893_s6 + $0x28] sm:$0xff]  ;;  %v3669_v19 = vld [vmem:[%s6893_s6 + $0x98] sm:$0xff]  ;;  %s4976_s9 = smul.u32 192, %s7009_s25  ;;  %v320_v63 = vsub.s32 0, %v319_v57 }
  0x12   : > { %v4992_v15 = vld [vmem:[%s6891_s4] sm:$0xff]   ;;  %v4993_v16 = vld [vmem:[%s6891_s4 + $0x48] sm:$0xff]   ;;  %4401 = vmatpush3.bf16.msra.mxu0 %v4991_v12  ;;  %v4995_v20 = vld [vmem:[%s6891_s4 + $0x50] sm:$0xff]   ;;  %s4977_s12 = smul.u32 72, %s7009_s25 }
  0x13   : > { %512 = vperm.xlu0 %4989, %v3663_v3   ;;  %372 = vperm.xlu1 %4990, %v354_v4   ;;  %v4994_v17 = vld [vmem:[%s6891_s4 + $0x8] sm:$0xff]   ;;  %v4996_v21 = vld [vmem:[%s6891_s4 + $0x10] sm:$0xff]   ;;  %v360_v23 = vld [vmem:[%s6893_s6 + $0x38] sm:$0xff]  ;;  %s5357_s16 = scalar_lea.vmem %s6887_s0, %s4976_s9 }
  0x14   : > { %4437 = vmatpush3.bf16.msra.mxu1 %v4992_v15  ;;  %4402 = vmatprep.subr.bf16.mxu0 %v6903_v5  ;;  %v359_v22 = vld [vmem:[%s6893_s6 + $0x30] sm:$0xff]  ;;  %v4997_v24 = vld [vmem:[%s6891_s4 + $0x58] sm:$0xff]   ;;  %v280_v26 = vld [vmem:[%s6888_s1] sm:$0x1]  ;;  %s6859_s17 = scalar_lea.vmem %s6894_s7, %s4977_s12 }
  0x15   : > { %4438 = vmatprep.subr.bf16.mxu1 %v6903_v5  ;;  %v4998_v25 = vld [vmem:[%s6891_s4 + $0x18] sm:$0xff]   ;;  %v282_v27 = vld [vmem:[%s6888_s1 + $0x1] sm:$0x1]  ;;  %v3671_v29 = vld [vmem:[%s6893_s6 + $0xa8] sm:$0xff]  ;;  %v5276_v30 = vmul.f32 0.001953125, %v280_v26 }
  0x16   : > { %4403 = vmatpush3.bf16.msra.mxu0 %v4993_v16  ;;  %v3670_v28 = vld [vmem:[%s6893_s6 + $0xa0] sm:$0xff]  ;;  %v283_v31 = vmul.f32 0.001953125, %v282_v27  ;;  %v362_v37 = vld [vmem:[%s6893_s6 + $0x48] sm:$0xff]  ;;  %v5003_v43 = vld [vmem:[%s6891_s4 + $0x70] sm:$0xff]  }
  0x17   : > { %517 = vperm.xlu0 %4989, %v3664_v6   ;;  %522 = vperm.xlu1 %4990, %v3665_v7   ;;  %v4999_v32 = vld [vmem:[%s6891_s4 + $0x60] sm:$0xff]   ;;  %v284_v34 = vmul.f32 %v5276_v30, %v5276_v30  ;;  %v5001_v38 = vld [vmem:[%s6891_s4 + $0x68] sm:$0xff]   ;;  %v5004_v44 = vld [vmem:[%s6891_s4 + $0x30] sm:$0xff]  }
  0x18   : > { %4439 = vmatpush3.bf16.msra.mxu1 %v4994_v17  ;;  %4404 = vmatprep.subr.bf16.mxu0 %v6903_v5  ;;  %v5000_v33 = vld [vmem:[%s6891_s4 + $0x20] sm:$0xff]   ;;  %v5002_v39 = vld [vmem:[%s6891_s4 + $0x28] sm:$0xff]   ;;  %v5005_v47 = vld [vmem:[%s6891_s4 + $0x78] sm:$0xff]  }
  0x19   : > { %4440 = vmatprep.subr.bf16.mxu1 %v6903_v5  ;;  %v361_v35 = vld [vmem:[%s6893_s6 + $0x40] sm:$0xff]  ;;  %v285_v36 = vsub.f32 %v283_v31, %v284_v34  ;;  %v3687_v42 = vld [vmem:[%s6893_s6 + $0xc8] sm:$0xff]  ;;  %v5006_v48 = vld [vmem:[%s6891_s4 + $0x38] sm:$0xff]  }
  0x1a   : > { %4405 = vmatpush3.bf16.msra.mxu0 %v4995_v20  ;;  %v3686_v41 = vld [vmem:[%s6893_s6 + $0xc0] sm:$0xff]  ;;  %v3711_v46 = vld [vmem:[%s6893_s6 + $0x128] sm:$0xff]  ;;  %v3688_v51 = vld [vmem:[%s6893_s6 + $0xd0] sm:$0xff] }
  0x1b   : > { %377 = vperm.xlu0 %4989, %v355_v8   ;;  %382 = vperm.xlu1 %4990, %v356_v9   ;;  %v287_v40 = vadd.f32 1e-05, %v285_v36  ;;  %v3710_v45 = vld [vmem:[%s6893_s6 + $0x120] sm:$0xff]  ;;  %v3689_v52 = vld [vmem:[%s6893_s6 + $0xd8] sm:$0xff]  ;;  %v3712_v55 = vld [vmem:[%s6893_s6 + $0x130] sm:$0xff] }
  0x1c   : > { %4441 = vmatpush3.bf16.msra.mxu1 %v4996_v21  ;;  %4406 = vmatprep.subr.bf16.mxu0 %v6903_v5  ;;  %v286_v49 = vld [vmem:[%s6889_s2] sm:$0x1]  ;;  %v3713_v56 = vld [vmem:[%s6893_s6 + $0x138] sm:$0xff]  ;;  %v3691_v62 = vld [vmem:[%s6893_s6 + $0xe8] sm:$0xff] }
  0x1d   : > { %4442 = vmatprep.subr.bf16.mxu1 %v6903_v5  ;;  %5119 = vrsqrt.f32 %v287_v40  ;;  %v290_v58 = vld [vmem:[%s6890_s3] sm:$0x1]  ;;  %v4187_v0 = vld [vmem:[%s5357_s16 + $0x90] sm:$0xff]   ;;  %v3715_v4 = vld [vmem:[%s6893_s6 + $0x148] sm:$0xff] }
  0x1e   : > { %4407 = vmatpush3.bf16.msra.mxu0 %v4997_v24  ;;  %v4182_v60 = vld [vmem:[%s5357_s16 + $0x60] sm:$0xff]   ;;  %v4183_v6 = vld [vmem:[%s5357_s16 + $0x68] sm:$0xff]   ;;  %v4155_v9 = vunpack.c.l.bf16 %v4187_v0  ;;  %v4184_v12 = vld [vmem:[%s5357_s16 + $0x70] sm:$0xff]  }
  0x1f   : > { %527 = vperm.xlu0 %4989, %v3666_v10   ;;  %532 = vperm.xlu1 %4990, %v3667_v11   ;;  %v3690_v61 = vld [vmem:[%s6893_s6 + $0xe0] sm:$0xff]  ;;  %v4135_v3 = vunpack.c.l.bf16 %v4182_v60  ;;  %v4136_v8 = vunpack.c.h.bf16 %v4182_v60  ;;  %v4156_v10 = vunpack.c.h.bf16 %v4187_v0  ;;  %v4188_v11 = vld [vmem:[%s5357_s16 + $0x98] sm:$0xff]   ;;  %v4139_v17 = vunpack.c.l.bf16 %v4183_v6  ;;  %v3716_v26 = vld [vmem:[%s6893_s6 + $0x150] sm:$0xff] }
  0x20   : > { %4443 = vmatpush3.bf16.msra.mxu1 %v4998_v25  ;;  %4408 = vmatprep.subr.bf16.mxu0 %v6903_v5  ;;  %v3714_v1 = vld [vmem:[%s6893_s6 + $0x140] sm:$0xff]  ;;  %v4185_v25 = vld [vmem:[%s5357_s16 + $0x78] sm:$0xff]   ;;  %v4143_v31 = vunpack.c.l.bf16 %v4184_v12  ;;  %v4191_v0 = vld [vmem:[%s5357_s16 + $0xb0] sm:$0xff]  }
  0x21   : > { %4444 = vmatprep.subr.bf16.mxu1 %v6903_v5  ;;  %v4189_v24 = vld [vmem:[%s5357_s16 + $0xa0] sm:$0xff]   ;;  %v3717_v27 = vld [vmem:[%s6893_s6 + $0x158] sm:$0xff] }
  0x22   : > { %4409 = vmatpush3.bf16.msra.mxu0 %v4999_v32 }
  0x23   : > { %387 = vperm.xlu0 %4989, %v357_v13   ;;  %392 = vperm.xlu1 %4990, %v358_v14   ;;  %v3692_v13 = vld [vmem:[%s6893_s6 + $0xf0] sm:$0xff]  ;;  %v3693_v14 = vld [vmem:[%s6893_s6 + $0xf8] sm:$0xff] }
  0x24   : > { %4445 = vmatpush3.bf16.msra.mxu1 %v5000_v33  ;;  %4410 = vmatprep.subr.bf16.mxu0 %v6903_v5 }
  0x25   : > { %4446 = vmatprep.subr.bf16.mxu1 %v6903_v5 }
  0x26   : > { %4411 = vmatpush3.bf16.msra.mxu0 %v5001_v38 }
  0x27   : > { %537 = vperm.xlu0 %4989, %v3668_v18   ;;  %542 = vperm.xlu1 %4990, %v3669_v19   ;;  %v5120_v50 = vpop.eup %5119 }
  0x28   : > { %4447 = vmatpush3.bf16.msra.mxu1 %v5002_v39  ;;  %4412 = vmatprep.subr.bf16.mxu0 %v6903_v5  ;;  %v289_v54 = vmul.f32 %v5120_v50, %v286_v49 }
  0x29   : > { %4448 = vmatprep.subr.bf16.mxu1 %v6903_v5 }
  0x2a   : > { %4413 = vmatpush3.bf16.msra.mxu0 %v5003_v43  ;;  %v291_v59 = vmul.f32 %v289_v54, %v5276_v30  ;;  %v5378_v7 = vrot.slane %v289_v54, %v320_v63  ;;  %v4160_v30 = vunpack.c.h.bf16 %v4188_v11  ;;  %v4147_v43 = vunpack.c.l.bf16 %v4185_v25 }
  0x2b   : > { %397 = vperm.xlu0 %4989, %v359_v22   ;;  %402 = vperm.xlu1 %4990, %v360_v23   ;;  %v4140_v23 = vunpack.c.h.bf16 %v4183_v6 }
  0x2c   : > { %4449 = vmatpush3.bf16.msra.mxu1 %v5004_v44  ;;  %4414 = vmatprep.subr.bf16.mxu0 %v6903_v5  ;;  %v292_v2 = vsub.f32 %v290_v58, %v291_v59  ;;  %v608_v16 = vmul.f32 %v4135_v3, %v5378_v7  ;;  %v609_v19 = vmul.f32 %v4136_v8, %v5378_v7  ;;  %v4190_v44 = vld [vmem:[%s5357_s16 + $0xa8] sm:$0xff]  }
  0x2d   : > { %4450 = vmatprep.subr.bf16.mxu1 %v6903_v5  ;;  %v748_v20 = vmul.f32 %v4155_v9, %v5378_v7  ;;  %v749_v21 = vmul.f32 %v4156_v10, %v5378_v7  ;;  %v610_v22 = vmul.f32 %v4139_v17, %v5378_v7  ;;  %v611_v36 = vmul.f32 %v4140_v23, %v5378_v7  ;;  %v363_v23 = vld [vmem:[%s6893_s6 + $0x50] sm:$0xff] }
  0x2e   : > { %4415 = vmatpush3.bf16.msra.mxu0 %v5005_v47  ;;  %v5388_v15 = vrot.slane %v292_v2, %v320_v63  ;;  %v751_v38 = vmul.f32 %v4160_v30, %v5378_v7  ;;  %v612_v39 = vmul.f32 %v4143_v31, %v5378_v7  ;;  %v3695_v47 = vld [vmem:[%s6893_s6 + $0x108] sm:$0xff]  ;;  %v4167_v57 = vunpack.c.l.bf16 %v4190_v44 }
  0x2f   : > { %547 = vperm.xlu0 %4989, %v3670_v28   ;;  %552 = vperm.xlu1 %4990, %v3671_v29   ;;  %v4159_v29 = vunpack.c.l.bf16 %v4188_v11  ;;  %v4168_v58 = vunpack.c.h.bf16 %v4190_v44  ;;  %v3719_v2 = vld [vmem:[%s6893_s6 + $0x168] sm:$0xff]  ;;  %v4171_v11 = vunpack.c.l.bf16 %v4191_v0 }
  0x30   : > { %4451 = vmatpush3.bf16.msra.mxu1 %v5006_v48  ;;  %4472 = vmatprep.subr.bf16.mxu0 %v6903_v5  ;;  %v5392_v18 = vadd.f32 %v608_v16, %v5388_v15  ;;  %v5407_v28 = vadd.f32 %v609_v19, %v5388_v15  ;;  %v5410_v32 = vadd.f32 %v748_v20, %v5388_v15  ;;  %v3684_v44 = vld [vmem:[%s5357_s16 + $0x88] ss:$48 sps:$4 sm:$0xff]  }
  0x31   : > { %4508 = vmatprep.subr.bf16.mxu1 %v6903_v5  ;;  %v5413_v33 = vadd.f32 %v749_v21, %v5388_v15  ;;  %v5416_v34 = vadd.f32 %v610_v22, %v5388_v15  ;;  %v5432_v48 = vadd.f32 %v611_v36, %v5388_v15  ;;  %v5438_v50 = vadd.f32 %v751_v38, %v5388_v15  ;;  %v303_v21 = vld [vmem:[%s5357_s16 + $0x28] ss:$48 sps:$4 sm:$0xff]   ;;  %v304_v22 = vld [vmem:[%s5357_s16 + $0x2c] sm:$0x1]  ;;  %v3672_v36 = vld [vmem:[%s6893_s6 + $0xb0] sm:$0xff] }
  0x32   : > { %v755_v6 = vmul.f32 %v4168_v58, %v5378_v7  ;;  %v756_v19 = vmul.f32 %v4171_v11, %v5378_v7 }
  0x33   : > { %407 = vperm.xlu0 %4989, %v361_v35   ;;  %412 = vperm.xlu1 %4990, %v362_v37   ;;  %v4144_v35 = vunpack.c.h.bf16 %v4184_v12  ;;  %v750_v37 = vmul.f32 %v4159_v29, %v5378_v7  ;;  %v4172_v12 = vunpack.c.h.bf16 %v4191_v0 }
  0x35   : > { %v613_v40 = vmul.f32 %v4144_v35, %v5378_v7  ;;  %v5435_v49 = vadd.f32 %v750_v37, %v5388_v15  ;;  %v757_v20 = vmul.f32 %v4172_v12, %v5378_v7  ;;  %v3661_v35 = vld [vmem:[%s5357_s16 + $0x5c] sm:$0x1]  ;;  %v4177_v12 = vld [vmem:[%s5357_s16 + $0x30] sm:$0xff]  }
  0x37   : > { %647 = vperm.xlu0 %4989, %v3686_v41   ;;  %652 = vperm.xlu1 %4990, %v3687_v42   ;;  %v4163_v41 = vunpack.c.l.bf16 %v4189_v24  ;;  %v4164_v42 = vunpack.c.h.bf16 %v4189_v24  ;;  %v315_v24 = vunpack.c.l.bf16 %v303_v21  ;;  %v5499_v29 = vadd.f32 %v757_v20, %v5388_v15 }
  0x38   : > { %v4115_v20 = vunpack.c.l.bf16 %v4177_v12 }
  0x39   : > { %v752_v53 = vmul.f32 %v4163_v41, %v5378_v7  ;;  %v753_v54 = vmul.f32 %v4164_v42, %v5378_v7  ;;  %v333_v30 = vmul.f32 %v5378_v7, %v315_v24  ;;  %v3673_v41 = vld [vmem:[%s6893_s6 + $0xb8] sm:$0x3] }
  0x3a   : > { %v4178_v24 = vld [vmem:[%s5357_s16 + $0x38] sm:$0xff]  }
  0x3b   : > { %787 = vperm.xlu0 %4989, %v3710_v45   ;;  %792 = vperm.xlu1 %4990, %v3711_v46   ;;  %v4186_v45 = vld [vmem:[%s5357_s16 + $0x80] sm:$0xff]   ;;  %v5450_v60 = vadd.f32 %v752_v53, %v5388_v15  ;;  %v5508_v37 = vadd.f32 %v5388_v15, %v333_v30  ;;  %v606_v53 = vunpack.c.l.bf16 %v3684_v44 }
  0x3c   : > { %v3694_v46 = vld [vmem:[%s6893_s6 + $0x100] sm:$0xff]  ;;  %v4151_v59 = vunpack.c.l.bf16 %v4186_v45  ;;  %v4152_v63 = vunpack.c.h.bf16 %v4186_v45  ;;  %v3685_v45 = vld [vmem:[%s5357_s16 + $0x8c] sm:$0x1] }
  0x3e   : > { %v616_v8 = vmul.f32 %v4151_v59, %v5378_v7  ;;  %v617_v10 = vmul.f32 %v4152_v63, %v5378_v7  ;;  %v3709_v59 = vld [vmem:[%s5357_s16 + $0xbc] sm:$0x1]  ;;  %v3721_v63 = vld [vmem:[%s6893_s6 + $0x178] sm:$0x3] }
  0x3f   : > { %657 = vperm.xlu0 %4989, %v3688_v51   ;;  %662 = vperm.xlu1 %4990, %v3689_v52   ;;  %v5441_v51 = vadd.f32 %v612_v39, %v5388_v15  ;;  %v5444_v52 = vadd.f32 %v613_v40, %v5388_v15  ;;  %v466_v39 = vunpack.c.h.bf16 %v303_v21  ;;  %v467_v40 = vunpack.c.l.bf16 %v3661_v35 }
  0x40   : > { %v5480_v16 = vadd.f32 %v616_v8, %v5388_v15  ;;  %v5483_v17 = vadd.f32 %v617_v10, %v5388_v15 }
  0x41   : > { %v478_v42 = vmul.f32 %v466_v39, %v5378_v7  ;;  %v4120_v39 = vunpack.c.h.bf16 %v4178_v24 }
  0x43   : > { %797 = vperm.xlu0 %4989, %v3712_v55   ;;  %802 = vperm.xlu1 %4990, %v3713_v56   ;;  %v4148_v55 = vunpack.c.h.bf16 %v4185_v25  ;;  %v614_v56 = vmul.f32 %v4147_v43, %v5378_v7  ;;  %v316_v25 = vunpack.c.l.bf16 %v304_v22  ;;  %v479_v43 = vmul.f32 %v467_v40, %v5378_v7  ;;  %v4179_v40 = vld [vmem:[%s5357_s16 + $0x40] sm:$0xff]  }
  0x44   : > { %v4116_v22 = vunpack.c.h.bf16 %v4177_v12 }
  0x45   : > { %v5464_v3 = vadd.f32 %v614_v56, %v5388_v15  ;;  %v334_v31 = vmul.f32 %v5378_v7, %v316_v25  ;;  %v3697_v56 = vld [vmem:[%s6893_s6 + $0x118] sm:$0x3]  ;;  %v4173_v25 = vld [vmem:[%s5357_s16 + $0x8] sm:$0xff]  }
  0x47   : > { %667 = vperm.xlu0 %4989, %v3690_v61   ;;  %672 = vperm.xlu1 %4990, %v3691_v62   ;;  %v5453_v61 = vadd.f32 %v753_v54, %v5388_v15  ;;  %v615_v62 = vmul.f32 %v4148_v55, %v5378_v7  ;;  %v5511_v38 = vadd.f32 %v5388_v15, %v334_v31  ;;  %v607_v54 = vunpack.c.l.bf16 %v3685_v45  ;;  %v3696_v55 = vld [vmem:[%s6893_s6 + $0x110] sm:$0xff] }
  0x48   : > { %v469_v31 = vmul.f32 %v4116_v22, %v5378_v7  ;;  %v4100_v45 = vunpack.c.h.bf16 %v4173_v25 }
  0x49   : > { %v5470_v9 = vadd.f32 %v615_v62, %v5388_v15  ;;  %v619_v58 = vmul.f32 %v607_v54, %v5378_v7  ;;  %v3720_v62 = vld [vmem:[%s6893_s6 + $0x170] sm:$0xff] }
  0x4b   : > { %807 = vperm.xlu0 %4989, %v3714_v1   ;;  %812 = vperm.xlu1 %4990, %v3715_v4   ;;  %v3718_v1 = vld [vmem:[%s6893_s6 + $0x160] sm:$0xff]  ;;  %v754_v4 = vmul.f32 %v4167_v57, %v5378_v7  ;;  %v618_v57 = vmul.f32 %v606_v53, %v5378_v7 }
  0x4d   : > { %v5542_v0 = vadd.f32 %v618_v57, %v5388_v15  ;;  %v5570_v57 = vld [vmem:[%s5357_s16 + $0x48] sm:$0xff]  }
  0x4f   : > { %677 = vperm.xlu0 %4989, %v3692_v13   ;;  %682 = vperm.xlu1 %4990, %v3693_v14   ;;  %v5474_v13 = vadd.f32 %v754_v4, %v5388_v15  ;;  %v5477_v14 = vadd.f32 %v755_v6, %v5388_v15  ;;  %v747_v4 = vunpack.c.l.bf16 %v3709_v59  ;;  %v471_v59 = vmul.f32 %v4120_v39, %v5378_v7 }
  0x51   : > { %v759_v8 = vmul.f32 %v747_v4, %v5378_v7  ;;  %v5575_v4 = vld [vmem:[%s5357_s16 + $0x18] sm:$0xff]  }
  0x52   : > { %v4107_v39 = vunpack.c.l.bf16 %v5575_v4 }
  0x53   : > { %817 = vperm.xlu0 %4989, %v3716_v26   ;;  %822 = vperm.xlu1 %4990, %v3717_v27   ;;  %v364_v26 = vld [vmem:[%s6893_s6 + $0x58] sm:$0x3]  ;;  %v5496_v27 = vadd.f32 %v756_v19, %v5388_v15  ;;  %v5553_v11 = vadd.f32 %v759_v8, %v5388_v15  ;;  %v4094_v19 = vld [vmem:[%s5357_s16] sm:$0xff]  }
  0x54   : > { %v4095_v21 = vunpack.c.l.bf16 %v4094_v19 }
  0x55   : > { %6931 = vst [vmem:[#allocation4_spill] sm:$0xff] %v5553_v11 }
  0x56   : > { %v323_v30 = vmul.f32 %v4095_v21, %v5378_v7  ;;  %v4127_v21 = vunpack.c.l.bf16 %v5570_v57 }
  0x57   : > { %687 = vperm.xlu0 %4989, %v3694_v46   ;;  %692 = vperm.xlu1 %4990, %v3695_v47   ;;  %v5521_v46 = vadd.f32 %v478_v42, %v5388_v15  ;;  %v5524_v47 = vadd.f32 %v479_v43, %v5388_v15 }
  0x58   : > { %v341_v54 = vadd.f32 %v5388_v15, %v323_v30  ;;  %v483_v30 = vadd.f32 %v471_v59, %v5388_v15 }
  0x5b   : > { %827 = vperm.xlu0 %4989, %v3718_v1   ;;  %832 = vperm.xlu1 %4990, %v3719_v2   ;;  %v5545_v1 = vadd.f32 %v619_v58, %v5388_v15  ;;  %v746_v2 = vunpack.c.h.bf16 %v3684_v44  ;;  %v4099_v44 = vunpack.c.l.bf16 %v4173_v25 }
  0x5d   : > { %6929 = vst [vmem:[#allocation2_spill] sm:$0xff] %v5545_v1  ;;  %v758_v6 = vmul.f32 %v746_v2, %v5378_v7  ;;  %v325_v12 = vmul.f32 %v4099_v44, %v5378_v7  ;;  %v5597_v44 = vld [vmem:[%s5357_s16 + $0x50] sm:$0xff]  }
  0x5f   : > { %417 = vperm.xlu0 %4989, %v363_v23   ;;  %422 = vperm.xlu1 %4990, %v364_v26   ;;  %v5550_v10 = vadd.f32 %v758_v6, %v5388_v15  ;;  %v4096_v23 = vunpack.c.h.bf16 %v4094_v19  ;;  %v468_v26 = vmul.f32 %v4115_v20, %v5378_v7  ;;  %v326_v19 = vmul.f32 %v4100_v45, %v5378_v7 }
  0x61   : > { %6930 = vst [vmem:[#allocation3_spill] sm:$0xff] %v5550_v10  ;;  %v324_v35 = vmul.f32 %v4096_v23, %v5378_v7  ;;  %v480_v53 = vadd.f32 %v468_v26, %v5388_v15  ;;  %v6934_v10 = vunpack.c.l.bf16 %v5597_v44 }
  0x63   : > { %557 = vperm.xlu0 %4989, %v3672_v36   ;;  %562 = vperm.xlu1 %4990, %v3673_v41   ;;  %v4119_v36 = vunpack.c.l.bf16 %v4178_v24  ;;  %v4174_v41 = vld [vmem:[%s5357_s16 + $0x10] sm:$0xff]   ;;  %v476_v1 = vmul.f32 %v6934_v10, %v5378_v7 }
  0x64   : > { %v4103_v2 = vunpack.c.l.bf16 %v4174_v41  ;;  %v4104_v20 = vunpack.c.h.bf16 %v4174_v41 }
  0x65   : > { %v470_v58 = vmul.f32 %v4119_v36, %v5378_v7  ;;  %v4128_v36 = vunpack.c.h.bf16 %v5570_v57 }
  0x66   : > { %v328_v57 = vmul.f32 %v4104_v20, %v5378_v7 }
  0x67   : > { %697 = vperm.xlu0 %4989, %v3696_v55   ;;  %702 = vperm.xlu1 %4990, %v3697_v56   ;;  %v481_v55 = vadd.f32 %v469_v31, %v5388_v15  ;;  %v342_v56 = vadd.f32 %v5388_v15, %v324_v35  ;;  %v482_v26 = vadd.f32 %v470_v58, %v5388_v15  ;;  %v5007_v31 = vld [vmem:[%s6891_s4 + $0x80] sm:$0xff]  }
  0x68   : > { %v5008_v35 = vld [vmem:[%s6891_s4 + $0xc0] sm:$0xff]  }
  0x6b   : > { %837 = vperm.xlu0 %4989, %v3720_v62   ;;  %842 = vperm.xlu1 %4990, %v3721_v63   ;;  %v4123_v62 = vunpack.c.l.bf16 %v4179_v40  ;;  %v4124_v63 = vunpack.c.h.bf16 %v4179_v40 }
  0x8e   : > { %v508_v42 = vpop.permute.xlu0 %507  ;;  %v368_v43 = vpop.permute.xlu1 %367 }
  0x8f   : > { %v565_v22 = vmul.f32 %v508_v42, %v480_v53  ;;  %v425_v23 = vmul.f32 %v368_v43, %v341_v54  ;;  %v472_v42 = vmul.f32 %v4123_v62, %v5378_v7  ;;  %v473_v43 = vmul.f32 %v4124_v63, %v5378_v7 }
  0x90   : > { %v343_v54 = vadd.f32 %v5388_v15, %v325_v12  ;;  %v5010_v12 = vld [vmem:[%s6891_s4 + $0xc8] sm:$0xff]  }
  0x92   : > { %v513_v6 = vpop.permute.xlu0 %512  ;;  %v373_v8 = vpop.permute.xlu1 %372 }
  0x93   : > { %v566_v24 = vmul.f32 %v513_v6, %v481_v55  ;;  %v426_v25 = vmul.f32 %v373_v8, %v342_v56  ;;  %v344_v55 = vadd.f32 %v5388_v15, %v326_v19  ;;  %v327_v56 = vmul.f32 %v4103_v2, %v5378_v7  ;;  %v5009_v2 = vld [vmem:[%s6891_s4 + $0x88] sm:$0xff]  }
  0x94   : > { %v4108_v19 = vunpack.c.h.bf16 %v5575_v4 }
  0x95   : > { %v5590_v40 = vpack.c.bf16 %v566_v24, %v565_v22  ;;  %v5592_v41 = vpack.c.bf16 %v426_v25, %v425_v23  ;;  %v484_v22 = vadd.f32 %v472_v42, %v5388_v15  ;;  %v474_v23 = vmul.f32 %v4127_v21, %v5378_v7 }
  0x96   : > { %v518_v45 = vpop.permute.xlu0 %517  ;;  %v523_v53 = vpop.permute.xlu1 %522 }
  0x97   : > { %v6896_v58 = vshrl.u32 %v5590_v40, 16  ;;  %v6898_v59 = vshll.u32 %v5590_v40, 16  ;;  %v6895_v62 = vshrl.u32 %v5592_v41, 16  ;;  %v6897_v63 = vshll.u32 %v5592_v41, 16  ;;  %4417 = vmatmul.mubr.bf16.vlgmr.msra.gmra.mrb[0].mxu0 %v5590_v40  ;;  %4453 = vmatmul.mubr.bf16.vlgmr.msra.gmra.mrb[0].mxu1 %v5592_v41 }
  0x98   : > { %v567_v6 = vmul.f32 %v518_v45, %v482_v26  ;;  %v568_v8 = vmul.f32 %v523_v53, %v483_v30  ;;  %4473 = vmatpush3.bf16.msra.mxu0 %v5007_v31  ;;  %4509 = vmatpush3.bf16.msra.mxu1 %v5008_v35  ;;  %v485_v31 = vadd.f32 %v473_v43, %v5388_v15 }
  0x99   : > { %4474 = vmatprep.subr.bf16.mxu0 %v6903_v5  ;;  %4510 = vmatprep.subr.bf16.mxu1 %v6903_v5  ;;  %v5623_v24 = vrot.slane %v6895_v62, 4  ;;  %v5627_v25 = vrot.slane %v6897_v63, 5  ;;  %v2382_v21 = vrot.slane %v6896_v58, 4  ;;  %v2383_v35 = vrot.slane %v6898_v59, 5  ;;  %v5012_v62 = vld [vmem:[%s6891_s4 + $0xd0] sm:$0xff]  }
  0x9a   : > { %v5629_v26 = vpack.c.bf16 %v568_v8, %v567_v6  ;;  %v378_v4 = vpop.permute.xlu0 %377  ;;  %v383_v30 = vpop.permute.xlu1 %382  ;;  %4420 = vmatprep.mubr.msk.bf16.mxu0 %vm5131_vm0, %v6903_v5  ;;  %4456 = vmatprep.mubr.msk.bf16.mxu1 %vm5131_vm0, %v6903_v5  ;;  %v345_v53 = vadd.f32 %v5388_v15, %v327_v56  ;;  %v346_v6 = vadd.f32 %v5388_v15, %v328_v57  ;;  %v5011_v8 = vld [vmem:[%s6891_s4 + $0x90] sm:$0xff]  }
  0x9b   : > { %v427_v42 = vmul.f32 %v378_v4, %v343_v54  ;;  %v428_v45 = vmul.f32 %v383_v30, %v344_v55  ;;  %v2384_v55 = vor.u32 %v2383_v35, %v2382_v21  ;;  %v486_v57 = vadd.f32 %v474_v23, %v5388_v15 }
  0x9c   : > { %v6900_v43 = vshll.u32 %v5629_v26, 16  ;;  %4475 = vmatpush3.bf16.msra.mxu0 %v5009_v2  ;;  %4511 = vmatpush3.bf16.msra.mxu1 %v5010_v12  ;;  %v6899_v58 = vshrl.u32 %v5629_v26, 16  ;;  %v475_v2 = vmul.f32 %v4128_v36, %v5378_v7  ;;  %v4132_v12 = vunpack.c.h.bf16 %v5597_v44  ;;  %v5669_v36 = vld [vmem:[%s5357_s16 + $0x20] sm:$0xff]  }
  0x9d   : > { %v5652_v56 = vpack.c.bf16 %v428_v45, %v427_v42  ;;  %4476 = vmatprep.subr.bf16.mxu0 %v6903_v5  ;;  %4512 = vmatprep.subr.bf16.mxu1 %v6903_v5  ;;  %v329_v63 = vmul.f32 %v4107_v39, %v5378_v7  ;;  %v6905_v42 = vrot.slane %v5629_v26, 5 }
  0x9e   : > { %v528_v4 = vpop.permute.xlu0 %527  ;;  %v533_v30 = vpop.permute.xlu1 %532  ;;  %v2385_v21 = vrot.slane %v6899_v58, 4  ;;  %v2386_v35 = vrot.slane %v6900_v43, 5  ;;  %v5013_v58 = vld [vmem:[%s6891_s4 + $0x98] sm:$0xff]  }
  0x9f   : > { %v6902_v45 = vshll.u32 %v5652_v56, 16  ;;  %v569_v59 = vmul.f32 %v528_v4, %v484_v22  ;;  %v570_v23 = vmul.f32 %v533_v30, %v485_v31  ;;  %4421 = vmatmul.mubr.bf16.gmra.mrb[4].mxu0 %v5629_v26  ;;  %4457 = vmatmul.mubr.bf16.gmra.mrb[4].mxu1 %v5652_v56  ;;  %v6901_v39 = vshrl.u32 %v5652_v56, 16  ;;  %v5014_v43 = vld [vmem:[%s6891_s4 + $0xd8] sm:$0xff]  }
  0xa0   : > { %4477 = vmatpush3.bf16.msra.mxu0 %v5011_v8  ;;  %4513 = vmatpush3.bf16.msra.mxu1 %v5012_v62  ;;  %v5678_v22 = vor.u32 %v2386_v35, %v2385_v21  ;;  %v2564_v31 = vrot.slane %v5592_v41, 5  ;;  %v6906_v4 = vrot.slane %v5652_v56, 5  ;;  %v2732_v30 = vrot.slane %v5590_v40, 5 }
  0xa1   : > { %v5683_v54 = vpack.c.bf16 %v570_v23, %v569_v59  ;;  %4478 = vmatprep.subr.bf16.mxu0 %v6903_v5  ;;  %4424 = vmatprep.mubr.msk.bf16.mxu0 %vm5131_vm0, %v6903_v5  ;;  %v330_v62 = vmul.f32 %v4108_v19, %v5378_v7  ;;  %v2210_v8 = vrot.slane %v6901_v39, 4  ;;  %v2211_v21 = vrot.slane %v6902_v45, 5 }
  0xa2   : > { %v388_v35 = vpop.permute.xlu0 %387  ;;  %v393_v20 = vpop.permute.xlu1 %392  ;;  %4460 = vmatprep.mubr.msk.bf16.mxu1 %vm5131_vm0, %v6903_v5  ;;  %4514 = vmatprep.subr.bf16.mxu1 %v6903_v5  ;;  %v4111_v59 = vunpack.c.l.bf16 %v5669_v36  ;;  %v5699_v23 = vsel %vm2206_vm1, %v2384_v55, %v5678_v22  ;;  %v5704_v19 = vsel %vm2563_vm2, %v2564_v31, %v6906_v4  ;;  %v5709_v39 = vsel %vm2563_vm2, %v2732_v30, %v6905_v42  ;;  %v5015_v55 = vld [vmem:[%s6891_s4 + $0xa0] sm:$0xff]  }
  0xa3   : > { %6932 = vst [vmem:[#allocation5_spill] sm:$0xff] %v5704_v19  ;;  %6933 = vst [vmem:[#allocation6_spill] sm:$0xff] %v5709_v39  ;;  %v429_v45 = vmul.f32 %v388_v35, %v345_v53  ;;  %v430_v11 = vmul.f32 %v393_v20, %v346_v6  ;;  %v487_v5 = vadd.f32 %v475_v2, %v5388_v15  ;;  %v5016_v31 = vld [vmem:[%s6891_s4 + $0xe0] sm:$0xff]   ;;  %v6910_v20 = vshll.u32 %v5683_v54, 16 }
  0xa4   : > { %4479 = vmatpush3.bf16.msra.mxu0 %v5013_v58  ;;  %4515 = vmatpush3.bf16.msra.mxu1 %v5014_v43  ;;  %v477_v30 = vmul.f32 %v4132_v12, %v5378_v7  ;;  %v6907_v53 = vshrl.u32 %v5683_v54, 16  ;;  %v2212_v6 = vor.u32 %v2211_v21, %v2210_v8  ;;  %v347_v10 = vadd.f32 %v5388_v15, %v329_v63 }
  0xa5   : > { %v5724_v2 = vpack.c.bf16 %v430_v11, %v429_v45  ;;  %v348_v44 = vadd.f32 %v5388_v15, %v330_v62  ;;  %v6935_v58 = vmov 0.0   ;;  %v4112_v43 = vunpack.c.h.bf16 %v5669_v36 }
  0xa6   : > { %4480 = vmatprep.subr.bf16.mxu0 %v6935_v58  ;;  %4516 = vmatprep.subr.bf16.mxu1 %v6935_v58  ;;  %v538_v35 = vpop.permute.xlu0 %537  ;;  %v543_v42 = vpop.permute.xlu1 %542  ;;  %v6936_v12 = vor.u32 %v5627_v25, %v5623_v24  ;;  %v2389_v11 = vrot.slane %v6907_v53, 4  ;;  %v2390_v63 = vrot.slane %v6910_v20, 5  ;;  %v2735_v45 = vrot.slane %v5683_v54, 5  ;;  %v5017_v25 = vld [vmem:[%s6891_s4 + $0xa8] sm:$0xff]  }
  0xa7   : > { %v571_v62 = vmul.f32 %v538_v35, %v486_v57  ;;  %v572_v8 = vmul.f32 %v543_v42, %v487_v5  ;;  %4425 = vmatmul.mubr.bf16.gmra.mrb[8].mxu0 %v5683_v54  ;;  %4461 = vmatmul.mubr.bf16.gmra.mrb[8].mxu1 %v5724_v2  ;;  %v6909_v36 = vshll.u32 %v5724_v2, 16  ;;  %v6908_v24 = vshrl.u32 %v5724_v2, 16  ;;  %v5018_v5 = vld [vmem:[%s6891_s4 + $0xe8] sm:$0xff]  }
  0xa8   : > { %v5735_v4 = vsel %vm2206_vm1, %v6936_v12, %v2212_v6  ;;  %4481 = vmatpush3.bf16.msra.mxu0 %v5015_v55  ;;  %4517 = vmatpush3.bf16.msra.mxu1 %v5016_v31  ;;  %v331_v21 = vmul.f32 %v4111_v59, %v5378_v7  ;;  %v2391_v57 = vor.u32 %v2390_v63, %v2389_v11  ;;  %v2567_v42 = vrot.slane %v5724_v2, 5 }
  0xa9   : > { %v5754_v35 = vpack.c.bf16 %v572_v8, %v571_v62  ;;  %4428 = vmatprep.mubr.msk.bf16.mxu0 %vm5131_vm0, %v6935_v58  ;;  %4464 = vmatprep.mubr.msk.bf16.mxu1 %vm5131_vm0, %v6935_v58  ;;  %v332_v55 = vmul.f32 %v4112_v43, %v5378_v7  ;;  %v2214_v59 = vrot.slane %v6908_v24, 4  ;;  %v2215_v31 = vrot.slane %v6909_v36, 5 }
  0xaa   : > { %v398_v12 = vpop.permute.xlu0 %397  ;;  %v403_v11 = vpop.permute.xlu1 %402  ;;  %4482 = vmatprep.subr.bf16.mxu0 %v6935_v58  ;;  %4518 = vmatprep.subr.bf16.mxu1 %v6935_v58  ;;  %v5769_v63 = vsel %vm2206_vm1, %v5678_v22, %v2391_v57  ;;  %v6937_v62 = vrot.slane %v5652_v56, 5  ;;  %v6939_v43 = vrot.slane %v5629_v26, 5  ;;  %v488_v36 = vadd.f32 %v476_v1, %v5388_v15  ;;  %v5019_v22 = vld [vmem:[%s6891_s4 + $0xb0] sm:$0xff]  }
  0xab   : > { %v431_v53 = vmul.f32 %v398_v12, %v347_v10  ;;  %v432_v24 = vmul.f32 %v403_v11, %v348_v44  ;;  %v489_v20 = vadd.f32 %v477_v30, %v5388_v15  ;;  %v2216_v39 = vor.u32 %v2215_v31, %v2214_v59  ;;  %v5020_v1 = vld [vmem:[%s6891_s4 + $0xf0] sm:$0xff]   ;;  %v5022_v11 = vld [vmem:[%s6891_s4 + $0xf8] sm:$0xff]  }
  0xac   : > { %v5774_v7 = vsel %vm2563_vm2, %v6937_v62, %v2567_v42  ;;  %v5781_v8 = vsel %vm2563_vm2, %v6939_v43, %v2735_v45  ;;  %4483 = vmatpush3.bf16.msra.mxu0 %v5017_v25  ;;  %4519 = vmatpush3.bf16.msra.mxu1 %v5018_v5  ;;  %v6914_v62 = vshll.u32 %v5754_v35, 16  ;;  %v349_v10 = vadd.f32 %v5388_v15, %v331_v21 }
  0xad   : > { %6938 = vst [vmem:[#allocation7_spill] sm:$0xff] %v5774_v7  ;;  %6940 = vst [vmem:[#allocation8_spill] sm:$0xff] %v5781_v8  ;;  %v6912_v7 = vshrl.u32 %v5754_v35, 16  ;;  %v5790_v19 = vpack.c.bf16 %v432_v24, %v431_v53  ;;  %v350_v44 = vadd.f32 %v5388_v15, %v332_v55  ;;  %4484 = vmatprep.subr.bf16.mxu0 %v6935_v58  ;;  %4520 = vmatprep.subr.bf16.mxu1 %v6935_v58 }
  0xae   : > { %v548_v30 = vpop.permute.xlu0 %547  ;;  %v553_v25 = vpop.permute.xlu1 %552  ;;  %v5800_v5 = vsel %vm2206_vm1, %v2212_v6, %v2216_v39  ;;  %v2394_v24 = vrot.slane %v6914_v62, 5  ;;  %v6917_v15 = vrot.slane %v5754_v35, 5  ;;  %v5021_v6 = vld [vmem:[%s6891_s4 + $0xb8] sm:$0xff]   ;;  %v6956_v8 = vshrl.u32 %v5629_v26, 16 }
  0xaf   : > { %v2393_v53 = vrot.slane %v6912_v7, 4  ;;  %v573_v21 = vmul.f32 %v548_v30, %v488_v36  ;;  %v574_v55 = vmul.f32 %v553_v25, %v489_v20  ;;  %4429 = vmatmul.mubr.bf16.gmra.mrb[12].mxu0 %v5754_v35  ;;  %4465 = vmatmul.mubr.bf16.gmra.mrb[12].mxu1 %v5790_v19  ;;  %v6913_v59 = vshll.u32 %v5790_v19, 16 }
  0xb0   : > { %v6911_v31 = vshrl.u32 %v5790_v19, 16  ;;  %4485 = vmatpush3.bf16.msra.mxu0 %v5019_v22  ;;  %4432 = vmatprep.mubr.msk.bf16.mxu0 %vm5131_vm0, %v6935_v58  ;;  %v2569_v36 = vrot.slane %v5790_v19, 5 }
  0xb1   : > { %v2395_v12 = vor.u32 %v2394_v24, %v2393_v53  ;;  %v5817_v20 = vpack.c.bf16 %v574_v55, %v573_v21  ;;  %4468 = vmatprep.mubr.msk.bf16.mxu1 %vm5131_vm0, %v6935_v58  ;;  %4521 = vmatpush3.bf16.msra.mxu1 %v5020_v1  ;;  %v2219_v22 = vrot.slane %v6913_v59, 5  ;;  %v5841_v24 = vsel %vm2563_vm2, %v2735_v45, %v6917_v15 }
  0xb2   : > { %v2218_v43 = vrot.slane %v6911_v31, 4  ;;  %v408_v30 = vpop.permute.xlu0 %407  ;;  %v413_v25 = vpop.permute.xlu1 %412  ;;  %4486 = vmatprep.subr.bf16.mxu0 %v6935_v58  ;;  %4522 = vmatprep.subr.bf16.mxu1 %v6935_v58  ;;  %v5834_v1 = vsel %vm2563_vm2, %v2567_v42, %v2569_v36  ;;  %6942 = vst [vmem:[#allocation10_spill] sm:$0xff] %v5841_v24  ;;  %v6943_v42 = vshll.u32 %v5590_v40, 16  ;;  %v6947_v24 = vshll.u32 %v5652_v56, 16 }
  0xb3   : > { %v5831_v53 = vsel %vm2206_vm1, %v2391_v57, %v2395_v12  ;;  %6941 = vst [vmem:[#allocation9_spill] sm:$0xff] %v5834_v1  ;;  %v433_v21 = vmul.f32 %v408_v30, %v349_v10  ;;  %v434_v55 = vmul.f32 %v413_v25, %v350_v44  ;;  %v6916_v31 = vshll.u32 %v5817_v20, 16 }
  0xb4   : > { %4487 = vmatpush3.bf16.msra.mxu0 %v5021_v6  ;;  %v6915_v7 = vshrl.u32 %v5817_v20, 16  ;;  %v2220_v59 = vor.u32 %v2219_v22, %v2218_v43  ;;  %v1349_v62 = vrot.slane %v6943_v42, 1 }
  0xb5   : > { %v5845_v57 = vpack.c.bf16 %v434_v55, %v433_v21  ;;  %4523 = vmatpush3.bf16.msra.mxu1 %v5022_v11  ;;  %4544 = vmatprep.subr.bf16.mxu0 %v6935_v58  ;;  %v2398_v6 = vrot.slane %v6916_v31, 5 }
  0xb6   : > { %v648_v1 = vpop.permute.xlu0 %647  ;;  %v653_v45 = vpop.permute.xlu1 %652  ;;  %4580 = vmatprep.subr.bf16.mxu1 %v6935_v58  ;;  %v2397_v10 = vrot.slane %v6915_v7, 4  ;;  %v5854_v44 = vsel %vm2206_vm1, %v2216_v39, %v2220_v59  ;;  %v6944_v39 = vshll.u32 %v5592_v41, 16 }
  0xb7   : > { %v705_v43 = vmul.f32 %v648_v1, %v5392_v18  ;;  %v706_v22 = vmul.f32 %v653_v45, %v5407_v28  ;;  %4433 = vmatmul.mubr.bf16.gmra.mrb[16].mxu0 %v5817_v20  ;;  %4469 = vmatmul.mubr.bf16.gmra.mrb[16].mxu1 %v5845_v57  ;;  %v6919_v30 = vshll.u32 %v5845_v57, 16  ;;  %v6918_v25 = vshrl.u32 %v5845_v57, 16 }
  0xb8   : > { %4488 = vmatprep.mubr.msk.bf16.mxu0 %vm5131_vm0, %v6935_v58  ;;  %4524 = vmatprep.mubr.msk.bf16.mxu1 %vm5131_vm0, %v6935_v58  ;;  %v1159_v21 = vrot.slane %v6944_v39, 1  ;;  %v6945_v18 = vshll.u32 %v5629_v26, 16  ;;  %v5873_v1 = vor.u32 %v2398_v6, %v2397_v10  ;;  %v6920_v55 = vrot.slane %v5845_v57, 5  ;;  %v5025_v26 = vld [vmem:[%s6891_s4 + $0x108] sm:$0xff]  }
  0xb9   : > { %v5876_v42 = vpack.c.bf16 %v706_v22, %v705_v43  ;;  %v6946_v45 = vshrl.u32 %v5590_v40, 16  ;;  %v2222_v31 = vrot.slane %v6918_v25, 4  ;;  %v2223_v15 = vrot.slane %v6919_v30, 5 }
  0xba   : > { %v1354_v28 = vrot.slane %v6945_v18, 1  ;;  %v788_v11 = vpop.permute.xlu0 %787  ;;  %v793_v39 = vpop.permute.xlu1 %792  ;;  %v1164_v18 = vrot.slane %v6947_v24, 1  ;;  %v5888_v10 = vsel %vm2206_vm1, %v2395_v12, %v5873_v1  ;;  %v5893_v40 = vsel %vm2563_vm2, %v2569_v36, %v6920_v55  ;;  %v5023_v55 = vld [vmem:[%s6891_s4 + $0x100] sm:$0xff]  }
  0xbb   : > { %v1350_v7 = vor.u32 %v1349_v62, %v6946_v45  ;;  %6948 = vst [vmem:[#allocation11_spill] sm:$0xff] %v5888_v10  ;;  %6949 = vst [vmem:[#allocation12_spill] sm:$0xff] %v5893_v40  ;;  %v6950_v62 = vrot.slane %v5817_v20, 5  ;;  %v6951_v6 = vrot.slane %v5754_v35, 5  ;;  %v1827_v22 = vshrl.u32 %v5876_v42, 16 }
  0xbc   : > { %v1829_v24 = vshll.u32 %v5876_v42, 16  ;;  %v845_v45 = vmul.f32 %v788_v11, %v5410_v32  ;;  %v846_v12 = vmul.f32 %v793_v39, %v5413_v33  ;;  %v6953_v25 = vshrl.u32 %v5592_v41, 16 }
  0xbd   : > { %v5900_v43 = vsel %vm2563_vm2, %v6951_v6, %v6950_v62  ;;  %v1355_v36 = vsel %vm1153_vm3, %v1350_v7, %v1354_v28  ;;  %v5024_v62 = vld [vmem:[%s6891_s4 + $0x140] sm:$0xff]   ;;  %v5915_v6 = vor.u32 %v2223_v15, %v2222_v31  ;;  %v6954_v32 = vshll.u32 %v5683_v54, 16 }
  0xbe   : > { %6952 = vst [vmem:[#allocation13_spill] sm:$0xff] %v5900_v43  ;;  %v1160_v30 = vor.u32 %v1159_v21, %v6953_v25  ;;  %v5917_v43 = vpack.c.bf16 %v846_v12, %v845_v45  ;;  %v5921_v11 = vrot.slane %v1827_v22, 4  ;;  %v5923_v41 = vrot.slane %v1829_v24, 5  ;;  %v658_v7 = vpop.permute.xlu0 %657  ;;  %v663_v25 = vpop.permute.xlu1 %662 }
  0xbf   : > { %v1362_v33 = vrot.slane %v6954_v32, 1  ;;  %v6955_v39 = vshll.u32 %v5724_v2, 16  ;;  %v1358_v15 = vor.u32 %v6956_v8, %v1354_v28  ;;  %v5932_v31 = vsel %vm2206_vm1, %v2220_v59, %v5915_v6  ;;  %4525 = vmatmul.mubr.bf16.vlgmr.msra.gmra.mrb[20].mxu1 %v1355_v36  ;;  %v5026_v8 = vld [vmem:[%s6891_s4 + $0x148] sm:$0xff]  }
  0xc0   : > { %v1165_v21 = vsel %vm1153_vm3, %v1160_v30, %v1164_v18  ;;  %v6921_v45 = vshrl.u32 %v5917_v43, 16  ;;  %v2019_v12 = vshll.u32 %v5917_v43, 16  ;;  %v707_v32 = vmul.f32 %v658_v7, %v5416_v34  ;;  %4581 = vmatpush3.bf16.msra.mxu1 %v5024_v62  ;;  %4528 = vmatprep.mubr.msk.bf16.mxu1 %vm5131_vm0, %v6935_v58 }
  0xc1   : > { %v1172_v40 = vrot.slane %v6955_v39, 1  ;;  %v708_v10 = vmul.f32 %v663_v25, %v5432_v48  ;;  %4489 = vmatmul.mubr.bf16.vlgmr.msra.gmra.mrb[20].mxu0 %v1165_v21  ;;  %v6957_v59 = vshrl.u32 %v5652_v56, 16  ;;  %v1831_v28 = vrot.slane %v1829_v24, 1  ;;  %4582 = vmatprep.subr.bf16.mxu1 %v6935_v58 }
  0xc2   : > { %4545 = vmatpush3.bf16.msra.mxu0 %v5023_v55  ;;  %v1363_v55 = vsel %vm1153_vm3, %v1358_v15, %v1362_v33  ;;  %v5955_v36 = vrot.slane %v6921_v45, 4  ;;  %v5957_v62 = vrot.slane %v2019_v12, 5  ;;  %v798_v56 = vpop.permute.xlu0 %797  ;;  %4492 = vmatprep.mubr.msk.bf16.mxu0 %vm5131_vm0, %v6935_v58  ;;  %v6958_v24 = vshrl.u32 %v5724_v2, 16  ;;  %v5027_v2 = vld [vmem:[%s6891_s4 + $0x110] sm:$0xff]  }
  0xc3   : > { %v1168_v30 = vor.u32 %v6957_v59, %v1164_v18  ;;  %v5948_v48 = vpack.c.bf16 %v708_v10, %v707_v32  ;;  %4546 = vmatprep.subr.bf16.mxu0 %v6935_v58  ;;  %v803_v18 = vpop.permute.xlu1 %802  ;;  %v6959_v25 = vshrl.u32 %v5683_v54, 16  ;;  %v6960_v39 = vshll.u32 %v5754_v35, 16  ;;  %v5028_v54 = vld [vmem:[%s6891_s4 + $0x150] sm:$0xff]  }
  0xc4   : > { %v1176_v7 = vor.u32 %v6958_v24, %v1172_v40  ;;  %v847_v59 = vmul.f32 %v798_v56, %v5435_v49  ;;  %v848_v34 = vmul.f32 %v803_v18, %v5438_v50  ;;  %v3250_v45 = vrot.slane %v5876_v42, 5  ;;  %4583 = vmatpush3.bf16.msra.mxu1 %v5026_v8 }
  0xc5   : > { %v1173_v10 = vsel %vm1153_vm3, %v1168_v30, %v1172_v40  ;;  %v1366_v21 = vor.u32 %v6959_v25, %v1362_v33  ;;  %v1370_v15 = vrot.slane %v6960_v39, 1  ;;  %v1834_v32 = vshll.u32 %v5948_v48, 16  ;;  %4584 = vmatprep.subr.bf16.mxu1 %v6935_v58 }
  0xc6   : > { %4547 = vmatpush3.bf16.msra.mxu0 %v5025_v26  ;;  %v1832_v40 = vor.u32 %v1831_v28, %v1827_v22  ;;  %v1838_v33 = vshrl.u32 %v5948_v48, 16  ;;  %v6922_v50 = vrot.slane %v5948_v48, 5  ;;  %v5984_v30 = vpack.c.bf16 %v848_v34, %v847_v59  ;;  %v668_v18 = vpop.permute.xlu0 %667 }
  0xc7   : > { %4548 = vmatprep.subr.bf16.mxu0 %v6935_v58  ;;  %v1836_v26 = vrot.slane %v1834_v32, 1  ;;  %v2021_v8 = vrot.slane %v2019_v12, 1  ;;  %v2898_v56 = vrot.slane %v1834_v32, 5  ;;  %v673_v24 = vpop.permute.xlu1 %672  ;;  %v6961_v22 = vshll.u32 %v5790_v19, 16  ;;  %4529 = vmatmul.mubr.bf16.gmra.mrb[24].mxu1 %v1363_v55 }
  0xc8   : > { %v1371_v25 = vsel %vm1153_vm3, %v1366_v21, %v1370_v15  ;;  %v2897_v39 = vrot.slane %v1838_v33, 4  ;;  %v5994_v34 = vsel %vm2563_vm2, %v3250_v45, %v6922_v50  ;;  %v2024_v59 = vshll.u32 %v5984_v30, 16  ;;  %4585 = vmatpush3.bf16.msra.mxu1 %v5028_v54  ;;  %v5029_v21 = vld [vmem:[%s6891_s4 + $0x118] sm:$0xff]   ;;  %4532 = vmatprep.mubr.msk.bf16.mxu1 %vm5131_vm0, %v6935_v58 }
  0xc9   : > { %v1180_v28 = vrot.slane %v6961_v22, 1  ;;  %6962 = vst [vmem:[#allocation14_spill] sm:$0xff] %v5994_v34  ;;  %v709_v49 = vmul.f32 %v668_v18, %v5441_v51  ;;  %v710_v12 = vmul.f32 %v673_v24, %v5444_v52  ;;  %4493 = vmatmul.mubr.bf16.gmra.mrb[24].mxu0 %v1173_v10  ;;  %v6000_v32 = vsel %vm1153_vm3, %v1832_v40, %v1836_v26  ;;  %v5030_v45 = vld [vmem:[%s6891_s4 + $0x158] sm:$0xff]  }
  0xca   : > { %4549 = vmatpush3.bf16.msra.mxu0 %v5027_v2  ;;  %v2028_v22 = vshrl.u32 %v5984_v30, 16  ;;  %v6009_v51 = vor.u32 %v2898_v56, %v2897_v39  ;;  %v3418_v52 = vrot.slane %v5917_v43, 5  ;;  %4496 = vmatprep.mubr.msk.bf16.mxu0 %vm5131_vm0, %v6935_v58  ;;  %v6963_v2 = vshrl.u32 %v5917_v43, 16  ;;  %v808_v24 = vpop.permute.xlu0 %807 }
  0xcb   : > { %v6013_v10 = vpack.c.bf16 %v710_v12, %v709_v49  ;;  %4550 = vmatprep.subr.bf16.mxu0 %v6935_v58  ;;  %v2026_v40 = vrot.slane %v2024_v59, 1  ;;  %v3073_v18 = vrot.slane %v2024_v59, 5  ;;  %v813_v50 = vpop.permute.xlu1 %812  ;;  %4586 = vmatprep.subr.bf16.mxu1 %v6935_v58  ;;  %v6964_v49 = vshrl.u32 %v5754_v35, 16 }
  0xcc   : > { %v2022_v54 = vor.u32 %v2021_v8, %v6963_v2  ;;  %v3072_v39 = vrot.slane %v2028_v22, 4  ;;  %v6965_v12 = vor.u32 %v5923_v41, %v5921_v11  ;;  %v6966_v8 = vrot.slane %v5984_v30, 5  ;;  %4587 = vmatpush3.bf16.msra.mxu1 %v5030_v45  ;;  %v5031_v41 = vld [vmem:[%s6891_s4 + $0x120] sm:$0xff]  }
  0xcd   : > { %v1374_v56 = vor.u32 %v6964_v49, %v1370_v15  ;;  %v849_v2 = vmul.f32 %v808_v24, %v5450_v60  ;;  %v850_v34 = vmul.f32 %v813_v50, %v5453_v61  ;;  %v1842_v15 = vshll.u32 %v6013_v10, 16  ;;  %4588 = vmatprep.subr.bf16.mxu1 %v6935_v58 }
  0xce   : > { %v6030_v55 = vsel %vm2206_vm1, %v6965_v12, %v6009_v51  ;;  %v6035_v59 = vsel %vm2563_vm2, %v3418_v52, %v6966_v8  ;;  %v6040_v35 = vsel %vm1153_vm3, %v2022_v54, %v2026_v40  ;;  %4551 = vmatpush3.bf16.msra.mxu0 %v5029_v21  ;;  %v1181_v11 = vsel %vm1153_vm3, %v1176_v7, %v1180_v28  ;;  %v5032_v52 = vld [vmem:[%s6891_s4 + $0x160] sm:$0xff]   ;;  %v678_v24 = vpop.permute.xlu0 %677 }
  0xcf   : > { %6967 = vst [vmem:[#allocation15_spill] sm:$0xff] %v6035_v59  ;;  %v1846_v60 = vshrl.u32 %v6013_v10, 16  ;;  %v6051_v61 = vor.u32 %v3073_v18, %v3072_v39  ;;  %v6923_v50 = vrot.slane %v6013_v10, 5  ;;  %v6054_v54 = vpack.c.bf16 %v850_v34, %v849_v2  ;;  %4552 = vmatprep.subr.bf16.mxu0 %v6935_v58  ;;  %v683_v49 = vpop.permute.xlu1 %682  ;;  %4533 = vmatmul.mubr.bf16.gmra.mrb[28].mxu1 %v1371_v25 }
  0xd0   : > { %v1840_v7 = vor.u32 %v1838_v33, %v1836_v26  ;;  %v1844_v21 = vrot.slane %v1842_v15, 1  ;;  %v2902_v45 = vrot.slane %v1842_v15, 5  ;;  %v6968_v12 = vshrl.u32 %v5790_v19, 16  ;;  %4589 = vmatpush3.bf16.msra.mxu1 %v5032_v52  ;;  %4536 = vmatprep.mubr.msk.bf16.mxu1 %vm5131_vm0, %v6935_v58 }
  0xd1   : > { %v6969_v18 = vor.u32 %v5957_v62, %v5955_v36  ;;  %v2901_v34 = vrot.slane %v1846_v60, 4  ;;  %v6970_v2 = vrot.slane %v5948_v48, 5  ;;  %v711_v26 = vmul.f32 %v678_v24, %v5464_v3  ;;  %4497 = vmatmul.mubr.bf16.gmra.mrb[28].mxu0 %v1181_v11  ;;  %v5034_v3 = vld [vmem:[%s6891_s4 + $0x168] sm:$0xff]   ;;  %4590 = vmatprep.subr.bf16.mxu1 %v6935_v58 }
  0xd2   : > { %v1184_v8 = vor.u32 %v6968_v12, %v1180_v28  ;;  %v712_v19 = vmul.f32 %v683_v49, %v5470_v9  ;;  %v6077_v28 = vsel %vm1153_vm3, %v1840_v7, %v1844_v21  ;;  %v2032_v36 = vshll.u32 %v6054_v54, 16  ;;  %4553 = vmatpush3.bf16.msra.mxu0 %v5031_v41  ;;  %v5033_v12 = vld [vmem:[%s6891_s4 + $0x128] sm:$0xff]   ;;  %4500 = vmatprep.mubr.msk.bf16.mxu0 %vm5131_vm0, %v6935_v58  ;;  %v818_v49 = vpop.permute.xlu0 %817 }
  0xd3   : > { %v6065_v39 = vsel %vm2206_vm1, %v6969_v18, %v6051_v61  ;;  %v6072_v33 = vsel %vm2563_vm2, %v6970_v2, %v6923_v50  ;;  %v6972_v62 = vshll.u32 %v5817_v20, 16  ;;  %v2036_v9 = vshrl.u32 %v6054_v54, 16  ;;  %v823_v18 = vpop.permute.xlu1 %822  ;;  %4554 = vmatprep.subr.bf16.mxu0 %v6935_v58  ;;  %v5035_v50 = vld [vmem:[%s6891_s4 + $0x130] sm:$0xff]  }
  0xd4   : > { %6971 = vst [vmem:[#allocation16_spill] sm:$0xff] %v6072_v33  ;;  %v6091_v25 = vor.u32 %v2902_v45, %v2901_v34  ;;  %v6924_v11 = vrot.slane %v6054_v54, 5  ;;  %v6094_v41 = vpack.c.bf16 %v712_v19, %v711_v26  ;;  %v2030_v52 = vor.u32 %v2028_v22, %v2026_v40  ;;  %4591 = vmatpush3.bf16.msra.mxu1 %v5034_v3 }
  0xd5   : > { %v6082_v15 = vrot.slane %v6972_v62, 1  ;;  %v2034_v7 = vrot.slane %v2032_v36, 1  ;;  %v3077_v24 = vrot.slane %v2032_v36, 5  ;;  %v6973_v2 = vshll.u32 %v5845_v57, 16  ;;  %4592 = vmatprep.subr.bf16.mxu1 %v6935_v58 }
  0xd6   : > { %v6107_v45 = vsel %vm2206_vm1, %v6009_v51, %v6091_v25  ;;  %v3076_v34 = vrot.slane %v2036_v9, 4  ;;  %v6974_v22 = vrot.slane %v5984_v30, 5  ;;  %v851_v26 = vmul.f32 %v818_v49, %v5474_v13  ;;  %4555 = vmatpush3.bf16.msra.mxu0 %v5033_v12  ;;  %v688_v49 = vpop.permute.xlu0 %687 }
  0xd7   : > { %v1188_v62 = vrot.slane %v6973_v2, 1  ;;  %v852_v19 = vmul.f32 %v823_v18, %v5477_v14  ;;  %v6119_v36 = vsel %vm1153_vm3, %v2030_v52, %v2034_v7  ;;  %v1850_v2 = vshll.u32 %v6094_v41, 16  ;;  %4556 = vmatprep.subr.bf16.mxu0 %v6935_v58  ;;  %v693_v18 = vpop.permute.xlu1 %692 }
  0xd8   : > { %v6114_v40 = vsel %vm2563_vm2, %v6974_v22, %v6924_v11  ;;  %v1379_v51 = vsel %vm1153_vm3, %v1374_v56, %v6082_v15  ;;  %v1854_v22 = vshrl.u32 %v6094_v41, 16  ;;  %v3078_v11 = vor.u32 %v3077_v24, %v3076_v34  ;;  %v5036_v56 = vld [vmem:[%s6891_s4 + $0x170] sm:$0xff]  }
  0xd9   : > { %6975 = vst [vmem:[#allocation17_spill] sm:$0xff] %v6114_v40  ;;  %v3255_v13 = vrot.slane %v6094_v41, 5  ;;  %v6129_v14 = vpack.c.bf16 %v852_v19, %v851_v26  ;;  %v1848_v12 = vor.u32 %v1846_v60, %v1844_v21  ;;  %v1852_v3 = vrot.slane %v1850_v2, 1  ;;  %4537 = vmatmul.mubr.bf16.gmra.mrb[32].mxu1 %v1379_v51 }
  0xda   : > { %v2906_v52 = vrot.slane %v1850_v2, 5  ;;  %v1189_v40 = vsel %vm1153_vm3, %v1184_v8, %v1188_v62  ;;  %v6139_v24 = vsel %vm2206_vm1, %v6051_v61, %v3078_v11  ;;  %v2905_v34 = vrot.slane %v1854_v22, 4  ;;  %4557 = vmatpush3.bf16.msra.mxu0 %v5035_v50  ;;  %v5037_v61 = vld [vmem:[%s6891_s4 + $0x138] sm:$0xff]   ;;  %4540 = vmatprep.mubr.msk.bf16.mxu1 %vm5131_vm0, %v6935_v58 }
  0xdb   : > { %6976 = vst [vmem:[#allocation18_spill] sm:$0xff] %v6139_v24  ;;  %v6977_v26 = vrot.slane %v6013_v10, 5  ;;  %v713_v33 = vmul.f32 %v688_v49, %v5480_v16  ;;  %v714_v60 = vmul.f32 %v693_v18, %v5483_v17  ;;  %4501 = vmatmul.mubr.bf16.gmra.mrb[32].mxu0 %v1189_v40  ;;  %v6149_v21 = vsel %vm1153_vm3, %v1848_v12, %v1852_v3  ;;  %v5038_v50 = vld [vmem:[%s6891_s4 + $0x178] sm:$0xff]   ;;  %v828_v18 = vpop.permute.xlu0 %827 }
  0xdc   : > { %v2040_v8 = vshll.u32 %v6129_v14, 16  ;;  %4504 = vmatprep.mubr.msk.bf16.mxu0 %vm5131_vm0, %v6935_v58  ;;  %v2044_v2 = vshrl.u32 %v6129_v14, 16  ;;  %v2907_v16 = vor.u32 %v2906_v52, %v2905_v34  ;;  %v3423_v17 = vrot.slane %v6129_v14, 5  ;;  %4593 = vmatpush3.bf16.msra.mxu1 %v5036_v56 }
  0xdd   : > { %v6144_v19 = vsel %vm2563_vm2, %v6977_v26, %v3255_v13  ;;  %v6159_v40 = vpack.c.bf16 %v714_v60, %v713_v33  ;;  %v2038_v51 = vor.u32 %v2036_v9, %v2034_v7  ;;  %v833_v26 = vpop.permute.xlu1 %832  ;;  %v6979_v52 = vshrl.u32 %v5817_v20, 16  ;;  %4558 = vmatprep.subr.bf16.mxu0 %v6935_v58  ;;  %4594 = vmatprep.subr.bf16.mxu1 %v6935_v58 }
  0xde   : > { %6978 = vst [vmem:[#allocation19_spill] sm:$0xff] %v6144_v19  ;;  %v2042_v12 = vrot.slane %v2040_v8, 1  ;;  %v3081_v49 = vrot.slane %v2040_v8, 5  ;;  %v6173_v33 = vsel %vm2206_vm1, %v6091_v25, %v2907_v16  ;;  %v3080_v56 = vrot.slane %v2044_v2, 4  ;;  %4559 = vmatpush3.bf16.msra.mxu0 %v5037_v61 }
  0xdf   : > { %v1382_v34 = vor.u32 %v6979_v52, %v6082_v15  ;;  %6980 = vst [vmem:[#allocation20_spill] sm:$0xff] %v6173_v33  ;;  %v6981_v60 = vrot.slane %v6054_v54, 5  ;;  %v853_v7 = vmul.f32 %v828_v18, %v5496_v27  ;;  %v854_v8 = vmul.f32 %v833_v26, %v5499_v29  ;;  %4616 = vmatprep.subr.bf16.mxu0 %v6935_v58  ;;  %v418_v18 = vpop.permute.xlu0 %417 }
  0xe0   : > { %v6183_v15 = vsel %vm1153_vm3, %v2038_v51, %v2042_v12  ;;  %v1858_v52 = vshll.u32 %v6159_v40, 16  ;;  %v6982_v19 = vshrl.u32 %v5845_v57, 16  ;;  %v6926_v25 = vshrl.u32 %v6159_v40, 16  ;;  %4595 = vmatpush3.bf16.msra.mxu1 %v5038_v50 }
  0xe1   : > { %v6178_v9 = vsel %vm2563_vm2, %v6981_v60, %v3423_v17  ;;  %v3082_v33 = vor.u32 %v3081_v49, %v3080_v56  ;;  %v6928_v24 = vrot.slane %v6159_v40, 5  ;;  %v6190_v60 = vpack.c.bf16 %v854_v8, %v853_v7  ;;  %v423_v26 = vpop.permute.xlu1 %422  ;;  %4652 = vmatprep.subr.bf16.mxu1 %v6935_v58  ;;  %4541 = vmatmul.mubr.bf16.gmra.mrb[36].mxu1 %v1382_v34 }
  0xe2   : > { %v1192_v59 = vor.u32 %v6982_v19, %v1188_v62  ;;  %v1856_v27 = vor.u32 %v1854_v22, %v1852_v3  ;;  %v6193_v29 = vrot.slane %v1858_v52, 1  ;;  %v2910_v51 = vrot.slane %v1858_v52, 5  ;;  %4596 = vmatprep.mubr.msk.bf16.mxu1 %vm5131_vm0, %v6935_v58 }
  0xe3   : > { %v2909_v62 = vrot.slane %v6926_v25, 4  ;;  %v6199_v19 = vsel %vm2206_vm1, %v3078_v11, %v3082_v33  ;;  %v6204_v61 = vsel %vm2563_vm2, %v3255_v13, %v6928_v24  ;;  %v435_v22 = vmul.f32 %v418_v18, %v5508_v37  ;;  %v558_v56 = vpop.permute.xlu0 %557  ;;  %v6984_v24 = vld [vmem:[#allocation2_spill] sm:$0xff] }
  0xe4   : > { %v436_v3 = vmul.f32 %v423_v26, %v5511_v38  ;;  %4505 = vmatmul.mubr.bf16.gmra.mrb[36].mxu0 %v1192_v59  ;;  %v6210_v50 = vsel %vm1153_vm3, %v1856_v27, %v6193_v29  ;;  %v2048_v49 = vshll.u32 %v6190_v60, 16  ;;  %v6925_v11 = vshrl.u32 %v6190_v60, 16 }
  0xe5   : > { %4560 = vmatprep.mubr.msk.bf16.mxu0 %vm5131_vm0, %v6935_v58  ;;  %v6218_v13 = vor.u32 %v2910_v51, %v2909_v62  ;;  %v6927_v37 = vrot.slane %v6190_v60, 5  ;;  %v563_v7 = vpop.permute.xlu1 %562  ;;  %v2046_v8 = vor.u32 %v2044_v2, %v2042_v12  ;;  %v575_v62 = vmul.f32 %v558_v56, %v5521_v46  ;;  %v5039_v2 = vld [vmem:[%s6891_s4 + $0x180] sm:$0xff]  }
  0xe6   : > { %v442_v38 = vpack.c.bf16 %v436_v3, %v435_v22  ;;  %v6221_v59 = vrot.slane %v2048_v49, 1  ;;  %v3085_v34 = vrot.slane %v2048_v49, 5  ;;  %v3084_v52 = vrot.slane %v6925_v11, 4 }
  0xe7   : > { %v6227_v27 = vsel %vm2206_vm1, %v2907_v16, %v6218_v13  ;;  %v6232_v51 = vsel %vm2563_vm2, %v3423_v17, %v6927_v37  ;;  %v576_v22 = vmul.f32 %v563_v7, %v5524_v47  ;;  %v5040_v16 = vld [vmem:[%s6891_s4 + $0x1c0] sm:$0xff]   ;;  %v698_v47 = vpop.permute.xlu0 %697 }
  0xe8   : > { %v2227_v18 = vshll.u32 %v442_v38, 16  ;;  %v2573_v26 = vrot.slane %v442_v38, 5  ;;  %v6244_v12 = vsel %vm1153_vm3, %v2046_v8, %v6221_v59  ;;  %v3086_v17 = vor.u32 %v3085_v34, %v3084_v52 }
  0xe9   : > { %v582_v49 = vpack.c.bf16 %v576_v22, %v575_v62  ;;  %v6983_v38 = vrot.slane %v5845_v57, 5  ;;  %v703_v56 = vpop.permute.xlu1 %702  ;;  %v715_v37 = vmul.f32 %v698_v47, %v5542_v0  ;;  %4597 = vmatmul.mubr.bf16.vlgmr.msra.gmra.mrb[40].mxu1 %v5917_v43  ;;  %v5041_v57 = vld [vmem:[%s6891_s4 + $0x188] sm:$0xff]   ;;  %v6987_v62 = vld [vmem:[#allocation4_spill] sm:$0xff] }
  0xea   : > { %v2229_v3 = vrot.slane %v2227_v18, 5  ;;  %v6252_v7 = vsel %vm2206_vm1, %v3082_v33, %v3086_v17  ;;  %v716_v8 = vmul.f32 %v703_v56, %v6984_v24  ;;  %4653 = vmatpush3.bf16.msra.mxu1 %v5040_v16  ;;  %v5042_v33 = vld [vmem:[%s6891_s4 + $0x1c8] sm:$0xff]   ;;  %4600 = vmatprep.mubr.msk.bf16.mxu1 %vm5131_vm0, %v6935_v58 }
  0xeb   : > { %v6249_v46 = vsel %vm2563_vm2, %v6983_v38, %v2573_v26  ;;  %v2402_v11 = vshll.u32 %v582_v49, 16  ;;  %v2741_v25 = vrot.slane %v582_v49, 5  ;;  %4654 = vmatprep.subr.bf16.mxu1 %v6935_v58  ;;  %v838_v52 = vpop.permute.xlu0 %837  ;;  %v6988_v49 = vrot.slane %v6159_v40, 5 }
  0xec   : > { %4561 = vmatmul.mubr.bf16.vlgmr.msra.gmra.mrb[40].mxu0 %v5876_v42  ;;  %v6266_v34 = vsel %vm2206_vm1, %v5915_v6, %v2229_v3  ;;  %v722_v24 = vpack.c.bf16 %v716_v8, %v715_v37  ;;  %v6985_v42 = vrot.slane %v5817_v20, 5  ;;  %v6986_v37 = vld [vmem:[#allocation3_spill] sm:$0xff]  ;;  %v5043_v20 = vld [vmem:[%s6891_s4 + $0x190] sm:$0xff]   ;;  %v5045_v8 = vld [vmem:[%s6891_s4 + $0x198] sm:$0xff]  }
  0xed   : > { %4617 = vmatpush3.bf16.msra.mxu0 %v5039_v2  ;;  %v2404_v0 = vrot.slane %v2402_v11, 5  ;;  %v843_v18 = vpop.permute.xlu1 %842  ;;  %4564 = vmatprep.mubr.msk.bf16.mxu0 %vm5131_vm0, %v6935_v58  ;;  %v855_v26 = vmul.f32 %v838_v52, %v6986_v37  ;;  %v5053_v52 = vld [vmem:[%s6891_s4 + $0x1b8] sm:$0xff]  }
  0xee   : > { %4618 = vmatprep.subr.bf16.mxu0 %v6935_v58  ;;  %v6273_v43 = vsel %vm2563_vm2, %v6985_v42, %v2741_v25  ;;  %v2914_v6 = vshll.u32 %v722_v24, 16  ;;  %v3259_v11 = vrot.slane %v722_v24, 5  ;;  %v856_v22 = vmul.f32 %v843_v18, %v6987_v62  ;;  %4655 = vmatpush3.bf16.msra.mxu1 %v5042_v33  ;;  %v5044_v25 = vld [vmem:[%s6891_s4 + $0x1d0] sm:$0xff]   ;;  %v5048_v24 = vld [vmem:[%s6891_s4 + $0x1e0] sm:$0xff]   ;;  %v5050_v42 = vld [vmem:[%s6891_s4 + $0x1e8] sm:$0xff]  }
  0xef   : > { %v6289_v2 = vsel %vm2206_vm1, %v5873_v1, %v2404_v0  ;;  %4656 = vmatprep.subr.bf16.mxu1 %v6935_v58  ;;  %v5047_v0 = vld [vmem:[%s6891_s4 + $0x1a0] sm:$0xff]   ;;  %v5054_v18 = vld [vmem:[%s6891_s4 + $0x1f8] sm:$0xff]   ;;  %v5065_v62 = vld [vmem:[%s6891_s4 + $0x228] sm:$0xff]  }
  0xf0   : > { %v2916_v16 = vrot.slane %v2914_v6, 5  ;;  %v862_v3 = vpack.c.bf16 %v856_v22, %v855_v26  ;;  %v6296_v38 = vsel %vm2563_vm2, %v6988_v49, %v3259_v11  ;;  %v5057_v6 = vld [vmem:[%s6891_s4 + $0x208] sm:$0xff]   ;;  %v5061_v37 = vld [vmem:[%s6891_s4 + $0x218] sm:$0xff]  }
  0xf1   : > { %4619 = vmatpush3.bf16.msra.mxu0 %v5041_v57  ;;  %4601 = vmatmul.mubr.bf16.gmra.mrb[44].mxu1 %v5984_v30  ;;  %v5046_v57 = vld [vmem:[%s6891_s4 + $0x1d8] sm:$0xff]   ;;  %v5058_v11 = vld [vmem:[%s6891_s4 + $0x248] sm:$0xff]  }
  0xf2   : > { %4620 = vmatprep.subr.bf16.mxu0 %v6935_v58  ;;  %v3089_v47 = vshll.u32 %v862_v3, 16  ;;  %v3427_v56 = vrot.slane %v862_v3, 5  ;;  %v6302_v1 = vsel %vm2206_vm1, %v6218_v13, %v2916_v16  ;;  %4657 = vmatpush3.bf16.msra.mxu1 %v5044_v25  ;;  %v5062_v26 = vld [vmem:[%s6891_s4 + $0x258] sm:$0xff]   ;;  %v5066_v22 = vld [vmem:[%s6891_s4 + $0x268] sm:$0xff]   ;;  %v6991_v16 = vshrl.u32 %v6190_v60, 16 }
  0xf3   : > { %4604 = vmatprep.mubr.msk.bf16.mxu1 %vm5131_vm0, %v6935_v58  ;;  %4658 = vmatprep.subr.bf16.mxu1 %v6935_v58  ;;  %v5070_v25 = vld [vmem:[%s6891_s4 + $0x278] sm:$0xff]  }
  0xf4   : > { %4565 = vmatmul.mubr.bf16.gmra.mrb[44].mxu0 %v5948_v48  ;;  %v3091_v33 = vrot.slane %v3089_v47, 5  ;;  %v6989_v48 = vrot.slane %v6190_v60, 5  ;;  %v2054_v3 = vor.u32 %v6991_v16, %v6221_v59  ;;  %v5074_v59 = vld [vmem:[%s6891_s4 + $0x2c8] sm:$0xff]   ;;  %v5077_v49 = vld [vmem:[%s6891_s4 + $0x298] sm:$0xff]  }
  0xf5   : > { %4621 = vmatpush3.bf16.msra.mxu0 %v5043_v20  ;;  %4568 = vmatprep.mubr.msk.bf16.mxu0 %vm5131_vm0, %v6935_v58  ;;  %v5069_v20 = vld [vmem:[%s6891_s4 + $0x238] sm:$0xff]  }
  0xf6   : > { %4622 = vmatprep.subr.bf16.mxu0 %v6935_v58  ;;  %v6316_v30 = vsel %vm2563_vm2, %v6989_v48, %v3427_v56  ;;  %v6322_v13 = vsel %vm2206_vm1, %v3086_v17, %v3091_v33  ;;  %4659 = vmatpush3.bf16.msra.mxu1 %v5046_v57  ;;  %v5049_v17 = vld [vmem:[%s6891_s4 + $0x1a8] sm:$0xff]   ;;  %v5078_v47 = vld [vmem:[%s6891_s4 + $0x2d8] sm:$0xff]  }
  0xf7   : > { %4660 = vmatprep.subr.bf16.mxu1 %v6935_v58  ;;  %v5081_v56 = vld [vmem:[%s6891_s4 + $0x2a8] sm:$0xff]   ;;  %v5085_v33 = vld [vmem:[%s6891_s4 + $0x2b8] sm:$0xff]  }
  0xf8   : > { %v6992_v57 = vld [vmem:[#allocation11_spill] sm:$0xff]  ;;  %v5086_v48 = vld [vmem:[%s6891_s4 + $0x2f8] sm:$0xff]  }
  0xf9   : > { %4623 = vmatpush3.bf16.msra.mxu0 %v5045_v8  ;;  %4605 = vmatmul.mubr.bf16.gmra.mrb[48].mxu1 %v6054_v54  ;;  %v5052_v54 = vld [vmem:[%s6891_s4 + $0x1f0] sm:$0xff]   ;;  %v5082_v8 = vld [vmem:[%s6891_s4 + $0x2e8] sm:$0xff]  }
  0xfa   : > { %4624 = vmatprep.subr.bf16.mxu0 %v6935_v58  ;;  %4661 = vmatpush3.bf16.msra.mxu1 %v5048_v24  ;;  %v6993_v24 = vld [vmem:[#allocation5_spill] sm:$0xff] }
  0xfb   : > { %4608 = vmatprep.mubr.msk.bf16.mxu1 %vm5131_vm0, %v6935_v58  ;;  %4662 = vmatprep.subr.bf16.mxu1 %v6935_v58 }
  0xfc   : > { %4569 = vmatmul.mubr.bf16.gmra.mrb[48].mxu0 %v6013_v10  ;;  %v5051_v10 = vld [vmem:[%s6891_s4 + $0x1b0] sm:$0xff]  }
  0xfd   : > { %4625 = vmatpush3.bf16.msra.mxu0 %v5047_v0  ;;  %4572 = vmatprep.mubr.msk.bf16.mxu0 %vm5131_vm0, %v6935_v58  ;;  %v5088_v0 = vld [vmem:[%s6891_s4 + $0x340] sm:$0xff]  }
  0xfe   : > { %4626 = vmatprep.subr.bf16.mxu0 %v6935_v58  ;;  %4663 = vmatpush3.bf16.msra.mxu1 %v5050_v42  ;;  %v5091_v42 = vld [vmem:[%s6891_s4 + $0x310] sm:$0xff]  }
  0xff   : > { %4664 = vmatprep.subr.bf16.mxu1 %v6935_v58 }
 0x101   : > { %4627 = vmatpush3.bf16.msra.mxu0 %v5049_v17  ;;  %4609 = vmatmul.mubr.bf16.gmra.mrb[52].mxu1 %v6129_v14  ;;  %v5056_v14 = vld [vmem:[%s6891_s4 + $0x240] sm:$0xff]  }
 0x102   : > { %4628 = vmatprep.subr.bf16.mxu0 %v6935_v58  ;;  %4612 = vmatprep.mubr.msk.bf16.mxu1 %vm5131_vm0, %v6935_v58  ;;  %v6994_v17 = vld [vmem:[#allocation6_spill] sm:$0xff] }
 0x103   : > { %4665 = vmatpush3.bf16.msra.mxu1 %v5052_v54  ;;  %v6995_v54 = vld [vmem:[#allocation7_spill] sm:$0xff] }
 0x104   : > { %4573 = vmatmul.mubr.bf16.gmra.mrb[52].mxu0 %v6094_v41  ;;  %4666 = vmatprep.subr.bf16.mxu1 %v6935_v58  ;;  %v5055_v41 = vld [vmem:[%s6891_s4 + $0x200] sm:$0xff]  }
 0x105   : > { %4629 = vmatpush3.bf16.msra.mxu0 %v5051_v10  ;;  %4576 = vmatprep.mubr.msk.bf16.mxu0 %vm5131_vm0, %v6935_v58  ;;  %v5092_v10 = vld [vmem:[%s6891_s4 + $0x350] sm:$0xff]  }
 0x106   : > { %4630 = vmatprep.subr.bf16.mxu0 %v6935_v58 }
 0x107   : > { %4667 = vmatpush3.bf16.msra.mxu1 %v5054_v18  ;;  %v5093_v18 = vld [vmem:[%s6891_s4 + $0x318] sm:$0xff]  }
 0x108   : > { %4724 = vmatprep.subr.bf16.mxu1 %v6935_v58 }
 0x109   : > { %4631 = vmatpush3.bf16.msra.mxu0 %v5053_v52  ;;  %4613 = vmatmul.mubr.bf16.gmra.mrb[56].mxu1 %v6190_v60  ;;  %v5072_v60 = vld [vmem:[%s6891_s4 + $0x2c0] sm:$0xff]   ;;  %v6996_v52 = vld [vmem:[#allocation8_spill] sm:$0xff] }
 0x10a   : > { %4688 = vmatprep.subr.bf16.mxu0 %v6935_v58  ;;  %4668 = vmatprep.mubr.msk.bf16.mxu1 %vm5131_vm0, %v6935_v58 }
 0x10c   : > { %4577 = vmatmul.mubr.bf16.gmra.mrb[56].mxu0 %v6159_v40 }
 0x10d   : > { %4632 = vmatprep.mubr.msk.bf16.mxu0 %vm5131_vm0, %v6935_v58 }
 0x111   : > { %4669 = vmatmul.mubr.bf16.vlgmr.msra.gmra.mrb[60].mxu1 %v6040_v35  ;;  %v5060_v35 = vld [vmem:[%s6891_s4 + $0x250] sm:$0xff]  }
 0x112   : > { %4725 = vmatpush3.bf16.msra.mxu1 %v5056_v14  ;;  %4672 = vmatprep.mubr.msk.bf16.mxu1 %vm5131_vm0, %v6935_v58 }
 0x113   : > { %4726 = vmatprep.subr.bf16.mxu1 %v6935_v58 }
 0x114   : > { %4633 = vmatmul.mubr.bf16.vlgmr.msra.gmra.mrb[60].mxu0 %v6000_v32  ;;  %v5059_v32 = vld [vmem:[%s6891_s4 + $0x210] sm:$0xff]  }
 0x115   : > { %4689 = vmatpush3.bf16.msra.mxu0 %v5055_v41  ;;  %4636 = vmatprep.mubr.msk.bf16.mxu0 %vm5131_vm0, %v6935_v58  ;;  %v5094_v41 = vld [vmem:[%s6891_s4 + $0x358] sm:$0xff]  }
 0x116   : > { %4690 = vmatprep.subr.bf16.mxu0 %v6935_v58  ;;  %4727 = vmatpush3.bf16.msra.mxu1 %v5058_v11 }
 0x117   : > { %4728 = vmatprep.subr.bf16.mxu1 %v6935_v58 }
 0x119   : > { %4691 = vmatpush3.bf16.msra.mxu0 %v5057_v6  ;;  %4673 = vmatmul.mubr.bf16.gmra.mrb[64].mxu1 %v6119_v36  ;;  %v5064_v36 = vld [vmem:[%s6891_s4 + $0x260] sm:$0xff]  }
 0x11a   : > { %4692 = vmatprep.subr.bf16.mxu0 %v6935_v58  ;;  %4729 = vmatpush3.bf16.msra.mxu1 %v5060_v35 }
 0x11b   : > { %4676 = vmatprep.mubr.msk.bf16.mxu1 %vm5131_vm0, %v6935_v58  ;;  %4730 = vmatprep.subr.bf16.mxu1 %v6935_v58 }
 0x11c   : > { %4637 = vmatmul.mubr.bf16.gmra.mrb[64].mxu0 %v6077_v28  ;;  %v5063_v28 = vld [vmem:[%s6891_s4 + $0x220] sm:$0xff]  }
 0x11d   : > { %4693 = vmatpush3.bf16.msra.mxu0 %v5059_v32  ;;  %4640 = vmatprep.mubr.msk.bf16.mxu0 %vm5131_vm0, %v6935_v58 }
 0x11e   : > { %4694 = vmatprep.subr.bf16.mxu0 %v6935_v58  ;;  %4731 = vmatpush3.bf16.msra.mxu1 %v5062_v26 }
 0x11f   : > { %4732 = vmatprep.subr.bf16.mxu1 %v6935_v58 }
 0x121   : > { %4695 = vmatpush3.bf16.msra.mxu0 %v5061_v37  ;;  %4677 = vmatmul.mubr.bf16.gmra.mrb[68].mxu1 %v6183_v15  ;;  %v5068_v15 = vld [vmem:[%s6891_s4 + $0x270] sm:$0xff]  }
 0x122   : > { %4696 = vmatprep.subr.bf16.mxu0 %v6935_v58  ;;  %4733 = vmatpush3.bf16.msra.mxu1 %v5064_v36  ;;  %v5096_v36 = vld [vmem:[%s6891_s4 + $0x360] sm:$0xff]  }
 0x123   : > { %4680 = vmatprep.mubr.msk.bf16.mxu1 %vm5131_vm0, %v6935_v58  ;;  %4734 = vmatprep.subr.bf16.mxu1 %v6935_v58 }
 0x124   : > { %4641 = vmatmul.mubr.bf16.gmra.mrb[68].mxu0 %v6149_v21  ;;  %v5067_v21 = vld [vmem:[%s6891_s4 + $0x230] sm:$0xff]  }
 0x125   : > { %4697 = vmatpush3.bf16.msra.mxu0 %v5063_v28  ;;  %4644 = vmatprep.mubr.msk.bf16.mxu0 %vm5131_vm0, %v6935_v58  ;;  %v5095_v28 = vld [vmem:[%s6891_s4 + $0x320] sm:$0xff]  }
 0x126   : > { %4698 = vmatprep.subr.bf16.mxu0 %v6935_v58  ;;  %4735 = vmatpush3.bf16.msra.mxu1 %v5066_v22 }
 0x127   : > { %4736 = vmatprep.subr.bf16.mxu1 %v6935_v58 }
 0x129   : > { %4699 = vmatpush3.bf16.msra.mxu0 %v5065_v62  ;;  %4681 = vmatmul.mubr.bf16.gmra.mrb[72].mxu1 %v6244_v12 }
 0x12a   : > { %4700 = vmatprep.subr.bf16.mxu0 %v6935_v58  ;;  %4684 = vmatprep.mubr.msk.bf16.mxu1 %vm5131_vm0, %v6935_v58 }
 0x12b   : > { %4737 = vmatpush3.bf16.msra.mxu1 %v5068_v15  ;;  %v6997_v15 = vld [vmem:[#allocation9_spill] sm:$0xff] }
 0x12c   : > { %4645 = vmatmul.mubr.bf16.gmra.mrb[72].mxu0 %v6210_v50  ;;  %4738 = vmatprep.subr.bf16.mxu1 %v6935_v58  ;;  %v6990_v50 = vshrl.u32 %v6159_v40, 16  ;;  %v5071_v40 = vld [vmem:[%s6891_s4 + $0x280] sm:$0xff]  }
 0x12d   : > { %4701 = vmatpush3.bf16.msra.mxu0 %v5067_v21  ;;  %4648 = vmatprep.mubr.msk.bf16.mxu0 %vm5131_vm0, %v6935_v58 }
 0x12e   : > { %4702 = vmatprep.subr.bf16.mxu0 %v6935_v58  ;;  %v1864_v12 = vor.u32 %v6990_v50, %v6193_v29  ;;  %v5073_v29 = vld [vmem:[%s6891_s4 + $0x288] sm:$0xff]  }
 0x12f   : > { %4739 = vmatpush3.bf16.msra.mxu1 %v5070_v25  ;;  %v5097_v25 = vld [vmem:[%s6891_s4 + $0x328] sm:$0xff]  }
 0x130   : > { %4796 = vmatprep.subr.bf16.mxu1 %v6935_v58  ;;  %v5098_v50 = vld [vmem:[%s6891_s4 + $0x368] sm:$0xff]  }
 0x131   : > { %4703 = vmatpush3.bf16.msra.mxu0 %v5069_v20  ;;  %4685 = vmatmul.mubr.bf16.gmra.mrb[76].mxu1 %v2054_v3  ;;  %v6998_v20 = vld [vmem:[#allocation10_spill] sm:$0xff] }
 0x132   : > { %4760 = vmatprep.subr.bf16.mxu0 %v6935_v58  ;;  %4740 = vmatprep.mubr.msk.bf16.mxu1 %vm5131_vm0, %v6935_v58 }
 0x134   : > { %4649 = vmatmul.mubr.bf16.gmra.mrb[76].mxu0 %v1864_v12 }
 0x135   : > { %4704 = vmatprep.mubr.msk.bf16.mxu0 %vm5131_vm0, %v6935_v58 }
 0x139   : > { %4741 = vmatmul.mubr.bf16.vlgmr.msra.gmra.mrb[80].mxu1 %v5699_v23  ;;  %v5076_v23 = vld [vmem:[%s6891_s4 + $0x2d0] sm:$0xff]  }
 0x13a   : > { %4797 = vmatpush3.bf16.msra.mxu1 %v5072_v60  ;;  %4744 = vmatprep.mubr.msk.bf16.mxu1 %vm5131_vm0, %v6935_v58 }
 0x13b   : > { %4798 = vmatprep.subr.bf16.mxu1 %v6935_v58 }
 0x13c   : > { %4705 = vmatmul.mubr.bf16.vlgmr.msra.gmra.mrb[80].mxu0 %v5735_v4  ;;  %v5075_v4 = vld [vmem:[%s6891_s4 + $0x290] sm:$0xff]  }
 0x13d   : > { %4761 = vmatpush3.bf16.msra.mxu0 %v5071_v40  ;;  %4708 = vmatprep.mubr.msk.bf16.mxu0 %vm5131_vm0, %v6935_v58 }
 0x13e   : > { %4762 = vmatprep.subr.bf16.mxu0 %v6935_v58  ;;  %4799 = vmatpush3.bf16.msra.mxu1 %v5074_v59 }
 0x13f   : > { %4800 = vmatprep.subr.bf16.mxu1 %v6935_v58 }
 0x141   : > { %4763 = vmatpush3.bf16.msra.mxu0 %v5073_v29  ;;  %4745 = vmatmul.mubr.bf16.gmra.mrb[84].mxu1 %v5769_v63  ;;  %v5079_v63 = vld [vmem:[%s6891_s4 + $0x2a0] sm:$0xff]  }
 0x142   : > { %4764 = vmatprep.subr.bf16.mxu0 %v6935_v58  ;;  %4801 = vmatpush3.bf16.msra.mxu1 %v5076_v23 }
 0x143   : > { %4748 = vmatprep.mubr.msk.bf16.mxu1 %vm5131_vm0, %v6935_v58  ;;  %4802 = vmatprep.subr.bf16.mxu1 %v6935_v58 }
 0x144   : > { %4709 = vmatmul.mubr.bf16.gmra.mrb[84].mxu0 %v5800_v5  ;;  %v5080_v5 = vld [vmem:[%s6891_s4 + $0x2e0] sm:$0xff]  }
 0x145   : > { %4765 = vmatpush3.bf16.msra.mxu0 %v5075_v4  ;;  %4712 = vmatprep.mubr.msk.bf16.mxu0 %vm5131_vm0, %v6935_v58  ;;  %v5099_v4 = vld [vmem:[%s6891_s4 + $0x330] sm:$0xff]  }
 0x146   : > { %4766 = vmatprep.subr.bf16.mxu0 %v6935_v58  ;;  %4803 = vmatpush3.bf16.msra.mxu1 %v5078_v47 }
 0x147   : > { %4804 = vmatprep.subr.bf16.mxu1 %v6935_v58 }
 0x149   : > { %4767 = vmatpush3.bf16.msra.mxu0 %v5077_v49  ;;  %4749 = vmatmul.mubr.bf16.gmra.mrb[88].mxu1 %v5831_v53  ;;  %v5083_v53 = vld [vmem:[%s6891_s4 + $0x2b0] sm:$0xff]  }
 0x14a   : > { %4768 = vmatprep.subr.bf16.mxu0 %v6935_v58  ;;  %4805 = vmatpush3.bf16.msra.mxu1 %v5080_v5  ;;  %v6999_v5 = vld [vmem:[#allocation12_spill] sm:$0xff] }
 0x14b   : > { %4752 = vmatprep.mubr.msk.bf16.mxu1 %vm5131_vm0, %v6935_v58  ;;  %4806 = vmatprep.subr.bf16.mxu1 %v6935_v58 }
 0x14c   : > { %4713 = vmatmul.mubr.bf16.gmra.mrb[88].mxu0 %v5854_v44  ;;  %v5084_v44 = vld [vmem:[%s6891_s4 + $0x2f0] sm:$0xff]  }
 0x14d   : > { %4769 = vmatpush3.bf16.msra.mxu0 %v5079_v63  ;;  %4716 = vmatprep.mubr.msk.bf16.mxu0 %vm5131_vm0, %v6935_v58  ;;  %v5100_v63 = vld [vmem:[%s6891_s4 + $0x370] sm:$0xff]  }
 0x14e   : > { %4770 = vmatprep.subr.bf16.mxu0 %v6935_v58  ;;  %4807 = vmatpush3.bf16.msra.mxu1 %v5082_v8  ;;  %v5101_v8 = vld [vmem:[%s6891_s4 + $0x338] sm:$0xff]  }
 0x14f   : > { %4808 = vmatprep.subr.bf16.mxu1 %v6935_v58 }
 0x151   : > { %4771 = vmatpush3.bf16.msra.mxu0 %v5081_v56  ;;  %4753 = vmatmul.mubr.bf16.gmra.mrb[92].mxu1 %v6992_v57  ;;  %v7000_v56 = vld [vmem:[#allocation13_spill] sm:$0xff] }
 0x152   : > { %4772 = vmatprep.subr.bf16.mxu0 %v6935_v58  ;;  %4756 = vmatprep.mubr.msk.bf16.mxu1 %vm5131_vm0, %v6935_v58 }
 0x153   : > { %4809 = vmatpush3.bf16.msra.mxu1 %v5084_v44 }
 0x154   : > { %4717 = vmatmul.mubr.bf16.gmra.mrb[92].mxu0 %v5932_v31  ;;  %4810 = vmatprep.subr.bf16.mxu1 %v6935_v58  ;;  %v5087_v31 = vld [vmem:[%s6891_s4 + $0x300] sm:$0xff]  }
 0x155   : > { %4773 = vmatpush3.bf16.msra.mxu0 %v5083_v53  ;;  %4720 = vmatprep.mubr.msk.bf16.mxu0 %vm5131_vm0, %v6935_v58  ;;  %v5102_v53 = vld [vmem:[%s6891_s4 + $0x378] sm:$0xff]  }
 0x156   : > { %4774 = vmatprep.subr.bf16.mxu0 %v6935_v58 }
 0x157   : > { %4811 = vmatpush3.bf16.msra.mxu1 %v5086_v48 }
 0x158   : > { %4868 = vmatprep.subr.bf16.mxu1 %v6935_v58 }
 0x159   : > { %4775 = vmatpush3.bf16.msra.mxu0 %v5085_v33  ;;  %4757 = vmatmul.mubr.bf16.gmra.mrb[96].mxu1 %v6289_v2  ;;  %v5090_v2 = vld [vmem:[%s6891_s4 + $0x348] sm:$0xff]  }
 0x15a   : > { %4832 = vmatprep.subr.bf16.mxu0 %v6935_v58  ;;  %4812 = vmatprep.mubr.msk.bf16.mxu1 %vm5131_vm0, %v6935_v58 }
 0x15c   : > { %4721 = vmatmul.mubr.bf16.gmra.mrb[96].mxu0 %v6266_v34  ;;  %v5089_v34 = vld [vmem:[%s6891_s4 + $0x308] sm:$0xff]  }
 0x15d   : > { %4776 = vmatprep.mubr.msk.bf16.mxu0 %vm5131_vm0, %v6935_v58 }
 0x161   : > { %4813 = vmatmul.mubr.bf16.vlgmr.msra.gmra.mrb[100].mxu1 %v6994_v17 }
 0x162   : > { %4869 = vmatpush3.bf16.msra.mxu1 %v5088_v0  ;;  %4816 = vmatprep.mubr.msk.bf16.mxu1 %vm5131_vm0, %v6935_v58 }
 0x163   : > { %4870 = vmatprep.subr.bf16.mxu1 %v6935_v58 }
 0x164   : > { %4777 = vmatmul.mubr.bf16.vlgmr.msra.gmra.mrb[100].mxu0 %v6993_v24 }
 0x165   : > { %4833 = vmatpush3.bf16.msra.mxu0 %v5087_v31  ;;  %4780 = vmatprep.mubr.msk.bf16.mxu0 %vm5131_vm0, %v6935_v58 }
 0x166   : > { %4834 = vmatprep.subr.bf16.mxu0 %v6935_v58  ;;  %4871 = vmatpush3.bf16.msra.mxu1 %v5090_v2 }
 0x167   : > { %4872 = vmatprep.subr.bf16.mxu1 %v6935_v58 }
 0x169   : > { %4835 = vmatpush3.bf16.msra.mxu0 %v5089_v34  ;;  %4817 = vmatmul.mubr.bf16.gmra.mrb[104].mxu1 %v6996_v52 }
 0x16a   : > { %4836 = vmatprep.subr.bf16.mxu0 %v6935_v58  ;;  %4873 = vmatpush3.bf16.msra.mxu1 %v5092_v10  ;;  %v978_v14 = vpop.f32.mrb[0].mxu0  ;;  %v1098_v6 = vpop.f32.mrb[0].mxu1 }
 0x16b   : > { %4820 = vmatprep.mubr.msk.bf16.mxu1 %vm5131_vm0, %v6935_v58  ;;  %4874 = vmatprep.subr.bf16.mxu1 %v6935_v58  ;;  %v6610_v11 = vadd.f32 %v1098_v6, %v978_v14  ;;  %v4418_v32 = vpop.f32.mrb[1].mxu0  ;;  %v4454_v35 = vpop.f32.mrb[1].mxu1 }
 0x16c   : > { %4781 = vmatmul.mubr.bf16.gmra.mrb[104].mxu0 %v6995_v54  ;;  %v981_v37 = vpop.f32.mrb[2].mxu0  ;;  %v1101_v26 = vpop.f32.mrb[2].mxu1 }
 0x16d   : > { %4837 = vmatpush3.bf16.msra.mxu0 %v5091_v42  ;;  %4784 = vmatprep.mubr.msk.bf16.mxu0 %vm5131_vm0, %v6935_v58  ;;  %v6618_v62 = vadd.f32 %v1101_v26, %v981_v37  ;;  %v4419_v22 = vpop.f32.mrb[3].mxu0  ;;  %v4455_v21 = vpop.f32.mrb[3].mxu1  ;;  %v5105_v37 = vld [vmem:[%s6891_s4 + $0x388] sm:$0xff]  }
 0x16e   : > { %4838 = vmatprep.subr.bf16.mxu0 %v6935_v58  ;;  %4875 = vmatpush3.bf16.msra.mxu1 %v5094_v41  ;;  %v5106_v26 = vld [vmem:[%s6891_s4 + $0x3c8] sm:$0xff]  }
 0x16f   : > { %4876 = vmatprep.subr.bf16.mxu1 %v6935_v58 }
 0x171   : > { %4839 = vmatpush3.bf16.msra.mxu0 %v5093_v18  ;;  %4821 = vmatmul.mubr.bf16.gmra.mrb[108].mxu1 %v6998_v20  ;;  %v5107_v20 = vld [vmem:[%s6891_s4 + $0x390] sm:$0xff]  }
 0x172   : > { %4840 = vmatprep.subr.bf16.mxu0 %v6935_v58  ;;  %4877 = vmatpush3.bf16.msra.mxu1 %v5096_v36  ;;  %v986_v12 = vpop.f32.mrb[4].mxu0  ;;  %v1106_v16 = vpop.f32.mrb[4].mxu1 }
 0x173   : > { %4824 = vmatprep.mubr.msk.bf16.mxu1 %vm5131_vm0, %v6935_v58  ;;  %4878 = vmatprep.subr.bf16.mxu1 %v6935_v58  ;;  %v6636_v3 = vadd.f32 %v1106_v16, %v986_v12  ;;  %v4422_v40 = vpop.f32.mrb[5].mxu0  ;;  %v4458_v60 = vpop.f32.mrb[5].mxu1  ;;  %v7001_v16 = vld [vmem:[#allocation18_spill] sm:$0xff] }
 0x174   : > { %4785 = vmatmul.mubr.bf16.gmra.mrb[108].mxu0 %v6997_v15  ;;  %v989_v29 = vpop.f32.mrb[6].mxu0  ;;  %v1109_v59 = vpop.f32.mrb[6].mxu1  ;;  %v5109_v40 = vld [vmem:[%s6891_s4 + $0x398] sm:$0xff]  }
 0x175   : > { %4841 = vmatpush3.bf16.msra.mxu0 %v5095_v28  ;;  %4788 = vmatprep.mubr.msk.bf16.mxu0 %vm5131_vm0, %v6935_v58  ;;  %v6641_v23 = vadd.f32 %v1109_v59, %v989_v29  ;;  %v4423_v49 = vpop.f32.mrb[7].mxu0  ;;  %v4459_v47 = vpop.f32.mrb[7].mxu1  ;;  %v5110_v60 = vld [vmem:[%s6891_s4 + $0x3d8] sm:$0xff]  }
 0x176   : > { %4842 = vmatprep.subr.bf16.mxu0 %v6935_v58  ;;  %4879 = vmatpush3.bf16.msra.mxu1 %v5098_v50 }
 0x177   : > { %4880 = vmatprep.subr.bf16.mxu1 %v6935_v58 }
 0x179   : > { %4843 = vmatpush3.bf16.msra.mxu0 %v5097_v25  ;;  %4825 = vmatmul.mubr.bf16.gmra.mrb[112].mxu1 %v7000_v56  ;;  %v5108_v25 = vld [vmem:[%s6891_s4 + $0x3d0] sm:$0xff]   ;;  %v5112_v56 = vld [vmem:[%s6891_s4 + $0x3e0] sm:$0xff]  }
 0x17a   : > { %4844 = vmatprep.subr.bf16.mxu0 %v6935_v58  ;;  %4828 = vmatprep.mubr.msk.bf16.mxu1 %vm5131_vm0, %v6935_v58  ;;  %v994_v44 = vpop.f32.mrb[8].mxu0  ;;  %v1114_v57 = vpop.f32.mrb[8].mxu1 }
 0x17b   : > { %4881 = vmatpush3.bf16.msra.mxu1 %v5100_v63  ;;  %v6662_v33 = vadd.f32 %v1114_v57, %v994_v44  ;;  %v4426_v48 = vpop.f32.mrb[9].mxu0  ;;  %v4462_v31 = vpop.f32.mrb[9].mxu1 }
 0x17c   : > { %4789 = vmatmul.mubr.bf16.gmra.mrb[112].mxu0 %v6999_v5  ;;  %4882 = vmatprep.subr.bf16.mxu1 %v6935_v58  ;;  %v997_v0 = vpop.f32.mrb[10].mxu0  ;;  %v1117_v24 = vpop.f32.mrb[10].mxu1  ;;  %v5111_v5 = vld [vmem:[%s6891_s4 + $0x3a0] sm:$0xff]   ;;  %v7002_v48 = vld [vmem:[#allocation20_spill] sm:$0xff]  ;;  %v5113_v31 = vld [vmem:[%s6891_s4 + $0x3a8] sm:$0xff]  }
 0x17d   : > { %4845 = vmatpush3.bf16.msra.mxu0 %v5099_v4  ;;  %4792 = vmatprep.mubr.msk.bf16.mxu0 %vm5131_vm0, %v6935_v58  ;;  %v6664_v17 = vadd.f32 %v1117_v24, %v997_v0  ;;  %v4427_v34 = vpop.f32.mrb[11].mxu0  ;;  %v4463_v2 = vpop.f32.mrb[11].mxu1 }
 0x17e   : > { %4846 = vmatprep.subr.bf16.mxu0 %v6935_v58 }
 0x17f   : > { %4883 = vmatpush3.bf16.msra.mxu1 %v5102_v53 }
 0x180   : > { %4940 = vmatprep.subr.bf16.mxu1 %v6935_v58 }
 0x181   : > { %4847 = vmatpush3.bf16.msra.mxu0 %v5101_v8  ;;  %4829 = vmatmul.mubr.bf16.gmra.mrb[116].mxu1 %v6273_v43  ;;  %v5104_v43 = vld [vmem:[%s6891_s4 + $0x3c0] sm:$0xff]  }
 0x182   : > { %4904 = vmatprep.subr.bf16.mxu0 %v6935_v58  ;;  %4884 = vmatprep.mubr.msk.bf16.mxu1 %vm5131_vm0, %v6935_v58  ;;  %v1002_v42 = vpop.f32.mrb[12].mxu0  ;;  %v1122_v10 = vpop.f32.mrb[12].mxu1 }
 0x183   : > { %v6674_v54 = vadd.f32 %v1122_v10, %v1002_v42  ;;  %v4430_v52 = vpop.f32.mrb[13].mxu0  ;;  %v4466_v18 = vpop.f32.mrb[13].mxu1 }
 0x184   : > { %4793 = vmatmul.mubr.bf16.gmra.mrb[116].mxu0 %v6249_v46  ;;  %v1005_v41 = vpop.f32.mrb[14].mxu0  ;;  %v1125_v14 = vpop.f32.mrb[14].mxu1  ;;  %v5103_v46 = vld [vmem:[%s6891_s4 + $0x380] sm:$0xff]   ;;  %v5115_v52 = vld [vmem:[%s6891_s4 + $0x3b0] sm:$0xff]  }
 0x185   : > { %4848 = vmatprep.mubr.msk.bf16.mxu0 %vm5131_vm0, %v6935_v58  ;;  %v6682_v6 = vadd.f32 %v1125_v14, %v1005_v41  ;;  %v4431_v32 = vpop.f32.mrb[15].mxu0  ;;  %v4467_v35 = vpop.f32.mrb[15].mxu1 }
 0x186   : > { %v5118_v32 = vld [vmem:[%s6891_s4 + $0x3f8] sm:$0xff]  }
 0x189   : > { %4885 = vmatmul.mubr.bf16.vlgmr.msra.gmra.mrb[120].mxu1 %v6065_v39 }
 0x18a   : > { %4941 = vmatpush3.bf16.msra.mxu1 %v5104_v43  ;;  %v1010_v28 = vpop.f32.mrb[16].mxu0  ;;  %v1130_v36 = vpop.f32.mrb[16].mxu1  ;;  %4888 = vmatprep.mubr.msk.bf16.mxu1 %vm5131_vm0, %v6935_v58 }
 0x18b   : > { %4942 = vmatprep.subr.bf16.mxu1 %v6935_v58  ;;  %v4434_v39 = vpop.f32.mrb[17].mxu0  ;;  %v4470_v22 = vpop.f32.mrb[17].mxu1 }
 0x18c   : > { %4849 = vmatmul.mubr.bf16.vlgmr.msra.gmra.mrb[120].mxu0 %v6030_v55  ;;  %v6698_v55 = vadd.f32 %v1130_v36, %v1010_v28  ;;  %v1013_v21 = vpop.f32.mrb[18].mxu0  ;;  %v1133_v15 = vpop.f32.mrb[18].mxu1 }
 0x18d   : > { %4905 = vmatpush3.bf16.msra.mxu0 %v5103_v46  ;;  %4852 = vmatprep.mubr.msk.bf16.mxu0 %vm5131_vm0, %v6935_v58  ;;  %v4435_v50 = vpop.f32.mrb[19].mxu0  ;;  %v4471_v12 = vpop.f32.mrb[19].mxu1 }
 0x18e   : > { %4906 = vmatprep.subr.bf16.mxu0 %v6935_v58  ;;  %4943 = vmatpush3.bf16.msra.mxu1 %v5106_v26 }
 0x18f   : > { %4944 = vmatprep.subr.bf16.mxu1 %v6935_v58 }
 0x191   : > { %4907 = vmatpush3.bf16.msra.mxu0 %v5105_v37  ;;  %4889 = vmatmul.mubr.bf16.gmra.mrb[124].mxu1 %v7001_v16 }
 0x192   : > { %4908 = vmatprep.subr.bf16.mxu0 %v6935_v58  ;;  %4945 = vmatpush3.bf16.msra.mxu1 %v5108_v25  ;;  %v1470_v59 = vpop.f32.mrb[20].mxu1 }
 0x193   : > { %4892 = vmatprep.mubr.msk.bf16.mxu1 %vm5131_vm0, %v6935_v58  ;;  %4946 = vmatprep.subr.bf16.mxu1 %v6935_v58  ;;  %v4526_v49 = vpop.f32.mrb[21].mxu1 }
 0x194   : > { %4853 = vmatmul.mubr.bf16.gmra.mrb[124].mxu0 %v6107_v45  ;;  %v1280_v29 = vpop.f32.mrb[20].mxu0  ;;  %v1473_v63 = vpop.f32.mrb[22].mxu1 }
 0x195   : > { %4909 = vmatpush3.bf16.msra.mxu0 %v5107_v20  ;;  %4856 = vmatprep.mubr.msk.bf16.mxu0 %vm5131_vm0, %v6935_v58  ;;  %v1318_v45 = vadd.f32 %v1280_v29, %v6610_v11  ;;  %v4490_v4 = vpop.f32.mrb[21].mxu0  ;;  %v4527_v11 = vpop.f32.mrb[23].mxu1 }
 0x196   : > { %4910 = vmatprep.subr.bf16.mxu0 %v6935_v58  ;;  %v1283_v47 = vpop.f32.mrb[22].mxu0  ;;  %4947 = vmatpush3.bf16.msra.mxu1 %v5110_v60  ;;  %v7004_v4 = vld [vmem:[#allocation15_spill] sm:$0xff] }
 0x197   : > { %v6729_v8 = vadd.f32 %v1470_v59, %v1318_v45  ;;  %v1319_v53 = vadd.f32 %v1283_v47, %v6618_v62  ;;  %v4491_v44 = vpop.f32.mrb[23].mxu0  ;;  %4948 = vmatprep.subr.bf16.mxu1 %v6935_v58  ;;  %v5114_v62 = vld [vmem:[%s6891_s4 + $0x3e8] sm:$0xff]   ;;  %v7003_v45 = vld [vmem:[#allocation14_spill] sm:$0xff] }
 0x199   : > { %4911 = vmatpush3.bf16.msra.mxu0 %v5109_v40  ;;  %v6734_v57 = vadd.f32 %v1473_v63, %v1319_v53  ;;  %4893 = vmatmul.mubr.bf16.gmra.mrb[128].mxu1 %v6199_v19 }
 0x19a   : > { %4912 = vmatprep.subr.bf16.mxu0 %v6935_v58  ;;  %4949 = vmatpush3.bf16.msra.mxu1 %v5112_v56  ;;  %v1478_v24 = vpop.f32.mrb[24].mxu1 }
 0x19b   : > { %4896 = vmatprep.mubr.msk.bf16.mxu1 %vm5131_vm0, %v6935_v58  ;;  %4950 = vmatprep.subr.bf16.mxu1 %v6935_v58  ;;  %v4530_v2 = vpop.f32.mrb[25].mxu1 }
 0x19c   : > { %4857 = vmatmul.mubr.bf16.gmra.mrb[128].mxu0 %v7002_v48  ;;  %v1288_v0 = vpop.f32.mrb[24].mxu0  ;;  %v1481_v10 = vpop.f32.mrb[26].mxu1  ;;  %v7005_v48 = vld [vmem:[#allocation16_spill] sm:$0xff] }
 0x19d   : > { %4913 = vmatpush3.bf16.msra.mxu0 %v5111_v5  ;;  %4860 = vmatprep.mubr.msk.bf16.mxu0 %vm5131_vm0, %v6935_v58  ;;  %v1320_v19 = vadd.f32 %v1288_v0, %v6636_v3  ;;  %v4494_v34 = vpop.f32.mrb[25].mxu0  ;;  %v4531_v46 = vpop.f32.mrb[27].mxu1  ;;  %v5116_v3 = vld [vmem:[%s6891_s4 + $0x3f0] sm:$0xff]  }
 0x19e   : > { %4914 = vmatprep.subr.bf16.mxu0 %v6935_v58  ;;  %v1291_v42 = vpop.f32.mrb[26].mxu0  ;;  %4951 = vmatpush3.bf16.msra.mxu1 %v5114_v62  ;;  %v7007_v46 = vld [vmem:[#allocation19_spill] sm:$0xff] }
 0x19f   : > { %v6754_v18 = vadd.f32 %v1478_v24, %v1320_v19  ;;  %v1321_v41 = vadd.f32 %v1291_v42, %v6641_v23  ;;  %v4495_v14 = vpop.f32.mrb[27].mxu0  ;;  %4952 = vmatprep.subr.bf16.mxu1 %v6935_v58  ;;  %v5117_v23 = vld [vmem:[%s6891_s4 + $0x3b8] sm:$0xff]  }
 0x1a1   : > { %4915 = vmatpush3.bf16.msra.mxu0 %v5113_v31  ;;  %v6762_v43 = vadd.f32 %v1481_v10, %v1321_v41  ;;  %4897 = vmatmul.mubr.bf16.gmra.mrb[132].mxu1 %v6252_v7  ;;  %v7006_v31 = vld [vmem:[#allocation17_spill] sm:$0xff] }
 0x1a2   : > { %4916 = vmatprep.subr.bf16.mxu0 %v6935_v58  ;;  %4900 = vmatprep.mubr.msk.bf16.mxu1 %vm5131_vm0, %v6935_v58 }
 0x1a3   : > { %4953 = vmatpush3.bf16.msra.mxu1 %v5116_v3 }
 0x1a4   : > { %4861 = vmatmul.mubr.bf16.gmra.mrb[132].mxu0 %v6227_v27  ;;  %v1296_v35 = vpop.f32.mrb[28].mxu0  ;;  %v1486_v27 = vpop.f32.mrb[28].mxu1  ;;  %4954 = vmatprep.subr.bf16.mxu1 %v6935_v58 }
 0x1a5   : > { %4917 = vmatpush3.bf16.msra.mxu0 %v5115_v52  ;;  %4864 = vmatprep.mubr.msk.bf16.mxu0 %vm5131_vm0, %v6935_v58  ;;  %v1322_v7 = vadd.f32 %v1296_v35, %v6662_v33  ;;  %v4498_v37 = vpop.f32.mrb[29].mxu0  ;;  %v4534_v26 = vpop.f32.mrb[29].mxu1 }
 0x1a6   : > { %4918 = vmatprep.subr.bf16.mxu0 %v6935_v58  ;;  %v1299_v28 = vpop.f32.mrb[30].mxu0  ;;  %v1489_v36 = vpop.f32.mrb[30].mxu1 }
 0x1a7   : > { %v6779_v39 = vadd.f32 %v1486_v27, %v1322_v7  ;;  %v1323_v22 = vadd.f32 %v1299_v28, %v6664_v17  ;;  %v4499_v21 = vpop.f32.mrb[31].mxu0  ;;  %v4535_v15 = vpop.f32.mrb[31].mxu1  ;;  %4955 = vmatpush3.bf16.msra.mxu1 %v5118_v32 }
 0x1a9   : > { %4919 = vmatpush3.bf16.msra.mxu0 %v5117_v23  ;;  %v6782_v20 = vadd.f32 %v1489_v36, %v1323_v22  ;;  %4901 = vmatmul.mubr.bf16.gmra.mrb[136].mxu1 %v6322_v13 }
 0x1aa   : > { %4956 = vmatprep.mubr.msk.bf16.mxu1 %vm5131_vm0, %v6935_v58 }
 0x1ac   : > { %4865 = vmatmul.mubr.bf16.gmra.mrb[136].mxu0 %v6302_v1  ;;  %v1494_v25 = vpop.f32.mrb[32].mxu1 }
 0x1ad   : > { %4920 = vmatprep.mubr.msk.bf16.mxu0 %vm5131_vm0, %v6935_v58  ;;  %v4538_v12 = vpop.f32.mrb[33].mxu1 }
 0x1ae   : > { %v1304_v33 = vpop.f32.mrb[32].mxu0  ;;  %v1497_v40 = vpop.f32.mrb[34].mxu1 }
 0x1af   : > { %v1324_v50 = vadd.f32 %v1304_v33, %v6674_v54  ;;  %v4502_v17 = vpop.f32.mrb[33].mxu0  ;;  %v4539_v13 = vpop.f32.mrb[35].mxu1 }
 0x1b0   : > { %v1307_v16 = vpop.f32.mrb[34].mxu0 }
 0x1b1   : > { %v6791_v60 = vadd.f32 %v1494_v25, %v1324_v50  ;;  %v1325_v1 = vadd.f32 %v1307_v16, %v6682_v6  ;;  %v4503_v29 = vpop.f32.mrb[35].mxu0  ;;  %4957 = vmatmul.mubr.bf16.vlgmr.msra.gmra.mrb[140].mxu1 %v7004_v4 }
 0x1b2   : > { %4960 = vmatprep.mubr.msk.bf16.mxu1 %vm5131_vm0, %v6935_v58 }
 0x1b3   : > { %v6794_v59 = vadd.f32 %v1497_v40, %v1325_v1 }
 0x1b4   : > { %4921 = vmatmul.mubr.bf16.vlgmr.msra.gmra.mrb[140].mxu0 %v7003_v45  ;;  %v1502_v49 = vpop.f32.mrb[36].mxu1 }
 0x1b5   : > { %4924 = vmatprep.mubr.msk.bf16.mxu0 %vm5131_vm0, %v6935_v58  ;;  %v4542_v6 = vpop.f32.mrb[37].mxu1 }
 0x1b6   : > { %v1505_v56 = vpop.f32.mrb[38].mxu1 }
 0x1b7   : > { %v1312_v54 = vpop.f32.mrb[36].mxu0  ;;  %v4543_v11 = vpop.f32.mrb[39].mxu1 }
 0x1b8   : > { %v1326_v47 = vadd.f32 %v1312_v54, %v6698_v55  ;;  %v4506_v63 = vpop.f32.mrb[37].mxu0 }
 0x1b9   : > { %v1315_v5 = vpop.f32.mrb[38].mxu0  ;;  %4961 = vmatmul.mubr.bf16.gmra.mrb[144].mxu1 %v7006_v31 }
 0x1ba   : > { %v6803_v53 = vadd.f32 %v1502_v49, %v1326_v47  ;;  %v4507_v44 = vpop.f32.mrb[39].mxu0  ;;  %4964 = vmatprep.mubr.msk.bf16.mxu1 %vm5131_vm0, %v6935_v58 }
 0x1bc   : > { %4925 = vmatmul.mubr.bf16.gmra.mrb[144].mxu0 %v7005_v48  ;;  %v1762_v55 = vpop.f32.mrb[40].mxu1 }
 0x1bd   : > { %4928 = vmatprep.mubr.msk.bf16.mxu0 %vm5131_vm0, %v6935_v58  ;;  %v4598_v19 = vpop.f32.mrb[41].mxu1 }
 0x1be   : > { %v1765_v2 = vpop.f32.mrb[42].mxu1 }
 0x1bf   : > { %v1616_v62 = vpop.f32.mrb[40].mxu0  ;;  %v4599_v41 = vpop.f32.mrb[43].mxu1 }
 0x1c0   : > { %v1654_v0 = vadd.f32 %v1616_v62, %v6729_v8  ;;  %v4562_v24 = vpop.f32.mrb[41].mxu0 }
 0x1c1   : > { %v1619_v34 = vpop.f32.mrb[42].mxu0  ;;  %4965 = vmatmul.mubr.bf16.gmra.mrb[148].mxu1 %v6178_v9 }
 0x1c2   : > { %v6812_v42 = vadd.f32 %v1762_v55, %v1654_v0  ;;  %v1655_v10 = vadd.f32 %v1619_v34, %v6734_v57  ;;  %v4563_v52 = vpop.f32.mrb[43].mxu0  ;;  %4968 = vmatprep.mubr.msk.bf16.mxu1 %vm5131_vm0, %v6935_v58 }
 0x1c4   : > { %v6815_v14 = vadd.f32 %v1765_v2, %v1655_v10  ;;  %4929 = vmatmul.mubr.bf16.gmra.mrb[148].mxu0 %v7007_v46  ;;  %v1770_v3 = vpop.f32.mrb[44].mxu1 }
 0x1c5   : > { %4932 = vmatprep.mubr.msk.bf16.mxu0 %vm5131_vm0, %v6935_v58  ;;  %v4602_v57 = vpop.f32.mrb[45].mxu1 }
 0x1c6   : > { %v1773_v27 = vpop.f32.mrb[46].mxu1 }
 0x1c7   : > { %v1624_v8 = vpop.f32.mrb[44].mxu0  ;;  %v4603_v28 = vpop.f32.mrb[47].mxu1 }
 0x1c8   : > { %v1656_v23 = vadd.f32 %v1624_v8, %v6754_v18  ;;  %v4566_v32 = vpop.f32.mrb[45].mxu0 }
 0x1c9   : > { %v1627_v35 = vpop.f32.mrb[46].mxu0  ;;  %4969 = vmatmul.mubr.bf16.gmra.mrb[152].mxu1 %v6232_v51 }
 0x1ca   : > { %v1802_v7 = vadd.f32 %v1770_v3, %v1656_v23  ;;  %v1657_v37 = vadd.f32 %v1627_v35, %v6762_v43  ;;  %v4567_v26 = vpop.f32.mrb[47].mxu0  ;;  %4972 = vmatprep.mubr.msk.bf16.mxu1 %vm5131_vm0, %v6935_v58 }
 0x1cc   : > { %v1803_v9 = vadd.f32 %v1773_v27, %v1657_v37  ;;  %4933 = vmatmul.mubr.bf16.gmra.mrb[152].mxu0 %v6204_v61  ;;  %v1778_v36 = vpop.f32.mrb[48].mxu1 }
 0x1cd   : > { %4936 = vmatprep.mubr.msk.bf16.mxu0 %vm5131_vm0, %v6935_v58  ;;  %v4606_v15 = vpop.f32.mrb[49].mxu1 }
 0x1ce   : > { %v1781_v33 = vpop.f32.mrb[50].mxu1 }
 0x1cf   : > { %v1632_v18 = vpop.f32.mrb[48].mxu0  ;;  %v4607_v17 = vpop.f32.mrb[51].mxu1 }
 0x1d0   : > { %v1658_v22 = vadd.f32 %v1632_v18, %v6779_v39  ;;  %v4570_v21 = vpop.f32.mrb[49].mxu0 }
 0x1d1   : > { %v1635_v43 = vpop.f32.mrb[50].mxu0  ;;  %4973 = vmatmul.mubr.bf16.gmra.mrb[156].mxu1 %v6316_v30 }
 0x1d2   : > { %v1804_v25 = vadd.f32 %v1778_v36, %v1658_v22  ;;  %v1659_v50 = vadd.f32 %v1635_v43, %v6782_v20  ;;  %v4571_v61 = vpop.f32.mrb[51].mxu0 }
 0x1d4   : > { %v1805_v51 = vadd.f32 %v1781_v33, %v1659_v50  ;;  %4937 = vmatmul.mubr.bf16.gmra.mrb[156].mxu0 %v6296_v38  ;;  %v1786_v58 = vpop.f32.mrb[52].mxu1 }
 0x1d5   : > { %v4610_v39 = vpop.f32.mrb[53].mxu1 }
 0x1d6   : > { %v1789_v29 = vpop.f32.mrb[54].mxu1 }
 0x1d7   : > { %v1640_v12 = vpop.f32.mrb[52].mxu0  ;;  %v4611_v20 = vpop.f32.mrb[55].mxu1 }
 0x1d8   : > { %v1660_v16 = vadd.f32 %v1640_v12, %v6791_v60  ;;  %v4574_v40 = vpop.f32.mrb[53].mxu0 }
 0x1d9   : > { %v1643_v1 = vpop.f32.mrb[54].mxu0 }
 0x1da   : > { %v1806_v13 = vadd.f32 %v1786_v58, %v1660_v16  ;;  %v1661_v45 = vadd.f32 %v1643_v1, %v6794_v59  ;;  %v4575_v4 = vpop.f32.mrb[55].mxu0 }
 0x1dc   : > { %v1807_v54 = vadd.f32 %v1789_v29, %v1661_v45  ;;  %v1794_v47 = vpop.f32.mrb[56].mxu1 }
 0x1dd   : > { %v4614_v30 = vpop.f32.mrb[57].mxu1 }
 0x1de   : > { %v1797_v5 = vpop.f32.mrb[58].mxu1 }
 0x1df   : > { %v1648_v49 = vpop.f32.mrb[56].mxu0  ;;  %v4615_v44 = vpop.f32.mrb[59].mxu1 }
 0x1e0   : > { %v1662_v38 = vadd.f32 %v1648_v49, %v6803_v53  ;;  %v4578_v63 = vpop.f32.mrb[57].mxu0 }
 0x1e1   : > { %v1651_v6 = vpop.f32.mrb[58].mxu0 }
 0x1e2   : > { %v1808_v56 = vadd.f32 %v1794_v47, %v1662_v38  ;;  %v4579_v60 = vpop.f32.mrb[59].mxu0 }
 0x1e4   : > { %v2142_v48 = vpop.f32.mrb[60].mxu1 }
 0x1e5   : > { %v4670_v59 = vpop.f32.mrb[61].mxu1 }
 0x1e6   : > { %v2145_v0 = vpop.f32.mrb[62].mxu1 }
 0x1e7   : > { %v1952_v11 = vpop.f32.mrb[60].mxu0  ;;  %v4671_v53 = vpop.f32.mrb[63].mxu1 }
 0x1e8   : > { %v1990_v31 = vadd.f32 %v1952_v11, %v6812_v42  ;;  %v4634_v62 = vpop.f32.mrb[61].mxu0 }
 0x1e9   : > { %v1955_v55 = vpop.f32.mrb[62].mxu0 }
 0x1ea   : > { %v2180_v24 = vadd.f32 %v2142_v48, %v1990_v31  ;;  %v1991_v19 = vadd.f32 %v1955_v55, %v6815_v14  ;;  %v4635_v34 = vpop.f32.mrb[63].mxu0 }
 0x1ec   : > { %v2181_v2 = vadd.f32 %v2145_v0, %v1991_v19  ;;  %v2150_v52 = vpop.f32.mrb[64].mxu1 }
 0x1ed   : > { %v4674_v8 = vpop.f32.mrb[65].mxu1 }
 0x1ee   : > { %v2153_v23 = vpop.f32.mrb[66].mxu1 }
 0x1ef   : > { %v1960_v10 = vpop.f32.mrb[64].mxu0  ;;  %v4675_v35 = vpop.f32.mrb[67].mxu1 }
 0x1f0   : > { %v1992_v41 = vadd.f32 %v1960_v10, %v1802_v7  ;;  %v4638_v46 = vpop.f32.mrb[65].mxu0 }
 0x1f1   : > { %v1963_v3 = vpop.f32.mrb[66].mxu0 }
 0x1f2   : > { %v2182_v32 = vadd.f32 %v2150_v52, %v1992_v41  ;;  %v1993_v57 = vadd.f32 %v1963_v3, %v1803_v9  ;;  %v4639_v42 = vpop.f32.mrb[67].mxu0 }
 0x1f4   : > { %v2183_v27 = vadd.f32 %v2153_v23, %v1993_v57  ;;  %v2158_v26 = vpop.f32.mrb[68].mxu1 }
 0x1f5   : > { %v4678_v14 = vpop.f32.mrb[69].mxu1 }
 0x1f6   : > { %v2161_v22 = vpop.f32.mrb[70].mxu1 }
 0x1f7   : > { %v1968_v37 = vpop.f32.mrb[68].mxu0  ;;  %v4679_v7 = vpop.f32.mrb[71].mxu1 }
 0x1f8   : > { %v1994_v28 = vadd.f32 %v1968_v37, %v1804_v25  ;;  %v4642_v18 = vpop.f32.mrb[69].mxu0 }
 0x1f9   : > { %v1971_v36 = vpop.f32.mrb[70].mxu0 }
 0x1fa   : > { %v2184_v21 = vadd.f32 %v2158_v26, %v1994_v28  ;;  %v1995_v15 = vadd.f32 %v1971_v36, %v1805_v51  ;;  %v4643_v43 = vpop.f32.mrb[71].mxu0 }
 0x1fc   : > { %v2185_v33 = vadd.f32 %v2161_v22, %v1995_v15  ;;  %v2166_v61 = vpop.f32.mrb[72].mxu1 }
 0x1fd   : > { %v4682_v9 = vpop.f32.mrb[73].mxu1 }
 0x1fe   : > { %v2169_v16 = vpop.f32.mrb[74].mxu1 }
 0x1ff   : > { %v1976_v50 = vpop.f32.mrb[72].mxu0  ;;  %v4683_v25 = vpop.f32.mrb[75].mxu1 }
 0x200   : > { %v1996_v17 = vadd.f32 %v1976_v50, %v1806_v13  ;;  %v4646_v12 = vpop.f32.mrb[73].mxu0 }
 0x201   : > { %v1979_v58 = vpop.f32.mrb[74].mxu0 }
 0x202   : > { %v2186_v40 = vadd.f32 %v2166_v61, %v1996_v17  ;;  %v1997_v39 = vadd.f32 %v1979_v58, %v1807_v54  ;;  %v4647_v1 = vpop.f32.mrb[75].mxu0 }
 0x204   : > { %v2187_v29 = vadd.f32 %v2169_v16, %v1997_v39  ;;  %v2174_v4 = vpop.f32.mrb[76].mxu1 }
 0x205   : > { %v4686_v51 = vpop.f32.mrb[77].mxu1 }
 0x206   : > { %v2177_v38 = vpop.f32.mrb[78].mxu1 }
 0x207   : > { %v1984_v45 = vpop.f32.mrb[76].mxu0  ;;  %v4687_v6 = vpop.f32.mrb[79].mxu1 }
 0x208   : > { %v1998_v20 = vadd.f32 %v1984_v45, %v1808_v56  ;;  %v4650_v49 = vpop.f32.mrb[77].mxu0 }
 0x209   : > { %v1987_v47 = vpop.f32.mrb[78].mxu0 }
 0x20a   : > { %v2188_v63 = vadd.f32 %v2174_v4, %v1998_v20  ;;  %v4651_v30 = vpop.f32.mrb[79].mxu0 }
 0x20c   : > { %v2493_v5 = vpop.f32.mrb[80].mxu1 }
 0x20d   : > { %v4742_v11 = vpop.f32.mrb[81].mxu1 }
 0x20e   : > { %v2496_v54 = vpop.f32.mrb[82].mxu1 }
 0x20f   : > { %v2318_v13 = vpop.f32.mrb[80].mxu0  ;;  %v4743_v55 = vpop.f32.mrb[83].mxu1 }
 0x210   : > { %v2356_v60 = vadd.f32 %v2318_v13, %v2180_v24  ;;  %v4706_v44 = vpop.f32.mrb[81].mxu0 }
 0x211   : > { %v2321_v48 = vpop.f32.mrb[82].mxu0 }
 0x212   : > { %v2531_v31 = vadd.f32 %v2493_v5, %v2356_v60  ;;  %v2357_v62 = vadd.f32 %v2321_v48, %v2181_v2  ;;  %v4707_v59 = vpop.f32.mrb[83].mxu0 }
 0x214   : > { %v2532_v0 = vadd.f32 %v2496_v54, %v2357_v62  ;;  %v2501_v19 = vpop.f32.mrb[84].mxu1 }
 0x215   : > { %v4746_v10 = vpop.f32.mrb[85].mxu1 }
 0x216   : > { %v2504_v41 = vpop.f32.mrb[86].mxu1 }
 0x217   : > { %v2326_v56 = vpop.f32.mrb[84].mxu0  ;;  %v4747_v24 = vpop.f32.mrb[87].mxu1 }
 0x218   : > { %v2358_v34 = vadd.f32 %v2326_v56, %v2182_v32  ;;  %v4710_v53 = vpop.f32.mrb[85].mxu0 }
 0x219   : > { %v2329_v52 = vpop.f32.mrb[86].mxu0 }
 0x21a   : > { %v2533_v46 = vadd.f32 %v2501_v19, %v2358_v34  ;;  %v2359_v8 = vadd.f32 %v2329_v52, %v2183_v27  ;;  %v4711_v3 = vpop.f32.mrb[87].mxu0 }
 0x21c   : > { %v2534_v23 = vadd.f32 %v2504_v41, %v2359_v8  ;;  %v2509_v42 = vpop.f32.mrb[88].mxu1 }
 0x21d   : > { %v4750_v2 = vpop.f32.mrb[89].mxu1 }
 0x21e   : > { %v2512_v28 = vpop.f32.mrb[90].mxu1 }
 0x21f   : > { %v2334_v57 = vpop.f32.mrb[88].mxu0  ;;  %v4751_v32 = vpop.f32.mrb[91].mxu1 }
 0x220   : > { %v2360_v35 = vadd.f32 %v2334_v57, %v2184_v21  ;;  %v4714_v37 = vpop.f32.mrb[89].mxu0 }
 0x221   : > { %v2337_v26 = vpop.f32.mrb[90].mxu0 }
 0x222   : > { %v2535_v18 = vadd.f32 %v2509_v42, %v2360_v35  ;;  %v2361_v14 = vadd.f32 %v2337_v26, %v2185_v33  ;;  %v4715_v36 = vpop.f32.mrb[91].mxu0 }
 0x224   : > { %v2536_v22 = vadd.f32 %v2512_v28, %v2361_v14  ;;  %v2517_v43 = vpop.f32.mrb[92].mxu1 }
 0x225   : > { %v4754_v27 = vpop.f32.mrb[93].mxu1 }
 0x226   : > { %v2520_v17 = vpop.f32.mrb[94].mxu1 }
 0x227   : > { %v2342_v15 = vpop.f32.mrb[92].mxu0  ;;  %v4755_v21 = vpop.f32.mrb[95].mxu1 }
 0x228   : > { %v2362_v7 = vadd.f32 %v2342_v15, %v2186_v40  ;;  %v4718_v50 = vpop.f32.mrb[93].mxu0 }
 0x229   : > { %v2345_v61 = vpop.f32.mrb[94].mxu0 }
 0x22a   : > { %v2537_v12 = vadd.f32 %v2517_v43, %v2362_v7  ;;  %v2363_v9 = vadd.f32 %v2345_v61, %v2187_v29  ;;  %v4719_v58 = vpop.f32.mrb[95].mxu0 }
 0x22c   : > { %v2538_v16 = vadd.f32 %v2520_v17, %v2363_v9  ;;  %v2525_v1 = vpop.f32.mrb[96].mxu1 }
 0x22d   : > { %v4758_v33 = vpop.f32.mrb[97].mxu1 }
 0x22e   : > { %v2528_v20 = vpop.f32.mrb[98].mxu1 }
 0x22f   : > { %v2350_v39 = vpop.f32.mrb[96].mxu0  ;;  %v4759_v47 = vpop.f32.mrb[99].mxu1 }
 0x230   : > { %v2364_v25 = vadd.f32 %v2350_v39, %v2188_v63  ;;  %v4722_v45 = vpop.f32.mrb[97].mxu0 }
 0x231   : > { %v2353_v4 = vpop.f32.mrb[98].mxu0 }
 0x232   : > { %v2539_v49 = vadd.f32 %v2525_v1, %v2364_v25  ;;  %v4723_v51 = vpop.f32.mrb[99].mxu0 }
 0x234   : > { %v2830_v38 = vpop.f32.mrb[100].mxu1 }
 0x235   : > { %v4814_v13 = vpop.f32.mrb[101].mxu1 }
 0x236   : > { %v2833_v29 = vpop.f32.mrb[102].mxu1 }
 0x237   : > { %v2662_v40 = vpop.f32.mrb[100].mxu0  ;;  %v4815_v48 = vpop.f32.mrb[103].mxu1 }
 0x238   : > { %v2700_v30 = vadd.f32 %v2662_v40, %v2531_v31  ;;  %v4778_v6 = vpop.f32.mrb[101].mxu0 }
 0x239   : > { %v2665_v5 = vpop.f32.mrb[102].mxu0 }
 0x23a   : > { %v2868_v60 = vadd.f32 %v2830_v38, %v2700_v30  ;;  %v2701_v44 = vadd.f32 %v2665_v5, %v2532_v0  ;;  %v4779_v11 = vpop.f32.mrb[103].mxu0 }
 0x23c   : > { %v2869_v54 = vadd.f32 %v2833_v29, %v2701_v44  ;;  %v2838_v62 = vpop.f32.mrb[104].mxu1 }
 0x23d   : > { %v4818_v56 = vpop.f32.mrb[105].mxu1 }
 0x23e   : > { %v2841_v34 = vpop.f32.mrb[106].mxu1 }
 0x23f   : > { %v2670_v63 = vpop.f32.mrb[104].mxu0  ;;  %v4819_v31 = vpop.f32.mrb[107].mxu1 }
 0x240   : > { %v2702_v59 = vadd.f32 %v2670_v63, %v2533_v46  ;;  %v4782_v55 = vpop.f32.mrb[105].mxu0 }
 0x241   : > { %v2673_v19 = vpop.f32.mrb[106].mxu0 }
 0x242   : > { %v2870_v53 = vadd.f32 %v2838_v62, %v2702_v59  ;;  %v2703_v10 = vadd.f32 %v2673_v19, %v2534_v23  ;;  %v4783_v52 = vpop.f32.mrb[107].mxu0 }
 0x244   : > { %v2871_v41 = vadd.f32 %v2841_v34, %v2703_v10  ;;  %v2846_v3 = vpop.f32.mrb[108].mxu1 }
 0x245   : > { %v4822_v0 = vpop.f32.mrb[109].mxu1 }
 0x246   : > { %v2849_v35 = vpop.f32.mrb[110].mxu1 }
 0x247   : > { %v2678_v8 = vpop.f32.mrb[108].mxu0  ;;  %v4823_v46 = vpop.f32.mrb[111].mxu1 }
 0x248   : > { %v2704_v24 = vadd.f32 %v2678_v8, %v2535_v18  ;;  %v4786_v57 = vpop.f32.mrb[109].mxu0 }
 0x249   : > { %v2681_v42 = vpop.f32.mrb[110].mxu0 }
 0x24a   : > { %v2872_v37 = vadd.f32 %v2846_v3, %v2704_v24  ;;  %v2705_v2 = vadd.f32 %v2681_v42, %v2536_v22  ;;  %v4787_v26 = vpop.f32.mrb[111].mxu0 }
 0x24c   : > { %v2873_v28 = vadd.f32 %v2849_v35, %v2705_v2  ;;  %v2854_v36 = vpop.f32.mrb[112].mxu1 }
 0x24d   : > { %v4826_v23 = vpop.f32.mrb[113].mxu1 }
 0x24e   : > { %v2857_v7 = vpop.f32.mrb[114].mxu1 }
 0x24f   : > { %v2686_v14 = vpop.f32.mrb[112].mxu0  ;;  %v4827_v18 = vpop.f32.mrb[115].mxu1 }
 0x250   : > { %v2706_v32 = vadd.f32 %v2686_v14, %v2537_v12  ;;  %v4790_v15 = vpop.f32.mrb[113].mxu0 }
 0x251   : > { %v2689_v43 = vpop.f32.mrb[114].mxu0 }
 0x252   : > { %v2874_v50 = vadd.f32 %v2854_v36, %v2706_v32  ;;  %v2707_v27 = vadd.f32 %v2689_v43, %v2538_v16  ;;  %v4791_v61 = vpop.f32.mrb[115].mxu0 }
 0x254   : > { %v2875_v17 = vadd.f32 %v2857_v7, %v2707_v27  ;;  %v2862_v58 = vpop.f32.mrb[116].mxu1 }
 0x255   : > { %v4830_v22 = vpop.f32.mrb[117].mxu1 }
 0x256   : > { %v2865_v25 = vpop.f32.mrb[118].mxu1 }
 0x257   : > { %v2694_v9 = vpop.f32.mrb[116].mxu0  ;;  %v4831_v4 = vpop.f32.mrb[119].mxu1 }
 0x258   : > { %v2708_v21 = vadd.f32 %v2694_v9, %v2539_v49  ;;  %v4794_v39 = vpop.f32.mrb[117].mxu0 }
 0x259   : > { %v2697_v1 = vpop.f32.mrb[118].mxu0 }
 0x25a   : > { %v2876_v45 = vadd.f32 %v2862_v58, %v2708_v21  ;;  %v4795_v33 = vpop.f32.mrb[119].mxu0 }
 0x25c   : > { %v3180_v20 = vpop.f32.mrb[120].mxu1 }
 0x25d   : > { %v4886_v40 = vpop.f32.mrb[121].mxu1 }
 0x25e   : > { %v3183_v16 = vpop.f32.mrb[122].mxu1 }
 0x25f   : > { %v3005_v12 = vpop.f32.mrb[120].mxu0  ;;  %v4887_v5 = vpop.f32.mrb[123].mxu1 }
 0x260   : > { %v3043_v51 = vadd.f32 %v3005_v12, %v2868_v60  ;;  %v4850_v47 = vpop.f32.mrb[121].mxu0  ;;  %v6854_v12 = vld [vmem:[%s6892_s5] ss:$0 sm:$0xff] }
 0x261   : > { %v3008_v38 = vpop.f32.mrb[122].mxu0 }
 0x262   : > { %v3218_v30 = vadd.f32 %v3180_v20, %v3043_v51  ;;  %v3044_v6 = vadd.f32 %v3008_v38, %v2869_v54  ;;  %v4851_v13 = vpop.f32.mrb[123].mxu0 }
 0x264   : > { %v3219_v29 = vadd.f32 %v3183_v16, %v3044_v6  ;;  %v3188_v44 = vpop.f32.mrb[124].mxu1 }
 0x265   : > { %v4890_v63 = vpop.f32.mrb[125].mxu1 }
 0x266   : > { %v3191_v59 = vpop.f32.mrb[126].mxu1 }
 0x267   : > { %v3013_v49 = vpop.f32.mrb[124].mxu0  ;;  %v4891_v60 = vpop.f32.mrb[127].mxu1 }
 0x268   : > { %v3045_v11 = vadd.f32 %v3013_v49, %v2870_v53  ;;  %v4854_v48 = vpop.f32.mrb[125].mxu0 }
 0x269   : > { %v3016_v62 = vpop.f32.mrb[126].mxu0 }
 0x26a   : > { %v3220_v55 = vadd.f32 %v3188_v44, %v3045_v11  ;;  %v3046_v56 = vadd.f32 %v3016_v62, %v2871_v41  ;;  %v4855_v19 = vpop.f32.mrb[127].mxu0 }
 0x26c   : > { %v3221_v34 = vadd.f32 %v3191_v59, %v3046_v56  ;;  %v3196_v52 = vpop.f32.mrb[128].mxu1 }
 0x26d   : > { %v4894_v54 = vpop.f32.mrb[129].mxu1 }
 0x26e   : > { %v3199_v24 = vpop.f32.mrb[130].mxu1 }
 0x26f   : > { %v3021_v10 = vpop.f32.mrb[128].mxu0  ;;  %v4895_v42 = vpop.f32.mrb[131].mxu1 }
 0x270   : > { %v3047_v31 = vadd.f32 %v3021_v10, %v2872_v37  ;;  %v4858_v8 = vpop.f32.mrb[129].mxu0 }
 0x271   : > { %v3024_v3 = vpop.f32.mrb[130].mxu0 }
 0x272   : > { %v6840_v57 = vadd.f32 %v3196_v52, %v3047_v31  ;;  %v3048_v0 = vadd.f32 %v3024_v3, %v2873_v28  ;;  %v4859_v53 = vpop.f32.mrb[131].mxu0 }
 0x274   : > { %v6842_v35 = vadd.f32 %v3199_v24, %v3048_v0  ;;  %v3204_v26 = vpop.f32.mrb[132].mxu1 }
 0x275   : > { %v4898_v14 = vpop.f32.mrb[133].mxu1 }
 0x276   : > { %v3207_v32 = vpop.f32.mrb[134].mxu1 }
 0x277   : > { %v3029_v2 = vpop.f32.mrb[132].mxu0  ;;  %v4899_v43 = vpop.f32.mrb[135].mxu1 }
 0x278   : > { %v3049_v41 = vadd.f32 %v3029_v2, %v2874_v50  ;;  %v4862_v46 = vpop.f32.mrb[133].mxu0 }
 0x279   : > { %v3032_v36 = vpop.f32.mrb[134].mxu0 }
 0x27a   : > { %v6844_v15 = vadd.f32 %v3204_v26, %v3049_v41  ;;  %v3050_v37 = vadd.f32 %v3032_v36, %v2875_v17  ;;  %v4863_v23 = vpop.f32.mrb[135].mxu0 }
 0x27c   : > { %v6846_v7 = vadd.f32 %v3207_v32, %v3050_v37  ;;  %v3212_v27 = vpop.f32.mrb[136].mxu1 }
 0x27d   : > { %v4902_v9 = vpop.f32.mrb[137].mxu1 }
 0x27e   : > { %v3215_v21 = vpop.f32.mrb[138].mxu1 }
 0x27f   : > { %v3037_v28 = vpop.f32.mrb[136].mxu0  ;;  %v4903_v22 = vpop.f32.mrb[139].mxu1 }
 0x280   : > { %v3051_v61 = vadd.f32 %v3037_v28, %v2876_v45  ;;  %v4866_v18 = vpop.f32.mrb[137].mxu0 }
 0x281   : > { %v3040_v58 = vpop.f32.mrb[138].mxu0 }
 0x282   : > { %v6848_v50 = vadd.f32 %v3212_v27, %v3051_v61  ;;  %v4867_v39 = vpop.f32.mrb[139].mxu0 }
 0x284   : > { %v3516_v25 = vpop.f32.mrb[140].mxu1 }
 0x285   : > { %v4958_v4 = vpop.f32.mrb[141].mxu1 }
 0x286   : > { %v3519_v20 = vpop.f32.mrb[142].mxu1 }
 0x287   : > { %v3348_v1 = vpop.f32.mrb[140].mxu0  ;;  %v4959_v38 = vpop.f32.mrb[143].mxu1 }
 0x288   : > { %v3386_v33 = vadd.f32 %v3348_v1, %v3218_v30  ;;  %v4922_v17 = vpop.f32.mrb[141].mxu0 }
 0x289   : > { %v3351_v45 = vpop.f32.mrb[142].mxu0 }
 0x28a   : > { %v3554_v51 = vadd.f32 %v3516_v25, %v3386_v33  ;;  %v3387_v47 = vadd.f32 %v3351_v45, %v3219_v29  ;;  %v4923_v40 = vpop.f32.mrb[143].mxu0 }
 0x28c   : > { %v3570_v16 = vadd.f32 %v6854_v12, %v3554_v51  ;;  %v3555_v30 = vadd.f32 %v3519_v20, %v3387_v47  ;;  %v3524_v5 = vpop.f32.mrb[144].mxu1 }
 0x28d   : > { %v4962_v44 = vpop.f32.mrb[145].mxu1 }
 0x28e   : > { %3579 = vst [vmem:[%s6859_s17] sm:$0xff] %v3570_v16  ;;  %v3571_v6 = vadd.f32 %v6854_v12, %v3555_v30  ;;  %v3527_v48 = vpop.f32.mrb[146].mxu1 }
 0x28f   : > { %v3356_v13 = vpop.f32.mrb[144].mxu0  ;;  %v4963_v56 = vpop.f32.mrb[147].mxu1 }
 0x290   : > { %3580 = vst [vmem:[%s6859_s17 + $0x8] sm:$0xff] %v3571_v6  ;;  %v3388_v29 = vadd.f32 %v3356_v13, %v3220_v55  ;;  %v4926_v49 = vpop.f32.mrb[145].mxu0 }
 0x291   : > { %v3359_v11 = vpop.f32.mrb[146].mxu0 }
 0x292   : > { %v3556_v63 = vadd.f32 %v3524_v5, %v3388_v29  ;;  %v3389_v62 = vadd.f32 %v3359_v11, %v3221_v34  ;;  %v4927_v59 = vpop.f32.mrb[147].mxu0 }
 0x294   : > { %v3572_v19 = vadd.f32 %v6854_v12, %v3556_v63  ;;  %v3557_v60 = vadd.f32 %v3527_v48, %v3389_v62  ;;  %v3532_v31 = vpop.f32.mrb[148].mxu1 }
 0x295   : > { %v4966_v54 = vpop.f32.mrb[149].mxu1 }
 0x296   : > { %3581 = vst [vmem:[%s6859_s17 + $0x10] sm:$0xff] %v3572_v19  ;;  %v3573_v10 = vadd.f32 %v6854_v12, %v3557_v60  ;;  %v3535_v24 = vpop.f32.mrb[150].mxu1 }
 0x297   : > { %v3364_v52 = vpop.f32.mrb[148].mxu0  ;;  %v4967_v42 = vpop.f32.mrb[151].mxu1 }
 0x298   : > { %3582 = vst [vmem:[%s6859_s17 + $0x18] sm:$0xff] %v3573_v10  ;;  %v3390_v55 = vadd.f32 %v3364_v52, %v6840_v57  ;;  %v4930_v8 = vpop.f32.mrb[149].mxu0 }
 0x299   : > { %v3367_v3 = vpop.f32.mrb[150].mxu0 }
 0x29a   : > { %v3558_v34 = vadd.f32 %v3532_v31, %v3390_v55  ;;  %v3391_v0 = vadd.f32 %v3367_v3, %v6842_v35  ;;  %v4931_v53 = vpop.f32.mrb[151].mxu0 }
 0x29c   : > { %v3574_v2 = vadd.f32 %v6854_v12, %v3558_v34  ;;  %v3559_v26 = vadd.f32 %v3535_v24, %v3391_v0  ;;  %v3540_v14 = vpop.f32.mrb[152].mxu1 }
 0x29d   : > { %v4970_v32 = vpop.f32.mrb[153].mxu1 }
 0x29e   : > { %3583 = vst [vmem:[%s6859_s17 + $0x20] sm:$0xff] %v3574_v2  ;;  %v3575_v41 = vadd.f32 %v6854_v12, %v3559_v26  ;;  %v3543_v23 = vpop.f32.mrb[154].mxu1 }
 0x29f   : > { %v3372_v46 = vpop.f32.mrb[152].mxu0  ;;  %v4971_v27 = vpop.f32.mrb[155].mxu1 }
 0x2a0   : > { %3584 = vst [vmem:[%s6859_s17 + $0x28] sm:$0xff] %v3575_v41  ;;  %v3392_v57 = vadd.f32 %v3372_v46, %v6844_v15  ;;  %v4934_v36 = vpop.f32.mrb[153].mxu0 }
 0x2a1   : > { %v3375_v37 = vpop.f32.mrb[154].mxu0 }
 0x2a2   : > { %v3560_v35 = vadd.f32 %v3540_v14, %v3392_v57  ;;  %v3393_v43 = vadd.f32 %v3375_v37, %v6846_v7  ;;  %v4935_v28 = vpop.f32.mrb[155].mxu0 }
 0x2a4   : > { %v3576_v61 = vadd.f32 %v6854_v12, %v3560_v35  ;;  %v3561_v18 = vadd.f32 %v3543_v23, %v3393_v43  ;;  %v3548_v21 = vpop.f32.mrb[156].mxu1 }
 0x2a5   : > { %v4974_v22 = vpop.f32.mrb[157].mxu1 }
 0x2a6   : > { %3585 = vst [vmem:[%s6859_s17 + $0x30] sm:$0xff] %v3576_v61  ;;  %v3577_v9 = vadd.f32 %v6854_v12, %v3561_v18  ;;  %v3551_v25 = vpop.f32.mrb[158].mxu1 }
 0x2a7   : > { %v3380_v58 = vpop.f32.mrb[156].mxu0  ;;  %v4975_v17 = vpop.f32.mrb[159].mxu1 }
 0x2a8   : > { %3586 = vst [vmem:[%s6859_s17 + $0x38] sm:$0xff] %v3577_v9  ;;  %v3394_v15 = vadd.f32 %v3380_v58, %v6848_v50  ;;  %v4938_v39 = vpop.f32.mrb[157].mxu0 }
 0x2a9   : > { %v3383_v1 = vpop.f32.mrb[158].mxu0 }
 0x2aa   : > { %v3562_v33 = vadd.f32 %v3548_v21, %v3394_v15  ;;  %v4939_v7 = vpop.f32.mrb[159].mxu0 }
 0x2ac   : > { %v3578_v4 = vadd.f32 %v6854_v12, %v3562_v33 }
 0x2ae   : > { %3587 = vst [vmem:[%s6859_s17 + $0x40] sm:$0xff] %v3578_v4 }
 0x2af PF: > { %s17_s24 = sadd.s32 1, %s5127_s24  }
 0x2b0   : > { %p14_p4 = scmp.ge.s32.totalorder %s17_s24, 4  }
 0x2b2   :  { %16 = sbr.rel (!%p14_p4) target bundleno = 1 (0x1), region = 99 }

</bundles_post_ra>
